<compile_context>
chip_gen: v6e
topology: v6e:2x2x1
jax: 0.10.0
libtpu: 0.0.40
codegen_flags: <defaults>
</compile_context>

<pallas_src>
import functools
import math

import jax
import jax.numpy as jnp
from jax.experimental import pallas as pl
from jax.experimental.pallas import tpu as pltpu


_BLOCK_WEIGHT_NAMES = ('n1w', 'n1b', 'qkvw', 'qkvb', 'tempc', 'convw', 'convb',
                       'projw', 'projb', 'n2w', 'n2b', 'fc1w', 'fc1b',
                       'fc2w', 'fc2b')


# ----------------------------- in-kernel helpers ----------------------------

def _layernorm(x, w, b, eps=1e-5):
  # PyTorch nn.LayerNorm over the last dim (biased variance, eps=1e-5).
  mu = jnp.mean(x, axis=-1, keepdims=True)
  var = jnp.mean(jnp.square(x - mu), axis=-1, keepdims=True)
  return (x - mu) * jax.lax.rsqrt(var + eps) * w + b


def _gelu_exact(x):
  # PyTorch nn.GELU default (erf form).
  return 0.5 * x * (1.0 + jax.lax.erf(x * (1.0 / math.sqrt(2.0))))


def _lepe_conv(v, convw, convb, mask_l, mask_r, pad_ref, H, W, C, P):
  """Depthwise 3x3 conv (stride 1, zero pad 1) of v=(H*W, C) viewed as (H,W,C).

  pad_ref is a (2*P + H*W, C) VMEM scratch whose first/last P rows are zero
  (top/bottom halo, zeroed once per grid step); only the image rows are
  rewritten here.  Column (w) edges are handled by the host-precomputed
  mask_l / mask_r multiplies, so each tap is a single shifted FMA.
  """
  L = H * W
  pad_ref[P:P + L, :] = v
  acc = jnp.zeros((L, C), jnp.float32)
  for di in (-1, 0, 1):
    for dj in (-1, 0, 1):
      s = di * W + dj
      sh = pad_ref[P + s:P + s + L, :]
      if dj == -1:
        sh = sh * mask_l          # output column w == 0 has no left neighbour
      elif dj == 1:
        sh = sh * mask_r          # output column w == W-1 has no right neighbour
      kidx = (di + 1) * 3 + (dj + 1)
      acc = acc + sh * convw[kidx:kidx + 1, :]
  return acc + convb


def _sima_block(x, wts, mask_l, mask_r, pad_ref, H, W, C, num_heads, P):
  """One SimABlock: norm1 -> SimA attention (+LePE) -> residual -> norm2 ->
  MLP -> residual, for a single batch element; x is (L, C)."""
  (n1w, n1b, qkvw, qkvb, tempc, convw, convb, projw, projb,
   n2w, n2b, fc1w, fc1b, fc2w, fc2b) = wts
  hd = C // num_heads

  # ---- norm1 + fused qkv projection ----
  xn = _layernorm(x, n1w, n1b)
  qkv = jnp.dot(xn, qkvw, preferred_element_type=jnp.float32) + qkvb
  q = qkv[:, 0 * C:1 * C]
  k = qkv[:, 1 * C:2 * C]
  v = qkv[:, 2 * C:3 * C]

  # ---- SimA: L2-normalise q, k over the token axis (F.normalize(dim=-2)) ----
  qn = q / jnp.maximum(jnp.sqrt(jnp.sum(q * q, axis=0, keepdims=True)), 1e-12)
  kn = k / jnp.maximum(jnp.sqrt(jnp.sum(k * k, axis=0, keepdims=True)), 1e-12)

  # ---- per-head attention: attn = k^T v ; out = q @ attn.  The per-head
  # temperature is applied afterwards as a per-channel column scale (exact,
  # since it is a scalar per head).
  head_outs = []
  for h in range(num_heads):
    lo, hi = h * hd, (h + 1) * hd
    attn_h = jax.lax.dot_general(kn[:, lo:hi], v[:, lo:hi],
                                 (((0,), (0,)), ((), ())),
                                 preferred_element_type=jnp.float32)   # (hd, hd)
    head_outs.append(jnp.dot(qn[:, lo:hi], attn_h,
                             preferred_element_type=jnp.float32))      # (L, hd)
  xattn = jnp.concatenate(head_outs, axis=-1) * tempc                  # (L, C)

  # ---- LePE positional term on v, output projection, first residual ----
  lepe = _lepe_conv(v, convw, convb, mask_l, mask_r, pad_ref, H, W, C, P)
  x = x + (jnp.dot(xattn + lepe, projw, preferred_element_type=jnp.float32)
           + projb)

  # ---- MLP (norm2 -> fc1 -> exact GELU -> fc2) + second residual ----
  xn2 = _layernorm(x, n2w, n2b)
  h1 = jnp.dot(xn2, fc1w, preferred_element_type=jnp.float32) + fc1b
  h1 = _gelu_exact(h1)
  return x + (jnp.dot(h1, fc2w, preferred_element_type=jnp.float32) + fc2b)


# ------------------------------ fused stage kernel ---------------------------

def _encoder_stage_kernel(num_paths, depth, H, W, C, num_heads, P, *refs):
  """Whole EncoderStage for one batch element (grid axis 0 = batch).

  refs layout:
    [x_path_0 .. x_path_{P-1}, mask_l, mask_r,
     for each path: (for each block: 15 weight refs), normw, normb,
     aggw, aggb, agg_lnw, agg_lnb,
     out_ref, lepe_pad_scratch]
  """
  L = H * W
  o_ref, pad_ref = refs[-2], refs[-1]
  refs = refs[:-2]

  pos = 0
  x_refs = refs[pos:pos + num_paths]
  pos += num_paths
  mask_l = refs[pos][...]
  mask_r = refs[pos + 1][...]
  pos += 2

  # zero the top/bottom halo rows of the LePE scratch once per grid step
  pad_ref[0:P, :] = jnp.zeros((P, C), jnp.float32)
  pad_ref[P + L:2 * P + L, :] = jnp.zeros((P, C), jnp.float32)

  nblk = len(_BLOCK_WEIGHT_NAMES)
  path_outs = []
  for p in range(num_paths):
    x = x_refs[p][0]                                           # (L, C)
    for _ in range(depth):
      wts = tuple(r[...] for r in refs[pos:pos + nblk])
      pos += nblk
      x = _sima_block(x, wts, mask_l, mask_r, pad_ref, H, W, C, num_heads, P)
    normw = refs[pos][...]
    normb = refs[pos + 1][...]
    pos += 2
    path_outs.append(_layernorm(x, normw, normb))              # EncoderBlock.norm

  aggw = refs[pos][...]
  aggb = refs[pos + 1][...]
  lnw = refs[pos + 2][...]
  lnb = refs[pos + 3][...]

  # aggregation Linear over the channel-concat of the paths, computed as a
  # per-path accumulation over row-slices of aggw (no in-kernel concatenate).
  y = jnp.dot(path_outs[0], aggw[0:C, :], preferred_element_type=jnp.float32)
  for p in range(1, num_paths):
    y = y + jnp.dot(path_outs[p], aggw[p * C:(p + 1) * C, :],
                    preferred_element_type=jnp.float32)
  y = y + aggb
  y = _layernorm(y, lnw, lnb)
  y = y * jnp.clip(y + 3.0, 0.0, 6.0) * (1.0 / 6.0)            # Hardswish
  o_ref[0] = y


# ------------------------------ pallas wrapper -------------------------------

def encoder_stage_forward(inputs, params, H, W, num_heads):
  """inputs: list of (B, L, dim // num_paths) arrays, one per path."""
  num_paths = len(inputs)
  B, L, C = inputs[0].shape
  depth = len(params['paths'][0]['blocks'])
  dim = C * num_paths
  assert L == H * W
  P = ((W + 1 + 7) // 8) * 8          # halo rows (>= W+1, sublane aligned)

  # host-precomputed column-edge masks for the LePE conv
  w_idx = jnp.arange(L, dtype=jnp.int32) % W
  mask_l = (w_idx >= 1).astype(jnp.float32).reshape(L, 1)
  mask_r = (w_idx <= W - 2).astype(jnp.float32).reshape(L, 1)

  args = []
  in_specs = []

  def add(arr, spec=None):
    args.append(arr)
    if spec is None:
      nd = arr.ndim
      spec = pl.BlockSpec(arr.shape, lambda b, nd=nd: (0,) * nd)
    in_specs.append(spec)

  for x in inputs:
    add(x, pl.BlockSpec((1, L, C), lambda b: (b, 0, 0)))
  add(mask_l)
  add(mask_r)
  for pp in params['paths']:
    for bp in pp['blocks']:
      for name in _BLOCK_WEIGHT_NAMES:
        add(bp[name])
    add(pp['normw'])
    add(pp['normb'])
  for name in ('w', 'b', 'lnw', 'lnb'):
    add(params['agg'][name])

  kern = functools.partial(_encoder_stage_kernel,
                           num_paths, depth, H, W, C, num_heads, P)
  out = pl.pallas_call(
      kern,
      out_shape=jax.ShapeDtypeStruct((B, L, dim), jnp.float32),
      grid=(B,),
      in_specs=in_specs,
      out_specs=pl.BlockSpec((1, L, dim), lambda b: (b, 0, 0)),
      scratch_shapes=[pltpu.VMEM((2 * P + L, C), jnp.float32)],
      compiler_params=pltpu.CompilerParams(
          dimension_semantics=("parallel",)),
  )(*args)
  trace = out                          # PyTorch: trace = out.detach().clone()
  return out, trace


# ------------------------------ parameter init -------------------------------

def init_params(key, dim, num_paths, depth, num_heads, mlp_ratio):
  Cp = dim // num_paths
  hd = Cp // num_heads
  hidden = int(round(Cp * mlp_ratio))
  keys = list(jax.random.split(key, 256))
  ctr = [0]

  def nxt():
    k = keys[ctr[0]]
    ctr[0] += 1
    return k

  def lin(fan_in, fan_out, scale=0.02):
    w = jax.random.normal(nxt(), (fan_in, fan_out), jnp.float32) * scale
    b = jax.random.normal(nxt(), (1, fan_out), jnp.float32) * scale
    return w, b

  paths = []
  for _ in range(num_paths):
    blocks = []
    for _ in range(depth):
      qkvw, qkvb = lin(Cp, 3 * Cp)
      projw, projb = lin(Cp, Cp)
      fc1w, fc1b = lin(Cp, hidden)
      fc2w, fc2b = lin(hidden, Cp)
      convw = jax.random.normal(nxt(), (9, Cp), jnp.float32) * 0.1  # (3*3, C) dw taps
      convb = jax.random.normal(nxt(), (1, Cp), jnp.float32) * 0.02
      temperature = jnp.ones((num_heads,), jnp.float32)             # nn.Parameter(ones)
      tempc = jnp.repeat(temperature, hd).reshape(1, Cp)            # folded per-channel
      blocks.append(dict(
          n1w=jnp.ones((1, Cp), jnp.float32), n1b=jnp.zeros((1, Cp), jnp.float32),
          n2w=jnp.ones((1, Cp), jnp.float32), n2b=jnp.zeros((1, Cp), jnp.float32),
          tempc=tempc,
          qkvw=qkvw, qkvb=qkvb, projw=projw, projb=projb,
          fc1w=fc1w, fc1b=fc1b, fc2w=fc2w, fc2b=fc2b,
          convw=convw, convb=convb))
    paths.append(dict(blocks=blocks,
                      normw=jnp.ones((1, Cp), jnp.float32),
                      normb=jnp.zeros((1, Cp), jnp.float32)))
  aggw, aggb = lin(dim, dim)
  agg = dict(w=aggw, b=aggb,
             lnw=jnp.ones((1, dim), jnp.float32),
             lnb=jnp.zeros((1, dim), jnp.float32))
  return dict(paths=paths, agg=agg)


# ---------------------------------- main -------------------------------------

if __name__ == "__main__":
  B = 2
  num_paths = 2
  dim = 32                       # total stage dim; per-path dim = 16
  Cp = dim // num_paths
  H = W = 8
  L = H * W                      # patches_resolution**2 = 64
  num_heads = 2
  depth = 2
  mlp_ratio = 4.0

  key = jax.random.PRNGKey(0)
  k_in, k_par = jax.random.split(key)
  in_keys = jax.random.split(k_in, num_paths)
  inputs = [jax.random.normal(k, (B, L, Cp), jnp.float32) for k in in_keys]

  params = init_params(k_par, dim, num_paths, depth, num_heads, mlp_ratio)

  out, trace = encoder_stage_forward(inputs, params, H, W, num_heads)
  jax.block_until_ready(out)
  jax.block_until_ready(trace)
  assert out.shape == (B, L, dim) and trace.shape == (B, L, dim)
  print("KERNEL_OK")
</pallas_src>

<mosaic_0001>
module attributes {stable_mosaic.version = 11 : i64} {
  func.func @_encoder_stage_kernel(%arg0: i32, %arg1: memref<1x64x16xf32, #tpu.memory_space<vmem>>, %arg2: memref<1x64x16xf32, #tpu.memory_space<vmem>>, %arg3: memref<64x1xf32, #tpu.memory_space<vmem>>, %arg4: memref<64x1xf32, #tpu.memory_space<vmem>>, %arg5: memref<1x16xf32, #tpu.memory_space<vmem>>, %arg6: memref<1x16xf32, #tpu.memory_space<vmem>>, %arg7: memref<16x48xf32, #tpu.memory_space<vmem>>, %arg8: memref<1x48xf32, #tpu.memory_space<vmem>>, %arg9: memref<1x16xf32, #tpu.memory_space<vmem>>, %arg10: memref<9x16xf32, #tpu.memory_space<vmem>>, %arg11: memref<1x16xf32, #tpu.memory_space<vmem>>, %arg12: memref<16x16xf32, #tpu.memory_space<vmem>>, %arg13: memref<1x16xf32, #tpu.memory_space<vmem>>, %arg14: memref<1x16xf32, #tpu.memory_space<vmem>>, %arg15: memref<1x16xf32, #tpu.memory_space<vmem>>, %arg16: memref<16x64xf32, #tpu.memory_space<vmem>>, %arg17: memref<1x64xf32, #tpu.memory_space<vmem>>, %arg18: memref<64x16xf32, #tpu.memory_space<vmem>>, %arg19: memref<1x16xf32, #tpu.memory_space<vmem>>, %arg20: memref<1x16xf32, #tpu.memory_space<vmem>>, %arg21: memref<1x16xf32, #tpu.memory_space<vmem>>, %arg22: memref<16x48xf32, #tpu.memory_space<vmem>>, %arg23: memref<1x48xf32, #tpu.memory_space<vmem>>, %arg24: memref<1x16xf32, #tpu.memory_space<vmem>>, %arg25: memref<9x16xf32, #tpu.memory_space<vmem>>, %arg26: memref<1x16xf32, #tpu.memory_space<vmem>>, %arg27: memref<16x16xf32, #tpu.memory_space<vmem>>, %arg28: memref<1x16xf32, #tpu.memory_space<vmem>>, %arg29: memref<1x16xf32, #tpu.memory_space<vmem>>, %arg30: memref<1x16xf32, #tpu.memory_space<vmem>>, %arg31: memref<16x64xf32, #tpu.memory_space<vmem>>, %arg32: memref<1x64xf32, #tpu.memory_space<vmem>>, %arg33: memref<64x16xf32, #tpu.memory_space<vmem>>, %arg34: memref<1x16xf32, #tpu.memory_space<vmem>>, %arg35: memref<1x16xf32, #tpu.memory_space<vmem>>, %arg36: memref<1x16xf32, #tpu.memory_space<vmem>>, %arg37: memref<1x16xf32, #tpu.memory_space<vmem>>, %arg38: memref<1x16xf32, #tpu.memory_space<vmem>>, %arg39: memref<16x48xf32, #tpu.memory_space<vmem>>, %arg40: memref<1x48xf32, #tpu.memory_space<vmem>>, %arg41: memref<1x16xf32, #tpu.memory_space<vmem>>, %arg42: memref<9x16xf32, #tpu.memory_space<vmem>>, %arg43: memref<1x16xf32, #tpu.memory_space<vmem>>, %arg44: memref<16x16xf32, #tpu.memory_space<vmem>>, %arg45: memref<1x16xf32, #tpu.memory_space<vmem>>, %arg46: memref<1x16xf32, #tpu.memory_space<vmem>>, %arg47: memref<1x16xf32, #tpu.memory_space<vmem>>, %arg48: memref<16x64xf32, #tpu.memory_space<vmem>>, %arg49: memref<1x64xf32, #tpu.memory_space<vmem>>, %arg50: memref<64x16xf32, #tpu.memory_space<vmem>>, %arg51: memref<1x16xf32, #tpu.memory_space<vmem>>, %arg52: memref<1x16xf32, #tpu.memory_space<vmem>>, %arg53: memref<1x16xf32, #tpu.memory_space<vmem>>, %arg54: memref<16x48xf32, #tpu.memory_space<vmem>>, %arg55: memref<1x48xf32, #tpu.memory_space<vmem>>, %arg56: memref<1x16xf32, #tpu.memory_space<vmem>>, %arg57: memref<9x16xf32, #tpu.memory_space<vmem>>, %arg58: memref<1x16xf32, #tpu.memory_space<vmem>>, %arg59: memref<16x16xf32, #tpu.memory_space<vmem>>, %arg60: memref<1x16xf32, #tpu.memory_space<vmem>>, %arg61: memref<1x16xf32, #tpu.memory_space<vmem>>, %arg62: memref<1x16xf32, #tpu.memory_space<vmem>>, %arg63: memref<16x64xf32, #tpu.memory_space<vmem>>, %arg64: memref<1x64xf32, #tpu.memory_space<vmem>>, %arg65: memref<64x16xf32, #tpu.memory_space<vmem>>, %arg66: memref<1x16xf32, #tpu.memory_space<vmem>>, %arg67: memref<1x16xf32, #tpu.memory_space<vmem>>, %arg68: memref<1x16xf32, #tpu.memory_space<vmem>>, %arg69: memref<32x32xf32, #tpu.memory_space<vmem>>, %arg70: memref<1x32xf32, #tpu.memory_space<vmem>>, %arg71: memref<1x32xf32, #tpu.memory_space<vmem>>, %arg72: memref<1x32xf32, #tpu.memory_space<vmem>>, %arg73: memref<1x64x32xf32, #tpu.memory_space<vmem>>, %arg74: memref<96x16xf32, #tpu.memory_space<vmem>>) attributes {dimension_semantics = [#tpu.dimension_semantics<parallel>], iteration_bounds = array<i64: 2>, scalar_prefetch = 0 : i64, scratch_operands = 1 : i64, tpu.core_type = #tpu.core_type<tc>, window_params = [{transform_indices = @transform_0, window_bounds = array<i64: 1, 64, 16>}, {transform_indices = @transform_1, window_bounds = array<i64: 1, 64, 16>}, {pipeline_mode = #tpu.pipeline_mode<synchronous>, transform_indices = @transform_2, window_bounds = array<i64: 64, 1>}, {pipeline_mode = #tpu.pipeline_mode<synchronous>, transform_indices = @transform_3, window_bounds = array<i64: 64, 1>}, {pipeline_mode = #tpu.pipeline_mode<synchronous>, transform_indices = @transform_4, window_bounds = array<i64: 1, 16>}, {pipeline_mode = #tpu.pipeline_mode<synchronous>, transform_indices = @transform_5, window_bounds = array<i64: 1, 16>}, {pipeline_mode = #tpu.pipeline_mode<synchronous>, transform_indices = @transform_6, window_bounds = array<i64: 16, 48>}, {pipeline_mode = #tpu.pipeline_mode<synchronous>, transform_indices = @transform_7, window_bounds = array<i64: 1, 48>}, {pipeline_mode = #tpu.pipeline_mode<synchronous>, transform_indices = @transform_8, window_bounds = array<i64: 1, 16>}, {pipeline_mode = #tpu.pipeline_mode<synchronous>, transform_indices = @transform_9, window_bounds = array<i64: 9, 16>}, {pipeline_mode = #tpu.pipeline_mode<synchronous>, transform_indices = @transform_10, window_bounds = array<i64: 1, 16>}, {pipeline_mode = #tpu.pipeline_mode<synchronous>, transform_indices = @transform_11, window_bounds = array<i64: 16, 16>}, {pipeline_mode = #tpu.pipeline_mode<synchronous>, transform_indices = @transform_12, window_bounds = array<i64: 1, 16>}, {pipeline_mode = #tpu.pipeline_mode<synchronous>, transform_indices = @transform_13, window_bounds = array<i64: 1, 16>}, {pipeline_mode = #tpu.pipeline_mode<synchronous>, transform_indices = @transform_14, window_bounds = array<i64: 1, 16>}, {pipeline_mode = #tpu.pipeline_mode<synchronous>, transform_indices = @transform_15, window_bounds = array<i64: 16, 64>}, {pipeline_mode = #tpu.pipeline_mode<synchronous>, transform_indices = @transform_16, window_bounds = array<i64: 1, 64>}, {pipeline_mode = #tpu.pipeline_mode<synchronous>, transform_indices = @transform_17, window_bounds = array<i64: 64, 16>}, {pipeline_mode = #tpu.pipeline_mode<synchronous>, transform_indices = @transform_18, window_bounds = array<i64: 1, 16>}, {pipeline_mode = #tpu.pipeline_mode<synchronous>, transform_indices = @transform_19, window_bounds = array<i64: 1, 16>}, {pipeline_mode = #tpu.pipeline_mode<synchronous>, transform_indices = @transform_20, window_bounds = array<i64: 1, 16>}, {pipeline_mode = #tpu.pipeline_mode<synchronous>, transform_indices = @transform_21, window_bounds = array<i64: 16, 48>}, {pipeline_mode = #tpu.pipeline_mode<synchronous>, transform_indices = @transform_22, window_bounds = array<i64: 1, 48>}, {pipeline_mode = #tpu.pipeline_mode<synchronous>, transform_indices = @transform_23, window_bounds = array<i64: 1, 16>}, {pipeline_mode = #tpu.pipeline_mode<synchronous>, transform_indices = @transform_24, window_bounds = array<i64: 9, 16>}, {pipeline_mode = #tpu.pipeline_mode<synchronous>, transform_indices = @transform_25, window_bounds = array<i64: 1, 16>}, {pipeline_mode = #tpu.pipeline_mode<synchronous>, transform_indices = @transform_26, window_bounds = array<i64: 16, 16>}, {pipeline_mode = #tpu.pipeline_mode<synchronous>, transform_indices = @transform_27, window_bounds = array<i64: 1, 16>}, {pipeline_mode = #tpu.pipeline_mode<synchronous>, transform_indices = @transform_28, window_bounds = array<i64: 1, 16>}, {pipeline_mode = #tpu.pipeline_mode<synchronous>, transform_indices = @transform_29, window_bounds = array<i64: 1, 16>}, {pipeline_mode = #tpu.pipeline_mode<synchronous>, transform_indices = @transform_30, window_bounds = array<i64: 16, 64>}, {pipeline_mode = #tpu.pipeline_mode<synchronous>, transform_indices = @transform_31, window_bounds = array<i64: 1, 64>}, {pipeline_mode = #tpu.pipeline_mode<synchronous>, transform_indices = @transform_32, window_bounds = array<i64: 64, 16>}, {pipeline_mode = #tpu.pipeline_mode<synchronous>, transform_indices = @transform_33, window_bounds = array<i64: 1, 16>}, {pipeline_mode = #tpu.pipeline_mode<synchronous>, transform_indices = @transform_34, window_bounds = array<i64: 1, 16>}, {pipeline_mode = #tpu.pipeline_mode<synchronous>, transform_indices = @transform_35, window_bounds = array<i64: 1, 16>}, {pipeline_mode = #tpu.pipeline_mode<synchronous>, transform_indices = @transform_36, window_bounds = array<i64: 1, 16>}, {pipeline_mode = #tpu.pipeline_mode<synchronous>, transform_indices = @transform_37, window_bounds = array<i64: 1, 16>}, {pipeline_mode = #tpu.pipeline_mode<synchronous>, transform_indices = @transform_38, window_bounds = array<i64: 16, 48>}, {pipeline_mode = #tpu.pipeline_mode<synchronous>, transform_indices = @transform_39, window_bounds = array<i64: 1, 48>}, {pipeline_mode = #tpu.pipeline_mode<synchronous>, transform_indices = @transform_40, window_bounds = array<i64: 1, 16>}, {pipeline_mode = #tpu.pipeline_mode<synchronous>, transform_indices = @transform_41, window_bounds = array<i64: 9, 16>}, {pipeline_mode = #tpu.pipeline_mode<synchronous>, transform_indices = @transform_42, window_bounds = array<i64: 1, 16>}, {pipeline_mode = #tpu.pipeline_mode<synchronous>, transform_indices = @transform_43, window_bounds = array<i64: 16, 16>}, {pipeline_mode = #tpu.pipeline_mode<synchronous>, transform_indices = @transform_44, window_bounds = array<i64: 1, 16>}, {pipeline_mode = #tpu.pipeline_mode<synchronous>, transform_indices = @transform_45, window_bounds = array<i64: 1, 16>}, {pipeline_mode = #tpu.pipeline_mode<synchronous>, transform_indices = @transform_46, window_bounds = array<i64: 1, 16>}, {pipeline_mode = #tpu.pipeline_mode<synchronous>, transform_indices = @transform_47, window_bounds = array<i64: 16, 64>}, {pipeline_mode = #tpu.pipeline_mode<synchronous>, transform_indices = @transform_48, window_bounds = array<i64: 1, 64>}, {pipeline_mode = #tpu.pipeline_mode<synchronous>, transform_indices = @transform_49, window_bounds = array<i64: 64, 16>}, {pipeline_mode = #tpu.pipeline_mode<synchronous>, transform_indices = @transform_50, window_bounds = array<i64: 1, 16>}, {pipeline_mode = #tpu.pipeline_mode<synchronous>, transform_indices = @transform_51, window_bounds = array<i64: 1, 16>}, {pipeline_mode = #tpu.pipeline_mode<synchronous>, transform_indices = @transform_52, window_bounds = array<i64: 1, 16>}, {pipeline_mode = #tpu.pipeline_mode<synchronous>, transform_indices = @transform_53, window_bounds = array<i64: 16, 48>}, {pipeline_mode = #tpu.pipeline_mode<synchronous>, transform_indices = @transform_54, window_bounds = array<i64: 1, 48>}, {pipeline_mode = #tpu.pipeline_mode<synchronous>, transform_indices = @transform_55, window_bounds = array<i64: 1, 16>}, {pipeline_mode = #tpu.pipeline_mode<synchronous>, transform_indices = @transform_56, window_bounds = array<i64: 9, 16>}, {pipeline_mode = #tpu.pipeline_mode<synchronous>, transform_indices = @transform_57, window_bounds = array<i64: 1, 16>}, {pipeline_mode = #tpu.pipeline_mode<synchronous>, transform_indices = @transform_58, window_bounds = array<i64: 16, 16>}, {pipeline_mode = #tpu.pipeline_mode<synchronous>, transform_indices = @transform_59, window_bounds = array<i64: 1, 16>}, {pipeline_mode = #tpu.pipeline_mode<synchronous>, transform_indices = @transform_60, window_bounds = array<i64: 1, 16>}, {pipeline_mode = #tpu.pipeline_mode<synchronous>, transform_indices = @transform_61, window_bounds = array<i64: 1, 16>}, {pipeline_mode = #tpu.pipeline_mode<synchronous>, transform_indices = @transform_62, window_bounds = array<i64: 16, 64>}, {pipeline_mode = #tpu.pipeline_mode<synchronous>, transform_indices = @transform_63, window_bounds = array<i64: 1, 64>}, {pipeline_mode = #tpu.pipeline_mode<synchronous>, transform_indices = @transform_64, window_bounds = array<i64: 64, 16>}, {pipeline_mode = #tpu.pipeline_mode<synchronous>, transform_indices = @transform_65, window_bounds = array<i64: 1, 16>}, {pipeline_mode = #tpu.pipeline_mode<synchronous>, transform_indices = @transform_66, window_bounds = array<i64: 1, 16>}, {pipeline_mode = #tpu.pipeline_mode<synchronous>, transform_indices = @transform_67, window_bounds = array<i64: 1, 16>}, {pipeline_mode = #tpu.pipeline_mode<synchronous>, transform_indices = @transform_68, window_bounds = array<i64: 32, 32>}, {pipeline_mode = #tpu.pipeline_mode<synchronous>, transform_indices = @transform_69, window_bounds = array<i64: 1, 32>}, {pipeline_mode = #tpu.pipeline_mode<synchronous>, transform_indices = @transform_70, window_bounds = array<i64: 1, 32>}, {pipeline_mode = #tpu.pipeline_mode<synchronous>, transform_indices = @transform_71, window_bounds = array<i64: 1, 32>}, {transform_indices = @transform_72, window_bounds = array<i64: 1, 64, 32>}]} {
    %c0 = arith.constant 0 : index
    %c0_0 = arith.constant 0 : index
    %0 = vector.load %arg3[%c0, %c0_0] : memref<64x1xf32, #tpu.memory_space<vmem>>, vector<64x1xf32>
    %c0_1 = arith.constant 0 : index
    %c0_2 = arith.constant 0 : index
    %1 = vector.load %arg4[%c0_1, %c0_2] : memref<64x1xf32, #tpu.memory_space<vmem>>, vector<64x1xf32>
    %cst = arith.constant 0.000000e+00 : f32
    %2 = vector.broadcast %cst : f32 to vector<16x16xf32>
    %c0_3 = arith.constant 0 : index
    %c0_4 = arith.constant 0 : index
    %3 = vector.load %arg74[%c0_3, %c0_4] : memref<96x16xf32, #tpu.memory_space<vmem>>, vector<16x16xf32>
    tpu.vector_store %arg74[%c0_3, %c0_4], %2 {strides = array<i32>} : memref<96x16xf32, #tpu.memory_space<vmem>>, vector<16x16xf32>,
    %cst_5 = arith.constant 0.000000e+00 : f32
    %4 = vector.broadcast %cst_5 : f32 to vector<16x16xf32>
    %c80 = arith.constant 80 : index
    %c0_6 = arith.constant 0 : index
    %5 = vector.load %arg74[%c80, %c0_6] : memref<96x16xf32, #tpu.memory_space<vmem>>, vector<16x16xf32>
    tpu.vector_store %arg74[%c80, %c0_6], %4 {strides = array<i32>} : memref<96x16xf32, #tpu.memory_space<vmem>>, vector<16x16xf32>,
    %c0_7 = arith.constant 0 : index
    %c0_8 = arith.constant 0 : index
    %c0_9 = arith.constant 0 : index
    %6 = vector.load %arg1[%c0_7, %c0_8, %c0_9] : memref<1x64x16xf32, #tpu.memory_space<vmem>>, vector<1x64x16xf32>
    %7 = vector.shape_cast %6 : vector<1x64x16xf32> to vector<64x16xf32>
    %c0_10 = arith.constant 0 : index
    %c0_11 = arith.constant 0 : index
    %8 = vector.load %arg5[%c0_10, %c0_11] : memref<1x16xf32, #tpu.memory_space<vmem>>, vector<1x16xf32>
    %c0_12 = arith.constant 0 : index
    %c0_13 = arith.constant 0 : index
    %9 = vector.load %arg6[%c0_12, %c0_13] : memref<1x16xf32, #tpu.memory_space<vmem>>, vector<1x16xf32>
    %c0_14 = arith.constant 0 : index
    %c0_15 = arith.constant 0 : index
    %10 = vector.load %arg7[%c0_14, %c0_15] : memref<16x48xf32, #tpu.memory_space<vmem>>, vector<16x48xf32>
    %c0_16 = arith.constant 0 : index
    %c0_17 = arith.constant 0 : index
    %11 = vector.load %arg8[%c0_16, %c0_17] : memref<1x48xf32, #tpu.memory_space<vmem>>, vector<1x48xf32>
    %c0_18 = arith.constant 0 : index
    %c0_19 = arith.constant 0 : index
    %12 = vector.load %arg9[%c0_18, %c0_19] : memref<1x16xf32, #tpu.memory_space<vmem>>, vector<1x16xf32>
    %c0_20 = arith.constant 0 : index
    %c0_21 = arith.constant 0 : index
    %13 = vector.load %arg10[%c0_20, %c0_21] : memref<9x16xf32, #tpu.memory_space<vmem>>, vector<9x16xf32>
    %c0_22 = arith.constant 0 : index
    %c0_23 = arith.constant 0 : index
    %14 = vector.load %arg11[%c0_22, %c0_23] : memref<1x16xf32, #tpu.memory_space<vmem>>, vector<1x16xf32>
    %c0_24 = arith.constant 0 : index
    %c0_25 = arith.constant 0 : index
    %15 = vector.load %arg12[%c0_24, %c0_25] : memref<16x16xf32, #tpu.memory_space<vmem>>, vector<16x16xf32>
    %c0_26 = arith.constant 0 : index
    %c0_27 = arith.constant 0 : index
    %16 = vector.load %arg13[%c0_26, %c0_27] : memref<1x16xf32, #tpu.memory_space<vmem>>, vector<1x16xf32>
    %c0_28 = arith.constant 0 : index
    %c0_29 = arith.constant 0 : index
    %17 = vector.load %arg14[%c0_28, %c0_29] : memref<1x16xf32, #tpu.memory_space<vmem>>, vector<1x16xf32>
    %c0_30 = arith.constant 0 : index
    %c0_31 = arith.constant 0 : index
    %18 = vector.load %arg15[%c0_30, %c0_31] : memref<1x16xf32, #tpu.memory_space<vmem>>, vector<1x16xf32>
    %c0_32 = arith.constant 0 : index
    %c0_33 = arith.constant 0 : index
    %19 = vector.load %arg16[%c0_32, %c0_33] : memref<16x64xf32, #tpu.memory_space<vmem>>, vector<16x64xf32>
    %c0_34 = arith.constant 0 : index
    %c0_35 = arith.constant 0 : index
    %20 = vector.load %arg17[%c0_34, %c0_35] : memref<1x64xf32, #tpu.memory_space<vmem>>, vector<1x64xf32>
    %c0_36 = arith.constant 0 : index
    %c0_37 = arith.constant 0 : index
    %21 = vector.load %arg18[%c0_36, %c0_37] : memref<64x16xf32, #tpu.memory_space<vmem>>, vector<64x16xf32>
    %c0_38 = arith.constant 0 : index
    %c0_39 = arith.constant 0 : index
    %22 = vector.load %arg19[%c0_38, %c0_39] : memref<1x16xf32, #tpu.memory_space<vmem>>, vector<1x16xf32>
    %cst_40 = arith.constant dense<0.000000e+00> : vector<64xf32>
    %23 = vector.multi_reduction <add>, %7, %cst_40 [1] : vector<64x16xf32> to vector<64xf32>
    %24 = vector.shape_cast %23 : vector<64xf32> to vector<64x1xf32>
    %cst_41 = arith.constant 1.600000e+01 : f32
    %25 = vector.broadcast %cst_41 : f32 to vector<64x1xf32>
    %26 = arith.divf %24, %25 : vector<64x1xf32>
    %27 = vector.broadcast %26 : vector<64x1xf32> to vector<64x16xf32>
    %28 = arith.subf %7, %27 : vector<64x16xf32>
    %29 = arith.mulf %28, %28 : vector<64x16xf32>
    %cst_42 = arith.constant dense<0.000000e+00> : vector<64xf32>
    %30 = vector.multi_reduction <add>, %29, %cst_42 [1] : vector<64x16xf32> to vector<64xf32>
    %31 = vector.shape_cast %30 : vector<64xf32> to vector<64x1xf32>
    %cst_43 = arith.constant 1.600000e+01 : f32
    %32 = vector.broadcast %cst_43 : f32 to vector<64x1xf32>
    %33 = arith.divf %31, %32 : vector<64x1xf32>
    %34 = vector.broadcast %26 : vector<64x1xf32> to vector<64x16xf32>
    %35 = arith.subf %7, %34 : vector<64x16xf32>
    %cst_44 = arith.constant 9.99999974E-6 : f32
    %36 = vector.broadcast %cst_44 : f32 to vector<64x1xf32>
    %37 = arith.addf %33, %36 : vector<64x1xf32>
    %38 = math.rsqrt %37 : vector<64x1xf32>
    %39 = vector.broadcast %38 : vector<64x1xf32> to vector<64x16xf32>
    %40 = arith.mulf %35, %39 : vector<64x16xf32>
    %41 = vector.broadcast %8 : vector<1x16xf32> to vector<64x16xf32>
    %42 = arith.mulf %40, %41 : vector<64x16xf32>
    %43 = vector.broadcast %9 : vector<1x16xf32> to vector<64x16xf32>
    %44 = arith.addf %42, %43 : vector<64x16xf32>
    %cst_45 = arith.constant dense<0.000000e+00> : vector<64x48xf32>
    %45 = tpu.matmul %44, %10, %cst_45 {dimension_numbers = #tpu.dot_dimension_numbers<[1], [0], [0], [1], [0, 0, 1, 1], [], []>} : vector<64x16xf32>, vector<16x48xf32>, vector<64x48xf32> -> vector<64x48xf32>
    %46 = vector.broadcast %11 : vector<1x48xf32> to vector<64x48xf32>
    %47 = arith.addf %45, %46 : vector<64x48xf32>
    %48 = vector.extract_strided_slice %47 {offsets = [0, 0], sizes = [64, 16], strides = [1, 1]} : vector<64x48xf32> to vector<64x16xf32>
    %49 = vector.extract_strided_slice %47 {offsets = [0, 16], sizes = [64, 16], strides = [1, 1]} : vector<64x48xf32> to vector<64x16xf32>
    %50 = vector.extract_strided_slice %47 {offsets = [0, 32], sizes = [64, 16], strides = [1, 1]} : vector<64x48xf32> to vector<64x16xf32>
    %51 = arith.mulf %48, %48 : vector<64x16xf32>
    %cst_46 = arith.constant dense<0.000000e+00> : vector<16xf32>
    %52 = vector.multi_reduction <add>, %51, %cst_46 [0] : vector<64x16xf32> to vector<16xf32>
    %53 = vector.shape_cast %52 : vector<16xf32> to vector<1x16xf32>
    %54 = math.sqrt %53 : vector<1x16xf32>
    %cst_47 = arith.constant 9.99999996E-13 : f32
    %55 = vector.broadcast %cst_47 : f32 to vector<1x16xf32>
    %56 = arith.maximumf %54, %55 : vector<1x16xf32>
    %57 = vector.broadcast %56 : vector<1x16xf32> to vector<64x16xf32>
    %58 = arith.divf %48, %57 : vector<64x16xf32>
    %59 = arith.mulf %49, %49 : vector<64x16xf32>
    %cst_48 = arith.constant dense<0.000000e+00> : vector<16xf32>
    %60 = vector.multi_reduction <add>, %59, %cst_48 [0] : vector<64x16xf32> to vector<16xf32>
    %61 = vector.shape_cast %60 : vector<16xf32> to vector<1x16xf32>
    %62 = math.sqrt %61 : vector<1x16xf32>
    %cst_49 = arith.constant 9.99999996E-13 : f32
    %63 = vector.broadcast %cst_49 : f32 to vector<1x16xf32>
    %64 = arith.maximumf %62, %63 : vector<1x16xf32>
    %65 = vector.broadcast %64 : vector<1x16xf32> to vector<64x16xf32>
    %66 = arith.divf %49, %65 : vector<64x16xf32>
    %67 = vector.extract_strided_slice %66 {offsets = [0, 0], sizes = [64, 8], strides = [1, 1]} : vector<64x16xf32> to vector<64x8xf32>
    %68 = vector.extract_strided_slice %50 {offsets = [0, 0], sizes = [64, 8], strides = [1, 1]} : vector<64x16xf32> to vector<64x8xf32>
    %cst_50 = arith.constant dense<0.000000e+00> : vector<8x8xf32>
    %69 = tpu.matmul %67, %68, %cst_50 {dimension_numbers = #tpu.dot_dimension_numbers<[0], [0], [1], [1], [0, 1, 1, 1], [], []>} : vector<64x8xf32>, vector<64x8xf32>, vector<8x8xf32> -> vector<8x8xf32>
    %70 = vector.extract_strided_slice %58 {offsets = [0, 0], sizes = [64, 8], strides = [1, 1]} : vector<64x16xf32> to vector<64x8xf32>
    %cst_51 = arith.constant dense<0.000000e+00> : vector<64x8xf32>
    %71 = tpu.matmul %70, %69, %cst_51 {dimension_numbers = #tpu.dot_dimension_numbers<[1], [0], [0], [1], [0, 0, 1, 1], [], []>} : vector<64x8xf32>, vector<8x8xf32>, vector<64x8xf32> -> vector<64x8xf32>
    %72 = vector.extract_strided_slice %66 {offsets = [0, 8], sizes = [64, 8], strides = [1, 1]} : vector<64x16xf32> to vector<64x8xf32>
    %73 = vector.extract_strided_slice %50 {offsets = [0, 8], sizes = [64, 8], strides = [1, 1]} : vector<64x16xf32> to vector<64x8xf32>
    %cst_52 = arith.constant dense<0.000000e+00> : vector<8x8xf32>
    %74 = tpu.matmul %72, %73, %cst_52 {dimension_numbers = #tpu.dot_dimension_numbers<[0], [0], [1], [1], [0, 1, 1, 1], [], []>} : vector<64x8xf32>, vector<64x8xf32>, vector<8x8xf32> -> vector<8x8xf32>
    %75 = vector.extract_strided_slice %58 {offsets = [0, 8], sizes = [64, 8], strides = [1, 1]} : vector<64x16xf32> to vector<64x8xf32>
    %cst_53 = arith.constant dense<0.000000e+00> : vector<64x8xf32>
    %76 = tpu.matmul %75, %74, %cst_53 {dimension_numbers = #tpu.dot_dimension_numbers<[1], [0], [0], [1], [0, 0, 1, 1], [], []>} : vector<64x8xf32>, vector<8x8xf32>, vector<64x8xf32> -> vector<64x8xf32>
    %77 = tpu.concatenate %71, %76 in 1 : vector<64x8xf32>, vector<64x8xf32> -> vector<64x16xf32>
    %78 = vector.broadcast %12 : vector<1x16xf32> to vector<64x16xf32>
    %79 = arith.mulf %77, %78 : vector<64x16xf32>
    %c16 = arith.constant 16 : index
    %c0_54 = arith.constant 0 : index
    %80 = vector.load %arg74[%c16, %c0_54] : memref<96x16xf32, #tpu.memory_space<vmem>>, vector<64x16xf32>
    tpu.vector_store %arg74[%c16, %c0_54], %50 {strides = array<i32>} : memref<96x16xf32, #tpu.memory_space<vmem>>, vector<64x16xf32>,
    %cst_55 = arith.constant 0.000000e+00 : f32
    %81 = vector.broadcast %cst_55 : f32 to vector<64x16xf32>
    %c7 = arith.constant 7 : index
    %c0_56 = arith.constant 0 : index
    %82 = vector.load %arg74[%c7, %c0_56] : memref<96x16xf32, #tpu.memory_space<vmem>>, vector<64x16xf32>
    %83 = vector.broadcast %0 : vector<64x1xf32> to vector<64x16xf32>
    %84 = arith.mulf %82, %83 : vector<64x16xf32>
    %85 = vector.extract_strided_slice %13 {offsets = [0, 0], sizes = [1, 16], strides = [1, 1]} : vector<9x16xf32> to vector<1x16xf32>
    %86 = vector.broadcast %85 : vector<1x16xf32> to vector<64x16xf32>
    %87 = arith.mulf %84, %86 : vector<64x16xf32>
    %88 = arith.addf %81, %87 : vector<64x16xf32>
    %c8 = arith.constant 8 : index
    %c0_57 = arith.constant 0 : index
    %89 = vector.load %arg74[%c8, %c0_57] : memref<96x16xf32, #tpu.memory_space<vmem>>, vector<64x16xf32>
    %90 = vector.extract_strided_slice %13 {offsets = [1, 0], sizes = [1, 16], strides = [1, 1]} : vector<9x16xf32> to vector<1x16xf32>
    %91 = vector.broadcast %90 : vector<1x16xf32> to vector<64x16xf32>
    %92 = arith.mulf %89, %91 : vector<64x16xf32>
    %93 = arith.addf %88, %92 : vector<64x16xf32>
    %c9 = arith.constant 9 : index
    %c0_58 = arith.constant 0 : index
    %94 = vector.load %arg74[%c9, %c0_58] : memref<96x16xf32, #tpu.memory_space<vmem>>, vector<64x16xf32>
    %95 = vector.broadcast %1 : vector<64x1xf32> to vector<64x16xf32>
    %96 = arith.mulf %94, %95 : vector<64x16xf32>
    %97 = vector.extract_strided_slice %13 {offsets = [2, 0], sizes = [1, 16], strides = [1, 1]} : vector<9x16xf32> to vector<1x16xf32>
    %98 = vector.broadcast %97 : vector<1x16xf32> to vector<64x16xf32>
    %99 = arith.mulf %96, %98 : vector<64x16xf32>
    %100 = arith.addf %93, %99 : vector<64x16xf32>
    %c15 = arith.constant 15 : index
    %c0_59 = arith.constant 0 : index
    %101 = vector.load %arg74[%c15, %c0_59] : memref<96x16xf32, #tpu.memory_space<vmem>>, vector<64x16xf32>
    %102 = vector.broadcast %0 : vector<64x1xf32> to vector<64x16xf32>
    %103 = arith.mulf %101, %102 : vector<64x16xf32>
    %104 = vector.extract_strided_slice %13 {offsets = [3, 0], sizes = [1, 16], strides = [1, 1]} : vector<9x16xf32> to vector<1x16xf32>
    %105 = vector.broadcast %104 : vector<1x16xf32> to vector<64x16xf32>
    %106 = arith.mulf %103, %105 : vector<64x16xf32>
    %107 = arith.addf %100, %106 : vector<64x16xf32>
    %c16_60 = arith.constant 16 : index
    %c0_61 = arith.constant 0 : index
    %108 = vector.load %arg74[%c16_60, %c0_61] : memref<96x16xf32, #tpu.memory_space<vmem>>, vector<64x16xf32>
    %109 = vector.extract_strided_slice %13 {offsets = [4, 0], sizes = [1, 16], strides = [1, 1]} : vector<9x16xf32> to vector<1x16xf32>
    %110 = vector.broadcast %109 : vector<1x16xf32> to vector<64x16xf32>
    %111 = arith.mulf %108, %110 : vector<64x16xf32>
    %112 = arith.addf %107, %111 : vector<64x16xf32>
    %c17 = arith.constant 17 : index
    %c0_62 = arith.constant 0 : index
    %113 = vector.load %arg74[%c17, %c0_62] : memref<96x16xf32, #tpu.memory_space<vmem>>, vector<64x16xf32>
    %114 = vector.broadcast %1 : vector<64x1xf32> to vector<64x16xf32>
    %115 = arith.mulf %113, %114 : vector<64x16xf32>
    %116 = vector.extract_strided_slice %13 {offsets = [5, 0], sizes = [1, 16], strides = [1, 1]} : vector<9x16xf32> to vector<1x16xf32>
    %117 = vector.broadcast %116 : vector<1x16xf32> to vector<64x16xf32>
    %118 = arith.mulf %115, %117 : vector<64x16xf32>
    %119 = arith.addf %112, %118 : vector<64x16xf32>
    %c23 = arith.constant 23 : index
    %c0_63 = arith.constant 0 : index
    %120 = vector.load %arg74[%c23, %c0_63] : memref<96x16xf32, #tpu.memory_space<vmem>>, vector<64x16xf32>
    %121 = vector.broadcast %0 : vector<64x1xf32> to vector<64x16xf32>
    %122 = arith.mulf %120, %121 : vector<64x16xf32>
    %123 = vector.extract_strided_slice %13 {offsets = [6, 0], sizes = [1, 16], strides = [1, 1]} : vector<9x16xf32> to vector<1x16xf32>
    %124 = vector.broadcast %123 : vector<1x16xf32> to vector<64x16xf32>
    %125 = arith.mulf %122, %124 : vector<64x16xf32>
    %126 = arith.addf %119, %125 : vector<64x16xf32>
    %c24 = arith.constant 24 : index
    %c0_64 = arith.constant 0 : index
    %127 = vector.load %arg74[%c24, %c0_64] : memref<96x16xf32, #tpu.memory_space<vmem>>, vector<64x16xf32>
    %128 = vector.extract_strided_slice %13 {offsets = [7, 0], sizes = [1, 16], strides = [1, 1]} : vector<9x16xf32> to vector<1x16xf32>
    %129 = vector.broadcast %128 : vector<1x16xf32> to vector<64x16xf32>
    %130 = arith.mulf %127, %129 : vector<64x16xf32>
    %131 = arith.addf %126, %130 : vector<64x16xf32>
    %c25 = arith.constant 25 : index
    %c0_65 = arith.constant 0 : index
    %132 = vector.load %arg74[%c25, %c0_65] : memref<96x16xf32, #tpu.memory_space<vmem>>, vector<64x16xf32>
    %133 = vector.broadcast %1 : vector<64x1xf32> to vector<64x16xf32>
    %134 = arith.mulf %132, %133 : vector<64x16xf32>
    %135 = vector.extract_strided_slice %13 {offsets = [8, 0], sizes = [1, 16], strides = [1, 1]} : vector<9x16xf32> to vector<1x16xf32>
    %136 = vector.broadcast %135 : vector<1x16xf32> to vector<64x16xf32>
    %137 = arith.mulf %134, %136 : vector<64x16xf32>
    %138 = arith.addf %131, %137 : vector<64x16xf32>
    %139 = vector.broadcast %14 : vector<1x16xf32> to vector<64x16xf32>
    %140 = arith.addf %138, %139 : vector<64x16xf32>
    %141 = arith.addf %79, %140 : vector<64x16xf32>
    %cst_66 = arith.constant dense<0.000000e+00> : vector<64x16xf32>
    %142 = tpu.matmul %141, %15, %cst_66 {dimension_numbers = #tpu.dot_dimension_numbers<[1], [0], [0], [1], [0, 0, 1, 1], [], []>} : vector<64x16xf32>, vector<16x16xf32>, vector<64x16xf32> -> vector<64x16xf32>
    %143 = vector.broadcast %16 : vector<1x16xf32> to vector<64x16xf32>
    %144 = arith.addf %142, %143 : vector<64x16xf32>
    %145 = arith.addf %7, %144 : vector<64x16xf32>
    %cst_67 = arith.constant dense<0.000000e+00> : vector<64xf32>
    %146 = vector.multi_reduction <add>, %145, %cst_67 [1] : vector<64x16xf32> to vector<64xf32>
    %147 = vector.shape_cast %146 : vector<64xf32> to vector<64x1xf32>
    %cst_68 = arith.constant 1.600000e+01 : f32
    %148 = vector.broadcast %cst_68 : f32 to vector<64x1xf32>
    %149 = arith.divf %147, %148 : vector<64x1xf32>
    %150 = vector.broadcast %149 : vector<64x1xf32> to vector<64x16xf32>
    %151 = arith.subf %145, %150 : vector<64x16xf32>
    %152 = arith.mulf %151, %151 : vector<64x16xf32>
    %cst_69 = arith.constant dense<0.000000e+00> : vector<64xf32>
    %153 = vector.multi_reduction <add>, %152, %cst_69 [1] : vector<64x16xf32> to vector<64xf32>
    %154 = vector.shape_cast %153 : vector<64xf32> to vector<64x1xf32>
    %cst_70 = arith.constant 1.600000e+01 : f32
    %155 = vector.broadcast %cst_70 : f32 to vector<64x1xf32>
    %156 = arith.divf %154, %155 : vector<64x1xf32>
    %157 = vector.broadcast %149 : vector<64x1xf32> to vector<64x16xf32>
    %158 = arith.subf %145, %157 : vector<64x16xf32>
    %cst_71 = arith.constant 9.99999974E-6 : f32
    %159 = vector.broadcast %cst_71 : f32 to vector<64x1xf32>
    %160 = arith.addf %156, %159 : vector<64x1xf32>
    %161 = math.rsqrt %160 : vector<64x1xf32>
    %162 = vector.broadcast %161 : vector<64x1xf32> to vector<64x16xf32>
    %163 = arith.mulf %158, %162 : vector<64x16xf32>
    %164 = vector.broadcast %17 : vector<1x16xf32> to vector<64x16xf32>
    %165 = arith.mulf %163, %164 : vector<64x16xf32>
    %166 = vector.broadcast %18 : vector<1x16xf32> to vector<64x16xf32>
    %167 = arith.addf %165, %166 : vector<64x16xf32>
    %cst_72 = arith.constant dense<0.000000e+00> : vector<64x64xf32>
    %168 = tpu.matmul %167, %19, %cst_72 {dimension_numbers = #tpu.dot_dimension_numbers<[1], [0], [0], [1], [0, 0, 1, 1], [], []>} : vector<64x16xf32>, vector<16x64xf32>, vector<64x64xf32> -> vector<64x64xf32>
    %169 = vector.broadcast %20 : vector<1x64xf32> to vector<64x64xf32>
    %170 = arith.addf %168, %169 : vector<64x64xf32>
    %cst_73 = arith.constant 5.000000e-01 : f32
    %171 = vector.broadcast %cst_73 : f32 to vector<64x64xf32>
    %172 = arith.mulf %171, %170 : vector<64x64xf32>
    %cst_74 = arith.constant 0.707106769 : f32
    %173 = vector.broadcast %cst_74 : f32 to vector<64x64xf32>
    %174 = arith.mulf %170, %173 : vector<64x64xf32>
    %175 = math.erf %174 : vector<64x64xf32>
    %cst_75 = arith.constant 1.000000e+00 : f32
    %176 = vector.broadcast %cst_75 : f32 to vector<64x64xf32>
    %177 = arith.addf %176, %175 : vector<64x64xf32>
    %178 = arith.mulf %172, %177 : vector<64x64xf32>
    %cst_76 = arith.constant dense<0.000000e+00> : vector<64x16xf32>
    %179 = tpu.matmul %178, %21, %cst_76 {dimension_numbers = #tpu.dot_dimension_numbers<[1], [0], [0], [1], [0, 0, 1, 1], [], []>} : vector<64x64xf32>, vector<64x16xf32>, vector<64x16xf32> -> vector<64x16xf32>
    %180 = vector.broadcast %22 : vector<1x16xf32> to vector<64x16xf32>
    %181 = arith.addf %179, %180 : vector<64x16xf32>
    %182 = arith.addf %145, %181 : vector<64x16xf32>
    %c0_77 = arith.constant 0 : index
    %c0_78 = arith.constant 0 : index
    %183 = vector.load %arg20[%c0_77, %c0_78] : memref<1x16xf32, #tpu.memory_space<vmem>>, vector<1x16xf32>
    %c0_79 = arith.constant 0 : index
    %c0_80 = arith.constant 0 : index
    %184 = vector.load %arg21[%c0_79, %c0_80] : memref<1x16xf32, #tpu.memory_space<vmem>>, vector<1x16xf32>
    %c0_81 = arith.constant 0 : index
    %c0_82 = arith.constant 0 : index
    %185 = vector.load %arg22[%c0_81, %c0_82] : memref<16x48xf32, #tpu.memory_space<vmem>>, vector<16x48xf32>
    %c0_83 = arith.constant 0 : index
    %c0_84 = arith.constant 0 : index
    %186 = vector.load %arg23[%c0_83, %c0_84] : memref<1x48xf32, #tpu.memory_space<vmem>>, vector<1x48xf32>
    %c0_85 = arith.constant 0 : index
    %c0_86 = arith.constant 0 : index
    %187 = vector.load %arg24[%c0_85, %c0_86] : memref<1x16xf32, #tpu.memory_space<vmem>>, vector<1x16xf32>
    %c0_87 = arith.constant 0 : index
    %c0_88 = arith.constant 0 : index
    %188 = vector.load %arg25[%c0_87, %c0_88] : memref<9x16xf32, #tpu.memory_space<vmem>>, vector<9x16xf32>
    %c0_89 = arith.constant 0 : index
    %c0_90 = arith.constant 0 : index
    %189 = vector.load %arg26[%c0_89, %c0_90] : memref<1x16xf32, #tpu.memory_space<vmem>>, vector<1x16xf32>
    %c0_91 = arith.constant 0 : index
    %c0_92 = arith.constant 0 : index
    %190 = vector.load %arg27[%c0_91, %c0_92] : memref<16x16xf32, #tpu.memory_space<vmem>>, vector<16x16xf32>
    %c0_93 = arith.constant 0 : index
    %c0_94 = arith.constant 0 : index
    %191 = vector.load %arg28[%c0_93, %c0_94] : memref<1x16xf32, #tpu.memory_space<vmem>>, vector<1x16xf32>
    %c0_95 = arith.constant 0 : index
    %c0_96 = arith.constant 0 : index
    %192 = vector.load %arg29[%c0_95, %c0_96] : memref<1x16xf32, #tpu.memory_space<vmem>>, vector<1x16xf32>
    %c0_97 = arith.constant 0 : index
    %c0_98 = arith.constant 0 : index
    %193 = vector.load %arg30[%c0_97, %c0_98] : memref<1x16xf32, #tpu.memory_space<vmem>>, vector<1x16xf32>
    %c0_99 = arith.constant 0 : index
    %c0_100 = arith.constant 0 : index
    %194 = vector.load %arg31[%c0_99, %c0_100] : memref<16x64xf32, #tpu.memory_space<vmem>>, vector<16x64xf32>
    %c0_101 = arith.constant 0 : index
    %c0_102 = arith.constant 0 : index
    %195 = vector.load %arg32[%c0_101, %c0_102] : memref<1x64xf32, #tpu.memory_space<vmem>>, vector<1x64xf32>
    %c0_103 = arith.constant 0 : index
    %c0_104 = arith.constant 0 : index
    %196 = vector.load %arg33[%c0_103, %c0_104] : memref<64x16xf32, #tpu.memory_space<vmem>>, vector<64x16xf32>
    %c0_105 = arith.constant 0 : index
    %c0_106 = arith.constant 0 : index
    %197 = vector.load %arg34[%c0_105, %c0_106] : memref<1x16xf32, #tpu.memory_space<vmem>>, vector<1x16xf32>
    %cst_107 = arith.constant dense<0.000000e+00> : vector<64xf32>
    %198 = vector.multi_reduction <add>, %182, %cst_107 [1] : vector<64x16xf32> to vector<64xf32>
    %199 = vector.shape_cast %198 : vector<64xf32> to vector<64x1xf32>
    %cst_108 = arith.constant 1.600000e+01 : f32
    %200 = vector.broadcast %cst_108 : f32 to vector<64x1xf32>
    %201 = arith.divf %199, %200 : vector<64x1xf32>
    %202 = vector.broadcast %201 : vector<64x1xf32> to vector<64x16xf32>
    %203 = arith.subf %182, %202 : vector<64x16xf32>
    %204 = arith.mulf %203, %203 : vector<64x16xf32>
    %cst_109 = arith.constant dense<0.000000e+00> : vector<64xf32>
    %205 = vector.multi_reduction <add>, %204, %cst_109 [1] : vector<64x16xf32> to vector<64xf32>
    %206 = vector.shape_cast %205 : vector<64xf32> to vector<64x1xf32>
    %cst_110 = arith.constant 1.600000e+01 : f32
    %207 = vector.broadcast %cst_110 : f32 to vector<64x1xf32>
    %208 = arith.divf %206, %207 : vector<64x1xf32>
    %209 = vector.broadcast %201 : vector<64x1xf32> to vector<64x16xf32>
    %210 = arith.subf %182, %209 : vector<64x16xf32>
    %cst_111 = arith.constant 9.99999974E-6 : f32
    %211 = vector.broadcast %cst_111 : f32 to vector<64x1xf32>
    %212 = arith.addf %208, %211 : vector<64x1xf32>
    %213 = math.rsqrt %212 : vector<64x1xf32>
    %214 = vector.broadcast %213 : vector<64x1xf32> to vector<64x16xf32>
    %215 = arith.mulf %210, %214 : vector<64x16xf32>
    %216 = vector.broadcast %183 : vector<1x16xf32> to vector<64x16xf32>
    %217 = arith.mulf %215, %216 : vector<64x16xf32>
    %218 = vector.broadcast %184 : vector<1x16xf32> to vector<64x16xf32>
    %219 = arith.addf %217, %218 : vector<64x16xf32>
    %cst_112 = arith.constant dense<0.000000e+00> : vector<64x48xf32>
    %220 = tpu.matmul %219, %185, %cst_112 {dimension_numbers = #tpu.dot_dimension_numbers<[1], [0], [0], [1], [0, 0, 1, 1], [], []>} : vector<64x16xf32>, vector<16x48xf32>, vector<64x48xf32> -> vector<64x48xf32>
    %221 = vector.broadcast %186 : vector<1x48xf32> to vector<64x48xf32>
    %222 = arith.addf %220, %221 : vector<64x48xf32>
    %223 = vector.extract_strided_slice %222 {offsets = [0, 0], sizes = [64, 16], strides = [1, 1]} : vector<64x48xf32> to vector<64x16xf32>
    %224 = vector.extract_strided_slice %222 {offsets = [0, 16], sizes = [64, 16], strides = [1, 1]} : vector<64x48xf32> to vector<64x16xf32>
    %225 = vector.extract_strided_slice %222 {offsets = [0, 32], sizes = [64, 16], strides = [1, 1]} : vector<64x48xf32> to vector<64x16xf32>
    %226 = arith.mulf %223, %223 : vector<64x16xf32>
    %cst_113 = arith.constant dense<0.000000e+00> : vector<16xf32>
    %227 = vector.multi_reduction <add>, %226, %cst_113 [0] : vector<64x16xf32> to vector<16xf32>
    %228 = vector.shape_cast %227 : vector<16xf32> to vector<1x16xf32>
    %229 = math.sqrt %228 : vector<1x16xf32>
    %cst_114 = arith.constant 9.99999996E-13 : f32
    %230 = vector.broadcast %cst_114 : f32 to vector<1x16xf32>
    %231 = arith.maximumf %229, %230 : vector<1x16xf32>
    %232 = vector.broadcast %231 : vector<1x16xf32> to vector<64x16xf32>
    %233 = arith.divf %223, %232 : vector<64x16xf32>
    %234 = arith.mulf %224, %224 : vector<64x16xf32>
    %cst_115 = arith.constant dense<0.000000e+00> : vector<16xf32>
    %235 = vector.multi_reduction <add>, %234, %cst_115 [0] : vector<64x16xf32> to vector<16xf32>
    %236 = vector.shape_cast %235 : vector<16xf32> to vector<1x16xf32>
    %237 = math.sqrt %236 : vector<1x16xf32>
    %cst_116 = arith.constant 9.99999996E-13 : f32
    %238 = vector.broadcast %cst_116 : f32 to vector<1x16xf32>
    %239 = arith.maximumf %237, %238 : vector<1x16xf32>
    %240 = vector.broadcast %239 : vector<1x16xf32> to vector<64x16xf32>
    %241 = arith.divf %224, %240 : vector<64x16xf32>
    %242 = vector.extract_strided_slice %241 {offsets = [0, 0], sizes = [64, 8], strides = [1, 1]} : vector<64x16xf32> to vector<64x8xf32>
    %243 = vector.extract_strided_slice %225 {offsets = [0, 0], sizes = [64, 8], strides = [1, 1]} : vector<64x16xf32> to vector<64x8xf32>
    %cst_117 = arith.constant dense<0.000000e+00> : vector<8x8xf32>
    %244 = tpu.matmul %242, %243, %cst_117 {dimension_numbers = #tpu.dot_dimension_numbers<[0], [0], [1], [1], [0, 1, 1, 1], [], []>} : vector<64x8xf32>, vector<64x8xf32>, vector<8x8xf32> -> vector<8x8xf32>
    %245 = vector.extract_strided_slice %233 {offsets = [0, 0], sizes = [64, 8], strides = [1, 1]} : vector<64x16xf32> to vector<64x8xf32>
    %cst_118 = arith.constant dense<0.000000e+00> : vector<64x8xf32>
    %246 = tpu.matmul %245, %244, %cst_118 {dimension_numbers = #tpu.dot_dimension_numbers<[1], [0], [0], [1], [0, 0, 1, 1], [], []>} : vector<64x8xf32>, vector<8x8xf32>, vector<64x8xf32> -> vector<64x8xf32>
    %247 = vector.extract_strided_slice %241 {offsets = [0, 8], sizes = [64, 8], strides = [1, 1]} : vector<64x16xf32> to vector<64x8xf32>
    %248 = vector.extract_strided_slice %225 {offsets = [0, 8], sizes = [64, 8], strides = [1, 1]} : vector<64x16xf32> to vector<64x8xf32>
    %cst_119 = arith.constant dense<0.000000e+00> : vector<8x8xf32>
    %249 = tpu.matmul %247, %248, %cst_119 {dimension_numbers = #tpu.dot_dimension_numbers<[0], [0], [1], [1], [0, 1, 1, 1], [], []>} : vector<64x8xf32>, vector<64x8xf32>, vector<8x8xf32> -> vector<8x8xf32>
    %250 = vector.extract_strided_slice %233 {offsets = [0, 8], sizes = [64, 8], strides = [1, 1]} : vector<64x16xf32> to vector<64x8xf32>
    %cst_120 = arith.constant dense<0.000000e+00> : vector<64x8xf32>
    %251 = tpu.matmul %250, %249, %cst_120 {dimension_numbers = #tpu.dot_dimension_numbers<[1], [0], [0], [1], [0, 0, 1, 1], [], []>} : vector<64x8xf32>, vector<8x8xf32>, vector<64x8xf32> -> vector<64x8xf32>
    %252 = tpu.concatenate %246, %251 in 1 : vector<64x8xf32>, vector<64x8xf32> -> vector<64x16xf32>
    %253 = vector.broadcast %187 : vector<1x16xf32> to vector<64x16xf32>
    %254 = arith.mulf %252, %253 : vector<64x16xf32>
    %c16_121 = arith.constant 16 : index
    %c0_122 = arith.constant 0 : index
    %255 = vector.load %arg74[%c16_121, %c0_122] : memref<96x16xf32, #tpu.memory_space<vmem>>, vector<64x16xf32>
    tpu.vector_store %arg74[%c16_121, %c0_122], %225 {strides = array<i32>} : memref<96x16xf32, #tpu.memory_space<vmem>>, vector<64x16xf32>,
    %cst_123 = arith.constant 0.000000e+00 : f32
    %256 = vector.broadcast %cst_123 : f32 to vector<64x16xf32>
    %c7_124 = arith.constant 7 : index
    %c0_125 = arith.constant 0 : index
    %257 = vector.load %arg74[%c7_124, %c0_125] : memref<96x16xf32, #tpu.memory_space<vmem>>, vector<64x16xf32>
    %258 = vector.broadcast %0 : vector<64x1xf32> to vector<64x16xf32>
    %259 = arith.mulf %257, %258 : vector<64x16xf32>
    %260 = vector.extract_strided_slice %188 {offsets = [0, 0], sizes = [1, 16], strides = [1, 1]} : vector<9x16xf32> to vector<1x16xf32>
    %261 = vector.broadcast %260 : vector<1x16xf32> to vector<64x16xf32>
    %262 = arith.mulf %259, %261 : vector<64x16xf32>
    %263 = arith.addf %256, %262 : vector<64x16xf32>
    %c8_126 = arith.constant 8 : index
    %c0_127 = arith.constant 0 : index
    %264 = vector.load %arg74[%c8_126, %c0_127] : memref<96x16xf32, #tpu.memory_space<vmem>>, vector<64x16xf32>
    %265 = vector.extract_strided_slice %188 {offsets = [1, 0], sizes = [1, 16], strides = [1, 1]} : vector<9x16xf32> to vector<1x16xf32>
    %266 = vector.broadcast %265 : vector<1x16xf32> to vector<64x16xf32>
    %267 = arith.mulf %264, %266 : vector<64x16xf32>
    %268 = arith.addf %263, %267 : vector<64x16xf32>
    %c9_128 = arith.constant 9 : index
    %c0_129 = arith.constant 0 : index
    %269 = vector.load %arg74[%c9_128, %c0_129] : memref<96x16xf32, #tpu.memory_space<vmem>>, vector<64x16xf32>
    %270 = vector.broadcast %1 : vector<64x1xf32> to vector<64x16xf32>
    %271 = arith.mulf %269, %270 : vector<64x16xf32>
    %272 = vector.extract_strided_slice %188 {offsets = [2, 0], sizes = [1, 16], strides = [1, 1]} : vector<9x16xf32> to vector<1x16xf32>
    %273 = vector.broadcast %272 : vector<1x16xf32> to vector<64x16xf32>
    %274 = arith.mulf %271, %273 : vector<64x16xf32>
    %275 = arith.addf %268, %274 : vector<64x16xf32>
    %c15_130 = arith.constant 15 : index
    %c0_131 = arith.constant 0 : index
    %276 = vector.load %arg74[%c15_130, %c0_131] : memref<96x16xf32, #tpu.memory_space<vmem>>, vector<64x16xf32>
    %277 = vector.broadcast %0 : vector<64x1xf32> to vector<64x16xf32>
    %278 = arith.mulf %276, %277 : vector<64x16xf32>
    %279 = vector.extract_strided_slice %188 {offsets = [3, 0], sizes = [1, 16], strides = [1, 1]} : vector<9x16xf32> to vector<1x16xf32>
    %280 = vector.broadcast %279 : vector<1x16xf32> to vector<64x16xf32>
    %281 = arith.mulf %278, %280 : vector<64x16xf32>
    %282 = arith.addf %275, %281 : vector<64x16xf32>
    %c16_132 = arith.constant 16 : index
    %c0_133 = arith.constant 0 : index
    %283 = vector.load %arg74[%c16_132, %c0_133] : memref<96x16xf32, #tpu.memory_space<vmem>>, vector<64x16xf32>
    %284 = vector.extract_strided_slice %188 {offsets = [4, 0], sizes = [1, 16], strides = [1, 1]} : vector<9x16xf32> to vector<1x16xf32>
    %285 = vector.broadcast %284 : vector<1x16xf32> to vector<64x16xf32>
    %286 = arith.mulf %283, %285 : vector<64x16xf32>
    %287 = arith.addf %282, %286 : vector<64x16xf32>
    %c17_134 = arith.constant 17 : index
    %c0_135 = arith.constant 0 : index
    %288 = vector.load %arg74[%c17_134, %c0_135] : memref<96x16xf32, #tpu.memory_space<vmem>>, vector<64x16xf32>
    %289 = vector.broadcast %1 : vector<64x1xf32> to vector<64x16xf32>
    %290 = arith.mulf %288, %289 : vector<64x16xf32>
    %291 = vector.extract_strided_slice %188 {offsets = [5, 0], sizes = [1, 16], strides = [1, 1]} : vector<9x16xf32> to vector<1x16xf32>
    %292 = vector.broadcast %291 : vector<1x16xf32> to vector<64x16xf32>
    %293 = arith.mulf %290, %292 : vector<64x16xf32>
    %294 = arith.addf %287, %293 : vector<64x16xf32>
    %c23_136 = arith.constant 23 : index
    %c0_137 = arith.constant 0 : index
    %295 = vector.load %arg74[%c23_136, %c0_137] : memref<96x16xf32, #tpu.memory_space<vmem>>, vector<64x16xf32>
    %296 = vector.broadcast %0 : vector<64x1xf32> to vector<64x16xf32>
    %297 = arith.mulf %295, %296 : vector<64x16xf32>
    %298 = vector.extract_strided_slice %188 {offsets = [6, 0], sizes = [1, 16], strides = [1, 1]} : vector<9x16xf32> to vector<1x16xf32>
    %299 = vector.broadcast %298 : vector<1x16xf32> to vector<64x16xf32>
    %300 = arith.mulf %297, %299 : vector<64x16xf32>
    %301 = arith.addf %294, %300 : vector<64x16xf32>
    %c24_138 = arith.constant 24 : index
    %c0_139 = arith.constant 0 : index
    %302 = vector.load %arg74[%c24_138, %c0_139] : memref<96x16xf32, #tpu.memory_space<vmem>>, vector<64x16xf32>
    %303 = vector.extract_strided_slice %188 {offsets = [7, 0], sizes = [1, 16], strides = [1, 1]} : vector<9x16xf32> to vector<1x16xf32>
    %304 = vector.broadcast %303 : vector<1x16xf32> to vector<64x16xf32>
    %305 = arith.mulf %302, %304 : vector<64x16xf32>
    %306 = arith.addf %301, %305 : vector<64x16xf32>
    %c25_140 = arith.constant 25 : index
    %c0_141 = arith.constant 0 : index
    %307 = vector.load %arg74[%c25_140, %c0_141] : memref<96x16xf32, #tpu.memory_space<vmem>>, vector<64x16xf32>
    %308 = vector.broadcast %1 : vector<64x1xf32> to vector<64x16xf32>
    %309 = arith.mulf %307, %308 : vector<64x16xf32>
    %310 = vector.extract_strided_slice %188 {offsets = [8, 0], sizes = [1, 16], strides = [1, 1]} : vector<9x16xf32> to vector<1x16xf32>
    %311 = vector.broadcast %310 : vector<1x16xf32> to vector<64x16xf32>
    %312 = arith.mulf %309, %311 : vector<64x16xf32>
    %313 = arith.addf %306, %312 : vector<64x16xf32>
    %314 = vector.broadcast %189 : vector<1x16xf32> to vector<64x16xf32>
    %315 = arith.addf %313, %314 : vector<64x16xf32>
    %316 = arith.addf %254, %315 : vector<64x16xf32>
    %cst_142 = arith.constant dense<0.000000e+00> : vector<64x16xf32>
    %317 = tpu.matmul %316, %190, %cst_142 {dimension_numbers = #tpu.dot_dimension_numbers<[1], [0], [0], [1], [0, 0, 1, 1], [], []>} : vector<64x16xf32>, vector<16x16xf32>, vector<64x16xf32> -> vector<64x16xf32>
    %318 = vector.broadcast %191 : vector<1x16xf32> to vector<64x16xf32>
    %319 = arith.addf %317, %318 : vector<64x16xf32>
    %320 = arith.addf %182, %319 : vector<64x16xf32>
    %cst_143 = arith.constant dense<0.000000e+00> : vector<64xf32>
    %321 = vector.multi_reduction <add>, %320, %cst_143 [1] : vector<64x16xf32> to vector<64xf32>
    %322 = vector.shape_cast %321 : vector<64xf32> to vector<64x1xf32>
    %cst_144 = arith.constant 1.600000e+01 : f32
    %323 = vector.broadcast %cst_144 : f32 to vector<64x1xf32>
    %324 = arith.divf %322, %323 : vector<64x1xf32>
    %325 = vector.broadcast %324 : vector<64x1xf32> to vector<64x16xf32>
    %326 = arith.subf %320, %325 : vector<64x16xf32>
    %327 = arith.mulf %326, %326 : vector<64x16xf32>
    %cst_145 = arith.constant dense<0.000000e+00> : vector<64xf32>
    %328 = vector.multi_reduction <add>, %327, %cst_145 [1] : vector<64x16xf32> to vector<64xf32>
    %329 = vector.shape_cast %328 : vector<64xf32> to vector<64x1xf32>
    %cst_146 = arith.constant 1.600000e+01 : f32
    %330 = vector.broadcast %cst_146 : f32 to vector<64x1xf32>
    %331 = arith.divf %329, %330 : vector<64x1xf32>
    %332 = vector.broadcast %324 : vector<64x1xf32> to vector<64x16xf32>
    %333 = arith.subf %320, %332 : vector<64x16xf32>
    %cst_147 = arith.constant 9.99999974E-6 : f32
    %334 = vector.broadcast %cst_147 : f32 to vector<64x1xf32>
    %335 = arith.addf %331, %334 : vector<64x1xf32>
    %336 = math.rsqrt %335 : vector<64x1xf32>
    %337 = vector.broadcast %336 : vector<64x1xf32> to vector<64x16xf32>
    %338 = arith.mulf %333, %337 : vector<64x16xf32>
    %339 = vector.broadcast %192 : vector<1x16xf32> to vector<64x16xf32>
    %340 = arith.mulf %338, %339 : vector<64x16xf32>
    %341 = vector.broadcast %193 : vector<1x16xf32> to vector<64x16xf32>
    %342 = arith.addf %340, %341 : vector<64x16xf32>
    %cst_148 = arith.constant dense<0.000000e+00> : vector<64x64xf32>
    %343 = tpu.matmul %342, %194, %cst_148 {dimension_numbers = #tpu.dot_dimension_numbers<[1], [0], [0], [1], [0, 0, 1, 1], [], []>} : vector<64x16xf32>, vector<16x64xf32>, vector<64x64xf32> -> vector<64x64xf32>
    %344 = vector.broadcast %195 : vector<1x64xf32> to vector<64x64xf32>
    %345 = arith.addf %343, %344 : vector<64x64xf32>
    %cst_149 = arith.constant 5.000000e-01 : f32
    %346 = vector.broadcast %cst_149 : f32 to vector<64x64xf32>
    %347 = arith.mulf %346, %345 : vector<64x64xf32>
    %cst_150 = arith.constant 0.707106769 : f32
    %348 = vector.broadcast %cst_150 : f32 to vector<64x64xf32>
    %349 = arith.mulf %345, %348 : vector<64x64xf32>
    %350 = math.erf %349 : vector<64x64xf32>
    %cst_151 = arith.constant 1.000000e+00 : f32
    %351 = vector.broadcast %cst_151 : f32 to vector<64x64xf32>
    %352 = arith.addf %351, %350 : vector<64x64xf32>
    %353 = arith.mulf %347, %352 : vector<64x64xf32>
    %cst_152 = arith.constant dense<0.000000e+00> : vector<64x16xf32>
    %354 = tpu.matmul %353, %196, %cst_152 {dimension_numbers = #tpu.dot_dimension_numbers<[1], [0], [0], [1], [0, 0, 1, 1], [], []>} : vector<64x64xf32>, vector<64x16xf32>, vector<64x16xf32> -> vector<64x16xf32>
    %355 = vector.broadcast %197 : vector<1x16xf32> to vector<64x16xf32>
    %356 = arith.addf %354, %355 : vector<64x16xf32>
    %357 = arith.addf %320, %356 : vector<64x16xf32>
    %c0_153 = arith.constant 0 : index
    %c0_154 = arith.constant 0 : index
    %358 = vector.load %arg35[%c0_153, %c0_154] : memref<1x16xf32, #tpu.memory_space<vmem>>, vector<1x16xf32>
    %c0_155 = arith.constant 0 : index
    %c0_156 = arith.constant 0 : index
    %359 = vector.load %arg36[%c0_155, %c0_156] : memref<1x16xf32, #tpu.memory_space<vmem>>, vector<1x16xf32>
    %cst_157 = arith.constant dense<0.000000e+00> : vector<64xf32>
    %360 = vector.multi_reduction <add>, %357, %cst_157 [1] : vector<64x16xf32> to vector<64xf32>
    %361 = vector.shape_cast %360 : vector<64xf32> to vector<64x1xf32>
    %cst_158 = arith.constant 1.600000e+01 : f32
    %362 = vector.broadcast %cst_158 : f32 to vector<64x1xf32>
    %363 = arith.divf %361, %362 : vector<64x1xf32>
    %364 = vector.broadcast %363 : vector<64x1xf32> to vector<64x16xf32>
    %365 = arith.subf %357, %364 : vector<64x16xf32>
    %366 = arith.mulf %365, %365 : vector<64x16xf32>
    %cst_159 = arith.constant dense<0.000000e+00> : vector<64xf32>
    %367 = vector.multi_reduction <add>, %366, %cst_159 [1] : vector<64x16xf32> to vector<64xf32>
    %368 = vector.shape_cast %367 : vector<64xf32> to vector<64x1xf32>
    %cst_160 = arith.constant 1.600000e+01 : f32
    %369 = vector.broadcast %cst_160 : f32 to vector<64x1xf32>
    %370 = arith.divf %368, %369 : vector<64x1xf32>
    %371 = vector.broadcast %363 : vector<64x1xf32> to vector<64x16xf32>
    %372 = arith.subf %357, %371 : vector<64x16xf32>
    %cst_161 = arith.constant 9.99999974E-6 : f32
    %373 = vector.broadcast %cst_161 : f32 to vector<64x1xf32>
    %374 = arith.addf %370, %373 : vector<64x1xf32>
    %375 = math.rsqrt %374 : vector<64x1xf32>
    %376 = vector.broadcast %375 : vector<64x1xf32> to vector<64x16xf32>
    %377 = arith.mulf %372, %376 : vector<64x16xf32>
    %378 = vector.broadcast %358 : vector<1x16xf32> to vector<64x16xf32>
    %379 = arith.mulf %377, %378 : vector<64x16xf32>
    %380 = vector.broadcast %359 : vector<1x16xf32> to vector<64x16xf32>
    %381 = arith.addf %379, %380 : vector<64x16xf32>
    %c0_162 = arith.constant 0 : index
    %c0_163 = arith.constant 0 : index
    %c0_164 = arith.constant 0 : index
    %382 = vector.load %arg2[%c0_162, %c0_163, %c0_164] : memref<1x64x16xf32, #tpu.memory_space<vmem>>, vector<1x64x16xf32>
    %383 = vector.shape_cast %382 : vector<1x64x16xf32> to vector<64x16xf32>
    %c0_165 = arith.constant 0 : index
    %c0_166 = arith.constant 0 : index
    %384 = vector.load %arg37[%c0_165, %c0_166] : memref<1x16xf32, #tpu.memory_space<vmem>>, vector<1x16xf32>
    %c0_167 = arith.constant 0 : index
    %c0_168 = arith.constant 0 : index
    %385 = vector.load %arg38[%c0_167, %c0_168] : memref<1x16xf32, #tpu.memory_space<vmem>>, vector<1x16xf32>
    %c0_169 = arith.constant 0 : index
    %c0_170 = arith.constant 0 : index
    %386 = vector.load %arg39[%c0_169, %c0_170] : memref<16x48xf32, #tpu.memory_space<vmem>>, vector<16x48xf32>
    %c0_171 = arith.constant 0 : index
    %c0_172 = arith.constant 0 : index
    %387 = vector.load %arg40[%c0_171, %c0_172] : memref<1x48xf32, #tpu.memory_space<vmem>>, vector<1x48xf32>
    %c0_173 = arith.constant 0 : index
    %c0_174 = arith.constant 0 : index
    %388 = vector.load %arg41[%c0_173, %c0_174] : memref<1x16xf32, #tpu.memory_space<vmem>>, vector<1x16xf32>
    %c0_175 = arith.constant 0 : index
    %c0_176 = arith.constant 0 : index
    %389 = vector.load %arg42[%c0_175, %c0_176] : memref<9x16xf32, #tpu.memory_space<vmem>>, vector<9x16xf32>
    %c0_177 = arith.constant 0 : index
    %c0_178 = arith.constant 0 : index
    %390 = vector.load %arg43[%c0_177, %c0_178] : memref<1x16xf32, #tpu.memory_space<vmem>>, vector<1x16xf32>
    %c0_179 = arith.constant 0 : index
    %c0_180 = arith.constant 0 : index
    %391 = vector.load %arg44[%c0_179, %c0_180] : memref<16x16xf32, #tpu.memory_space<vmem>>, vector<16x16xf32>
    %c0_181 = arith.constant 0 : index
    %c0_182 = arith.constant 0 : index
    %392 = vector.load %arg45[%c0_181, %c0_182] : memref<1x16xf32, #tpu.memory_space<vmem>>, vector<1x16xf32>
    %c0_183 = arith.constant 0 : index
    %c0_184 = arith.constant 0 : index
    %393 = vector.load %arg46[%c0_183, %c0_184] : memref<1x16xf32, #tpu.memory_space<vmem>>, vector<1x16xf32>
    %c0_185 = arith.constant 0 : index
    %c0_186 = arith.constant 0 : index
    %394 = vector.load %arg47[%c0_185, %c0_186] : memref<1x16xf32, #tpu.memory_space<vmem>>, vector<1x16xf32>
    %c0_187 = arith.constant 0 : index
    %c0_188 = arith.constant 0 : index
    %395 = vector.load %arg48[%c0_187, %c0_188] : memref<16x64xf32, #tpu.memory_space<vmem>>, vector<16x64xf32>
    %c0_189 = arith.constant 0 : index
    %c0_190 = arith.constant 0 : index
    %396 = vector.load %arg49[%c0_189, %c0_190] : memref<1x64xf32, #tpu.memory_space<vmem>>, vector<1x64xf32>
    %c0_191 = arith.constant 0 : index
    %c0_192 = arith.constant 0 : index
    %397 = vector.load %arg50[%c0_191, %c0_192] : memref<64x16xf32, #tpu.memory_space<vmem>>, vector<64x16xf32>
    %c0_193 = arith.constant 0 : index
    %c0_194 = arith.constant 0 : index
    %398 = vector.load %arg51[%c0_193, %c0_194] : memref<1x16xf32, #tpu.memory_space<vmem>>, vector<1x16xf32>
    %cst_195 = arith.constant dense<0.000000e+00> : vector<64xf32>
    %399 = vector.multi_reduction <add>, %383, %cst_195 [1] : vector<64x16xf32> to vector<64xf32>
    %400 = vector.shape_cast %399 : vector<64xf32> to vector<64x1xf32>
    %cst_196 = arith.constant 1.600000e+01 : f32
    %401 = vector.broadcast %cst_196 : f32 to vector<64x1xf32>
    %402 = arith.divf %400, %401 : vector<64x1xf32>
    %403 = vector.broadcast %402 : vector<64x1xf32> to vector<64x16xf32>
    %404 = arith.subf %383, %403 : vector<64x16xf32>
    %405 = arith.mulf %404, %404 : vector<64x16xf32>
    %cst_197 = arith.constant dense<0.000000e+00> : vector<64xf32>
    %406 = vector.multi_reduction <add>, %405, %cst_197 [1] : vector<64x16xf32> to vector<64xf32>
    %407 = vector.shape_cast %406 : vector<64xf32> to vector<64x1xf32>
    %cst_198 = arith.constant 1.600000e+01 : f32
    %408 = vector.broadcast %cst_198 : f32 to vector<64x1xf32>
    %409 = arith.divf %407, %408 : vector<64x1xf32>
    %410 = vector.broadcast %402 : vector<64x1xf32> to vector<64x16xf32>
    %411 = arith.subf %383, %410 : vector<64x16xf32>
    %cst_199 = arith.constant 9.99999974E-6 : f32
    %412 = vector.broadcast %cst_199 : f32 to vector<64x1xf32>
    %413 = arith.addf %409, %412 : vector<64x1xf32>
    %414 = math.rsqrt %413 : vector<64x1xf32>
    %415 = vector.broadcast %414 : vector<64x1xf32> to vector<64x16xf32>
    %416 = arith.mulf %411, %415 : vector<64x16xf32>
    %417 = vector.broadcast %384 : vector<1x16xf32> to vector<64x16xf32>
    %418 = arith.mulf %416, %417 : vector<64x16xf32>
    %419 = vector.broadcast %385 : vector<1x16xf32> to vector<64x16xf32>
    %420 = arith.addf %418, %419 : vector<64x16xf32>
    %cst_200 = arith.constant dense<0.000000e+00> : vector<64x48xf32>
    %421 = tpu.matmul %420, %386, %cst_200 {dimension_numbers = #tpu.dot_dimension_numbers<[1], [0], [0], [1], [0, 0, 1, 1], [], []>} : vector<64x16xf32>, vector<16x48xf32>, vector<64x48xf32> -> vector<64x48xf32>
    %422 = vector.broadcast %387 : vector<1x48xf32> to vector<64x48xf32>
    %423 = arith.addf %421, %422 : vector<64x48xf32>
    %424 = vector.extract_strided_slice %423 {offsets = [0, 0], sizes = [64, 16], strides = [1, 1]} : vector<64x48xf32> to vector<64x16xf32>
    %425 = vector.extract_strided_slice %423 {offsets = [0, 16], sizes = [64, 16], strides = [1, 1]} : vector<64x48xf32> to vector<64x16xf32>
    %426 = vector.extract_strided_slice %423 {offsets = [0, 32], sizes = [64, 16], strides = [1, 1]} : vector<64x48xf32> to vector<64x16xf32>
    %427 = arith.mulf %424, %424 : vector<64x16xf32>
    %cst_201 = arith.constant dense<0.000000e+00> : vector<16xf32>
    %428 = vector.multi_reduction <add>, %427, %cst_201 [0] : vector<64x16xf32> to vector<16xf32>
    %429 = vector.shape_cast %428 : vector<16xf32> to vector<1x16xf32>
    %430 = math.sqrt %429 : vector<1x16xf32>
    %cst_202 = arith.constant 9.99999996E-13 : f32
    %431 = vector.broadcast %cst_202 : f32 to vector<1x16xf32>
    %432 = arith.maximumf %430, %431 : vector<1x16xf32>
    %433 = vector.broadcast %432 : vector<1x16xf32> to vector<64x16xf32>
    %434 = arith.divf %424, %433 : vector<64x16xf32>
    %435 = arith.mulf %425, %425 : vector<64x16xf32>
    %cst_203 = arith.constant dense<0.000000e+00> : vector<16xf32>
    %436 = vector.multi_reduction <add>, %435, %cst_203 [0] : vector<64x16xf32> to vector<16xf32>
    %437 = vector.shape_cast %436 : vector<16xf32> to vector<1x16xf32>
    %438 = math.sqrt %437 : vector<1x16xf32>
    %cst_204 = arith.constant 9.99999996E-13 : f32
    %439 = vector.broadcast %cst_204 : f32 to vector<1x16xf32>
    %440 = arith.maximumf %438, %439 : vector<1x16xf32>
    %441 = vector.broadcast %440 : vector<1x16xf32> to vector<64x16xf32>
    %442 = arith.divf %425, %441 : vector<64x16xf32>
    %443 = vector.extract_strided_slice %442 {offsets = [0, 0], sizes = [64, 8], strides = [1, 1]} : vector<64x16xf32> to vector<64x8xf32>
    %444 = vector.extract_strided_slice %426 {offsets = [0, 0], sizes = [64, 8], strides = [1, 1]} : vector<64x16xf32> to vector<64x8xf32>
    %cst_205 = arith.constant dense<0.000000e+00> : vector<8x8xf32>
    %445 = tpu.matmul %443, %444, %cst_205 {dimension_numbers = #tpu.dot_dimension_numbers<[0], [0], [1], [1], [0, 1, 1, 1], [], []>} : vector<64x8xf32>, vector<64x8xf32>, vector<8x8xf32> -> vector<8x8xf32>
    %446 = vector.extract_strided_slice %434 {offsets = [0, 0], sizes = [64, 8], strides = [1, 1]} : vector<64x16xf32> to vector<64x8xf32>
    %cst_206 = arith.constant dense<0.000000e+00> : vector<64x8xf32>
    %447 = tpu.matmul %446, %445, %cst_206 {dimension_numbers = #tpu.dot_dimension_numbers<[1], [0], [0], [1], [0, 0, 1, 1], [], []>} : vector<64x8xf32>, vector<8x8xf32>, vector<64x8xf32> -> vector<64x8xf32>
    %448 = vector.extract_strided_slice %442 {offsets = [0, 8], sizes = [64, 8], strides = [1, 1]} : vector<64x16xf32> to vector<64x8xf32>
    %449 = vector.extract_strided_slice %426 {offsets = [0, 8], sizes = [64, 8], strides = [1, 1]} : vector<64x16xf32> to vector<64x8xf32>
    %cst_207 = arith.constant dense<0.000000e+00> : vector<8x8xf32>
    %450 = tpu.matmul %448, %449, %cst_207 {dimension_numbers = #tpu.dot_dimension_numbers<[0], [0], [1], [1], [0, 1, 1, 1], [], []>} : vector<64x8xf32>, vector<64x8xf32>, vector<8x8xf32> -> vector<8x8xf32>
    %451 = vector.extract_strided_slice %434 {offsets = [0, 8], sizes = [64, 8], strides = [1, 1]} : vector<64x16xf32> to vector<64x8xf32>
    %cst_208 = arith.constant dense<0.000000e+00> : vector<64x8xf32>
    %452 = tpu.matmul %451, %450, %cst_208 {dimension_numbers = #tpu.dot_dimension_numbers<[1], [0], [0], [1], [0, 0, 1, 1], [], []>} : vector<64x8xf32>, vector<8x8xf32>, vector<64x8xf32> -> vector<64x8xf32>
    %453 = tpu.concatenate %447, %452 in 1 : vector<64x8xf32>, vector<64x8xf32> -> vector<64x16xf32>
    %454 = vector.broadcast %388 : vector<1x16xf32> to vector<64x16xf32>
    %455 = arith.mulf %453, %454 : vector<64x16xf32>
    %c16_209 = arith.constant 16 : index
    %c0_210 = arith.constant 0 : index
    %456 = vector.load %arg74[%c16_209, %c0_210] : memref<96x16xf32, #tpu.memory_space<vmem>>, vector<64x16xf32>
    tpu.vector_store %arg74[%c16_209, %c0_210], %426 {strides = array<i32>} : memref<96x16xf32, #tpu.memory_space<vmem>>, vector<64x16xf32>,
    %cst_211 = arith.constant 0.000000e+00 : f32
    %457 = vector.broadcast %cst_211 : f32 to vector<64x16xf32>
    %c7_212 = arith.constant 7 : index
    %c0_213 = arith.constant 0 : index
    %458 = vector.load %arg74[%c7_212, %c0_213] : memref<96x16xf32, #tpu.memory_space<vmem>>, vector<64x16xf32>
    %459 = vector.broadcast %0 : vector<64x1xf32> to vector<64x16xf32>
    %460 = arith.mulf %458, %459 : vector<64x16xf32>
    %461 = vector.extract_strided_slice %389 {offsets = [0, 0], sizes = [1, 16], strides = [1, 1]} : vector<9x16xf32> to vector<1x16xf32>
    %462 = vector.broadcast %461 : vector<1x16xf32> to vector<64x16xf32>
    %463 = arith.mulf %460, %462 : vector<64x16xf32>
    %464 = arith.addf %457, %463 : vector<64x16xf32>
    %c8_214 = arith.constant 8 : index
    %c0_215 = arith.constant 0 : index
    %465 = vector.load %arg74[%c8_214, %c0_215] : memref<96x16xf32, #tpu.memory_space<vmem>>, vector<64x16xf32>
    %466 = vector.extract_strided_slice %389 {offsets = [1, 0], sizes = [1, 16], strides = [1, 1]} : vector<9x16xf32> to vector<1x16xf32>
    %467 = vector.broadcast %466 : vector<1x16xf32> to vector<64x16xf32>
    %468 = arith.mulf %465, %467 : vector<64x16xf32>
    %469 = arith.addf %464, %468 : vector<64x16xf32>
    %c9_216 = arith.constant 9 : index
    %c0_217 = arith.constant 0 : index
    %470 = vector.load %arg74[%c9_216, %c0_217] : memref<96x16xf32, #tpu.memory_space<vmem>>, vector<64x16xf32>
    %471 = vector.broadcast %1 : vector<64x1xf32> to vector<64x16xf32>
    %472 = arith.mulf %470, %471 : vector<64x16xf32>
    %473 = vector.extract_strided_slice %389 {offsets = [2, 0], sizes = [1, 16], strides = [1, 1]} : vector<9x16xf32> to vector<1x16xf32>
    %474 = vector.broadcast %473 : vector<1x16xf32> to vector<64x16xf32>
    %475 = arith.mulf %472, %474 : vector<64x16xf32>
    %476 = arith.addf %469, %475 : vector<64x16xf32>
    %c15_218 = arith.constant 15 : index
    %c0_219 = arith.constant 0 : index
    %477 = vector.load %arg74[%c15_218, %c0_219] : memref<96x16xf32, #tpu.memory_space<vmem>>, vector<64x16xf32>
    %478 = vector.broadcast %0 : vector<64x1xf32> to vector<64x16xf32>
    %479 = arith.mulf %477, %478 : vector<64x16xf32>
    %480 = vector.extract_strided_slice %389 {offsets = [3, 0], sizes = [1, 16], strides = [1, 1]} : vector<9x16xf32> to vector<1x16xf32>
    %481 = vector.broadcast %480 : vector<1x16xf32> to vector<64x16xf32>
    %482 = arith.mulf %479, %481 : vector<64x16xf32>
    %483 = arith.addf %476, %482 : vector<64x16xf32>
    %c16_220 = arith.constant 16 : index
    %c0_221 = arith.constant 0 : index
    %484 = vector.load %arg74[%c16_220, %c0_221] : memref<96x16xf32, #tpu.memory_space<vmem>>, vector<64x16xf32>
    %485 = vector.extract_strided_slice %389 {offsets = [4, 0], sizes = [1, 16], strides = [1, 1]} : vector<9x16xf32> to vector<1x16xf32>
    %486 = vector.broadcast %485 : vector<1x16xf32> to vector<64x16xf32>
    %487 = arith.mulf %484, %486 : vector<64x16xf32>
    %488 = arith.addf %483, %487 : vector<64x16xf32>
    %c17_222 = arith.constant 17 : index
    %c0_223 = arith.constant 0 : index
    %489 = vector.load %arg74[%c17_222, %c0_223] : memref<96x16xf32, #tpu.memory_space<vmem>>, vector<64x16xf32>
    %490 = vector.broadcast %1 : vector<64x1xf32> to vector<64x16xf32>
    %491 = arith.mulf %489, %490 : vector<64x16xf32>
    %492 = vector.extract_strided_slice %389 {offsets = [5, 0], sizes = [1, 16], strides = [1, 1]} : vector<9x16xf32> to vector<1x16xf32>
    %493 = vector.broadcast %492 : vector<1x16xf32> to vector<64x16xf32>
    %494 = arith.mulf %491, %493 : vector<64x16xf32>
    %495 = arith.addf %488, %494 : vector<64x16xf32>
    %c23_224 = arith.constant 23 : index
    %c0_225 = arith.constant 0 : index
    %496 = vector.load %arg74[%c23_224, %c0_225] : memref<96x16xf32, #tpu.memory_space<vmem>>, vector<64x16xf32>
    %497 = vector.broadcast %0 : vector<64x1xf32> to vector<64x16xf32>
    %498 = arith.mulf %496, %497 : vector<64x16xf32>
    %499 = vector.extract_strided_slice %389 {offsets = [6, 0], sizes = [1, 16], strides = [1, 1]} : vector<9x16xf32> to vector<1x16xf32>
    %500 = vector.broadcast %499 : vector<1x16xf32> to vector<64x16xf32>
    %501 = arith.mulf %498, %500 : vector<64x16xf32>
    %502 = arith.addf %495, %501 : vector<64x16xf32>
    %c24_226 = arith.constant 24 : index
    %c0_227 = arith.constant 0 : index
    %503 = vector.load %arg74[%c24_226, %c0_227] : memref<96x16xf32, #tpu.memory_space<vmem>>, vector<64x16xf32>
    %504 = vector.extract_strided_slice %389 {offsets = [7, 0], sizes = [1, 16], strides = [1, 1]} : vector<9x16xf32> to vector<1x16xf32>
    %505 = vector.broadcast %504 : vector<1x16xf32> to vector<64x16xf32>
    %506 = arith.mulf %503, %505 : vector<64x16xf32>
    %507 = arith.addf %502, %506 : vector<64x16xf32>
    %c25_228 = arith.constant 25 : index
    %c0_229 = arith.constant 0 : index
    %508 = vector.load %arg74[%c25_228, %c0_229] : memref<96x16xf32, #tpu.memory_space<vmem>>, vector<64x16xf32>
    %509 = vector.broadcast %1 : vector<64x1xf32> to vector<64x16xf32>
    %510 = arith.mulf %508, %509 : vector<64x16xf32>
    %511 = vector.extract_strided_slice %389 {offsets = [8, 0], sizes = [1, 16], strides = [1, 1]} : vector<9x16xf32> to vector<1x16xf32>
    %512 = vector.broadcast %511 : vector<1x16xf32> to vector<64x16xf32>
    %513 = arith.mulf %510, %512 : vector<64x16xf32>
    %514 = arith.addf %507, %513 : vector<64x16xf32>
    %515 = vector.broadcast %390 : vector<1x16xf32> to vector<64x16xf32>
    %516 = arith.addf %514, %515 : vector<64x16xf32>
    %517 = arith.addf %455, %516 : vector<64x16xf32>
    %cst_230 = arith.constant dense<0.000000e+00> : vector<64x16xf32>
    %518 = tpu.matmul %517, %391, %cst_230 {dimension_numbers = #tpu.dot_dimension_numbers<[1], [0], [0], [1], [0, 0, 1, 1], [], []>} : vector<64x16xf32>, vector<16x16xf32>, vector<64x16xf32> -> vector<64x16xf32>
    %519 = vector.broadcast %392 : vector<1x16xf32> to vector<64x16xf32>
    %520 = arith.addf %518, %519 : vector<64x16xf32>
    %521 = arith.addf %383, %520 : vector<64x16xf32>
    %cst_231 = arith.constant dense<0.000000e+00> : vector<64xf32>
    %522 = vector.multi_reduction <add>, %521, %cst_231 [1] : vector<64x16xf32> to vector<64xf32>
    %523 = vector.shape_cast %522 : vector<64xf32> to vector<64x1xf32>
    %cst_232 = arith.constant 1.600000e+01 : f32
    %524 = vector.broadcast %cst_232 : f32 to vector<64x1xf32>
    %525 = arith.divf %523, %524 : vector<64x1xf32>
    %526 = vector.broadcast %525 : vector<64x1xf32> to vector<64x16xf32>
    %527 = arith.subf %521, %526 : vector<64x16xf32>
    %528 = arith.mulf %527, %527 : vector<64x16xf32>
    %cst_233 = arith.constant dense<0.000000e+00> : vector<64xf32>
    %529 = vector.multi_reduction <add>, %528, %cst_233 [1] : vector<64x16xf32> to vector<64xf32>
    %530 = vector.shape_cast %529 : vector<64xf32> to vector<64x1xf32>
    %cst_234 = arith.constant 1.600000e+01 : f32
    %531 = vector.broadcast %cst_234 : f32 to vector<64x1xf32>
    %532 = arith.divf %530, %531 : vector<64x1xf32>
    %533 = vector.broadcast %525 : vector<64x1xf32> to vector<64x16xf32>
    %534 = arith.subf %521, %533 : vector<64x16xf32>
    %cst_235 = arith.constant 9.99999974E-6 : f32
    %535 = vector.broadcast %cst_235 : f32 to vector<64x1xf32>
    %536 = arith.addf %532, %535 : vector<64x1xf32>
    %537 = math.rsqrt %536 : vector<64x1xf32>
    %538 = vector.broadcast %537 : vector<64x1xf32> to vector<64x16xf32>
    %539 = arith.mulf %534, %538 : vector<64x16xf32>
    %540 = vector.broadcast %393 : vector<1x16xf32> to vector<64x16xf32>
    %541 = arith.mulf %539, %540 : vector<64x16xf32>
    %542 = vector.broadcast %394 : vector<1x16xf32> to vector<64x16xf32>
    %543 = arith.addf %541, %542 : vector<64x16xf32>
    %cst_236 = arith.constant dense<0.000000e+00> : vector<64x64xf32>
    %544 = tpu.matmul %543, %395, %cst_236 {dimension_numbers = #tpu.dot_dimension_numbers<[1], [0], [0], [1], [0, 0, 1, 1], [], []>} : vector<64x16xf32>, vector<16x64xf32>, vector<64x64xf32> -> vector<64x64xf32>
    %545 = vector.broadcast %396 : vector<1x64xf32> to vector<64x64xf32>
    %546 = arith.addf %544, %545 : vector<64x64xf32>
    %cst_237 = arith.constant 5.000000e-01 : f32
    %547 = vector.broadcast %cst_237 : f32 to vector<64x64xf32>
    %548 = arith.mulf %547, %546 : vector<64x64xf32>
    %cst_238 = arith.constant 0.707106769 : f32
    %549 = vector.broadcast %cst_238 : f32 to vector<64x64xf32>
    %550 = arith.mulf %546, %549 : vector<64x64xf32>
    %551 = math.erf %550 : vector<64x64xf32>
    %cst_239 = arith.constant 1.000000e+00 : f32
    %552 = vector.broadcast %cst_239 : f32 to vector<64x64xf32>
    %553 = arith.addf %552, %551 : vector<64x64xf32>
    %554 = arith.mulf %548, %553 : vector<64x64xf32>
    %cst_240 = arith.constant dense<0.000000e+00> : vector<64x16xf32>
    %555 = tpu.matmul %554, %397, %cst_240 {dimension_numbers = #tpu.dot_dimension_numbers<[1], [0], [0], [1], [0, 0, 1, 1], [], []>} : vector<64x64xf32>, vector<64x16xf32>, vector<64x16xf32> -> vector<64x16xf32>
    %556 = vector.broadcast %398 : vector<1x16xf32> to vector<64x16xf32>
    %557 = arith.addf %555, %556 : vector<64x16xf32>
    %558 = arith.addf %521, %557 : vector<64x16xf32>
    %c0_241 = arith.constant 0 : index
    %c0_242 = arith.constant 0 : index
    %559 = vector.load %arg52[%c0_241, %c0_242] : memref<1x16xf32, #tpu.memory_space<vmem>>, vector<1x16xf32>
    %c0_243 = arith.constant 0 : index
    %c0_244 = arith.constant 0 : index
    %560 = vector.load %arg53[%c0_243, %c0_244] : memref<1x16xf32, #tpu.memory_space<vmem>>, vector<1x16xf32>
    %c0_245 = arith.constant 0 : index
    %c0_246 = arith.constant 0 : index
    %561 = vector.load %arg54[%c0_245, %c0_246] : memref<16x48xf32, #tpu.memory_space<vmem>>, vector<16x48xf32>
    %c0_247 = arith.constant 0 : index
    %c0_248 = arith.constant 0 : index
    %562 = vector.load %arg55[%c0_247, %c0_248] : memref<1x48xf32, #tpu.memory_space<vmem>>, vector<1x48xf32>
    %c0_249 = arith.constant 0 : index
    %c0_250 = arith.constant 0 : index
    %563 = vector.load %arg56[%c0_249, %c0_250] : memref<1x16xf32, #tpu.memory_space<vmem>>, vector<1x16xf32>
    %c0_251 = arith.constant 0 : index
    %c0_252 = arith.constant 0 : index
    %564 = vector.load %arg57[%c0_251, %c0_252] : memref<9x16xf32, #tpu.memory_space<vmem>>, vector<9x16xf32>
    %c0_253 = arith.constant 0 : index
    %c0_254 = arith.constant 0 : index
    %565 = vector.load %arg58[%c0_253, %c0_254] : memref<1x16xf32, #tpu.memory_space<vmem>>, vector<1x16xf32>
    %c0_255 = arith.constant 0 : index
    %c0_256 = arith.constant 0 : index
    %566 = vector.load %arg59[%c0_255, %c0_256] : memref<16x16xf32, #tpu.memory_space<vmem>>, vector<16x16xf32>
    %c0_257 = arith.constant 0 : index
    %c0_258 = arith.constant 0 : index
    %567 = vector.load %arg60[%c0_257, %c0_258] : memref<1x16xf32, #tpu.memory_space<vmem>>, vector<1x16xf32>
    %c0_259 = arith.constant 0 : index
    %c0_260 = arith.constant 0 : index
    %568 = vector.load %arg61[%c0_259, %c0_260] : memref<1x16xf32, #tpu.memory_space<vmem>>, vector<1x16xf32>
    %c0_261 = arith.constant 0 : index
    %c0_262 = arith.constant 0 : index
    %569 = vector.load %arg62[%c0_261, %c0_262] : memref<1x16xf32, #tpu.memory_space<vmem>>, vector<1x16xf32>
    %c0_263 = arith.constant 0 : index
    %c0_264 = arith.constant 0 : index
    %570 = vector.load %arg63[%c0_263, %c0_264] : memref<16x64xf32, #tpu.memory_space<vmem>>, vector<16x64xf32>
    %c0_265 = arith.constant 0 : index
    %c0_266 = arith.constant 0 : index
    %571 = vector.load %arg64[%c0_265, %c0_266] : memref<1x64xf32, #tpu.memory_space<vmem>>, vector<1x64xf32>
    %c0_267 = arith.constant 0 : index
    %c0_268 = arith.constant 0 : index
    %572 = vector.load %arg65[%c0_267, %c0_268] : memref<64x16xf32, #tpu.memory_space<vmem>>, vector<64x16xf32>
    %c0_269 = arith.constant 0 : index
    %c0_270 = arith.constant 0 : index
    %573 = vector.load %arg66[%c0_269, %c0_270] : memref<1x16xf32, #tpu.memory_space<vmem>>, vector<1x16xf32>
    %cst_271 = arith.constant dense<0.000000e+00> : vector<64xf32>
    %574 = vector.multi_reduction <add>, %558, %cst_271 [1] : vector<64x16xf32> to vector<64xf32>
    %575 = vector.shape_cast %574 : vector<64xf32> to vector<64x1xf32>
    %cst_272 = arith.constant 1.600000e+01 : f32
    %576 = vector.broadcast %cst_272 : f32 to vector<64x1xf32>
    %577 = arith.divf %575, %576 : vector<64x1xf32>
    %578 = vector.broadcast %577 : vector<64x1xf32> to vector<64x16xf32>
    %579 = arith.subf %558, %578 : vector<64x16xf32>
    %580 = arith.mulf %579, %579 : vector<64x16xf32>
    %cst_273 = arith.constant dense<0.000000e+00> : vector<64xf32>
    %581 = vector.multi_reduction <add>, %580, %cst_273 [1] : vector<64x16xf32> to vector<64xf32>
    %582 = vector.shape_cast %581 : vector<64xf32> to vector<64x1xf32>
    %cst_274 = arith.constant 1.600000e+01 : f32
    %583 = vector.broadcast %cst_274 : f32 to vector<64x1xf32>
    %584 = arith.divf %582, %583 : vector<64x1xf32>
    %585 = vector.broadcast %577 : vector<64x1xf32> to vector<64x16xf32>
    %586 = arith.subf %558, %585 : vector<64x16xf32>
    %cst_275 = arith.constant 9.99999974E-6 : f32
    %587 = vector.broadcast %cst_275 : f32 to vector<64x1xf32>
    %588 = arith.addf %584, %587 : vector<64x1xf32>
    %589 = math.rsqrt %588 : vector<64x1xf32>
    %590 = vector.broadcast %589 : vector<64x1xf32> to vector<64x16xf32>
    %591 = arith.mulf %586, %590 : vector<64x16xf32>
    %592 = vector.broadcast %559 : vector<1x16xf32> to vector<64x16xf32>
    %593 = arith.mulf %591, %592 : vector<64x16xf32>
    %594 = vector.broadcast %560 : vector<1x16xf32> to vector<64x16xf32>
    %595 = arith.addf %593, %594 : vector<64x16xf32>
    %cst_276 = arith.constant dense<0.000000e+00> : vector<64x48xf32>
    %596 = tpu.matmul %595, %561, %cst_276 {dimension_numbers = #tpu.dot_dimension_numbers<[1], [0], [0], [1], [0, 0, 1, 1], [], []>} : vector<64x16xf32>, vector<16x48xf32>, vector<64x48xf32> -> vector<64x48xf32>
    %597 = vector.broadcast %562 : vector<1x48xf32> to vector<64x48xf32>
    %598 = arith.addf %596, %597 : vector<64x48xf32>
    %599 = vector.extract_strided_slice %598 {offsets = [0, 0], sizes = [64, 16], strides = [1, 1]} : vector<64x48xf32> to vector<64x16xf32>
    %600 = vector.extract_strided_slice %598 {offsets = [0, 16], sizes = [64, 16], strides = [1, 1]} : vector<64x48xf32> to vector<64x16xf32>
    %601 = vector.extract_strided_slice %598 {offsets = [0, 32], sizes = [64, 16], strides = [1, 1]} : vector<64x48xf32> to vector<64x16xf32>
    %602 = arith.mulf %599, %599 : vector<64x16xf32>
    %cst_277 = arith.constant dense<0.000000e+00> : vector<16xf32>
    %603 = vector.multi_reduction <add>, %602, %cst_277 [0] : vector<64x16xf32> to vector<16xf32>
    %604 = vector.shape_cast %603 : vector<16xf32> to vector<1x16xf32>
    %605 = math.sqrt %604 : vector<1x16xf32>
    %cst_278 = arith.constant 9.99999996E-13 : f32
    %606 = vector.broadcast %cst_278 : f32 to vector<1x16xf32>
    %607 = arith.maximumf %605, %606 : vector<1x16xf32>
    %608 = vector.broadcast %607 : vector<1x16xf32> to vector<64x16xf32>
    %609 = arith.divf %599, %608 : vector<64x16xf32>
    %610 = arith.mulf %600, %600 : vector<64x16xf32>
    %cst_279 = arith.constant dense<0.000000e+00> : vector<16xf32>
    %611 = vector.multi_reduction <add>, %610, %cst_279 [0] : vector<64x16xf32> to vector<16xf32>
    %612 = vector.shape_cast %611 : vector<16xf32> to vector<1x16xf32>
    %613 = math.sqrt %612 : vector<1x16xf32>
    %cst_280 = arith.constant 9.99999996E-13 : f32
    %614 = vector.broadcast %cst_280 : f32 to vector<1x16xf32>
    %615 = arith.maximumf %613, %614 : vector<1x16xf32>
    %616 = vector.broadcast %615 : vector<1x16xf32> to vector<64x16xf32>
    %617 = arith.divf %600, %616 : vector<64x16xf32>
    %618 = vector.extract_strided_slice %617 {offsets = [0, 0], sizes = [64, 8], strides = [1, 1]} : vector<64x16xf32> to vector<64x8xf32>
    %619 = vector.extract_strided_slice %601 {offsets = [0, 0], sizes = [64, 8], strides = [1, 1]} : vector<64x16xf32> to vector<64x8xf32>
    %cst_281 = arith.constant dense<0.000000e+00> : vector<8x8xf32>
    %620 = tpu.matmul %618, %619, %cst_281 {dimension_numbers = #tpu.dot_dimension_numbers<[0], [0], [1], [1], [0, 1, 1, 1], [], []>} : vector<64x8xf32>, vector<64x8xf32>, vector<8x8xf32> -> vector<8x8xf32>
    %621 = vector.extract_strided_slice %609 {offsets = [0, 0], sizes = [64, 8], strides = [1, 1]} : vector<64x16xf32> to vector<64x8xf32>
    %cst_282 = arith.constant dense<0.000000e+00> : vector<64x8xf32>
    %622 = tpu.matmul %621, %620, %cst_282 {dimension_numbers = #tpu.dot_dimension_numbers<[1], [0], [0], [1], [0, 0, 1, 1], [], []>} : vector<64x8xf32>, vector<8x8xf32>, vector<64x8xf32> -> vector<64x8xf32>
    %623 = vector.extract_strided_slice %617 {offsets = [0, 8], sizes = [64, 8], strides = [1, 1]} : vector<64x16xf32> to vector<64x8xf32>
    %624 = vector.extract_strided_slice %601 {offsets = [0, 8], sizes = [64, 8], strides = [1, 1]} : vector<64x16xf32> to vector<64x8xf32>
    %cst_283 = arith.constant dense<0.000000e+00> : vector<8x8xf32>
    %625 = tpu.matmul %623, %624, %cst_283 {dimension_numbers = #tpu.dot_dimension_numbers<[0], [0], [1], [1], [0, 1, 1, 1], [], []>} : vector<64x8xf32>, vector<64x8xf32>, vector<8x8xf32> -> vector<8x8xf32>
    %626 = vector.extract_strided_slice %609 {offsets = [0, 8], sizes = [64, 8], strides = [1, 1]} : vector<64x16xf32> to vector<64x8xf32>
    %cst_284 = arith.constant dense<0.000000e+00> : vector<64x8xf32>
    %627 = tpu.matmul %626, %625, %cst_284 {dimension_numbers = #tpu.dot_dimension_numbers<[1], [0], [0], [1], [0, 0, 1, 1], [], []>} : vector<64x8xf32>, vector<8x8xf32>, vector<64x8xf32> -> vector<64x8xf32>
    %628 = tpu.concatenate %622, %627 in 1 : vector<64x8xf32>, vector<64x8xf32> -> vector<64x16xf32>
    %629 = vector.broadcast %563 : vector<1x16xf32> to vector<64x16xf32>
    %630 = arith.mulf %628, %629 : vector<64x16xf32>
    %c16_285 = arith.constant 16 : index
    %c0_286 = arith.constant 0 : index
    %631 = vector.load %arg74[%c16_285, %c0_286] : memref<96x16xf32, #tpu.memory_space<vmem>>, vector<64x16xf32>
    tpu.vector_store %arg74[%c16_285, %c0_286], %601 {strides = array<i32>} : memref<96x16xf32, #tpu.memory_space<vmem>>, vector<64x16xf32>,
    %cst_287 = arith.constant 0.000000e+00 : f32
    %632 = vector.broadcast %cst_287 : f32 to vector<64x16xf32>
    %c7_288 = arith.constant 7 : index
    %c0_289 = arith.constant 0 : index
    %633 = vector.load %arg74[%c7_288, %c0_289] : memref<96x16xf32, #tpu.memory_space<vmem>>, vector<64x16xf32>
    %634 = vector.broadcast %0 : vector<64x1xf32> to vector<64x16xf32>
    %635 = arith.mulf %633, %634 : vector<64x16xf32>
    %636 = vector.extract_strided_slice %564 {offsets = [0, 0], sizes = [1, 16], strides = [1, 1]} : vector<9x16xf32> to vector<1x16xf32>
    %637 = vector.broadcast %636 : vector<1x16xf32> to vector<64x16xf32>
    %638 = arith.mulf %635, %637 : vector<64x16xf32>
    %639 = arith.addf %632, %638 : vector<64x16xf32>
    %c8_290 = arith.constant 8 : index
    %c0_291 = arith.constant 0 : index
    %640 = vector.load %arg74[%c8_290, %c0_291] : memref<96x16xf32, #tpu.memory_space<vmem>>, vector<64x16xf32>
    %641 = vector.extract_strided_slice %564 {offsets = [1, 0], sizes = [1, 16], strides = [1, 1]} : vector<9x16xf32> to vector<1x16xf32>
    %642 = vector.broadcast %641 : vector<1x16xf32> to vector<64x16xf32>
    %643 = arith.mulf %640, %642 : vector<64x16xf32>
    %644 = arith.addf %639, %643 : vector<64x16xf32>
    %c9_292 = arith.constant 9 : index
    %c0_293 = arith.constant 0 : index
    %645 = vector.load %arg74[%c9_292, %c0_293] : memref<96x16xf32, #tpu.memory_space<vmem>>, vector<64x16xf32>
    %646 = vector.broadcast %1 : vector<64x1xf32> to vector<64x16xf32>
    %647 = arith.mulf %645, %646 : vector<64x16xf32>
    %648 = vector.extract_strided_slice %564 {offsets = [2, 0], sizes = [1, 16], strides = [1, 1]} : vector<9x16xf32> to vector<1x16xf32>
    %649 = vector.broadcast %648 : vector<1x16xf32> to vector<64x16xf32>
    %650 = arith.mulf %647, %649 : vector<64x16xf32>
    %651 = arith.addf %644, %650 : vector<64x16xf32>
    %c15_294 = arith.constant 15 : index
    %c0_295 = arith.constant 0 : index
    %652 = vector.load %arg74[%c15_294, %c0_295] : memref<96x16xf32, #tpu.memory_space<vmem>>, vector<64x16xf32>
    %653 = vector.broadcast %0 : vector<64x1xf32> to vector<64x16xf32>
    %654 = arith.mulf %652, %653 : vector<64x16xf32>
    %655 = vector.extract_strided_slice %564 {offsets = [3, 0], sizes = [1, 16], strides = [1, 1]} : vector<9x16xf32> to vector<1x16xf32>
    %656 = vector.broadcast %655 : vector<1x16xf32> to vector<64x16xf32>
    %657 = arith.mulf %654, %656 : vector<64x16xf32>
    %658 = arith.addf %651, %657 : vector<64x16xf32>
    %c16_296 = arith.constant 16 : index
    %c0_297 = arith.constant 0 : index
    %659 = vector.load %arg74[%c16_296, %c0_297] : memref<96x16xf32, #tpu.memory_space<vmem>>, vector<64x16xf32>
    %660 = vector.extract_strided_slice %564 {offsets = [4, 0], sizes = [1, 16], strides = [1, 1]} : vector<9x16xf32> to vector<1x16xf32>
    %661 = vector.broadcast %660 : vector<1x16xf32> to vector<64x16xf32>
    %662 = arith.mulf %659, %661 : vector<64x16xf32>
    %663 = arith.addf %658, %662 : vector<64x16xf32>
    %c17_298 = arith.constant 17 : index
    %c0_299 = arith.constant 0 : index
    %664 = vector.load %arg74[%c17_298, %c0_299] : memref<96x16xf32, #tpu.memory_space<vmem>>, vector<64x16xf32>
    %665 = vector.broadcast %1 : vector<64x1xf32> to vector<64x16xf32>
    %666 = arith.mulf %664, %665 : vector<64x16xf32>
    %667 = vector.extract_strided_slice %564 {offsets = [5, 0], sizes = [1, 16], strides = [1, 1]} : vector<9x16xf32> to vector<1x16xf32>
    %668 = vector.broadcast %667 : vector<1x16xf32> to vector<64x16xf32>
    %669 = arith.mulf %666, %668 : vector<64x16xf32>
    %670 = arith.addf %663, %669 : vector<64x16xf32>
    %c23_300 = arith.constant 23 : index
    %c0_301 = arith.constant 0 : index
    %671 = vector.load %arg74[%c23_300, %c0_301] : memref<96x16xf32, #tpu.memory_space<vmem>>, vector<64x16xf32>
    %672 = vector.broadcast %0 : vector<64x1xf32> to vector<64x16xf32>
    %673 = arith.mulf %671, %672 : vector<64x16xf32>
    %674 = vector.extract_strided_slice %564 {offsets = [6, 0], sizes = [1, 16], strides = [1, 1]} : vector<9x16xf32> to vector<1x16xf32>
    %675 = vector.broadcast %674 : vector<1x16xf32> to vector<64x16xf32>
    %676 = arith.mulf %673, %675 : vector<64x16xf32>
    %677 = arith.addf %670, %676 : vector<64x16xf32>
    %c24_302 = arith.constant 24 : index
    %c0_303 = arith.constant 0 : index
    %678 = vector.load %arg74[%c24_302, %c0_303] : memref<96x16xf32, #tpu.memory_space<vmem>>, vector<64x16xf32>
    %679 = vector.extract_strided_slice %564 {offsets = [7, 0], sizes = [1, 16], strides = [1, 1]} : vector<9x16xf32> to vector<1x16xf32>
    %680 = vector.broadcast %679 : vector<1x16xf32> to vector<64x16xf32>
    %681 = arith.mulf %678, %680 : vector<64x16xf32>
    %682 = arith.addf %677, %681 : vector<64x16xf32>
    %c25_304 = arith.constant 25 : index
    %c0_305 = arith.constant 0 : index
    %683 = vector.load %arg74[%c25_304, %c0_305] : memref<96x16xf32, #tpu.memory_space<vmem>>, vector<64x16xf32>
    %684 = vector.broadcast %1 : vector<64x1xf32> to vector<64x16xf32>
    %685 = arith.mulf %683, %684 : vector<64x16xf32>
    %686 = vector.extract_strided_slice %564 {offsets = [8, 0], sizes = [1, 16], strides = [1, 1]} : vector<9x16xf32> to vector<1x16xf32>
    %687 = vector.broadcast %686 : vector<1x16xf32> to vector<64x16xf32>
    %688 = arith.mulf %685, %687 : vector<64x16xf32>
    %689 = arith.addf %682, %688 : vector<64x16xf32>
    %690 = vector.broadcast %565 : vector<1x16xf32> to vector<64x16xf32>
    %691 = arith.addf %689, %690 : vector<64x16xf32>
    %692 = arith.addf %630, %691 : vector<64x16xf32>
    %cst_306 = arith.constant dense<0.000000e+00> : vector<64x16xf32>
    %693 = tpu.matmul %692, %566, %cst_306 {dimension_numbers = #tpu.dot_dimension_numbers<[1], [0], [0], [1], [0, 0, 1, 1], [], []>} : vector<64x16xf32>, vector<16x16xf32>, vector<64x16xf32> -> vector<64x16xf32>
    %694 = vector.broadcast %567 : vector<1x16xf32> to vector<64x16xf32>
    %695 = arith.addf %693, %694 : vector<64x16xf32>
    %696 = arith.addf %558, %695 : vector<64x16xf32>
    %cst_307 = arith.constant dense<0.000000e+00> : vector<64xf32>
    %697 = vector.multi_reduction <add>, %696, %cst_307 [1] : vector<64x16xf32> to vector<64xf32>
    %698 = vector.shape_cast %697 : vector<64xf32> to vector<64x1xf32>
    %cst_308 = arith.constant 1.600000e+01 : f32
    %699 = vector.broadcast %cst_308 : f32 to vector<64x1xf32>
    %700 = arith.divf %698, %699 : vector<64x1xf32>
    %701 = vector.broadcast %700 : vector<64x1xf32> to vector<64x16xf32>
    %702 = arith.subf %696, %701 : vector<64x16xf32>
    %703 = arith.mulf %702, %702 : vector<64x16xf32>
    %cst_309 = arith.constant dense<0.000000e+00> : vector<64xf32>
    %704 = vector.multi_reduction <add>, %703, %cst_309 [1] : vector<64x16xf32> to vector<64xf32>
    %705 = vector.shape_cast %704 : vector<64xf32> to vector<64x1xf32>
    %cst_310 = arith.constant 1.600000e+01 : f32
    %706 = vector.broadcast %cst_310 : f32 to vector<64x1xf32>
    %707 = arith.divf %705, %706 : vector<64x1xf32>
    %708 = vector.broadcast %700 : vector<64x1xf32> to vector<64x16xf32>
    %709 = arith.subf %696, %708 : vector<64x16xf32>
    %cst_311 = arith.constant 9.99999974E-6 : f32
    %710 = vector.broadcast %cst_311 : f32 to vector<64x1xf32>
    %711 = arith.addf %707, %710 : vector<64x1xf32>
    %712 = math.rsqrt %711 : vector<64x1xf32>
    %713 = vector.broadcast %712 : vector<64x1xf32> to vector<64x16xf32>
    %714 = arith.mulf %709, %713 : vector<64x16xf32>
    %715 = vector.broadcast %568 : vector<1x16xf32> to vector<64x16xf32>
    %716 = arith.mulf %714, %715 : vector<64x16xf32>
    %717 = vector.broadcast %569 : vector<1x16xf32> to vector<64x16xf32>
    %718 = arith.addf %716, %717 : vector<64x16xf32>
    %cst_312 = arith.constant dense<0.000000e+00> : vector<64x64xf32>
    %719 = tpu.matmul %718, %570, %cst_312 {dimension_numbers = #tpu.dot_dimension_numbers<[1], [0], [0], [1], [0, 0, 1, 1], [], []>} : vector<64x16xf32>, vector<16x64xf32>, vector<64x64xf32> -> vector<64x64xf32>
    %720 = vector.broadcast %571 : vector<1x64xf32> to vector<64x64xf32>
    %721 = arith.addf %719, %720 : vector<64x64xf32>
    %cst_313 = arith.constant 5.000000e-01 : f32
    %722 = vector.broadcast %cst_313 : f32 to vector<64x64xf32>
    %723 = arith.mulf %722, %721 : vector<64x64xf32>
    %cst_314 = arith.constant 0.707106769 : f32
    %724 = vector.broadcast %cst_314 : f32 to vector<64x64xf32>
    %725 = arith.mulf %721, %724 : vector<64x64xf32>
    %726 = math.erf %725 : vector<64x64xf32>
    %cst_315 = arith.constant 1.000000e+00 : f32
    %727 = vector.broadcast %cst_315 : f32 to vector<64x64xf32>
    %728 = arith.addf %727, %726 : vector<64x64xf32>
    %729 = arith.mulf %723, %728 : vector<64x64xf32>
    %cst_316 = arith.constant dense<0.000000e+00> : vector<64x16xf32>
    %730 = tpu.matmul %729, %572, %cst_316 {dimension_numbers = #tpu.dot_dimension_numbers<[1], [0], [0], [1], [0, 0, 1, 1], [], []>} : vector<64x64xf32>, vector<64x16xf32>, vector<64x16xf32> -> vector<64x16xf32>
    %731 = vector.broadcast %573 : vector<1x16xf32> to vector<64x16xf32>
    %732 = arith.addf %730, %731 : vector<64x16xf32>
    %733 = arith.addf %696, %732 : vector<64x16xf32>
    %c0_317 = arith.constant 0 : index
    %c0_318 = arith.constant 0 : index
    %734 = vector.load %arg67[%c0_317, %c0_318] : memref<1x16xf32, #tpu.memory_space<vmem>>, vector<1x16xf32>
    %c0_319 = arith.constant 0 : index
    %c0_320 = arith.constant 0 : index
    %735 = vector.load %arg68[%c0_319, %c0_320] : memref<1x16xf32, #tpu.memory_space<vmem>>, vector<1x16xf32>
    %cst_321 = arith.constant dense<0.000000e+00> : vector<64xf32>
    %736 = vector.multi_reduction <add>, %733, %cst_321 [1] : vector<64x16xf32> to vector<64xf32>
    %737 = vector.shape_cast %736 : vector<64xf32> to vector<64x1xf32>
    %cst_322 = arith.constant 1.600000e+01 : f32
    %738 = vector.broadcast %cst_322 : f32 to vector<64x1xf32>
    %739 = arith.divf %737, %738 : vector<64x1xf32>
    %740 = vector.broadcast %739 : vector<64x1xf32> to vector<64x16xf32>
    %741 = arith.subf %733, %740 : vector<64x16xf32>
    %742 = arith.mulf %741, %741 : vector<64x16xf32>
    %cst_323 = arith.constant dense<0.000000e+00> : vector<64xf32>
    %743 = vector.multi_reduction <add>, %742, %cst_323 [1] : vector<64x16xf32> to vector<64xf32>
    %744 = vector.shape_cast %743 : vector<64xf32> to vector<64x1xf32>
    %cst_324 = arith.constant 1.600000e+01 : f32
    %745 = vector.broadcast %cst_324 : f32 to vector<64x1xf32>
    %746 = arith.divf %744, %745 : vector<64x1xf32>
    %747 = vector.broadcast %739 : vector<64x1xf32> to vector<64x16xf32>
    %748 = arith.subf %733, %747 : vector<64x16xf32>
    %cst_325 = arith.constant 9.99999974E-6 : f32
    %749 = vector.broadcast %cst_325 : f32 to vector<64x1xf32>
    %750 = arith.addf %746, %749 : vector<64x1xf32>
    %751 = math.rsqrt %750 : vector<64x1xf32>
    %752 = vector.broadcast %751 : vector<64x1xf32> to vector<64x16xf32>
    %753 = arith.mulf %748, %752 : vector<64x16xf32>
    %754 = vector.broadcast %734 : vector<1x16xf32> to vector<64x16xf32>
    %755 = arith.mulf %753, %754 : vector<64x16xf32>
    %756 = vector.broadcast %735 : vector<1x16xf32> to vector<64x16xf32>
    %757 = arith.addf %755, %756 : vector<64x16xf32>
    %c0_326 = arith.constant 0 : index
    %c0_327 = arith.constant 0 : index
    %758 = vector.load %arg69[%c0_326, %c0_327] : memref<32x32xf32, #tpu.memory_space<vmem>>, vector<32x32xf32>
    %c0_328 = arith.constant 0 : index
    %c0_329 = arith.constant 0 : index
    %759 = vector.load %arg70[%c0_328, %c0_329] : memref<1x32xf32, #tpu.memory_space<vmem>>, vector<1x32xf32>
    %c0_330 = arith.constant 0 : index
    %c0_331 = arith.constant 0 : index
    %760 = vector.load %arg71[%c0_330, %c0_331] : memref<1x32xf32, #tpu.memory_space<vmem>>, vector<1x32xf32>
    %c0_332 = arith.constant 0 : index
    %c0_333 = arith.constant 0 : index
    %761 = vector.load %arg72[%c0_332, %c0_333] : memref<1x32xf32, #tpu.memory_space<vmem>>, vector<1x32xf32>
    %762 = vector.extract_strided_slice %758 {offsets = [0, 0], sizes = [16, 32], strides = [1, 1]} : vector<32x32xf32> to vector<16x32xf32>
    %cst_334 = arith.constant dense<0.000000e+00> : vector<64x32xf32>
    %763 = tpu.matmul %381, %762, %cst_334 {dimension_numbers = #tpu.dot_dimension_numbers<[1], [0], [0], [1], [0, 0, 1, 1], [], []>} : vector<64x16xf32>, vector<16x32xf32>, vector<64x32xf32> -> vector<64x32xf32>
    %764 = vector.extract_strided_slice %758 {offsets = [16, 0], sizes = [16, 32], strides = [1, 1]} : vector<32x32xf32> to vector<16x32xf32>
    %cst_335 = arith.constant dense<0.000000e+00> : vector<64x32xf32>
    %765 = tpu.matmul %757, %764, %cst_335 {dimension_numbers = #tpu.dot_dimension_numbers<[1], [0], [0], [1], [0, 0, 1, 1], [], []>} : vector<64x16xf32>, vector<16x32xf32>, vector<64x32xf32> -> vector<64x32xf32>
    %766 = arith.addf %763, %765 : vector<64x32xf32>
    %767 = vector.broadcast %759 : vector<1x32xf32> to vector<64x32xf32>
    %768 = arith.addf %766, %767 : vector<64x32xf32>
    %cst_336 = arith.constant dense<0.000000e+00> : vector<64xf32>
    %769 = vector.multi_reduction <add>, %768, %cst_336 [1] : vector<64x32xf32> to vector<64xf32>
    %770 = vector.shape_cast %769 : vector<64xf32> to vector<64x1xf32>
    %cst_337 = arith.constant 3.200000e+01 : f32
    %771 = vector.broadcast %cst_337 : f32 to vector<64x1xf32>
    %772 = arith.divf %770, %771 : vector<64x1xf32>
    %773 = vector.broadcast %772 : vector<64x1xf32> to vector<64x32xf32>
    %774 = arith.subf %768, %773 : vector<64x32xf32>
    %775 = arith.mulf %774, %774 : vector<64x32xf32>
    %cst_338 = arith.constant dense<0.000000e+00> : vector<64xf32>
    %776 = vector.multi_reduction <add>, %775, %cst_338 [1] : vector<64x32xf32> to vector<64xf32>
    %777 = vector.shape_cast %776 : vector<64xf32> to vector<64x1xf32>
    %cst_339 = arith.constant 3.200000e+01 : f32
    %778 = vector.broadcast %cst_339 : f32 to vector<64x1xf32>
    %779 = arith.divf %777, %778 : vector<64x1xf32>
    %780 = vector.broadcast %772 : vector<64x1xf32> to vector<64x32xf32>
    %781 = arith.subf %768, %780 : vector<64x32xf32>
    %cst_340 = arith.constant 9.99999974E-6 : f32
    %782 = vector.broadcast %cst_340 : f32 to vector<64x1xf32>
    %783 = arith.addf %779, %782 : vector<64x1xf32>
    %784 = math.rsqrt %783 : vector<64x1xf32>
    %785 = vector.broadcast %784 : vector<64x1xf32> to vector<64x32xf32>
    %786 = arith.mulf %781, %785 : vector<64x32xf32>
    %787 = vector.broadcast %760 : vector<1x32xf32> to vector<64x32xf32>
    %788 = arith.mulf %786, %787 : vector<64x32xf32>
    %789 = vector.broadcast %761 : vector<1x32xf32> to vector<64x32xf32>
    %790 = arith.addf %788, %789 : vector<64x32xf32>
    %cst_341 = arith.constant 3.000000e+00 : f32
    %791 = vector.broadcast %cst_341 : f32 to vector<64x32xf32>
    %792 = arith.addf %790, %791 : vector<64x32xf32>
    %cst_342 = arith.constant 0.000000e+00 : f32
    %cst_343 = arith.constant 6.000000e+00 : f32
    %793 = vector.broadcast %cst_342 : f32 to vector<64x32xf32>
    %794 = arith.maximumf %793, %792 : vector<64x32xf32>
    %795 = vector.broadcast %cst_343 : f32 to vector<64x32xf32>
    %796 = arith.minimumf %795, %794 : vector<64x32xf32>
    %797 = arith.mulf %790, %796 : vector<64x32xf32>
    %cst_344 = arith.constant 0.166666672 : f32
    %798 = vector.broadcast %cst_344 : f32 to vector<64x32xf32>
    %799 = arith.mulf %797, %798 : vector<64x32xf32>
    %c0_345 = arith.constant 0 : index
    %c0_346 = arith.constant 0 : index
    %c0_347 = arith.constant 0 : index
    %800 = vector.load %arg73[%c0_345, %c0_346, %c0_347] : memref<1x64x32xf32, #tpu.memory_space<vmem>>, vector<1x64x32xf32>
    %801 = vector.shape_cast %800 : vector<1x64x32xf32> to vector<64x32xf32>
    %802 = vector.shape_cast %799 : vector<64x32xf32> to vector<1x64x32xf32>
    tpu.vector_store %arg73[%c0_345, %c0_346, %c0_347], %802 {strides = array<i32>} : memref<1x64x32xf32, #tpu.memory_space<vmem>>, vector<1x64x32xf32>,
    return
  }
  func.func @transform_0(%arg0: i32) -> (i32, i32, i32) {
    %c0_i32 = arith.constant 0 : i32
    %c0_i32_0 = arith.constant 0 : i32
    %c0_i32_1 = arith.constant 0 : i32
    return %arg0, %c0_i32, %c0_i32_0 : i32, i32, i32
  }
  func.func @transform_1(%arg0: i32) -> (i32, i32, i32) {
    %c0_i32 = arith.constant 0 : i32
    %c0_i32_0 = arith.constant 0 : i32
    %c0_i32_1 = arith.constant 0 : i32
    return %arg0, %c0_i32, %c0_i32_0 : i32, i32, i32
  }
  func.func @transform_2(%arg0: i32) -> (i32, i32) {
    %c0_i32 = arith.constant 0 : i32
    %c0_i32_0 = arith.constant 0 : i32
    %c0_i32_1 = arith.constant 0 : i32
    return %c0_i32, %c0_i32_0 : i32, i32
  }
  func.func @transform_3(%arg0: i32) -> (i32, i32) {
    %c0_i32 = arith.constant 0 : i32
    %c0_i32_0 = arith.constant 0 : i32
    %c0_i32_1 = arith.constant 0 : i32
    return %c0_i32, %c0_i32_0 : i32, i32
  }
  func.func @transform_4(%arg0: i32) -> (i32, i32) {
    %c0_i32 = arith.constant 0 : i32
    %c0_i32_0 = arith.constant 0 : i32
    %c0_i32_1 = arith.constant 0 : i32
    return %c0_i32, %c0_i32_0 : i32, i32
  }
  func.func @transform_5(%arg0: i32) -> (i32, i32) {
    %c0_i32 = arith.constant 0 : i32
    %c0_i32_0 = arith.constant 0 : i32
    %c0_i32_1 = arith.constant 0 : i32
    return %c0_i32, %c0_i32_0 : i32, i32
  }
  func.func @transform_6(%arg0: i32) -> (i32, i32) {
    %c0_i32 = arith.constant 0 : i32
    %c0_i32_0 = arith.constant 0 : i32
    %c0_i32_1 = arith.constant 0 : i32
    return %c0_i32, %c0_i32_0 : i32, i32
  }
  func.func @transform_7(%arg0: i32) -> (i32, i32) {
    %c0_i32 = arith.constant 0 : i32
    %c0_i32_0 = arith.constant 0 : i32
    %c0_i32_1 = arith.constant 0 : i32
    return %c0_i32, %c0_i32_0 : i32, i32
  }
  func.func @transform_8(%arg0: i32) -> (i32, i32) {
    %c0_i32 = arith.constant 0 : i32
    %c0_i32_0 = arith.constant 0 : i32
    %c0_i32_1 = arith.constant 0 : i32
    return %c0_i32, %c0_i32_0 : i32, i32
  }
  func.func @transform_9(%arg0: i32) -> (i32, i32) {
    %c0_i32 = arith.constant 0 : i32
    %c0_i32_0 = arith.constant 0 : i32
    %c0_i32_1 = arith.constant 0 : i32
    return %c0_i32, %c0_i32_0 : i32, i32
  }
  func.func @transform_10(%arg0: i32) -> (i32, i32) {
    %c0_i32 = arith.constant 0 : i32
    %c0_i32_0 = arith.constant 0 : i32
    %c0_i32_1 = arith.constant 0 : i32
    return %c0_i32, %c0_i32_0 : i32, i32
  }
  func.func @transform_11(%arg0: i32) -> (i32, i32) {
    %c0_i32 = arith.constant 0 : i32
    %c0_i32_0 = arith.constant 0 : i32
    %c0_i32_1 = arith.constant 0 : i32
    return %c0_i32, %c0_i32_0 : i32, i32
  }
  func.func @transform_12(%arg0: i32) -> (i32, i32) {
    %c0_i32 = arith.constant 0 : i32
    %c0_i32_0 = arith.constant 0 : i32
    %c0_i32_1 = arith.constant 0 : i32
    return %c0_i32, %c0_i32_0 : i32, i32
  }
  func.func @transform_13(%arg0: i32) -> (i32, i32) {
    %c0_i32 = arith.constant 0 : i32
    %c0_i32_0 = arith.constant 0 : i32
    %c0_i32_1 = arith.constant 0 : i32
    return %c0_i32, %c0_i32_0 : i32, i32
  }
  func.func @transform_14(%arg0: i32) -> (i32, i32) {
    %c0_i32 = arith.constant 0 : i32
    %c0_i32_0 = arith.constant 0 : i32
    %c0_i32_1 = arith.constant 0 : i32
    return %c0_i32, %c0_i32_0 : i32, i32
  }
  func.func @transform_15(%arg0: i32) -> (i32, i32) {
    %c0_i32 = arith.constant 0 : i32
    %c0_i32_0 = arith.constant 0 : i32
    %c0_i32_1 = arith.constant 0 : i32
    return %c0_i32, %c0_i32_0 : i32, i32
  }
  func.func @transform_16(%arg0: i32) -> (i32, i32) {
    %c0_i32 = arith.constant 0 : i32
    %c0_i32_0 = arith.constant 0 : i32
    %c0_i32_1 = arith.constant 0 : i32
    return %c0_i32, %c0_i32_0 : i32, i32
  }
  func.func @transform_17(%arg0: i32) -> (i32, i32) {
    %c0_i32 = arith.constant 0 : i32
    %c0_i32_0 = arith.constant 0 : i32
    %c0_i32_1 = arith.constant 0 : i32
    return %c0_i32, %c0_i32_0 : i32, i32
  }
  func.func @transform_18(%arg0: i32) -> (i32, i32) {
    %c0_i32 = arith.constant 0 : i32
    %c0_i32_0 = arith.constant 0 : i32
    %c0_i32_1 = arith.constant 0 : i32
    return %c0_i32, %c0_i32_0 : i32, i32
  }
  func.func @transform_19(%arg0: i32) -> (i32, i32) {
    %c0_i32 = arith.constant 0 : i32
    %c0_i32_0 = arith.constant 0 : i32
    %c0_i32_1 = arith.constant 0 : i32
    return %c0_i32, %c0_i32_0 : i32, i32
  }
  func.func @transform_20(%arg0: i32) -> (i32, i32) {
    %c0_i32 = arith.constant 0 : i32
    %c0_i32_0 = arith.constant 0 : i32
    %c0_i32_1 = arith.constant 0 : i32
    return %c0_i32, %c0_i32_0 : i32, i32
  }
  func.func @transform_21(%arg0: i32) -> (i32, i32) {
    %c0_i32 = arith.constant 0 : i32
    %c0_i32_0 = arith.constant 0 : i32
    %c0_i32_1 = arith.constant 0 : i32
    return %c0_i32, %c0_i32_0 : i32, i32
  }
  func.func @transform_22(%arg0: i32) -> (i32, i32) {
    %c0_i32 = arith.constant 0 : i32
    %c0_i32_0 = arith.constant 0 : i32
    %c0_i32_1 = arith.constant 0 : i32
    return %c0_i32, %c0_i32_0 : i32, i32
  }
  func.func @transform_23(%arg0: i32) -> (i32, i32) {
    %c0_i32 = arith.constant 0 : i32
    %c0_i32_0 = arith.constant 0 : i32
    %c0_i32_1 = arith.constant 0 : i32
    return %c0_i32, %c0_i32_0 : i32, i32
  }
  func.func @transform_24(%arg0: i32) -> (i32, i32) {
    %c0_i32 = arith.constant 0 : i32
    %c0_i32_0 = arith.constant 0 : i32
    %c0_i32_1 = arith.constant 0 : i32
    return %c0_i32, %c0_i32_0 : i32, i32
  }
  func.func @transform_25(%arg0: i32) -> (i32, i32) {
    %c0_i32 = arith.constant 0 : i32
    %c0_i32_0 = arith.constant 0 : i32
    %c0_i32_1 = arith.constant 0 : i32
    return %c0_i32, %c0_i32_0 : i32, i32
  }
  func.func @transform_26(%arg0: i32) -> (i32, i32) {
    %c0_i32 = arith.constant 0 : i32
    %c0_i32_0 = arith.constant 0 : i32
    %c0_i32_1 = arith.constant 0 : i32
    return %c0_i32, %c0_i32_0 : i32, i32
  }
  func.func @transform_27(%arg0: i32) -> (i32, i32) {
    %c0_i32 = arith.constant 0 : i32
    %c0_i32_0 = arith.constant 0 : i32
    %c0_i32_1 = arith.constant 0 : i32
    return %c0_i32, %c0_i32_0 : i32, i32
  }
  func.func @transform_28(%arg0: i32) -> (i32, i32) {
    %c0_i32 = arith.constant 0 : i32
    %c0_i32_0 = arith.constant 0 : i32
    %c0_i32_1 = arith.constant 0 : i32
    return %c0_i32, %c0_i32_0 : i32, i32
  }
  func.func @transform_29(%arg0: i32) -> (i32, i32) {
    %c0_i32 = arith.constant 0 : i32
    %c0_i32_0 = arith.constant 0 : i32
    %c0_i32_1 = arith.constant 0 : i32
    return %c0_i32, %c0_i32_0 : i32, i32
  }
  func.func @transform_30(%arg0: i32) -> (i32, i32) {
    %c0_i32 = arith.constant 0 : i32
    %c0_i32_0 = arith.constant 0 : i32
    %c0_i32_1 = arith.constant 0 : i32
    return %c0_i32, %c0_i32_0 : i32, i32
  }
  func.func @transform_31(%arg0: i32) -> (i32, i32) {
    %c0_i32 = arith.constant 0 : i32
    %c0_i32_0 = arith.constant 0 : i32
    %c0_i32_1 = arith.constant 0 : i32
    return %c0_i32, %c0_i32_0 : i32, i32
  }
  func.func @transform_32(%arg0: i32) -> (i32, i32) {
    %c0_i32 = arith.constant 0 : i32
    %c0_i32_0 = arith.constant 0 : i32
    %c0_i32_1 = arith.constant 0 : i32
    return %c0_i32, %c0_i32_0 : i32, i32
  }
  func.func @transform_33(%arg0: i32) -> (i32, i32) {
    %c0_i32 = arith.constant 0 : i32
    %c0_i32_0 = arith.constant 0 : i32
    %c0_i32_1 = arith.constant 0 : i32
    return %c0_i32, %c0_i32_0 : i32, i32
  }
  func.func @transform_34(%arg0: i32) -> (i32, i32) {
    %c0_i32 = arith.constant 0 : i32
    %c0_i32_0 = arith.constant 0 : i32
    %c0_i32_1 = arith.constant 0 : i32
    return %c0_i32, %c0_i32_0 : i32, i32
  }
  func.func @transform_35(%arg0: i32) -> (i32, i32) {
    %c0_i32 = arith.constant 0 : i32
    %c0_i32_0 = arith.constant 0 : i32
    %c0_i32_1 = arith.constant 0 : i32
    return %c0_i32, %c0_i32_0 : i32, i32
  }
  func.func @transform_36(%arg0: i32) -> (i32, i32) {
    %c0_i32 = arith.constant 0 : i32
    %c0_i32_0 = arith.constant 0 : i32
    %c0_i32_1 = arith.constant 0 : i32
    return %c0_i32, %c0_i32_0 : i32, i32
  }
  func.func @transform_37(%arg0: i32) -> (i32, i32) {
    %c0_i32 = arith.constant 0 : i32
    %c0_i32_0 = arith.constant 0 : i32
    %c0_i32_1 = arith.constant 0 : i32
    return %c0_i32, %c0_i32_0 : i32, i32
  }
  func.func @transform_38(%arg0: i32) -> (i32, i32) {
    %c0_i32 = arith.constant 0 : i32
    %c0_i32_0 = arith.constant 0 : i32
    %c0_i32_1 = arith.constant 0 : i32
    return %c0_i32, %c0_i32_0 : i32, i32
  }
  func.func @transform_39(%arg0: i32) -> (i32, i32) {
    %c0_i32 = arith.constant 0 : i32
    %c0_i32_0 = arith.constant 0 : i32
    %c0_i32_1 = arith.constant 0 : i32
    return %c0_i32, %c0_i32_0 : i32, i32
  }
  func.func @transform_40(%arg0: i32) -> (i32, i32) {
    %c0_i32 = arith.constant 0 : i32
    %c0_i32_0 = arith.constant 0 : i32
    %c0_i32_1 = arith.constant 0 : i32
    return %c0_i32, %c0_i32_0 : i32, i32
  }
  func.func @transform_41(%arg0: i32) -> (i32, i32) {
    %c0_i32 = arith.constant 0 : i32
    %c0_i32_0 = arith.constant 0 : i32
    %c0_i32_1 = arith.constant 0 : i32
    return %c0_i32, %c0_i32_0 : i32, i32
  }
  func.func @transform_42(%arg0: i32) -> (i32, i32) {
    %c0_i32 = arith.constant 0 : i32
    %c0_i32_0 = arith.constant 0 : i32
    %c0_i32_1 = arith.constant 0 : i32
    return %c0_i32, %c0_i32_0 : i32, i32
  }
  func.func @transform_43(%arg0: i32) -> (i32, i32) {
    %c0_i32 = arith.constant 0 : i32
    %c0_i32_0 = arith.constant 0 : i32
    %c0_i32_1 = arith.constant 0 : i32
    return %c0_i32, %c0_i32_0 : i32, i32
  }
  func.func @transform_44(%arg0: i32) -> (i32, i32) {
    %c0_i32 = arith.constant 0 : i32
    %c0_i32_0 = arith.constant 0 : i32
    %c0_i32_1 = arith.constant 0 : i32
    return %c0_i32, %c0_i32_0 : i32, i32
  }
  func.func @transform_45(%arg0: i32) -> (i32, i32) {
    %c0_i32 = arith.constant 0 : i32
    %c0_i32_0 = arith.constant 0 : i32
    %c0_i32_1 = arith.constant 0 : i32
    return %c0_i32, %c0_i32_0 : i32, i32
  }
  func.func @transform_46(%arg0: i32) -> (i32, i32) {
    %c0_i32 = arith.constant 0 : i32
    %c0_i32_0 = arith.constant 0 : i32
    %c0_i32_1 = arith.constant 0 : i32
    return %c0_i32, %c0_i32_0 : i32, i32
  }
  func.func @transform_47(%arg0: i32) -> (i32, i32) {
    %c0_i32 = arith.constant 0 : i32
    %c0_i32_0 = arith.constant 0 : i32
    %c0_i32_1 = arith.constant 0 : i32
    return %c0_i32, %c0_i32_0 : i32, i32
  }
  func.func @transform_48(%arg0: i32) -> (i32, i32) {
    %c0_i32 = arith.constant 0 : i32
    %c0_i32_0 = arith.constant 0 : i32
    %c0_i32_1 = arith.constant 0 : i32
    return %c0_i32, %c0_i32_0 : i32, i32
  }
  func.func @transform_49(%arg0: i32) -> (i32, i32) {
    %c0_i32 = arith.constant 0 : i32
    %c0_i32_0 = arith.constant 0 : i32
    %c0_i32_1 = arith.constant 0 : i32
    return %c0_i32, %c0_i32_0 : i32, i32
  }
  func.func @transform_50(%arg0: i32) -> (i32, i32) {
    %c0_i32 = arith.constant 0 : i32
    %c0_i32_0 = arith.constant 0 : i32
    %c0_i32_1 = arith.constant 0 : i32
    return %c0_i32, %c0_i32_0 : i32, i32
  }
  func.func @transform_51(%arg0: i32) -> (i32, i32) {
    %c0_i32 = arith.constant 0 : i32
    %c0_i32_0 = arith.constant 0 : i32
    %c0_i32_1 = arith.constant 0 : i32
    return %c0_i32, %c0_i32_0 : i32, i32
  }
  func.func @transform_52(%arg0: i32) -> (i32, i32) {
    %c0_i32 = arith.constant 0 : i32
    %c0_i32_0 = arith.constant 0 : i32
    %c0_i32_1 = arith.constant 0 : i32
    return %c0_i32, %c0_i32_0 : i32, i32
  }
  func.func @transform_53(%arg0: i32) -> (i32, i32) {
    %c0_i32 = arith.constant 0 : i32
    %c0_i32_0 = arith.constant 0 : i32
    %c0_i32_1 = arith.constant 0 : i32
    return %c0_i32, %c0_i32_0 : i32, i32
  }
  func.func @transform_54(%arg0: i32) -> (i32, i32) {
    %c0_i32 = arith.constant 0 : i32
    %c0_i32_0 = arith.constant 0 : i32
    %c0_i32_1 = arith.constant 0 : i32
    return %c0_i32, %c0_i32_0 : i32, i32
  }
  func.func @transform_55(%arg0: i32) -> (i32, i32) {
    %c0_i32 = arith.constant 0 : i32
    %c0_i32_0 = arith.constant 0 : i32
    %c0_i32_1 = arith.constant 0 : i32
    return %c0_i32, %c0_i32_0 : i32, i32
  }
  func.func @transform_56(%arg0: i32) -> (i32, i32) {
    %c0_i32 = arith.constant 0 : i32
    %c0_i32_0 = arith.constant 0 : i32
    %c0_i32_1 = arith.constant 0 : i32
    return %c0_i32, %c0_i32_0 : i32, i32
  }
  func.func @transform_57(%arg0: i32) -> (i32, i32) {
    %c0_i32 = arith.constant 0 : i32
    %c0_i32_0 = arith.constant 0 : i32
    %c0_i32_1 = arith.constant 0 : i32
    return %c0_i32, %c0_i32_0 : i32, i32
  }
  func.func @transform_58(%arg0: i32) -> (i32, i32) {
    %c0_i32 = arith.constant 0 : i32
    %c0_i32_0 = arith.constant 0 : i32
    %c0_i32_1 = arith.constant 0 : i32
    return %c0_i32, %c0_i32_0 : i32, i32
  }
  func.func @transform_59(%arg0: i32) -> (i32, i32) {
    %c0_i32 = arith.constant 0 : i32
    %c0_i32_0 = arith.constant 0 : i32
    %c0_i32_1 = arith.constant 0 : i32
    return %c0_i32, %c0_i32_0 : i32, i32
  }
  func.func @transform_60(%arg0: i32) -> (i32, i32) {
    %c0_i32 = arith.constant 0 : i32
    %c0_i32_0 = arith.constant 0 : i32
    %c0_i32_1 = arith.constant 0 : i32
    return %c0_i32, %c0_i32_0 : i32, i32
  }
  func.func @transform_61(%arg0: i32) -> (i32, i32) {
    %c0_i32 = arith.constant 0 : i32
    %c0_i32_0 = arith.constant 0 : i32
    %c0_i32_1 = arith.constant 0 : i32
    return %c0_i32, %c0_i32_0 : i32, i32
  }
  func.func @transform_62(%arg0: i32) -> (i32, i32) {
    %c0_i32 = arith.constant 0 : i32
    %c0_i32_0 = arith.constant 0 : i32
    %c0_i32_1 = arith.constant 0 : i32
    return %c0_i32, %c0_i32_0 : i32, i32
  }
  func.func @transform_63(%arg0: i32) -> (i32, i32) {
    %c0_i32 = arith.constant 0 : i32
    %c0_i32_0 = arith.constant 0 : i32
    %c0_i32_1 = arith.constant 0 : i32
    return %c0_i32, %c0_i32_0 : i32, i32
  }
  func.func @transform_64(%arg0: i32) -> (i32, i32) {
    %c0_i32 = arith.constant 0 : i32
    %c0_i32_0 = arith.constant 0 : i32
    %c0_i32_1 = arith.constant 0 : i32
    return %c0_i32, %c0_i32_0 : i32, i32
  }
  func.func @transform_65(%arg0: i32) -> (i32, i32) {
    %c0_i32 = arith.constant 0 : i32
    %c0_i32_0 = arith.constant 0 : i32
    %c0_i32_1 = arith.constant 0 : i32
    return %c0_i32, %c0_i32_0 : i32, i32
  }
  func.func @transform_66(%arg0: i32) -> (i32, i32) {
    %c0_i32 = arith.constant 0 : i32
    %c0_i32_0 = arith.constant 0 : i32
    %c0_i32_1 = arith.constant 0 : i32
    return %c0_i32, %c0_i32_0 : i32, i32
  }
  func.func @transform_67(%arg0: i32) -> (i32, i32) {
    %c0_i32 = arith.constant 0 : i32
    %c0_i32_0 = arith.constant 0 : i32
    %c0_i32_1 = arith.constant 0 : i32
    return %c0_i32, %c0_i32_0 : i32, i32
  }
  func.func @transform_68(%arg0: i32) -> (i32, i32) {
    %c0_i32 = arith.constant 0 : i32
    %c0_i32_0 = arith.constant 0 : i32
    %c0_i32_1 = arith.constant 0 : i32
    return %c0_i32, %c0_i32_0 : i32, i32
  }
  func.func @transform_69(%arg0: i32) -> (i32, i32) {
    %c0_i32 = arith.constant 0 : i32
    %c0_i32_0 = arith.constant 0 : i32
    %c0_i32_1 = arith.constant 0 : i32
    return %c0_i32, %c0_i32_0 : i32, i32
  }
  func.func @transform_70(%arg0: i32) -> (i32, i32) {
    %c0_i32 = arith.constant 0 : i32
    %c0_i32_0 = arith.constant 0 : i32
    %c0_i32_1 = arith.constant 0 : i32
    return %c0_i32, %c0_i32_0 : i32, i32
  }
  func.func @transform_71(%arg0: i32) -> (i32, i32) {
    %c0_i32 = arith.constant 0 : i32
    %c0_i32_0 = arith.constant 0 : i32
    %c0_i32_1 = arith.constant 0 : i32
    return %c0_i32, %c0_i32_0 : i32, i32
  }
  func.func @transform_72(%arg0: i32) -> (i32, i32, i32) {
    %c0_i32 = arith.constant 0 : i32
    %c0_i32_0 = arith.constant 0 : i32
    %c0_i32_1 = arith.constant 0 : i32
    return %arg0, %c0_i32, %c0_i32_0 : i32, i32, i32
  }
}

</mosaic_0001>

<bundles_post_ra>
// kernel: tpu_custom_call.1
= control target key start
LH: loop header
LB: loop body
LE: loop exit
PB: predicated region body
PF: predicated region fallthrough
CT: control target
= control target key end

     0   :  { %s14100_s6 = smov 1   ;;  %s14101_s10 = smov 2   ;;  %s18309_s0 = inlined_call_operand.smem [shape: u32[73], index: -1, kind: input, shape index: {}] }
   0x1   :  { %s14217_s5 = sld [smem:[%s18309_s0]]   ;;  %s14102_s14 = smov 3  }
   0x2   :  { %s14222_s9 = sld [smem:[%s18309_s0 + %s14100_s6]]   ;;  %s14103_s18 = smov 4  }
   0x3   :  { %s14227_s13 = sld [smem:[%s18309_s0 + %s14101_s10]]   ;;  %s14104_s22 = smov 5  }
   0x4   :  { %s14232_s17 = sld [smem:[%s18309_s0 + %s14102_s14]]   ;;  %s14105_s26 = smov 6  }
   0x5   :  { %s14237_s21 = sld [smem:[%s18309_s0 + %s14103_s18]]   ;;  %s14106_s30 = smov 7  }
   0x6   :  { %s14242_s25 = sld [smem:[%s18309_s0 + %s14104_s22]]   ;;  %s14107_s4 = smov 8  }
   0x7   :  { %18457 = sst [smem:[#allocation61_spill]] %s14217_s5  ;;  %s14108_s10 = smov 9  }
   0x8   :  { %18458 = sst [smem:[#allocation62_spill]] %s14222_s9  ;;  %s14109_s15 = smov 10  }
   0x9   :  { %18459 = sst [smem:[#allocation63_spill]] %s14227_s13  ;;  %s14110_s20 = smov 11  }
   0xa   :  { %18460 = sst [smem:[#allocation64_spill]] %s14232_s17  ;;  %s14112_s1 = smov 13  }
   0xb   :  { %18461 = sst [smem:[#allocation65_spill]] %s14237_s21  ;;  %s14113_s7 = smov 14  }
   0xc   :  { %18462 = sst [smem:[#allocation66_spill]] %s14242_s25  ;;  %s14115_s22 = smov 16  }
   0xd   :  { %s14247_s29 = sld [smem:[%s18309_s0 + %s14105_s26]]   ;;  %s14111_s26 = smov 12  }
   0xe   :  { %s14252_s3 = sld [smem:[%s18309_s0 + %s14106_s30]]   ;;  %s14116_s28 = smov 17  }
   0xf   :  { %s14257_s8 = sld [smem:[%s18309_s0 + %s14107_s4]]  }
  0x10   :  { %s14262_s14 = sld [smem:[%s18309_s0 + %s14108_s10]]  }
  0x11   :  { %s14267_s19 = sld [smem:[%s18309_s0 + %s14109_s15]]   ;;  %s14114_s15 = smov 15  }
  0x12   :  { %s14272_s24 = sld [smem:[%s18309_s0 + %s14110_s20]]  }
  0x13   :  { %18463 = sst [smem:[#allocation67_spill]] %s14247_s29 }
  0x14   :  { %18464 = sst [smem:[#allocation68_spill]] %s14252_s3 }
  0x15   :  { %18465 = sst [smem:[#allocation69_spill]] %s14257_s8 }
  0x16   :  { %18466 = sst [smem:[#allocation70_spill]] %s14262_s14 }
  0x17   :  { %18467 = sst [smem:[#allocation71_spill]] %s14267_s19 }
  0x18   :  { %18468 = sst [smem:[#allocation72_spill]] %s14272_s24 }
  0x19   :  { %s14277_s30 = sld [smem:[%s18309_s0 + %s14111_s26]]  }
  0x1a   :  { %s14282_s6 = sld [smem:[%s18309_s0 + %s14112_s1]]  }
  0x1b   :  { %s14287_s12 = sld [smem:[%s18309_s0 + %s14113_s7]]   ;;  %s14117_s7 = smov 18  }
  0x1c   :  { %s14292_s20 = sld [smem:[%s18309_s0 + %s14114_s15]]   ;;  %s14118_s15 = smov 19  }
  0x1d   :  { %s14297_s27 = sld [smem:[%s18309_s0 + %s14115_s22]]   ;;  %s14119_s22 = smov 20  }
  0x1e   :  { %s14302_s4 = sld [smem:[%s18309_s0 + %s14116_s28]]   ;;  %s14120_s28 = smov 21  }
  0x1f   :  { %18469 = sst [smem:[#allocation73_spill]] %s14277_s30 }
  0x20   :  { %18470 = sst [smem:[#allocation74_spill]] %s14282_s6 }
  0x21   :  { %18471 = sst [smem:[#allocation75_spill]] %s14287_s12 }
  0x22   :  { %18472 = sst [smem:[#allocation76_spill]] %s14292_s20 }
  0x23   :  { %18473 = sst [smem:[#allocation77_spill]] %s14297_s27 }
  0x24   :  { %18474 = sst [smem:[#allocation78_spill]] %s14302_s4 }
  0x25   :  { %s14307_s9 = sld [smem:[%s18309_s0 + %s14117_s7]]   ;;  %s14121_s7 = smov 22  }
  0x26   :  { %s14312_s12 = sld [smem:[%s18309_s0 + %s14118_s15]]   ;;  %s14122_s15 = smov 23  }
  0x27   :  { %s14317_s27 = sld [smem:[%s18309_s0 + %s14119_s22]]   ;;  %s14123_s22 = smov 24  }
  0x28   :  { %s14322_s4 = sld [smem:[%s18309_s0 + %s14120_s28]]   ;;  %s14124_s28 = smov 25  }
  0x2b   :  { %18475 = sst [smem:[#allocation79_spill]] %s14307_s9 }
  0x2c   :  { %18476 = sst [smem:[#allocation80_spill]] %s14312_s12 }
  0x2d   :  { %18477 = sst [smem:[#allocation81_spill]] %s14317_s27 }
  0x2e   :  { %18478 = sst [smem:[#allocation82_spill]] %s14322_s4 }
  0x2f   :  { %s14327_s9 = sld [smem:[%s18309_s0 + %s14121_s7]]   ;;  %s14125_s7 = smov 26  }
  0x30   :  { %s14332_s12 = sld [smem:[%s18309_s0 + %s14122_s15]]   ;;  %s14126_s15 = smov 27  }
  0x31   :  { %s14337_s27 = sld [smem:[%s18309_s0 + %s14123_s22]]   ;;  %s14127_s22 = smov 28  }
  0x32   :  { %s14342_s4 = sld [smem:[%s18309_s0 + %s14124_s28]]   ;;  %s14128_s28 = smov 29  }
  0x35   :  { %18479 = sst [smem:[#allocation83_spill]] %s14327_s9 }
  0x36   :  { %18480 = sst [smem:[#allocation84_spill]] %s14332_s12 }
  0x37   :  { %18481 = sst [smem:[#allocation85_spill]] %s14337_s27 }
  0x38   :  { %18482 = sst [smem:[#allocation86_spill]] %s14342_s4 }
  0x39   :  { %s14347_s9 = sld [smem:[%s18309_s0 + %s14125_s7]]   ;;  %s14129_s7 = smov 30  }
  0x3a   :  { %s14352_s12 = sld [smem:[%s18309_s0 + %s14126_s15]]   ;;  %s14130_s15 = smov 31  }
  0x3b   :  { %s14357_s27 = sld [smem:[%s18309_s0 + %s14127_s22]]   ;;  %s14131_s22 = smov 32  }
  0x3c   :  { %s14362_s4 = sld [smem:[%s18309_s0 + %s14128_s28]]   ;;  %s14132_s28 = smov 33  }
  0x3f   :  { %18483 = sst [smem:[#allocation87_spill]] %s14347_s9 }
  0x40   :  { %18484 = sst [smem:[#allocation88_spill]] %s14352_s12 }
  0x41   :  { %18485 = sst [smem:[#allocation89_spill]] %s14357_s27 }
  0x42   :  { %18486 = sst [smem:[#allocation90_spill]] %s14362_s4 }
  0x43   :  { %s14367_s9 = sld [smem:[%s18309_s0 + %s14129_s7]]   ;;  %s14133_s7 = smov 34  }
  0x44   :  { %s14372_s12 = sld [smem:[%s18309_s0 + %s14130_s15]]   ;;  %s14134_s15 = smov 35  }
  0x45   :  { %s14377_s27 = sld [smem:[%s18309_s0 + %s14131_s22]]   ;;  %s14135_s22 = smov 36  }
  0x46   :  { %s14382_s4 = sld [smem:[%s18309_s0 + %s14132_s28]]   ;;  %s14136_s28 = smov 37  }
  0x47   :  { %s14402_s6 = sld [smem:[%s18309_s0 + %s14136_s28]]   ;;  %s14140_s28 = smov 41  }
  0x48   :  { %s14422_s19 = sld [smem:[%s18309_s0 + %s14140_s28]]   ;;  %s14144_s28 = smov 45  }
  0x49   :  { %18487 = sst [smem:[#allocation91_spill]] %s14367_s9 }
  0x4a   :  { %18488 = sst [smem:[#allocation92_spill]] %s14372_s12 }
  0x4b   :  { %18489 = sst [smem:[#allocation93_spill]] %s14377_s27 }
  0x4c   :  { %18490 = sst [smem:[#allocation94_spill]] %s14382_s4 }
  0x4d   :  { %s14387_s9 = sld [smem:[%s18309_s0 + %s14133_s7]]   ;;  %s14137_s7 = smov 38  }
  0x4e   :  { %s14392_s12 = sld [smem:[%s18309_s0 + %s14134_s15]]   ;;  %s14138_s15 = smov 39  }
  0x4f   :  { %s14397_s27 = sld [smem:[%s18309_s0 + %s14135_s22]]   ;;  %s14139_s22 = smov 40  }
  0x50   :  { %18492 = sst [smem:[#allocation96_spill]] %s14402_s6 }
  0x51   :  { %s14407_s20 = sld [smem:[%s18309_s0 + %s14137_s7]]   ;;  %s14141_s7 = smov 42  }
  0x52   :  { %s14412_s30 = sld [smem:[%s18309_s0 + %s14138_s15]]   ;;  %s14142_s15 = smov 43  }
  0x53   :  { %18491 = sst [smem:[#allocation95_spill]] %s14387_s9 }
  0x54   :  { %s14417_s8 = sld [smem:[%s18309_s0 + %s14139_s22]]   ;;  %s14143_s22 = smov 44  }
  0x55   :  { %18495 = sst [smem:[#allocation99_spill]] %s14422_s19 }
  0x56   :  { %s14432_s14 = sld [smem:[%s18309_s0 + %s14142_s15]]   ;;  %s14146_s15 = smov 47  }
  0x57   :  { %18493 = sst [smem:[#allocation97_spill]] %s14407_s20 }
  0x58   :  { %s14427_s20 = sld [smem:[%s18309_s0 + %s14141_s7]]   ;;  %s14145_s7 = smov 46  }
  0x59   :  { %s14437_s24 = sld [smem:[%s18309_s0 + %s14143_s22]]   ;;  %s14147_s22 = smov 48  }
  0x5a   :  { %18494 = sst [smem:[#allocation98_spill]] %s14417_s8 }
  0x5b   :  { %s14442_s19 = sld [smem:[%s18309_s0 + %s14144_s28]]   ;;  %s14148_s28 = smov 49  }
  0x5c   :  { %18496 = sst [smem:[#allocation100_spill]] %s14432_s14 }
  0x5d   :  { %s14447_s17 = sld [smem:[%s18309_s0 + %s14145_s7]]   ;;  %s14149_s7 = smov 50  }
  0x5e   :  { %s14452_s14 = sld [smem:[%s18309_s0 + %s14146_s15]]   ;;  %s14150_s15 = smov 51  }
  0x5f   :  { %18497 = sst [smem:[#allocation101_spill]] %s14437_s24 }
  0x60   :  { %s14457_s13 = sld [smem:[%s18309_s0 + %s14147_s22]]   ;;  %s14151_s22 = smov 52  }
  0x61   :  { %s14462_s3 = sld [smem:[%s18309_s0 + %s14148_s28]]   ;;  %s14152_s28 = smov 53  }
  0x62   :  { %s14467_s25 = sld [smem:[%s18309_s0 + %s14149_s7]]   ;;  %s14153_s7 = smov 54  }
  0x63   :  { %18498 = sst [smem:[#allocation102_spill]] %s14447_s17 }
  0x64   :  { %18499 = sst [smem:[#allocation103_spill]] %s14452_s14 }
  0x65   :  { %s14472_s14 = sld [smem:[%s18309_s0 + %s14150_s15]]   ;;  %s14154_s15 = smov 55  }
  0x66   :  { %s14477_s21 = sld [smem:[%s18309_s0 + %s14151_s22]]   ;;  %s14155_s22 = smov 56  }
  0x67   :  { %18500 = sst [smem:[#allocation104_spill]] %s14462_s3 }
  0x68   :  { %18501 = sst [smem:[#allocation105_spill]] %s14467_s25 }
  0x69   :  { %s14482_s3 = sld [smem:[%s18309_s0 + %s14152_s28]]   ;;  %s14156_s28 = smov 57  }
  0x6a   :  { %s14487_s29 = sld [smem:[%s18309_s0 + %s14153_s7]]   ;;  %s14157_s7 = smov 58  }
  0x6b   :  { %s14492_s5 = sld [smem:[%s18309_s0 + %s14154_s15]]   ;;  %s14158_s15 = smov 59  }
  0x6c   :  { %18502 = sst [smem:[#allocation106_spill]] %s14477_s21 }
  0x6d   :  { %s14497_s21 = sld [smem:[%s18309_s0 + %s14155_s22]]   ;;  %s14159_s22 = smov 60  }
  0x6e   :  { %s14507_s25 = sld [smem:[%s18309_s0 + %s14157_s7]]   ;;  %s14161_s7 = smov 62  }
  0x6f   :  { %18503 = sst [smem:[#allocation107_spill]] %s14482_s3 }
  0x70   :  { %s14502_s3 = sld [smem:[%s18309_s0 + %s14156_s28]]   ;;  %s14160_s28 = smov 61  }
  0x71   :  { %18504 = sst [smem:[#allocation108_spill]] %s14492_s5 }
  0x72   :  { %s14512_s5 = sld [smem:[%s18309_s0 + %s14158_s15]]   ;;  %s14162_s15 = smov 63  }
  0x73   :  { %18505 = sst [smem:[#allocation109_spill]] %s14497_s21 }
  0x74   :  { %18507 = sst [smem:[#allocation111_spill]] %s14507_s25 }
  0x75   :  { %s14517_s21 = sld [smem:[%s18309_s0 + %s14159_s22]]   ;;  %s14163_s22 = smov 64  }
  0x76   :  { %18506 = sst [smem:[#allocation110_spill]] %s14502_s3 }
  0x77   :  { %s14522_s17 = sld [smem:[%s18309_s0 + %s14160_s28]]   ;;  %s14164_s28 = smov 65  }
  0x78   :  { %18508 = sst [smem:[#allocation112_spill]] %s14512_s5 }
  0x79   :  { %s14527_s25 = sld [smem:[%s18309_s0 + %s14161_s7]]   ;;  %s14165_s7 = smov 66  }
  0x7a   :  { %s14532_s5 = sld [smem:[%s18309_s0 + %s14162_s15]]   ;;  %s14166_s15 = smov 67  }
  0x7b   :  { %s14537_s24 = sld [smem:[%s18309_s0 + %s14163_s22]]   ;;  %s14167_s22 = smov 68  }
  0x7c   :  { %s14552_s8 = sld [smem:[%s18309_s0 + %s14166_s15]]   ;;  %s14170_s15 = smov 71  }
  0x7d   :  { %18509 = sst [smem:[#allocation113_spill]] %s14522_s17 }
  0x7e   :  { %s14542_s17 = sld [smem:[%s18309_s0 + %s14164_s28]]   ;;  %s14168_s28 = smov 69  }
  0x7f   :  { %18510 = sst [smem:[#allocation114_spill]] %s14527_s25 }
  0x80   :  { %18511 = sst [smem:[#allocation115_spill]] %s14532_s5 }
  0x81   :  { %18512 = sst [smem:[#allocation116_spill]] %s14537_s24 }
  0x82   :  { %s14547_s25 = sld [smem:[%s18309_s0 + %s14165_s7]]   ;;  %s14169_s7 = smov 70  }
  0x83   :  { %18514 = sst [smem:[#allocation118_spill]] %s14552_s8 }
  0x84   :  { %18513 = sst [smem:[#allocation117_spill]] %s14542_s17 }
  0x85   :  { %s14557_s24 = sld [smem:[%s18309_s0 + %s14167_s22]]   ;;  %s14171_s22 = smov 72  }
  0x86   :  { %s14562_s17 = sld [smem:[%s18309_s0 + %s14168_s28]]  }
  0x87   :  { %s14567_s6 = sld [smem:[%s18309_s0 + %s14169_s7]]  }
  0x88   :  { %s14572_s8 = sld [smem:[%s18309_s0 + %s14170_s15]]  }
  0x8b   :  { %18515 = sst [smem:[#allocation119_spill]] %s14557_s24 }
  0x8c   :  { %s14577_s24 = sld [smem:[%s18309_s0 + %s14171_s22]]  }
  0x8d   :  { %18516 = sst [smem:[#allocation120_spill]] %s14567_s6 }
  0x8e   :  { %150 = vsyncpa [#allocation4], 0 }
  0x8f   :  { %151 = vsyncpa [#allocation6], 0 }
  0x90   :  { %152 = vsyncpa [#allocation9], 0 }
  0x91   :  { %153 = vsyncpa [#allocation12], 0 }
  0x92   :  { %154 = vsyncpa [#allocation15], 0 }
  0x93   :  { %155 = vsyncpa [#allocation18], 0 }
  0x94   :  { %156 = vsyncpa [#allocation21], 0 }
  0x95   :  { %157 = vsyncpa [#allocation24], 0 }
  0x96   :  { %158 = vsyncpa [#allocation27], 0 }
  0x97   :  { %159 = vsyncpa [#allocation30], 0 }
  0x98   :  { %160 = vsyncpa [#allocation33], 0 }
  0x99   :  { %161 = vsyncpa [#allocation36], 0 }
  0x9a   :  { %162 = vsyncpa [#allocation39], 0 }
  0x9b   :  { %163 = vsyncpa [#allocation42], 0 }
  0x9c   :  { %164 = vsyncpa [#allocation45], 0  ;;  %s14579_s28 = smov 0  }
  0x9d LB: > { %s14172_s0 = smov [#allocation5]   ;;  %s14585_s2 = sadd.s32 4294967295, %s14098_s28   ;;  %s14098_s28 = sphi %s14579_s28, %s170_s28  }
  0x9e   : > { %s1840_s1 = sshll.u32 %s14172_s0, 4  ;;  %p11359_p0 = scmp.ge.s32.totalorder %s14098_s28, 1  ;;  %s1841_s1 = int_to_ptr.vmem [resolvable:$true] %s1840_s1 }
  0x9f   : > { %p1723_p1 = scmp.lt.s32.totalorder %s14098_s28, 3  ;;  %p18333_p2 = scmp.eq.s32.totalorder %s14585_s2, 0 }
  0xa0   : > { %s14173_s10 = smov [#allocation8]   ;;  %s14174_s15 = smov [#allocation11]  }
  0xa1   : > { %p14590_p3 = pnand %p11359_p0, %p1723_p1  ;;  %s1862_s11 = sshll.u32 %s14173_s10, 4  ;;  %s14596_s11 = int_to_ptr.vmem [resolvable:$true] %s1862_s11 }
  0xa2   : > { %s1887_s16 = sshll.u32 %s14174_s15, 4  ;;  %s14175_s22 = smov [#allocation14]   ;;  %s14604_s16 = int_to_ptr.vmem [resolvable:$true] %s1887_s16 }
  0xa3   : > { %s18517_s7 = scalar_select %p14590_p3, 1, 0 }
  0xa4   : > { %p12756_p4 = pneg %p14590_p3  ;;  %s1912_s23 = sshll.u32 %s14175_s22, 4  ;;  %s14606_s23 = int_to_ptr.vmem [resolvable:$true] %s1912_s23 }
  0xa5   : > { %s13315_s0 = scalar_lea.vmem %s1841_s1, 16  ;;  %s13322_s10 = scalar_lea.vmem %s1841_s1, 32 }
  0xa6   : > { %p14600_p5 = pnand %p18333_p2, %p12756_p4  ;;  %p13316_p7 = scmp.ne.s32.totalorder %s1841_s1, %s13315_s0 }
  0xa7   : > { %p13323_p10 = scmp.lt.s32.totalorder %s1841_s1, %s1841_s1  ;;  %p13324_p11 = scmp.lt.s32.totalorder %s13322_s10, %s13315_s0 }
  0xa8   : > { %p14610_p6 = pneg %p14600_p5 }
  0xa9   : > { %p13325_p12 = por %p13324_p11, %p13323_p10 }
  0xaa   : > { %p13318_p8 = pnand %p13316_p7, %p14610_p6 }
  0xac   : > { %p13319_p9 = pneg %p13318_p8 }
  0xae   : > { %p13326_p13 = pnand %p13325_p12, %p13319_p9 }
  0xb0   : > { %13329 = shalt.err (!%p13326_p13)
}
  0xb1   : > { %s18520_s9 = sld [smem:[#allocation95_spill]]  ;;  %s13341_s15 = scalar_lea.vmem %s14596_s11, 16 }
  0xb2   : > { %p13342_p0 = scmp.ne.s32.totalorder %s14596_s11, %s13341_s15  ;;  %s13348_s22 = scalar_lea.vmem %s14596_s11, 32 }
  0xb3   : > { %p13349_p7 = scmp.lt.s32.totalorder %s14596_s11, %s14596_s11  ;;  %p13350_p8 = scmp.lt.s32.totalorder %s13348_s22, %s13341_s15 }
  0xb4   : > { %p13344_p1 = pnand %p13342_p0, %p14610_p6 }
  0xb5   : > { %p13351_p9 = por %p13350_p8, %p13349_p7 }
  0xb6   : > { %p13345_p4 = pneg %p13344_p1 }
  0xb7   : > { %12762 = dma.hbm_to_vmem [thread:$0]  (!%p14600_p5), %s18520_s9, 16, %s1841_s1, [#allocation6]  }
  0xb8   : > { %p13352_p10 = pnand %p13351_p9, %p13345_p4 }
  0xba   : > { %13355 = shalt.err (!%p13352_p10)
}
  0xbb   : > { %12768 = dma.hbm_to_vmem [thread:$0]  (!%p14600_p5), %s14397_s27, 16, %s14596_s11, [#allocation9]  }
  0xbc   : > { %s13367_s1 = scalar_lea.vmem %s14604_s16, 16  ;;  %s13374_s0 = scalar_lea.vmem %s14604_s16, 32 }
  0xbd   : > { %p13368_p11 = scmp.ne.s32.totalorder %s14604_s16, %s13367_s1  ;;  %p13375_p0 = scmp.lt.s32.totalorder %s14604_s16, %s14604_s16 }
  0xbe   : > { %p13376_p1 = scmp.lt.s32.totalorder %s13374_s0, %s13367_s1 }
  0xbf   : > { %p13370_p12 = pnand %p13368_p11, %p14610_p6 }
  0xc0   : > { %p13377_p4 = por %p13376_p1, %p13375_p0 }
  0xc1   : > { %p13371_p13 = pneg %p13370_p12 }
  0xc3   : > { %p13378_p7 = pnand %p13377_p4, %p13371_p13 }
  0xc5   : > { %13381 = shalt.err (!%p13378_p7)
}
  0xc6   : > { %12774 = dma.hbm_to_vmem [thread:$0]  (!%p14600_p5), %s14412_s30, 16, %s14604_s16, [#allocation12]  }
  0xc7   : > { %s13393_s11 = scalar_lea.vmem %s14606_s23, 16  ;;  %s13400_s10 = scalar_lea.vmem %s14606_s23, 32 }
  0xc8   : > { %p13394_p8 = scmp.ne.s32.totalorder %s14606_s23, %s13393_s11  ;;  %p13401_p11 = scmp.lt.s32.totalorder %s14606_s23, %s14606_s23 }
  0xc9   : > { %p13402_p12 = scmp.lt.s32.totalorder %s13400_s10, %s13393_s11 }
  0xca   : > { %p13396_p9 = pnand %p13394_p8, %p14610_p6 }
  0xcb   : > { %p13403_p13 = por %p13402_p12, %p13401_p11 }
  0xcc   : > { %p13397_p10 = pneg %p13396_p9 }
  0xce   : > { %p13404_p0 = pnand %p13403_p13, %p13397_p10 }
  0xd0   : > { %13407 = shalt.err (!%p13404_p0)
}
  0xd1   : > { %12780 = dma.hbm_to_vmem [thread:$0]  (!%p14600_p5), %s14427_s20, 16, %s14606_s23, [#allocation15]  }
  0xd2   : > { %s14176_s15 = smov [#allocation17]   ;;  %s14177_s22 = smov [#allocation20]  }
  0xd3   : > { %s1937_s16 = sshll.u32 %s14176_s15, 4  ;;  %s1962_s1 = sshll.u32 %s14177_s22, 4  ;;  %s1938_s16 = int_to_ptr.vmem [resolvable:$true] %s1937_s16  ;;  %s1963_s1 = int_to_ptr.vmem [resolvable:$true] %s1962_s1 }
  0xd4   : > { %s13419_s0 = scalar_lea.vmem %s1938_s16, 16  ;;  %s13426_s11 = scalar_lea.vmem %s1938_s16, 32 }
  0xd5   : > { %p13420_p1 = scmp.ne.s32.totalorder %s1938_s16, %s13419_s0  ;;  %p13427_p8 = scmp.lt.s32.totalorder %s1938_s16, %s1938_s16 }
  0xd6   : > { %p13428_p9 = scmp.lt.s32.totalorder %s13426_s11, %s13419_s0 }
  0xd7   : > { %p13422_p4 = pnand %p13420_p1, %p14610_p6 }
  0xd8   : > { %p13429_p10 = por %p13428_p9, %p13427_p8 }
  0xd9   : > { %p13423_p7 = pneg %p13422_p4 }
  0xdb   : > { %p13430_p11 = pnand %p13429_p10, %p13423_p7 }
  0xdd   : > { %13433 = shalt.err (!%p13430_p11)
}
  0xde   : > { %12786 = dma.hbm_to_vmem [thread:$0]  (!%p14600_p5), %s14442_s19, 16, %s1938_s16, [#allocation18]  }
  0xdf   : > { %s13445_s23 = scalar_lea.vmem %s1963_s1, 16  ;;  %s13452_s10 = scalar_lea.vmem %s1963_s1, 32 }
  0xe0   : > { %p13446_p12 = scmp.ne.s32.totalorder %s1963_s1, %s13445_s23  ;;  %p13453_p1 = scmp.lt.s32.totalorder %s1963_s1, %s1963_s1 }
  0xe1   : > { %p13454_p4 = scmp.lt.s32.totalorder %s13452_s10, %s13445_s23 }
  0xe2   : > { %p13448_p13 = pnand %p13446_p12, %p14610_p6 }
  0xe3   : > { %p13455_p2 = por %p13454_p4, %p13453_p1 }
  0xe4   : > { %p13449_p0 = pneg %p13448_p13 }
  0xe6   : > { %p13456_p3 = pnand %p13455_p2, %p13449_p0 }
  0xe8   : > { %13459 = shalt.err (!%p13456_p3)
}
  0xe9   : > { %12792 = dma.hbm_to_vmem [thread:$0]  (!%p14600_p5), %s14457_s13, 16, %s1963_s1, [#allocation21]  }
  0xea   : > { %s14178_s15 = smov [#allocation23]   ;;  %s14179_s16 = smov [#allocation26]  }
  0xeb   : > { %s1987_s22 = sshll.u32 %s14178_s15, 4  ;;  %s2012_s0 = sshll.u32 %s14179_s16, 4  ;;  %s1988_s22 = int_to_ptr.vmem [resolvable:$true] %s1987_s22  ;;  %s2013_s0 = int_to_ptr.vmem [resolvable:$true] %s2012_s0 }
  0xec   : > { %s13471_s11 = scalar_lea.vmem %s1988_s22, 16  ;;  %s13478_s9 = scalar_lea.vmem %s1988_s22, 32 }
  0xed   : > { %p13472_p7 = scmp.ne.s32.totalorder %s1988_s22, %s13471_s11  ;;  %p13479_p10 = scmp.lt.s32.totalorder %s1988_s22, %s1988_s22 }
  0xee   : > { %p13480_p11 = scmp.lt.s32.totalorder %s13478_s9, %s13471_s11 }
  0xef   : > { %p13474_p8 = pnand %p13472_p7, %p14610_p6 }
  0xf0   : > { %p13481_p2 = por %p13480_p11, %p13479_p10 }
  0xf1   : > { %p13475_p9 = pneg %p13474_p8 }
  0xf3   : > { %p13482_p3 = pnand %p13481_p2, %p13475_p9 }
  0xf5   : > { %13485 = shalt.err (!%p13482_p3)
}
  0xf6   : > { %12798 = dma.hbm_to_vmem [thread:$0]  (!%p14600_p5), %s14472_s14, 16, %s1988_s22, [#allocation24]  }
  0xf7   : > { %s13497_s1 = scalar_lea.vmem %s2013_s0, 16  ;;  %s13504_s23 = scalar_lea.vmem %s2013_s0, 32 }
  0xf8   : > { %p13498_p12 = scmp.ne.s32.totalorder %s2013_s0, %s13497_s1  ;;  %p13505_p1 = scmp.lt.s32.totalorder %s2013_s0, %s2013_s0 }
  0xf9   : > { %p13506_p4 = scmp.lt.s32.totalorder %s13504_s23, %s13497_s1 }
  0xfa   : > { %p13500_p13 = pnand %p13498_p12, %p14610_p6 }
  0xfb   : > { %p13507_p7 = por %p13506_p4, %p13505_p1 }
  0xfc   : > { %p13501_p0 = pneg %p13500_p13 }
  0xfe   : > { %p13508_p8 = pnand %p13507_p7, %p13501_p0 }
 0x100   : > { %13511 = shalt.err (!%p13508_p8)
}
 0x101   : > { %12804 = dma.hbm_to_vmem [thread:$0]  (!%p14600_p5), %s14487_s29, 16, %s2013_s0, [#allocation27]  }
 0x102   : > { %s14180_s9 = smov [#allocation29]   ;;  %s14181_s15 = smov [#allocation32]  }
 0x103   : > { %s2037_s10 = sshll.u32 %s14180_s9, 4  ;;  %s2062_s22 = sshll.u32 %s14181_s15, 4  ;;  %s2038_s10 = int_to_ptr.vmem [resolvable:$true] %s2037_s10  ;;  %s2063_s22 = int_to_ptr.vmem [resolvable:$true] %s2062_s22 }
 0x104   : > { %s13523_s16 = scalar_lea.vmem %s2038_s10, 16  ;;  %s13530_s11 = scalar_lea.vmem %s2038_s10, 32 }
 0x105   : > { %p13524_p9 = scmp.ne.s32.totalorder %s2038_s10, %s13523_s16  ;;  %p13531_p2 = scmp.lt.s32.totalorder %s2038_s10, %s2038_s10 }
 0x106   : > { %p13532_p3 = scmp.lt.s32.totalorder %s13530_s11, %s13523_s16 }
 0x107   : > { %p13526_p10 = pnand %p13524_p9, %p14610_p6 }
 0x108   : > { %p13533_p12 = por %p13532_p3, %p13531_p2 }
 0x109   : > { %p13527_p11 = pneg %p13526_p10 }
 0x10b   : > { %p13534_p13 = pnand %p13533_p12, %p13527_p11 }
 0x10d   : > { %13537 = shalt.err (!%p13534_p13)
}
 0x10e   : > { %s18521_s3 = sld [smem:[#allocation110_spill]]  ;;  %s13549_s0 = scalar_lea.vmem %s2063_s22, 16 }
 0x10f   : > { %p13550_p0 = scmp.ne.s32.totalorder %s2063_s22, %s13549_s0  ;;  %s13556_s1 = scalar_lea.vmem %s2063_s22, 32 }
 0x110   : > { %p13557_p7 = scmp.lt.s32.totalorder %s2063_s22, %s2063_s22  ;;  %p13558_p8 = scmp.lt.s32.totalorder %s13556_s1, %s13549_s0 }
 0x111   : > { %p13552_p1 = pnand %p13550_p0, %p14610_p6 }
 0x112   : > { %p13559_p9 = por %p13558_p8, %p13557_p7 }
 0x113   : > { %p13553_p4 = pneg %p13552_p1 }
 0x114   : > { %12810 = dma.hbm_to_vmem [thread:$0]  (!%p14600_p5), %s18521_s3, 16, %s2038_s10, [#allocation30]  }
 0x115   : > { %p13560_p10 = pnand %p13559_p9, %p13553_p4 }
 0x117   : > { %13563 = shalt.err (!%p13560_p10)
}
 0x118   : > { %12816 = dma.hbm_to_vmem [thread:$0]  (!%p14600_p5), %s14517_s21, 16, %s2063_s22, [#allocation33]  }
 0x119   : > { %s14182_s23 = smov [#allocation35]   ;;  %s14183_s10 = smov [#allocation38]  }
 0x11a   : > { %s2087_s9 = sshll.u32 %s14182_s23, 4  ;;  %s2112_s15 = sshll.u32 %s14183_s10, 4  ;;  %s2088_s9 = int_to_ptr.vmem [resolvable:$true] %s2087_s9  ;;  %s2113_s15 = int_to_ptr.vmem [resolvable:$true] %s2112_s15 }
 0x11b   : > { %s13575_s16 = scalar_lea.vmem %s2088_s9, 16  ;;  %s13582_s11 = scalar_lea.vmem %s2088_s9, 32 }
 0x11c   : > { %p13576_p11 = scmp.ne.s32.totalorder %s2088_s9, %s13575_s16  ;;  %p13583_p12 = scmp.lt.s32.totalorder %s2088_s9, %s2088_s9 }
 0x11d   : > { %p13584_p13 = scmp.lt.s32.totalorder %s13582_s11, %s13575_s16 }
 0x11e   : > { %p13578_p2 = pnand %p13576_p11, %p14610_p6 }
 0x11f   : > { %p13585_p0 = por %p13584_p13, %p13583_p12 }
 0x120   : > { %p13579_p3 = pneg %p13578_p2 }
 0x122   : > { %p13586_p1 = pnand %p13585_p0, %p13579_p3 }
 0x124   : > { %13589 = shalt.err (!%p13586_p1)
}
 0x125   : > { %s18522_s5 = sld [smem:[#allocation115_spill]]  ;;  %s13601_s22 = scalar_lea.vmem %s2113_s15, 16 }
 0x126   : > { %p13602_p4 = scmp.ne.s32.totalorder %s2113_s15, %s13601_s22  ;;  %s13608_s0 = scalar_lea.vmem %s2113_s15, 32 }
 0x127   : > { %p13609_p9 = scmp.lt.s32.totalorder %s2113_s15, %s2113_s15  ;;  %p13610_p10 = scmp.lt.s32.totalorder %s13608_s0, %s13601_s22 }
 0x128   : > { %p13604_p7 = pnand %p13602_p4, %p14610_p6 }
 0x129   : > { %p13611_p11 = por %p13610_p10, %p13609_p9 }
 0x12a   : > { %p13605_p8 = pneg %p13604_p7 }
 0x12b   : > { %12822 = dma.hbm_to_vmem [thread:$0]  (!%p14600_p5), %s18522_s5, 16, %s2088_s9, [#allocation36]  }
 0x12c   : > { %p13612_p2 = pnand %p13611_p11, %p13605_p8 }
 0x12e   : > { %13615 = shalt.err (!%p13612_p2)
}
 0x12f   : > { %12828 = dma.hbm_to_vmem [thread:$0]  (!%p14600_p5), %s14547_s25, 16, %s2113_s15, [#allocation39]  }
 0x130   : > { %s14184_s1 = smov [#allocation41]   ;;  %s14185_s9 = smov [#allocation3]  }
 0x131   : > { %s2137_s23 = sshll.u32 %s14184_s1, 4  ;;  %s1829_s10 = sshll.u32 %s14185_s9, 4  ;;  %s2138_s23 = int_to_ptr.vmem [resolvable:$true] %s2137_s23  ;;  %s1830_s10 = int_to_ptr.vmem [resolvable:$true] %s1829_s10 }
 0x132   : > { %s13627_s16 = scalar_lea.vmem %s2138_s23, 16  ;;  %s13634_s11 = scalar_lea.vmem %s2138_s23, 32 }
 0x133   : > { %p13628_p3 = scmp.ne.s32.totalorder %s2138_s23, %s13627_s16  ;;  %p13635_p0 = scmp.lt.s32.totalorder %s2138_s23, %s2138_s23 }
 0x134   : > { %p13636_p1 = scmp.lt.s32.totalorder %s13634_s11, %s13627_s16 }
 0x135   : > { %p13630_p12 = pnand %p13628_p3, %p14610_p6 }
 0x136   : > { %p13637_p4 = por %p13636_p1, %p13635_p0 }
 0x137   : > { %p13631_p13 = pneg %p13630_p12 }
 0x139   : > { %p13638_p7 = pnand %p13637_p4, %p13631_p13 }
 0x13b   : > { %13641 = shalt.err (!%p13638_p7)
}
 0x13c   : > { %12834 = dma.hbm_to_vmem [thread:$0]  (!%p14600_p5), %s14562_s17, 16, %s2138_s23, [#allocation42]  }
 0x13d   : > { %s13653_s15 = scalar_lea.vmem %s1830_s10, 16  ;;  %s13660_s22 = scalar_lea.vmem %s1830_s10, 32 }
 0x13e   : > { %p13654_p8 = scmp.ne.s32.totalorder %s1830_s10, %s13653_s15  ;;  %p13661_p11 = scmp.lt.s32.totalorder %s1830_s10, %s1830_s10 }
 0x13f   : > { %p13662_p2 = scmp.lt.s32.totalorder %s13660_s22, %s13653_s15 }
 0x140   : > { %p13656_p9 = pnand %p13654_p8, %p14610_p6 }
 0x141   : > { %p13663_p3 = por %p13662_p2, %p13661_p11 }
 0x142   : > { %p13657_p10 = pneg %p13656_p9 }
 0x144   : > { %p13664_p12 = pnand %p13663_p3, %p13657_p10 }
 0x146   : > { %13667 = shalt.err (!%p13664_p12)
}
 0x147   : > { %s18523_s4 = sld [smem:[#allocation94_spill]]  ;;  %s14186_s0 = smov [#allocation7]  }
 0x148   : > { %s1851_s1 = sshll.u32 %s14186_s0, 4  ;;  %s14187_s23 = smov [#allocation10]   ;;  %s1852_s1 = int_to_ptr.vmem [resolvable:$true] %s1851_s1 }
 0x149   : > { %s1873_s9 = sshll.u32 %s14187_s23, 4  ;;  %s13679_s16 = scalar_lea.vmem %s1852_s1, 16  ;;  %s1874_s9 = int_to_ptr.vmem [resolvable:$true] %s1873_s9 }
 0x14a   : > { %p13680_p13 = scmp.ne.s32.totalorder %s1852_s1, %s13679_s16  ;;  %s13686_s11 = scalar_lea.vmem %s1852_s1, 32 }
 0x14b   : > { %p13687_p4 = scmp.lt.s32.totalorder %s1852_s1, %s1852_s1  ;;  %p13688_p7 = scmp.lt.s32.totalorder %s13686_s11, %s13679_s16 }
 0x14c   : > { %p13682_p0 = pnand %p13680_p13, %p14610_p6 }
 0x14d   : > { %12759 = dma.hbm_to_vmem [thread:$0]  (!%p14600_p5), %s18523_s4, 16, %s1830_s10, [#allocation4]  }
 0x14e   : > { %p13683_p1 = pneg %p13682_p0  ;;  %p13689_p8 = por %p13688_p7, %p13687_p4 }
 0x150   : > { %p13690_p9 = pnand %p13689_p8, %p13683_p1 }
 0x152   : > { %13693 = shalt.err (!%p13690_p9)
}
 0x153   : > { %12765 = dma.hbm_to_vmem [thread:$0]  (!%p14600_p5), %s14392_s12, 16, %s1852_s1, [#allocation6]  }
 0x154   : > { %s13705_s10 = scalar_lea.vmem %s1874_s9, 16  ;;  %s13712_s15 = scalar_lea.vmem %s1874_s9, 32 }
 0x155   : > { %p13706_p10 = scmp.ne.s32.totalorder %s1874_s9, %s13705_s10  ;;  %p13713_p3 = scmp.lt.s32.totalorder %s1874_s9, %s1874_s9 }
 0x156   : > { %p13714_p12 = scmp.lt.s32.totalorder %s13712_s15, %s13705_s10 }
 0x157   : > { %p13708_p11 = pnand %p13706_p10, %p14610_p6 }
 0x158   : > { %p13715_p13 = por %p13714_p12, %p13713_p3 }
 0x159   : > { %p13709_p2 = pneg %p13708_p11 }
 0x15b   : > { %p13716_p0 = pnand %p13715_p13, %p13709_p2 }
 0x15d   : > { %13719 = shalt.err (!%p13716_p0)
}
 0x15e   : > { %s18524_s22 = sld [smem:[#allocation96_spill]]  ;;  %s14188_s0 = smov [#allocation13]  }
 0x15f   : > { %s1898_s23 = sshll.u32 %s14188_s0, 4  ;;  %s14189_s1 = smov [#allocation16]   ;;  %s1899_s23 = int_to_ptr.vmem [resolvable:$true] %s1898_s23 }
 0x160   : > { %s1926_s16 = sshll.u32 %s14189_s1, 4  ;;  %s13731_s11 = scalar_lea.vmem %s1899_s23, 16  ;;  %s1927_s16 = int_to_ptr.vmem [resolvable:$true] %s1926_s16 }
 0x161   : > { %p13732_p1 = scmp.ne.s32.totalorder %s1899_s23, %s13731_s11  ;;  %s13738_s3 = scalar_lea.vmem %s1899_s23, 32 }
 0x162   : > { %p13739_p8 = scmp.lt.s32.totalorder %s1899_s23, %s1899_s23  ;;  %p13740_p9 = scmp.lt.s32.totalorder %s13738_s3, %s13731_s11 }
 0x163   : > { %p13734_p4 = pnand %p13732_p1, %p14610_p6 }
 0x164   : > { %12771 = dma.hbm_to_vmem [thread:$0]  (!%p14600_p5), %s18524_s22, 16, %s1874_s9, [#allocation9]  }
 0x165   : > { %p13735_p7 = pneg %p13734_p4  ;;  %p13741_p10 = por %p13740_p9, %p13739_p8 }
 0x167   : > { %p13742_p11 = pnand %p13741_p10, %p13735_p7 }
 0x169   : > { %13745 = shalt.err (!%p13742_p11)
}
 0x16a   : > { %s18525_s10 = sld [smem:[#allocation98_spill]]  ;;  %s13757_s9 = scalar_lea.vmem %s1927_s16, 16 }
 0x16b   : > { %p13758_p2 = scmp.ne.s32.totalorder %s1927_s16, %s13757_s9  ;;  %s13764_s15 = scalar_lea.vmem %s1927_s16, 32 }
 0x16c   : > { %p13765_p13 = scmp.lt.s32.totalorder %s1927_s16, %s1927_s16  ;;  %p13766_p0 = scmp.lt.s32.totalorder %s13764_s15, %s13757_s9 }
 0x16d   : > { %p13760_p3 = pnand %p13758_p2, %p14610_p6 }
 0x16e   : > { %p13767_p1 = por %p13766_p0, %p13765_p13 }
 0x16f   : > { %p13761_p12 = pneg %p13760_p3 }
 0x170   : > { %12777 = dma.hbm_to_vmem [thread:$0]  (!%p14600_p5), %s18525_s10, 16, %s1899_s23, [#allocation12]  }
 0x171   : > { %p13768_p4 = pnand %p13767_p1, %p13761_p12 }
 0x173   : > { %13771 = shalt.err (!%p13768_p4)
}
 0x174   : > { %s18526_s3 = sld [smem:[#allocation101_spill]]  ;;  %s14190_s22 = smov [#allocation19]  }
 0x175   : > { %s1948_s0 = sshll.u32 %s14190_s22, 4  ;;  %s14191_s23 = smov [#allocation22]   ;;  %s1949_s0 = int_to_ptr.vmem [resolvable:$true] %s1948_s0 }
 0x176   : > { %s1976_s1 = sshll.u32 %s14191_s23, 4  ;;  %s13783_s11 = scalar_lea.vmem %s1949_s0, 16  ;;  %s1977_s1 = int_to_ptr.vmem [resolvable:$true] %s1976_s1 }
 0x177   : > { %p13784_p7 = scmp.ne.s32.totalorder %s1949_s0, %s13783_s11  ;;  %s13790_s10 = scalar_lea.vmem %s1949_s0, 32 }
 0x178   : > { %p13791_p10 = scmp.lt.s32.totalorder %s1949_s0, %s1949_s0  ;;  %p13792_p11 = scmp.lt.s32.totalorder %s13790_s10, %s13783_s11 }
 0x179   : > { %p13786_p8 = pnand %p13784_p7, %p14610_p6 }
 0x17a   : > { %12783 = dma.hbm_to_vmem [thread:$0]  (!%p14600_p5), %s18526_s3, 16, %s1927_s16, [#allocation15]  }
 0x17b   : > { %p13787_p9 = pneg %p13786_p8  ;;  %p13793_p2 = por %p13792_p11, %p13791_p10 }
 0x17d   : > { %p13794_p3 = pnand %p13793_p2, %p13787_p9 }
 0x17f   : > { %13797 = shalt.err (!%p13794_p3)
}
 0x180   : > { %s18527_s9 = sld [smem:[#allocation102_spill]]  ;;  %s13809_s16 = scalar_lea.vmem %s1977_s1, 16 }
 0x181   : > { %p13810_p12 = scmp.ne.s32.totalorder %s1977_s1, %s13809_s16  ;;  %s13816_s15 = scalar_lea.vmem %s1977_s1, 32 }
 0x182   : > { %p13817_p1 = scmp.lt.s32.totalorder %s1977_s1, %s1977_s1  ;;  %p13818_p4 = scmp.lt.s32.totalorder %s13816_s15, %s13809_s16 }
 0x183   : > { %p13812_p13 = pnand %p13810_p12, %p14610_p6 }
 0x184   : > { %p13819_p7 = por %p13818_p4, %p13817_p1 }
 0x185   : > { %p13813_p0 = pneg %p13812_p13 }
 0x186   : > { %12789 = dma.hbm_to_vmem [thread:$0]  (!%p14600_p5), %s18527_s9, 16, %s1949_s0, [#allocation18]  }
 0x187   : > { %p13820_p8 = pnand %p13819_p7, %p13813_p0 }
 0x189   : > { %13823 = shalt.err (!%p13820_p8)
}
 0x18a   : > { %s18528_s3 = sld [smem:[#allocation105_spill]]  ;;  %s14192_s22 = smov [#allocation25]  }
 0x18b   : > { %s1998_s23 = sshll.u32 %s14192_s22, 4  ;;  %s14193_s0 = smov [#allocation28]   ;;  %s1999_s23 = int_to_ptr.vmem [resolvable:$true] %s1998_s23 }
 0x18c   : > { %s2023_s11 = sshll.u32 %s14193_s0, 4  ;;  %s13835_s10 = scalar_lea.vmem %s1999_s23, 16  ;;  %s2024_s11 = int_to_ptr.vmem [resolvable:$true] %s2023_s11 }
 0x18d   : > { %p13836_p9 = scmp.ne.s32.totalorder %s1999_s23, %s13835_s10  ;;  %s13842_s9 = scalar_lea.vmem %s1999_s23, 32 }
 0x18e   : > { %p13843_p2 = scmp.lt.s32.totalorder %s1999_s23, %s1999_s23  ;;  %p13844_p3 = scmp.lt.s32.totalorder %s13842_s9, %s13835_s10 }
 0x18f   : > { %p13838_p10 = pnand %p13836_p9, %p14610_p6 }
 0x190   : > { %12795 = dma.hbm_to_vmem [thread:$0]  (!%p14600_p5), %s18528_s3, 16, %s1977_s1, [#allocation21]  }
 0x191   : > { %p13839_p11 = pneg %p13838_p10  ;;  %p13845_p12 = por %p13844_p3, %p13843_p2 }
 0x193   : > { %p13846_p13 = pnand %p13845_p12, %p13839_p11 }
 0x195   : > { %13849 = shalt.err (!%p13846_p13)
}
 0x196   : > { %s18529_s16 = sld [smem:[#allocation106_spill]]  ;;  %s13861_s1 = scalar_lea.vmem %s2024_s11, 16 }
 0x197   : > { %p13862_p0 = scmp.ne.s32.totalorder %s2024_s11, %s13861_s1  ;;  %s13868_s15 = scalar_lea.vmem %s2024_s11, 32 }
 0x198   : > { %p13869_p7 = scmp.lt.s32.totalorder %s2024_s11, %s2024_s11  ;;  %p13870_p8 = scmp.lt.s32.totalorder %s13868_s15, %s13861_s1 }
 0x199   : > { %p13864_p1 = pnand %p13862_p0, %p14610_p6 }
 0x19a   : > { %p13871_p9 = por %p13870_p8, %p13869_p7 }
 0x19b   : > { %p13865_p4 = pneg %p13864_p1 }
 0x19c   : > { %12801 = dma.hbm_to_vmem [thread:$0]  (!%p14600_p5), %s18529_s16, 16, %s1999_s23, [#allocation24]  }
 0x19d   : > { %p13872_p10 = pnand %p13871_p9, %p13865_p4 }
 0x19f   : > { %13875 = shalt.err (!%p13872_p10)
}
 0x1a0   : > { %s18530_s3 = sld [smem:[#allocation108_spill]]  ;;  %s14194_s22 = smov [#allocation31]  }
 0x1a1   : > { %s2051_s0 = sshll.u32 %s14194_s22, 4  ;;  %s14195_s23 = smov [#allocation34]   ;;  %s2052_s0 = int_to_ptr.vmem [resolvable:$true] %s2051_s0 }
 0x1a2   : > { %s2073_s10 = sshll.u32 %s14195_s23, 4  ;;  %s13887_s9 = scalar_lea.vmem %s2052_s0, 16  ;;  %s2074_s10 = int_to_ptr.vmem [resolvable:$true] %s2073_s10 }
 0x1a3   : > { %p13888_p11 = scmp.ne.s32.totalorder %s2052_s0, %s13887_s9  ;;  %s13894_s16 = scalar_lea.vmem %s2052_s0, 32 }
 0x1a4   : > { %p13895_p12 = scmp.lt.s32.totalorder %s2052_s0, %s2052_s0  ;;  %p13896_p13 = scmp.lt.s32.totalorder %s13894_s16, %s13887_s9 }
 0x1a5   : > { %p13890_p2 = pnand %p13888_p11, %p14610_p6 }
 0x1a6   : > { %12807 = dma.hbm_to_vmem [thread:$0]  (!%p14600_p5), %s18530_s3, 16, %s2024_s11, [#allocation27]  }
 0x1a7   : > { %p13891_p3 = pneg %p13890_p2  ;;  %p13897_p0 = por %p13896_p13, %p13895_p12 }
 0x1a9   : > { %p13898_p1 = pnand %p13897_p0, %p13891_p3 }
 0x1ab   : > { %13901 = shalt.err (!%p13898_p1)
}
 0x1ac   : > { %s18531_s1 = sld [smem:[#allocation112_spill]]  ;;  %s13913_s11 = scalar_lea.vmem %s2074_s10, 16 }
 0x1ad   : > { %p13914_p4 = scmp.ne.s32.totalorder %s2074_s10, %s13913_s11  ;;  %s13920_s15 = scalar_lea.vmem %s2074_s10, 32 }
 0x1ae   : > { %p13921_p9 = scmp.lt.s32.totalorder %s2074_s10, %s2074_s10  ;;  %p13922_p10 = scmp.lt.s32.totalorder %s13920_s15, %s13913_s11 }
 0x1af   : > { %p13916_p7 = pnand %p13914_p4, %p14610_p6 }
 0x1b0   : > { %p13923_p11 = por %p13922_p10, %p13921_p9 }
 0x1b1   : > { %p13917_p8 = pneg %p13916_p7 }
 0x1b2   : > { %12813 = dma.hbm_to_vmem [thread:$0]  (!%p14600_p5), %s18531_s1, 16, %s2052_s0, [#allocation30]  }
 0x1b3   : > { %p13924_p2 = pnand %p13923_p11, %p13917_p8 }
 0x1b5   : > { %13927 = shalt.err (!%p13924_p2)
}
 0x1b6   : > { %s18532_s3 = sld [smem:[#allocation113_spill]]  ;;  %s14196_s22 = smov [#allocation37]  }
 0x1b7   : > { %s2101_s23 = sshll.u32 %s14196_s22, 4  ;;  %s14197_s0 = smov [#allocation40]   ;;  %s2102_s23 = int_to_ptr.vmem [resolvable:$true] %s2101_s23 }
 0x1b8   : > { %s2123_s9 = sshll.u32 %s14197_s0, 4  ;;  %s13939_s16 = scalar_lea.vmem %s2102_s23, 16  ;;  %s2124_s9 = int_to_ptr.vmem [resolvable:$true] %s2123_s9 }
 0x1b9   : > { %p13940_p3 = scmp.ne.s32.totalorder %s2102_s23, %s13939_s16  ;;  %s13946_s1 = scalar_lea.vmem %s2102_s23, 32 }
 0x1ba   : > { %p13947_p0 = scmp.lt.s32.totalorder %s2102_s23, %s2102_s23  ;;  %p13948_p1 = scmp.lt.s32.totalorder %s13946_s1, %s13939_s16 }
 0x1bb   : > { %p13942_p12 = pnand %p13940_p3, %p14610_p6 }
 0x1bc   : > { %12819 = dma.hbm_to_vmem [thread:$0]  (!%p14600_p5), %s18532_s3, 16, %s2074_s10, [#allocation33]  }
 0x1bd   : > { %p13943_p13 = pneg %p13942_p12  ;;  %p13949_p4 = por %p13948_p1, %p13947_p0 }
 0x1bf   : > { %p13950_p7 = pnand %p13949_p4, %p13943_p13 }
 0x1c1   : > { %13953 = shalt.err (!%p13950_p7)
}
 0x1c2   : > { %s18533_s11 = sld [smem:[#allocation117_spill]]  ;;  %s13965_s10 = scalar_lea.vmem %s2124_s9, 16 }
 0x1c3   : > { %p13966_p8 = scmp.ne.s32.totalorder %s2124_s9, %s13965_s10  ;;  %s13972_s15 = scalar_lea.vmem %s2124_s9, 32 }
 0x1c4   : > { %p13973_p11 = scmp.lt.s32.totalorder %s2124_s9, %s2124_s9  ;;  %p13974_p2 = scmp.lt.s32.totalorder %s13972_s15, %s13965_s10 }
 0x1c5   : > { %p13968_p9 = pnand %p13966_p8, %p14610_p6 }
 0x1c6   : > { %p13975_p3 = por %p13974_p2, %p13973_p11 }
 0x1c7   : > { %p13969_p10 = pneg %p13968_p9 }
 0x1c8   : > { %12825 = dma.hbm_to_vmem [thread:$0]  (!%p14600_p5), %s18533_s11, 16, %s2102_s23, [#allocation36]  }
 0x1c9   : > { %p13976_p12 = pnand %p13975_p3, %p13969_p10 }
 0x1cb   : > { %13979 = shalt.err (!%p13976_p12)
}
 0x1cc   : > { %s18534_s3 = sld [smem:[#allocation118_spill]]  ;;  %s14198_s22 = smov [#allocation43]  }
 0x1cd   : > { %s2148_s0 = sshll.u32 %s14198_s22, 4  ;;  %s14199_s23 = smov [#allocation44]   ;;  %s2149_s0 = int_to_ptr.vmem [resolvable:$true] %s2148_s0 }
 0x1ce   : > { %s2159_s16 = sshll.u32 %s14199_s23, 4  ;;  %s13991_s1 = scalar_lea.vmem %s2149_s0, 16  ;;  %s2160_s16 = int_to_ptr.vmem [resolvable:$true] %s2159_s16 }
 0x1cf   : > { %p13992_p13 = scmp.ne.s32.totalorder %s2149_s0, %s13991_s1  ;;  %s13998_s11 = scalar_lea.vmem %s2149_s0, 32 }
 0x1d0   : > { %p13999_p4 = scmp.lt.s32.totalorder %s2149_s0, %s2149_s0  ;;  %p14000_p7 = scmp.lt.s32.totalorder %s13998_s11, %s13991_s1 }
 0x1d1   : > { %p13994_p0 = pnand %p13992_p13, %p14610_p6 }
 0x1d2   : > { %12831 = dma.hbm_to_vmem [thread:$0]  (!%p14600_p5), %s18534_s3, 16, %s2124_s9, [#allocation39]  }
 0x1d3   : > { %p13995_p1 = pneg %p13994_p0  ;;  %p14001_p8 = por %p14000_p7, %p13999_p4 }
 0x1d5   : > { %p14002_p9 = pnand %p14001_p8, %p13995_p1 }
 0x1d7   : > { %14005 = shalt.err (!%p14002_p9)
}
 0x1d8   : > { %s18535_s6 = sld [smem:[#allocation120_spill]]  ;;  %s14017_s9 = scalar_lea.vmem %s2160_s16, 16 }
 0x1d9   : > { %p14018_p10 = scmp.ne.s32.totalorder %s2160_s16, %s14017_s9  ;;  %s14024_s10 = scalar_lea.vmem %s2160_s16, 32 }
 0x1da   : > { %p14025_p3 = scmp.lt.s32.totalorder %s2160_s16, %s2160_s16  ;;  %p14026_p12 = scmp.lt.s32.totalorder %s14024_s10, %s14017_s9 }
 0x1db   : > { %p14020_p11 = pnand %p14018_p10, %p14610_p6 }
 0x1dc   : > { %p14027_p13 = por %p14026_p12, %p14025_p3 }
 0x1dd   : > { %p14021_p2 = pneg %p14020_p11 }
 0x1de   : > { %12837 = dma.hbm_to_vmem [thread:$0]  (!%p14600_p5), %s18535_s6, 16, %s2149_s0, [#allocation42]  }
 0x1df   : > { %p14028_p0 = pnand %p14027_p13, %p14021_p2 }
 0x1e1   : > { %14031 = shalt.err (!%p14028_p0)
}
 0x1e2   : > { %12840 = dma.hbm_to_vmem [thread:$0]  (!%p14600_p5), %s14572_s8, 16, %s2160_s16, [#allocation45]  }
 0x1e3   : > { %p18536_p1 = scmp.ne.s32.totalorder %s18517_s7, 0 }
 0x1e5   : > { %2188 = sbr.rel (%p18536_p1) target bundleno = 9718 (0x25f6), region = 308 }
 0x1ea   : > { %p18537_p4 = scmp.eq.s32.totalorder %s14585_s2, 0 }
 0x1ec   : > { %14037 = dma.done.wait (%p18537_p4), [#allocation4], 16   ;;  %p18538_p7 = pmov %p18537_p4 }
 0x1ed   : > { %p18539_p6 = pmov %p18537_p4 }
 0x1ee   : > { %14039 = vsyncadd (%p18538_p7), [#allocation4], 4294967280 }
 0x1ef   : > { %14041 = dma.done.wait (%p18539_p6), [#allocation6], 32   ;;  %p18540_p8 = pmov %p18537_p4 }
 0x1f0   : > { %p18541_p9 = pmov %p18537_p4 }
 0x1f1   : > { %14043 = vsyncadd (%p18540_p8), [#allocation6], 4294967264 }
 0x1f2   : > { %14045 = dma.done.wait (%p18541_p9), [#allocation9], 32   ;;  %p18542_p5 = pmov %p18537_p4 }
 0x1f3   : > { %p18543_p10 = pmov %p18537_p4 }
 0x1f4   : > { %14047 = vsyncadd (%p18542_p5), [#allocation9], 4294967264 }
 0x1f5   : > { %14049 = dma.done.wait (%p18543_p10), [#allocation12], 32   ;;  %p18544_p11 = pmov %p18537_p4 }
 0x1f6   : > { %p18545_p2 = pmov %p18537_p4 }
 0x1f7   : > { %14051 = vsyncadd (%p18544_p11), [#allocation12], 4294967264 }
 0x1f8   : > { %14053 = dma.done.wait (%p18545_p2), [#allocation15], 32   ;;  %p18546_p3 = pmov %p18545_p2 }
 0x1f9   : > { %p18547_p12 = pmov %p18545_p2 }
 0x1fa   : > { %14055 = vsyncadd (%p18546_p3), [#allocation15], 4294967264 }
 0x1fb   : > { %14057 = dma.done.wait (%p18547_p12), [#allocation18], 32   ;;  %p18548_p13 = pmov %p18545_p2 }
 0x1fc   : > { %p18549_p0 = pmov %p18545_p2 }
 0x1fd   : > { %14059 = vsyncadd (%p18548_p13), [#allocation18], 4294967264 }
 0x1fe   : > { %14061 = dma.done.wait (%p18549_p0), [#allocation21], 32   ;;  %p18550_p1 = pmov %p18549_p0 }
 0x1ff   : > { %p18551_p4 = pmov %p18549_p0 }
 0x200   : > { %14063 = vsyncadd (%p18550_p1), [#allocation21], 4294967264 }
 0x201   : > { %14065 = dma.done.wait (%p18551_p4), [#allocation24], 32   ;;  %p18552_p7 = pmov %p18549_p0 }
 0x202   : > { %p18553_p6 = pmov %p18549_p0 }
 0x203   : > { %14067 = vsyncadd (%p18552_p7), [#allocation24], 4294967264 }
 0x204   : > { %14069 = dma.done.wait (%p18553_p6), [#allocation27], 32   ;;  %p18554_p8 = pmov %p18549_p0 }
 0x205   : > { %p18555_p9 = pmov %p18549_p0 }
 0x206   : > { %14071 = vsyncadd (%p18554_p8), [#allocation27], 4294967264 }
 0x207   : > { %14073 = dma.done.wait (%p18555_p9), [#allocation30], 32   ;;  %p18556_p5 = pmov %p18549_p0 }
 0x208   : > { %p18557_p10 = pmov %p18549_p0 }
 0x209   : > { %14075 = vsyncadd (%p18556_p5), [#allocation30], 4294967264 }
 0x20a   : > { %14077 = dma.done.wait (%p18557_p10), [#allocation33], 32   ;;  %p18558_p11 = pmov %p18549_p0 }
 0x20b   : > { %p18559_p2 = pmov %p18549_p0 }
 0x20c   : > { %14079 = vsyncadd (%p18558_p11), [#allocation33], 4294967264 }
 0x20d   : > { %14081 = dma.done.wait (%p18559_p2), [#allocation36], 32   ;;  %p18560_p3 = pmov %p18549_p0 }
 0x20e   : > { %p18561_p12 = pmov %p18549_p0 }
 0x20f   : > { %14083 = vsyncadd (%p18560_p3), [#allocation36], 4294967264 }
 0x210   : > { %14085 = dma.done.wait (%p18561_p12), [#allocation39], 32   ;;  %p18562_p13 = pmov %p18549_p0 }
 0x212   : > { %14087 = vsyncadd (%p18562_p13), [#allocation39], 4294967264 }
 0x213   : > { %14089 = dma.done.wait (%p18549_p0), [#allocation42], 32   ;;  %p18563_p1 = pmov %p18549_p0 }
 0x214   : > { %p18564_p4 = pmov %p18549_p0 }
 0x215   : > { %14091 = vsyncadd (%p18563_p1), [#allocation42], 4294967264 }
 0x216   : > { %14093 = dma.done.wait (%p18564_p4), [#allocation45], 16   ;;  %p18565_p7 = pmov %p18549_p0 }
 0x217   : > { %s18566_s7 = sld [smem:[#allocation61_spill]]  ;;  %p2463_p6 = scmp.lt.s32.totalorder %s14585_s2, 1  ;;  %vm2494_vm0 = vcmask 130048   ;;  %vm2847_vm1 = vcmask 261248   ;;  %vm3056_vm6 = vcmask 64512   ;;  %vm14205_vm7 = vmmov 0  }
 0x218   : > { %14095 = vsyncadd (%p18565_p7), [#allocation45], 4294967280  ;;  %s18568_s15 = sld [smem:[#allocation65_spill]]  ;;  %s18369_s0 = smov 96   ;;  %vm2982_vm8 = vcmask 523264  }
 0x219   : > { %s18926_s2 = smov (!%p2463_p6, %s14585_s2), 1  ;;  %s18569_s3 = sld [smem:[#allocation66_spill]] }
 0x21a   : > { %s14836_s18 = sshll.u32 %s18926_s2, 6  ;;  %s18567_s2 = sld [smem:[#allocation67_spill]] }
 0x21b   : > { %s18570_s22 = sld [smem:[#allocation68_spill]]  ;;  %s18375_s23 = smov 88  }
 0x21c   : > { %s18371_s16 = smov 112   ;;  %s18373_s1 = smov 104  }
 0x21d   : > { %s14840_s26 = scalar_lea.vmem %s18566_s7, %s14836_s18  ;;  %s18571_s11 = sld [smem:[#allocation63_spill]] }
 0x21e   : > { %v2499_v0 = vld [vmem:[%s14840_s26] sm:$0xff]  ;;  %v2501_v1 = vld [vmem:[%s14840_s26 + $0x10] sm:$0xff]  ;;  %v2500_v2 = vld [vmem:[%s14840_s26 + $0x8] sm:$0xff]  ;;  %s18367_s9 = smov 120   ;;  %s18572_s10 = sld [smem:[#allocation64_spill]] }
 0x21f   : > { %v2533_v3 = vsel %vm2494_vm0, %v2499_v0, 0.0  ;;  %v2539_v4 = vsel %vm2494_vm0, %v2501_v1, 0.0  ;;  %v2502_v5 = vld [vmem:[%s14840_s26 + $0x18] sm:$0xff]  ;;  %v2536_v6 = vsel %vm2494_vm0, %v2500_v2, 0.0  ;;  %v2503_v8 = vld [vmem:[%s14840_s26 + $0x20] sm:$0xff]  ;;  %v2504_v9 = vld [vmem:[%s14840_s26 + $0x28] sm:$0xff] }
 0x220   : > { %2534 = vadd.xlane.f32.xlu0 %v2533_v3  ;;  %2540 = vadd.xlane.f32.xlu1 %v2539_v4  ;;  %v2542_v7 = vsel %vm2494_vm0, %v2502_v5, 0.0  ;;  %v2545_v10 = vsel %vm2494_vm0, %v2503_v8, 0.0  ;;  %v2548_v11 = vsel %vm2494_vm0, %v2504_v9, 0.0  ;;  %v2505_v12 = vld [vmem:[%s14840_s26 + $0x30] sm:$0xff]  ;;  %v2506_v13 = vld [vmem:[%s14840_s26 + $0x38] sm:$0xff]  ;;  %v2510_v56 = vld [vmem:[%s18567_s2 + $0x8] sm:$0xff] }
 0x221   : > { %v2551_v14 = vsel %vm2494_vm0, %v2505_v12, 0.0  ;;  %v2554_v15 = vsel %vm2494_vm0, %v2506_v13, 0.0  ;;  %12044 = vmatprep.subr.mxu0 %v2510_v56  ;;  %v2509_v57 = vld [vmem:[%s18567_s2] sm:$0xff]  ;;  %s18573_s7 = sld [smem:[#allocation72_spill]] }
 0x222   : > { %12045 = vmatpush3.msra.mxu0 %v2510_v56  ;;  %s18710_s2 = sld [smem:[#allocation84_spill]] }
 0x223   : > { %12046 = vmatprep.subr.mxu0 %v2509_v57  ;;  %s18746_s4 = sld [smem:[#allocation97_spill]] }
 0x224   : > { %2537 = vadd.xlane.f32.xlu0 %v2536_v6  ;;  %2543 = vadd.xlane.f32.xlu1 %v2542_v7  ;;  %s18748_s5 = sld [smem:[#allocation90_spill]] }
 0x225   : > { %12047 = vmatpush3.msra.mxu0 %v2509_v57  ;;  %s18759_s6 = sld [smem:[#allocation100_spill]] }
 0x228   : > { %2546 = vadd.xlane.f32.xlu0 %v2545_v10  ;;  %2549 = vadd.xlane.f32.xlu1 %v2548_v11 }
 0x22c   : > { %2552 = vadd.xlane.f32.xlu0 %v2551_v14  ;;  %2555 = vadd.xlane.f32.xlu1 %v2554_v15 }
 0x2a9   : > { %v2535_v16 = vpop.xlane.xlu0 %2534  ;;  %v2541_v17 = vpop.xlane.xlu1 %2540 }
 0x2aa   : > { %v2558_v18 = vmul.f32 0.0625, %v2535_v16  ;;  %v2560_v19 = vmul.f32 0.0625, %v2541_v17 }
 0x2ac   : > { %v14858_v20 = vsub.f32 %v2499_v0, %v2558_v18  ;;  %v14860_v21 = vsub.f32 %v2501_v1, %v2560_v19  ;;  %v11424_v18 = vld [vmem:[%s18568_s15] ss:$0 sm:$0xff]  ;;  %s18365_s15 = smov 8  }
 0x2ad   : > { %v2538_v22 = vpop.xlane.xlu0 %2537  ;;  %v2544_v23 = vpop.xlane.xlu1 %2543 }
 0x2ae   : > { %v2559_v24 = vmul.f32 0.0625, %v2538_v22  ;;  %v2561_v25 = vmul.f32 0.0625, %v2544_v23  ;;  %v2574_v26 = vmul.f32 %v14858_v20, %v14858_v20  ;;  %v2576_v27 = vmul.f32 %v14860_v21, %v14860_v21  ;;  %v11425_v23 = vld [vmem:[%s18569_s3] ss:$0 sm:$0xff]  ;;  %s18582_s3 = sld [smem:[#allocation70_spill]] }
 0x2b0   : > { %v14866_v28 = vsub.f32 %v2500_v2, %v2559_v24  ;;  %v14868_v29 = vsub.f32 %v2502_v5, %v2561_v25  ;;  %v2582_v30 = vsel %vm2494_vm0, %v2574_v26, 0.0  ;;  %v2588_v33 = vsel %vm2494_vm0, %v2576_v27, 0.0 }
 0x2b1   : > { %2583 = vadd.xlane.f32.xlu0 %v2582_v30  ;;  %v2547_v31 = vpop.xlane.xlu0 %2546  ;;  %v2550_v32 = vpop.xlane.xlu1 %2549 }
 0x2b2   : > { %v2562_v34 = vmul.f32 0.0625, %v2547_v31  ;;  %v2563_v35 = vmul.f32 0.0625, %v2550_v32  ;;  %v2575_v36 = vmul.f32 %v14866_v28, %v14866_v28  ;;  %v2577_v37 = vmul.f32 %v14868_v29, %v14868_v29 }
 0x2b4   : > { %v14876_v38 = vsub.f32 %v2503_v8, %v2562_v34  ;;  %v14878_v39 = vsub.f32 %v2504_v9, %v2563_v35  ;;  %v2585_v40 = vsel %vm2494_vm0, %v2575_v36, 0.0  ;;  %v2591_v43 = vsel %vm2494_vm0, %v2577_v37, 0.0 }
 0x2b5   : > { %2589 = vadd.xlane.f32.xlu0 %v2588_v33  ;;  %2586 = vadd.xlane.f32.xlu1 %v2585_v40  ;;  %v2553_v41 = vpop.xlane.xlu0 %2552  ;;  %v2556_v42 = vpop.xlane.xlu1 %2555 }
 0x2b6   : > { %v2564_v44 = vmul.f32 0.0625, %v2553_v41  ;;  %v2565_v45 = vmul.f32 0.0625, %v2556_v42  ;;  %v2578_v46 = vmul.f32 %v14876_v38, %v14876_v38  ;;  %v2579_v47 = vmul.f32 %v14878_v39, %v14878_v39 }
 0x2b8   : > { %v14886_v48 = vsub.f32 %v2505_v12, %v2564_v44  ;;  %v14888_v49 = vsub.f32 %v2506_v13, %v2565_v45  ;;  %v2594_v50 = vsel %vm2494_vm0, %v2578_v46, 0.0  ;;  %v2597_v51 = vsel %vm2494_vm0, %v2579_v47, 0.0 }
 0x2b9   : > { %2592 = vadd.xlane.f32.xlu1 %v2591_v43  ;;  %2595 = vadd.xlane.f32.xlu0 %v2594_v50 }
 0x2ba   : > { %v2580_v52 = vmul.f32 %v14886_v48, %v14886_v48  ;;  %v2581_v53 = vmul.f32 %v14888_v49, %v14888_v49 }
 0x2bc   : > { %v2600_v54 = vsel %vm2494_vm0, %v2580_v52, 0.0  ;;  %v2603_v55 = vsel %vm2494_vm0, %v2581_v53, 0.0 }
 0x2bd   : > { %2598 = vadd.xlane.f32.xlu1 %v2597_v51  ;;  %2601 = vadd.xlane.f32.xlu0 %v2600_v54 }
 0x2c1   : > { %2604 = vadd.xlane.f32.xlu1 %v2603_v55 }
 0x33a   : > { %v2584_v58 = vpop.xlane.xlu0 %2583 }
 0x33b   : > { %v2606_v59 = vmul.f32 0.0625, %v2584_v58 }
 0x33d   : > { %v2614_v60 = vadd.f32 1e-05, %v2606_v59 }
 0x33e   : > { %v2587_v61 = vpop.xlane.xlu1 %2586  ;;  %v2590_v62 = vpop.xlane.xlu0 %2589 }
 0x33f   : > { %13016 = vrsqrt.f32 %v2614_v60  ;;  %v2607_v63 = vmul.f32 0.0625, %v2587_v61  ;;  %v2608_v0 = vmul.f32 0.0625, %v2590_v62 }
 0x341   : > { %v2615_v1 = vadd.f32 1e-05, %v2607_v63  ;;  %v2616_v2 = vadd.f32 1e-05, %v2608_v0 }
 0x342   : > { %v2593_v3 = vpop.xlane.xlu1 %2592  ;;  %v2596_v4 = vpop.xlane.xlu0 %2595 }
 0x343   : > { %13018 = vrsqrt.f32 %v2615_v1  ;;  %v2609_v5 = vmul.f32 0.0625, %v2593_v3  ;;  %v2610_v6 = vmul.f32 0.0625, %v2596_v4 }
 0x344   : > { %13020 = vrsqrt.f32 %v2616_v2 }
 0x345   : > { %v2617_v7 = vadd.f32 1e-05, %v2609_v5  ;;  %v2618_v8 = vadd.f32 1e-05, %v2610_v6 }
 0x346   : > { %v2599_v9 = vpop.xlane.xlu1 %2598  ;;  %v2602_v10 = vpop.xlane.xlu0 %2601 }
 0x347   : > { %13022 = vrsqrt.f32 %v2617_v7  ;;  %v2611_v11 = vmul.f32 0.0625, %v2599_v9  ;;  %v2612_v12 = vmul.f32 0.0625, %v2602_v10 }
 0x348   : > { %13024 = vrsqrt.f32 %v2618_v8 }
 0x349   : > { %v2619_v13 = vadd.f32 1e-05, %v2611_v11  ;;  %v2620_v14 = vadd.f32 1e-05, %v2612_v12 }
 0x34a   : > { %v2605_v15 = vpop.xlane.xlu1 %2604 }
 0x34b   : > { %13026 = vrsqrt.f32 %v2619_v13  ;;  %v2613_v16 = vmul.f32 0.0625, %v2605_v15 }
 0x34c   : > { %v13017_v17 = vpop.eup %13016  ;;  %13028 = vrsqrt.f32 %v2620_v14 }
 0x34d   : > { %v2621_v19 = vadd.f32 1e-05, %v2613_v16  ;;  %v2630_v22 = vmul.f32 %v13017_v17, %v14858_v20 }
 0x34f   : > { %13030 = vrsqrt.f32 %v2621_v19  ;;  %v2644_v24 = vmul.f32 %v11424_v18, %v2630_v22 }
 0x350   : > { %v13019_v25 = vpop.eup %13018 }
 0x351   : > { %v13021_v26 = vpop.eup %13020  ;;  %v2658_v27 = vadd.f32 %v11425_v23, %v2644_v24  ;;  %v2631_v30 = vmul.f32 %v13019_v25, %v14866_v28 }
 0x352   : > { %v2632_v31 = vmul.f32 %v13021_v26, %v14860_v21 }
 0x353   : > { %12048 = vmatprep.mubr.msk.f32.mxu0 %vm2494_vm0, %v2658_v27  ;;  %v2645_v32 = vmul.f32 %v11424_v18, %v2631_v30 }
 0x354   : > { %v13023_v33 = vpop.eup %13022  ;;  %v2646_v34 = vmul.f32 %v11424_v18, %v2632_v31 }
 0x355   : > { %v13025_v35 = vpop.eup %13024  ;;  %v2659_v36 = vadd.f32 %v11425_v23, %v2645_v32  ;;  %v2633_v37 = vmul.f32 %v13023_v33, %v14868_v29 }
 0x356   : > { %v2660_v20 = vadd.f32 %v11425_v23, %v2646_v34  ;;  %v2634_v40 = vmul.f32 %v13025_v35, %v14876_v38 }
 0x357   : > { %12049 = vmatmul.mubr.msk.f32.vlgmr.msra.gmra.mxu0 %vm2494_vm0, %v2659_v36  ;;  %v2647_v41 = vmul.f32 %v11424_v18, %v2633_v37 }
 0x358   : > { %v13027_v42 = vpop.eup %13026  ;;  %12051 = vmatprep.mubr.msk.f32.mxu0 %vm2494_vm0, %v2660_v20  ;;  %v2648_v28 = vmul.f32 %v11424_v18, %v2634_v40 }
 0x359   : > { %v13029_v21 = vpop.eup %13028  ;;  %v2661_v43 = vadd.f32 %v11425_v23, %v2647_v41  ;;  %v2635_v44 = vmul.f32 %v13027_v42, %v14878_v39 }
 0x35a   : > { %v2662_v45 = vadd.f32 %v11425_v23, %v2648_v28  ;;  %v2636_v46 = vmul.f32 %v13029_v21, %v14886_v48  ;;  %v18335_v48 = vmov 0.0  }
 0x35b   : > { %12052 = vmatmul.mubr.msk.f32.gmra.mxu0 %vm2494_vm0, %v2661_v43  ;;  %v2649_v29 = vmul.f32 %v11424_v18, %v2635_v44  ;;  %12060 = vmatprep.subr.mxu1 %v18335_v48  ;;  %2495 = vst.msk [vmem:[#allocation2] sm:$0xff] %vm2494_vm0, %v18335_v48  ;;  %2496 = vst.msk [vmem:[#allocation2 + $0x8] sm:$0xff] %vm2494_vm0, %v18335_v48 }
 0x35c   : > { %v13031_v47 = vpop.eup %13030  ;;  %12054 = vmatprep.mubr.msk.f32.mxu0 %vm2494_vm0, %v2662_v45  ;;  %v2650_v38 = vmul.f32 %v11424_v18, %v2636_v46  ;;  %2497 = vst.msk [vmem:[#allocation2 + $0x50] sm:$0xff] %vm2494_vm0, %v18335_v48  ;;  %2498 = vst.msk [vmem:[#allocation2 + $0x58] sm:$0xff] %vm2494_vm0, %v18335_v48  ;;  %12076 = vmatprep.mubr.msk.f32.mxu1 %vm14205_vm7, %v18335_v48 }
 0x35d   : > { %v2663_v50 = vadd.f32 %v11425_v23, %v2649_v29  ;;  %v2637_v51 = vmul.f32 %v13031_v47, %v14888_v49  ;;  %v11426_v49 = vld [vmem:[%s18570_s22] ss:$0 sm:$0xff]  ;;  %s18619_s22 = sld [smem:[#allocation71_spill]] }
 0x35e   : > { %v2664_v52 = vadd.f32 %v11425_v23, %v2650_v38 }
 0x35f   : > { %12055 = vmatmul.mubr.msk.f32.gmra.mxu0 %vm2494_vm0, %v2663_v50  ;;  %v2651_v53 = vmul.f32 %v11424_v18, %v2637_v51 }
 0x360   : > { %12057 = vmatprep.mubr.msk.f32.mxu0 %vm2494_vm0, %v2664_v52 }
 0x361   : > { %v2665_v39 = vadd.f32 %v11425_v23, %v2651_v53 }
 0x363   : > { %12058 = vmatmul.mubr.msk.f32.gmra.mxu0 %vm2494_vm0, %v2665_v39 }
 0x417   : > { %v12050_v54 = vpop.f32.mrf.mxu0 }
 0x418   : > { %v14928_v55 = vadd.f32 %v12050_v54, %v11426_v49 }
 0x419   : > { %v2762_v56 = vpop.f32.mrf.mxu0 }
 0x41a   : > { %v14930_v57 = vadd.f32 %v11426_v49, %v2762_v56  ;;  %2960 = vrot.lane.b32.xlu0 %v14928_v55, %s18369_s0  ;;  %v2802_v59 = vmul.f32 %v14928_v55, %v14928_v55 }
 0x41b   : > { %v12053_v58 = vpop.f32.mrf.mxu0 }
 0x41c   : > { %v2801_v60 = vmul.f32 %v14930_v57, %v14930_v57  ;;  %v14938_v61 = vadd.f32 %v12053_v58, %v11426_v49  ;;  %2958 = vrot.lane.b32.xlu1 %v14930_v57, %s18369_s0  ;;  %v2810_v4 = vsel %vm2494_vm0, %v2802_v59, 0.0  ;;  %v2849_v5 = vsel %vm2847_vm1, %v2802_v59, 0.0 }
 0x41d   : > { %v2772_v62 = vpop.f32.mrf.mxu0 }
 0x41e   : > { %v2809_v63 = vsel %vm2494_vm0, %v2801_v60, 0.0  ;;  %v2848_v0 = vsel %vm2847_vm1, %v2801_v60, 0.0  ;;  %v14944_v1 = vadd.f32 %v11426_v49, %v2772_v62  ;;  %3244 = vrot.lane.b32.xlu0 %v14928_v55, %s18375_s23  ;;  %v2804_v2 = vmul.f32 %v14938_v61, %v14938_v61 }
 0x41f   : > { %v12056_v3 = vpop.f32.mrf.mxu0  ;;  %v2811_v8 = vadd.f32 %v2810_v4, %v2809_v63  ;;  %v2850_v9 = vadd.f32 %v2849_v5, %v2848_v0 }
 0x420   : > { %v2803_v6 = vmul.f32 %v14944_v1, %v14944_v1  ;;  %v14954_v7 = vadd.f32 %v12056_v3, %v11426_v49  ;;  %3242 = vrot.lane.b32.xlu1 %v14930_v57, %s18375_s23  ;;  %v2814_v14 = vsel %vm2494_vm0, %v2804_v2, 0.0  ;;  %v2853_v18 = vsel %vm2847_vm1, %v2804_v2, 0.0 }
 0x421   : > { %v2782_v10 = vpop.f32.mrf.mxu0 }
 0x422   : > { %v2812_v11 = vsel %vm2494_vm0, %v2803_v6, 0.0  ;;  %v2851_v12 = vsel %vm2847_vm1, %v2803_v6, 0.0  ;;  %v14960_v13 = vadd.f32 %v11426_v49, %v2782_v10  ;;  %2964 = vrot.lane.b32.xlu0 %v14938_v61, %s18369_s0  ;;  %v2806_v19 = vmul.f32 %v14954_v7, %v14954_v7 }
 0x423   : > { %v2813_v15 = vadd.f32 %v2812_v11, %v2811_v8  ;;  %v2852_v16 = vadd.f32 %v2851_v12, %v2850_v9  ;;  %v12059_v17 = vpop.f32.mrf.mxu0 }
 0x424   : > { %v2805_v22 = vmul.f32 %v14960_v13, %v14960_v13  ;;  %v14970_v23 = vadd.f32 %v12059_v17, %v11426_v49  ;;  %2962 = vrot.lane.b32.xlu1 %v14944_v1, %s18369_s0  ;;  %v2818_v34 = vsel %vm2494_vm0, %v2806_v19, 0.0  ;;  %v2857_v35 = vsel %vm2847_vm1, %v2806_v19, 0.0 }
 0x425   : > { %v2815_v24 = vadd.f32 %v2814_v14, %v2813_v15  ;;  %v2854_v25 = vadd.f32 %v2853_v18, %v2852_v16  ;;  %v2792_v26 = vpop.f32.mrf.mxu0 }
 0x426   : > { %v2816_v27 = vsel %vm2494_vm0, %v2805_v22, 0.0  ;;  %v2855_v30 = vsel %vm2847_vm1, %v2805_v22, 0.0  ;;  %v14976_v31 = vadd.f32 %v11426_v49, %v2792_v26  ;;  %3248 = vrot.lane.b32.xlu0 %v14938_v61, %s18375_s23  ;;  %v2808_v36 = vmul.f32 %v14970_v23, %v14970_v23 }
 0x427   : > { %v2817_v32 = vadd.f32 %v2816_v27, %v2815_v24  ;;  %v2856_v33 = vadd.f32 %v2855_v30, %v2854_v25 }
 0x428   : > { %v2807_v37 = vmul.f32 %v14976_v31, %v14976_v31  ;;  %3246 = vrot.lane.b32.xlu1 %v14944_v1, %s18375_s23  ;;  %v2822_v43 = vsel %vm2494_vm0, %v2808_v36, 0.0  ;;  %v2861_v44 = vsel %vm2847_vm1, %v2808_v36, 0.0 }
 0x429   : > { %v2819_v20 = vadd.f32 %v2818_v34, %v2817_v32  ;;  %v2858_v40 = vadd.f32 %v2857_v35, %v2856_v33 }
 0x42a   : > { %v2820_v41 = vsel %vm2494_vm0, %v2807_v37, 0.0  ;;  %v2859_v42 = vsel %vm2847_vm1, %v2807_v37, 0.0  ;;  %2968 = vrot.lane.b32.xlu0 %v14954_v7, %s18369_s0 }
 0x42b   : > { %v2821_v28 = vadd.f32 %v2820_v41, %v2819_v20  ;;  %v2860_v21 = vadd.f32 %v2859_v42, %v2858_v40 }
 0x42c   : > { %2966 = vrot.lane.b32.xlu1 %v14960_v13, %s18369_s0 }
 0x42d   : > { %v2823_v45 = vadd.f32 %v2822_v43, %v2821_v28  ;;  %v2862_v46 = vadd.f32 %v2861_v44, %v2860_v21 }
 0x42e   : > { %3252 = vrot.lane.b32.xlu0 %v14954_v7, %s18375_s23 }
 0x42f   : > { %v2824_v29 = vrot.slane %v2823_v45, 4  ;;  %v2863_v47 = vrot.slane %v2862_v46, 4 }
 0x430   : > { %3250 = vrot.lane.b32.xlu1 %v14960_v13, %s18375_s23 }
 0x431   : > { %v2825_v38 = vadd.f32 %v2824_v29, %v2823_v45  ;;  %v2864_v50 = vadd.f32 %v2863_v47, %v2862_v46 }
 0x432   : > { %2972 = vrot.lane.b32.xlu0 %v14970_v23, %s18369_s0 }
 0x433   : > { %v2826_v51 = vrot.slane %v2825_v38, 2  ;;  %v2865_v52 = vrot.slane %v2864_v50, 2 }
 0x434   : > { %2970 = vrot.lane.b32.xlu1 %v14976_v31, %s18369_s0  ;;  %s18657_s0 = sld [smem:[#allocation81_spill]] }
 0x435   : > { %v2827_v53 = vadd.f32 %v2826_v51, %v2825_v38  ;;  %v2866_v39 = vadd.f32 %v2865_v52, %v2864_v50 }
 0x436   : > { %3256 = vrot.lane.b32.xlu0 %v14970_v23, %s18375_s23 }
 0x437   : > { %v2828_v49 = vrot.slane %v2827_v53, 1  ;;  %v2867_v54 = vrot.slane %v2866_v39, 1 }
 0x438   : > { %3254 = vrot.lane.b32.xlu1 %v14976_v31, %s18375_s23 }
 0x439   : > { %v2829_v56 = vadd.f32 %v2828_v49, %v2827_v53  ;;  %v2868_v58 = vadd.f32 %v2867_v54, %v2866_v39 }
 0x43b   : > { %13032 = vrsqrt.f32 %v2829_v56  ;;  %vm2832_vm2 = vcmp.eq.f32.partialorder %v2829_v56, inf  ;;  %v2835_v63 = vand.u32 2147483648, %v2829_v56  ;;  %vm2834_vm3 = vcmp.eq.f32.partialorder %v2829_v56, 0.0 }
 0x43c   : > { %13034 = vrsqrt.f32 %v2868_v58  ;;  %vm2871_vm4 = vcmp.eq.f32.partialorder %v2868_v58, inf  ;;  %v2874_v3 = vand.u32 2147483648, %v2868_v58  ;;  %vm2873_vm5 = vcmp.eq.f32.partialorder %v2868_v58, 0.0 }
 0x448   : > { %v13033_v59 = vpop.eup %13032 }
 0x449   : > { %v13035_v60 = vpop.eup %13034  ;;  %v2831_v62 = vmul.f32 %v13033_v59, %v2829_v56 }
 0x44a   : > { %v2870_v0 = vmul.f32 %v13035_v60, %v2868_v58 }
 0x44b   : > { %v2833_v2 = vsel %vm2832_vm2, %v2829_v56, %v2831_v62  ;;  %v2479_v62 = vld [vmem:[%s18571_s11 + $0x8] sm:$0xff] }
 0x44c   : > { %v2836_v4 = vsel %vm2834_vm3, %v2835_v63, %v2833_v2  ;;  %v2872_v5 = vsel %vm2871_vm4, %v2868_v58, %v2870_v0  ;;  %v14207_v58 = vmov 0   ;;  %v2481_v63 = vld [vmem:[%s18571_s11 + $0x18] sm:$0xff]  ;;  %v2486_v0 = vld [vmem:[%s18572_s10] sm:$0xff] }
 0x44d   : > { %v2837_v6 = vmax.f32 %v2836_v4, 1e-12  ;;  %v2875_v8 = vsel %vm2873_vm5, %v2874_v3, %v2872_v5  ;;  %v2489_v2 = vld [vmem:[%s18572_s10 + $0x18] sm:$0xff]  ;;  %v2480_v3 = vld [vmem:[%s18571_s11 + $0x10] sm:$0xff]  ;;  %v2483_v4 = vld [vmem:[%s18571_s11 + $0x28] sm:$0xff] }
 0x44e   : > { %v2876_v9 = vmax.f32 %v2875_v8, 1e-12  ;;  %v2488_v5 = vld [vmem:[%s18572_s10 + $0x10] sm:$0xff]  ;;  %v2482_v8 = vld [vmem:[%s18571_s11 + $0x20] sm:$0xff] }
 0x44f   : > { %13036 = vrcp.f32 %v2837_v6  ;;  %v2491_v6 = vld [vmem:[%s18572_s10 + $0x28] sm:$0xff] }
 0x450   : > { %13038 = vrcp.f32 %v2876_v9  ;;  %v2485_v9 = vld [vmem:[%s18571_s11 + $0x38] sm:$0xff] }
 0x45c   : > { %v15008_v10 = vpop.eup %13036 }
 0x45d   : > { %v13039_v11 = vpop.eup %13038  ;;  %v15012_v12 = vmul.f32 %v15008_v10, %v14930_v57  ;;  %v15016_v14 = vmul.f32 %v15008_v10, %v14944_v1  ;;  %v15020_v15 = vmul.f32 %v15008_v10, %v14960_v13  ;;  %v15030_v18 = vmul.f32 %v15008_v10, %v14976_v31 }
 0x45e   : > { %v2879_v16 = vmul.f32 %v13039_v11, %v14928_v55  ;;  %v2878_v17 = vmul.f32 %v13039_v11, %v14930_v57  ;;  %v15034_v19 = vmul.f32 %v15008_v10, %v14954_v7  ;;  %v15038_v22 = vmul.f32 %v15008_v10, %v14970_v23 }
 0x45f   : > { %12081 = vmatprep.mubr.msk.f32.mxu0 %vm3056_vm6, %v15012_v12  ;;  %v2880_v57 = vmul.f32 %v13039_v11, %v14944_v1  ;;  %v2882_v24 = vmul.f32 %v13039_v11, %v14960_v13  ;;  %v2881_v25 = vmul.f32 %v13039_v11, %v14938_v61  ;;  %v2884_v26 = vmul.f32 %v13039_v11, %v14976_v31 }
 0x460   : > { %2896 = vrot.lane.b32.xlu1 %v2879_v16, %s18371_s16  ;;  %2894 = vrot.lane.b32.xlu0 %v2878_v17, %s18371_s16  ;;  %v2883_v27 = vmul.f32 %v13039_v11, %v14954_v7  ;;  %v2885_v1 = vmul.f32 %v13039_v11, %v14970_v23  ;;  %v15098_v59 = vmul.f32 %v15008_v10, %v14928_v55  ;;  %v2478_v55 = vld [vmem:[%s18571_s11] sm:$0xff]  ;;  %v2493_v11 = vld [vmem:[%s18572_s10 + $0x38] sm:$0xff] }
 0x461   : > { %v15106_v60 = vmul.f32 %v15008_v10, %v14938_v61  ;;  %v2487_v61 = vld [vmem:[%s18572_s10 + $0x8] sm:$0xff]  ;;  %v2490_v10 = vld [vmem:[%s18572_s10 + $0x20] sm:$0xff] }
 0x464   : > { %2898 = vrot.lane.b32.xlu1 %v2880_v57, %s18371_s16  ;;  %2902 = vrot.lane.b32.xlu0 %v2882_v24, %s18371_s16 }
 0x468   : > { %2900 = vrot.lane.b32.xlu1 %v2881_v25, %s18371_s16  ;;  %2906 = vrot.lane.b32.xlu0 %v2884_v26, %s18371_s16 }
 0x46c   : > { %2904 = vrot.lane.b32.xlu1 %v2883_v27, %s18371_s16  ;;  %3186 = vrot.lane.b32.xlu0 %v2878_v17, %s18373_s1 }
 0x470   : > { %2908 = vrot.lane.b32.xlu1 %v2885_v1, %s18371_s16  ;;  %3190 = vrot.lane.b32.xlu0 %v2880_v57, %s18373_s1 }
 0x474   : > { %3188 = vrot.lane.b32.xlu1 %v2879_v16, %s18373_s1  ;;  %3194 = vrot.lane.b32.xlu0 %v2882_v24, %s18373_s1  ;;  %v2492_v16 = vld [vmem:[%s18572_s10 + $0x30] sm:$0xff] }
 0x478   : > { %3192 = vrot.lane.b32.xlu1 %v2881_v25, %s18373_s1  ;;  %3198 = vrot.lane.b32.xlu0 %v2884_v26, %s18373_s1 }
 0x47c   : > { %3196 = vrot.lane.b32.xlu1 %v2883_v27, %s18373_s1 }
 0x480   : > { %3200 = vrot.lane.b32.xlu1 %v2885_v1, %s18373_s1 }
 0x48c   : > { %v2961_v7 = vpop.permute.xlu0 %2960 }
 0x48d   : > { %3531 = vst.msk [vmem:[#allocation2 + $0x18] sm:$0xff] %vm2494_vm0, %v2961_v7 }
 0x48e   : > { %v2959_v13 = vpop.permute.xlu1 %2958 }
 0x48f   : > { %3530 = vst.msk [vmem:[#allocation2 + $0x10] sm:$0xff] %vm2494_vm0, %v2959_v13 }
 0x490   : > { %v15062_v23 = vpop.permute.xlu0 %3244 }
 0x492   : > { %v15064_v30 = vpop.permute.xlu1 %3242 }
 0x494   : > { %v2965_v31 = vpop.permute.xlu0 %2964 }
 0x495   : > { %3533 = vst.msk [vmem:[#allocation2 + $0x28] sm:$0xff] %vm2494_vm0, %v2965_v31 }
 0x496   : > { %v2963_v32 = vpop.permute.xlu1 %2962 }
 0x497   : > { %3532 = vst.msk [vmem:[#allocation2 + $0x20] sm:$0xff] %vm2494_vm0, %v2963_v32 }
 0x498   : > { %v15068_v33 = vpop.permute.xlu0 %3248 }
 0x49a   : > { %v15070_v34 = vpop.permute.xlu1 %3246 }
 0x49c   : > { %v2969_v35 = vpop.permute.xlu0 %2968 }
 0x49d   : > { %3535 = vst.msk [vmem:[#allocation2 + $0x38] sm:$0xff] %vm2494_vm0, %v2969_v35 }
 0x49e   : > { %v2967_v36 = vpop.permute.xlu1 %2966 }
 0x49f   : > { %3534 = vst.msk [vmem:[#allocation2 + $0x30] sm:$0xff] %vm2494_vm0, %v2967_v36 }
 0x4a0   : > { %v15074_v37 = vpop.permute.xlu0 %3252 }
 0x4a2   : > { %v15076_v20 = vpop.permute.xlu1 %3250 }
 0x4a4   : > { %v2973_v40 = vpop.permute.xlu0 %2972 }
 0x4a5   : > { %3537 = vst.msk [vmem:[#allocation2 + $0x48] sm:$0xff] %vm2494_vm0, %v2973_v40  ;;  %12061 = vmatpush3.msra.mxu1 %v2973_v40 }
 0x4a6   : > { %v2971_v41 = vpop.permute.xlu1 %2970  ;;  %12062 = vmatprep.subr.mxu1 %v18335_v48 }
 0x4a7   : > { %3536 = vst.msk [vmem:[#allocation2 + $0x40] sm:$0xff] %vm2494_vm0, %v2971_v41  ;;  %12063 = vmatpush3.msra.mxu1 %v2971_v41 }
 0x4a8   : > { %12064 = vmatprep.subr.mxu1 %v18335_v48  ;;  %v15090_v42 = vpop.permute.xlu0 %3256 }
 0x4a9   : > { %12065 = vmatpush3.msra.mxu1 %v2969_v35  ;;  %v2517_v35 = vld [vmem:[%s18573_s7 + $0x8] sm:$0xff] }
 0x4aa   : > { %12066 = vmatprep.subr.mxu1 %v18335_v48  ;;  %v15092_v28 = vpop.permute.xlu1 %3254 }
 0x4ab   : > { %12067 = vmatpush3.msra.mxu1 %v2967_v36 }
 0x4ac   : > { %12068 = vmatprep.subr.mxu1 %v18335_v48 }
 0x4ad   : > { %12069 = vmatpush3.msra.mxu1 %v2965_v31 }
 0x4ae   : > { %12070 = vmatprep.subr.mxu1 %v18335_v48 }
 0x4af   : > { %12071 = vmatpush3.msra.mxu1 %v2963_v32 }
 0x4b0   : > { %12072 = vmatprep.subr.mxu1 %v18335_v48 }
 0x4b1   : > { %12073 = vmatpush3.msra.mxu1 %v2961_v7 }
 0x4b2   : > { %12074 = vmatprep.subr.mxu1 %v18335_v48 }
 0x4b3   : > { %12075 = vmatpush3.msra.mxu1 %v2959_v13 }
 0x4b4   : > { %12093 = vmatprep.subr.mxu1 %v18335_v48 }
 0x4d2   : > { %v2897_v21 = vpop.permute.xlu1 %2896  ;;  %v2895_v43 = vpop.permute.xlu0 %2894 }
 0x4d3   : > { %2918 = vxpose.xlu0.b32.start [1/8] (short) (narrow) %v2895_v43, 8 }
 0x4d6   : > { %v2899_v44 = vpop.permute.xlu1 %2898  ;;  %v2903_v45 = vpop.permute.xlu0 %2902 }
 0x4d7   : > { %2919 = vxpose.xlu0.b32.cont [2/8] (short) (narrow) %v2897_v21, 8 }
 0x4da   : > { %v2901_v46 = vpop.permute.xlu1 %2900  ;;  %v2907_v29 = vpop.permute.xlu0 %2906 }
 0x4db   : > { %2920 = vxpose.xlu0.b32.cont [3/8] (short) (narrow) %v2899_v44, 8 }
 0x4de   : > { %v2905_v47 = vpop.permute.xlu1 %2904  ;;  %v3187_v38 = vpop.permute.xlu0 %3186 }
 0x4df   : > { %2921 = vxpose.xlu0.b32.cont [4/8] (short) (narrow) %v2901_v46, 8  ;;  %3210 = vxpose.xlu1.b32.start [1/8] (short) (narrow) %v3187_v38, 8 }
 0x4e2   : > { %v2909_v50 = vpop.permute.xlu1 %2908  ;;  %v3191_v52 = vpop.permute.xlu0 %3190 }
 0x4e3   : > { %2922 = vxpose.xlu0.b32.cont [5/8] (short) (narrow) %v2903_v45, 8 }
 0x4e6   : > { %v3189_v51 = vpop.permute.xlu1 %3188  ;;  %v3195_v39 = vpop.permute.xlu0 %3194 }
 0x4e7   : > { %2923 = vxpose.xlu0.b32.cont [6/8] (short) (narrow) %v2905_v47, 8  ;;  %3211 = vxpose.xlu1.b32.cont [2/8] (short) (narrow) %v3189_v51, 8 }
 0x4ea   : > { %v3193_v53 = vpop.permute.xlu1 %3192  ;;  %v3199_v54 = vpop.permute.xlu0 %3198 }
 0x4eb   : > { %2924 = vxpose.xlu0.b32.cont [7/8] (short) (narrow) %v2907_v29, 8  ;;  %3212 = vxpose.xlu1.b32.cont [3/8] (short) (narrow) %v3191_v52, 8 }
 0x4ee   : > { %v3197_v49 = vpop.permute.xlu1 %3196 }
 0x4ef   : > { %2925 = vxpose.xlu0.b32.end [8/8] (short) (narrow) %v2909_v50, 8  ;;  %3213 = vxpose.xlu1.b32.cont [4/8] (short) (narrow) %v3193_v53, 8  ;;  %v3594_v50 = vlaneseq }
 0x4f1   : > { %v3595_v51 = vshrl.u32 %v3594_v50, 7 }
 0x4f2   : > { %v3201_v56 = vpop.permute.xlu1 %3200 }
 0x4f3   : > { %3214 = vxpose.xlu1.b32.cont [5/8] (short) (narrow) %v3195_v39, 8  ;;  %v15213_v39 = vsub.s32 4, %v3595_v51 }
 0x4f5   : > { %18588 = vst [vmem:[#allocation134_spill] sm:$0xff] %v15213_v39 }
 0x4f7   : > { %3215 = vxpose.xlu1.b32.cont [6/8] (short) (narrow) %v3197_v49, 8  ;;  %v15216_v49 = vld [vmem:[%s18582_s3] sm:$0xff] }
 0x4fb   : > { %3216 = vxpose.xlu1.b32.cont [7/8] (short) (narrow) %v3199_v54, 8  ;;  %v15218_v54 = vsub.s32 1, %v3595_v51 }
 0x4fd   : > { %18589 = vst [vmem:[#allocation135_spill] sm:$0xff] %v15218_v54 }
 0x4ff   : > { %3217 = vxpose.xlu1.b32.end [8/8] (short) (narrow) %v3201_v56, 8  ;;  %v15220_v56 = vsub.s32 7, %v3595_v51 }
 0x501   : > { %18590 = vst [vmem:[#allocation136_spill] sm:$0xff] %v15220_v56 }
 0x518   : > { %3339 = vrot.lane.b32.xlu0 %v15012_v12, %s18367_s9  ;;  %v2484_v12 = vld [vmem:[%s18571_s11 + $0x30] sm:$0xff] }
 0x519   : > { %13014 = vset.pattern.permute.xlu0 %v14207_v58 }
 0x51c   : > { %3343 = vrot.lane.b32.xlu0 %v15016_v14, %s18367_s9 }
 0x51d   : > { %3341 = vrot.lane.b32.xlu1 %v15098_v59, %s18367_s9 }
 0x51e   : > { %13015 = vset.pattern.permute.xlu1 %v14207_v58 }
 0x520   : > { %3347 = vrot.lane.b32.xlu0 %v15020_v15, %s18367_s9 }
 0x521   : > { %3345 = vrot.lane.b32.xlu1 %v15106_v60, %s18367_s9 }
 0x524   : > { %3351 = vrot.lane.b32.xlu0 %v15030_v18, %s18367_s9 }
 0x525   : > { %3349 = vrot.lane.b32.xlu1 %v15034_v19, %s18367_s9 }
 0x528   : > { %3548 = vperm.xlu0 %13014, %v2478_v55   ;;  %v3625_v55 = vrot.slane %v15216_v49, %v15218_v54 }
 0x529   : > { %3353 = vrot.lane.b32.xlu1 %v15038_v22, %s18367_s9  ;;  %s18656_s9 = sld [smem:[#allocation80_spill]] }
 0x52c   : > { %3657 = vperm.xlu0 %13014, %v2487_v61   ;;  %v3755_v61 = vld [vmem:[#allocation2 + $0x18] sm:$0xff] }
 0x52d   : > { %3553 = vperm.xlu1 %13015, %v2479_v62   ;;  %v15232_v62 = vrot.slane %v15216_v49, %v15220_v56 }
 0x530   : > { %3563 = vperm.xlu0 %13014, %v2481_v63   ;;  %v3615_v63 = vld [vmem:[#allocation2 + $0x10] sm:$0xff] }
 0x531   : > { %3652 = vperm.xlu1 %13015, %v2486_v0   ;;  %v15234_v0 = vsub.s32 0, %v3595_v51 }
 0x533   : > { %18591 = vst [vmem:[#allocation137_spill] sm:$0xff] %v15234_v0 }
 0x534   : > { %3667 = vperm.xlu0 %13014, %v2489_v2   ;;  %v3756_v2 = vld [vmem:[#allocation2 + $0x20] sm:$0xff] }
 0x535   : > { %3558 = vperm.xlu1 %13015, %v2480_v3   ;;  %v3757_v3 = vld [vmem:[#allocation2 + $0x28] sm:$0xff] }
 0x538   : > { %3573 = vperm.xlu0 %13014, %v2483_v4  }
 0x539   : > { %3662 = vperm.xlu1 %13015, %v2488_v5  }
 0x53c   : > { %3677 = vperm.xlu0 %13014, %v2491_v6   ;;  %v3627_v6 = vmul.f32 %v3625_v55, %v3615_v63 }
 0x53d   : > { %3568 = vperm.xlu1 %13015, %v2482_v8   ;;  %v3538_v8 = vld [vmem:[#allocation2 + $0x7] sm:$0xff] }
 0x540   : > { %3583 = vperm.xlu0 %13014, %v2485_v9  }
 0x541   : > { %3672 = vperm.xlu1 %13015, %v2490_v10   ;;  %v15243_v10 = vmul.f32 %v15232_v62, %v3755_v61 }
 0x543   : > { %18593 = vst [vmem:[#allocation139_spill] sm:$0xff] %v15243_v10 }
 0x544   : > { %3687 = vperm.xlu0 %13014, %v2493_v11   ;;  %v15245_v11 = vmul.f32 %v3755_v61, %v3625_v55 }
 0x545   : > { %3578 = vperm.xlu1 %13015, %v2484_v12   ;;  %v3759_v12 = vld [vmem:[#allocation2 + $0x38] sm:$0xff] }
 0x549   : > { %3682 = vperm.xlu1 %13015, %v2492_v16  }
 0x54f   : > { %v2934_v17 = vpop.trf.xlu0 }
 0x550   : > { %12077 = vmatmul.mubr.msk.f32.vlgmr.msra.gmra.mxu1 %vm2982_vm8, %v2934_v17  ;;  %v3539_v17 = vld [vmem:[#allocation2 + $0xf] sm:$0xff] }
 0x551   : > { %12094 = vmatpush3.msra.mxu1 %v15090_v42  ;;  %12109 = vmatprep.mubr.msk.f32.mxu1 %vm14205_vm7, %v18335_v48 }
 0x552   : > { %12095 = vmatprep.subr.mxu1 %v18335_v48 }
 0x553   : > { %12096 = vmatpush3.msra.mxu1 %v15092_v28 }
 0x554   : > { %12097 = vmatprep.subr.mxu1 %v18335_v48 }
 0x555   : > { %12098 = vmatpush3.msra.mxu1 %v15074_v37  ;;  %v2516_v37 = vld [vmem:[%s18573_s7] sm:$0xff]  ;;  %s18764_s7 = sld [smem:[#allocation99_spill]] }
 0x556   : > { %12099 = vmatprep.subr.mxu1 %v18335_v48 }
 0x557   : > { %12100 = vmatpush3.msra.mxu1 %v15076_v20 }
 0x558   : > { %12101 = vmatprep.subr.mxu1 %v18335_v48 }
 0x559   : > { %12102 = vmatpush3.msra.mxu1 %v15068_v33 }
 0x55a   : > { %12103 = vmatprep.subr.mxu1 %v18335_v48 }
 0x55b   : > { %12104 = vmatpush3.msra.mxu1 %v15070_v34 }
 0x55c   : > { %12105 = vmatprep.subr.mxu1 %v18335_v48 }
 0x55d   : > { %12106 = vmatpush3.msra.mxu1 %v15062_v23 }
 0x55e   : > { %12107 = vmatprep.subr.mxu1 %v18335_v48  ;;  %v3643_v48 = vld [vmem:[#allocation2 + $0x11] sm:$0xff] }
 0x55f   : > { %12108 = vmatpush3.msra.mxu1 %v15064_v30  ;;  %v3226_v57 = vpop.trf.xlu1 }
 0x560   : > { %12110 = vmatmul.mubr.msk.f32.vlgmr.msra.gmra.mxu1 %vm2982_vm8, %v3226_v57  ;;  %12126 = vmatprep.subr.mxu1 %v2517_v35 }
 0x561   : > { %12127 = vmatpush3.msra.mxu1 %v2517_v35  ;;  %v15272_v35 = vmul.f32 %v15232_v62, %v3759_v12 }
 0x562   : > { %12128 = vmatprep.subr.mxu1 %v2516_v37 }
 0x563   : > { %12129 = vmatpush3.msra.mxu1 %v2516_v37  ;;  %18597 = vst [vmem:[#allocation143_spill] sm:$0xff] %v15272_v35  ;;  %v15274_v37 = vmul.f32 %v3759_v12, %v3625_v55 }
 0x58a   : > { %v3340_v26 = vpop.permute.xlu0 %3339 }
 0x58e   : > { %v3344_v1 = vpop.permute.xlu0 %3343 }
 0x58f   : > { %v3342_v27 = vpop.permute.xlu1 %3341 }
 0x610   : > { %v3052_v24 = vpop.f32.mrf.mxu1 }
 0x611   : > { %12079 = vmatprep.subr.mxu0 %v3052_v24 }
 0x612   : > { %v12078_v25 = vpop.f32.mrf.mxu1  ;;  %12080 = vmatpush3.msra.mxu0 %v3052_v24  ;;  %v3758_v24 = vld [vmem:[#allocation2 + $0x30] sm:$0xff] }
 0x613   : > { %12082 = vmatmul.mubr.msk.f32.vlgmr.msra.gmra.mxu0 %vm3056_vm6, %v15098_v59 }
 0x614   : > { %12084 = vmatprep.mubr.msk.f32.mxu0 %vm3056_vm6, %v15016_v14  ;;  %v3346_v14 = vpop.permute.xlu1 %3345 }
 0x617   : > { %12085 = vmatmul.mubr.msk.f32.gmra.mxu0 %vm3056_vm6, %v15106_v60  ;;  %v3765_v60 = vrot.slane %v15216_v49, %v15213_v39 }
 0x618   : > { %12087 = vmatprep.mubr.msk.f32.mxu0 %vm3056_vm6, %v15020_v15  ;;  %v3348_v15 = vpop.permute.xlu0 %3347 }
 0x619   : > { %v15236_v4 = vmul.f32 %v3765_v60, %v3755_v61  ;;  %v15240_v9 = vmul.f32 %v3765_v60, %v3615_v63  ;;  %v15249_v57 = vmul.f32 %v3765_v60, %v3756_v2  ;;  %v15251_v25 = vmul.f32 %v3765_v60, %v3757_v3 }
 0x61b   : > { %12088 = vmatmul.mubr.msk.f32.gmra.mxu0 %vm3056_vm6, %v15034_v19 }
 0x61c   : > { %12090 = vmatprep.mubr.msk.f32.mxu0 %vm3056_vm6, %v15030_v18  ;;  %v3350_v18 = vpop.permute.xlu1 %3349  ;;  %v3352_v19 = vpop.permute.xlu0 %3351 }
 0x61f   : > { %12091 = vmatmul.mubr.msk.f32.gmra.mxu0 %vm3056_vm6, %v15038_v22 }
 0x620   : > { %v3335_v7 = vpop.f32.mrf.mxu1  ;;  %12114 = vmatprep.mubr.msk.f32.mxu0 %vm3056_vm6, %v3340_v26  ;;  %v3354_v22 = vpop.permute.xlu1 %3353  ;;  %v15254_v26 = vmul.f32 %v15232_v62, %v3757_v3 }
 0x621   : > { %12112 = vmatprep.subr.mxu0 %v3335_v7  ;;  %v15203_v29 = vpop.permute.xlu0 %3548 }
 0x622   : > { %v12111_v13 = vpop.f32.mrf.mxu1  ;;  %12113 = vmatpush3.msra.mxu0 %v3335_v7  ;;  %18584 = vst [vmem:[#allocation130_spill] sm:$0xff] %v15203_v29  ;;  %18595 = vst [vmem:[#allocation141_spill] sm:$0xff] %v15254_v26  ;;  %v15261_v7 = vrot.slane %v15216_v49, %v15234_v0  ;;  %v3644_v0 = vld [vmem:[#allocation2 + $0x19] sm:$0xff]  ;;  %v15373_v26 = vld [vmem:[#allocation2 + $0x29] sm:$0xff] }
 0x623   : > { %12115 = vmatmul.mubr.msk.f32.vlgmr.msra.gmra.mxu0 %vm3056_vm6, %v3342_v27  ;;  %v15256_v27 = vmul.f32 %v3757_v3, %v3625_v55  ;;  %v15266_v13 = vmul.f32 %v3756_v2, %v3625_v55 }
 0x624   : > { %12117 = vmatprep.mubr.msk.f32.mxu0 %vm3056_vm6, %v3344_v1  ;;  %v15201_v46 = vpop.permute.xlu1 %3553 }
 0x625   : > { %18583 = vst [vmem:[#allocation129_spill] sm:$0xff] %v15201_v46  ;;  %v15207_v38 = vpop.permute.xlu0 %3657  ;;  %v3587_v1 = vmul.f32 %v15201_v46, %v3539_v17 }
 0x626   : > { %18586 = vst [vmem:[#allocation132_spill] sm:$0xff] %v15207_v38 }
 0x627   : > { %12118 = vmatmul.mubr.msk.f32.gmra.mxu0 %vm3056_vm6, %v3346_v14  ;;  %v15264_v14 = vmul.f32 %v15232_v62, %v3756_v2  ;;  %v3599_v63 = vmul.f32 %v15261_v7, %v3587_v1  ;;  %v3642_v2 = vld [vmem:[#allocation2 + $0x9] sm:$0xff]  ;;  %v3540_v1 = vld [vmem:[#allocation2 + $0x17] sm:$0xff] }
 0x628   : > { %12120 = vmatprep.mubr.msk.f32.mxu0 %vm3056_vm6, %v3348_v15  ;;  %v15205_v47 = vpop.permute.xlu1 %3652  ;;  %v3761_v15 = vld [vmem:[#allocation2 + $0x48] sm:$0xff] }
 0x629   : > { %18585 = vst [vmem:[#allocation131_spill] sm:$0xff] %v15205_v47  ;;  %v15211_v53 = vpop.permute.xlu0 %3563  ;;  %v15291_v50 = vmul.f32 %v3765_v60, %v3761_v15  ;;  %v3690_v56 = vmul.f32 %v15205_v47, %v3642_v2  ;;  %v3541_v2 = vld [vmem:[#allocation2 + $0x1f] sm:$0xff] }
 0x62a   : > { %18587 = vst [vmem:[#allocation133_spill] sm:$0xff] %v15211_v53 }
 0x62b   : > { %12121 = vmatmul.mubr.msk.f32.gmra.mxu0 %vm3056_vm6, %v3350_v18  ;;  %v3586_v18 = vmul.f32 %v15203_v29, %v3538_v8  ;;  %18603 = vst [vmem:[#allocation149_spill] sm:$0xff] %v15291_v50 }
 0x62c   : > { %12123 = vmatprep.mubr.msk.f32.mxu0 %vm3056_vm6, %v3352_v19  ;;  %v15209_v52 = vpop.permute.xlu1 %3558  ;;  %v3760_v19 = vld [vmem:[#allocation2 + $0x40] sm:$0xff] }
 0x62d   : > { %v15224_v59 = vpop.permute.xlu0 %3667  ;;  %v15296_v3 = vmul.f32 %v3765_v60, %v3760_v19  ;;  %v15299_v8 = vmul.f32 %v15232_v62, %v3760_v19  ;;  %v3598_v39 = vmul.f32 %v15261_v7, %v3586_v18  ;;  %v15308_v54 = vmul.f32 %v3760_v19, %v3625_v55 }
 0x62e   : > { %v3728_v50 = vmul.f32 %v15209_v52, %v3541_v2 }
 0x62f   : > { %12124 = vmatmul.mubr.msk.f32.gmra.mxu0 %vm3056_vm6, %v3354_v22  ;;  %v15269_v22 = vmul.f32 %v3765_v60, %v3759_v12  ;;  %18605 = vst [vmem:[#allocation151_spill] sm:$0xff] %v15296_v3  ;;  %18606 = vst [vmem:[#allocation152_spill] sm:$0xff] %v15299_v8  ;;  %v15302_v12 = vmul.f32 %v15232_v62, %v3761_v15 }
 0x630   : > { %v15222_v58 = vpop.permute.xlu1 %3662 }
 0x631   : > { %v15247_v16 = vpop.permute.xlu0 %3573  ;;  %18596 = vst [vmem:[#allocation142_spill] sm:$0xff] %v15269_v22  ;;  %18607 = vst [vmem:[#allocation153_spill] sm:$0xff] %v15302_v12  ;;  %v3589_v12 = vmul.f32 %v15211_v53, %v3541_v2  ;;  %v15412_v22 = vld [vmem:[#allocation2 + $0x41] sm:$0xff] }
 0x632   : > { %18594 = vst [vmem:[#allocation140_spill] sm:$0xff] %v15247_v16 }
 0x634   : > { %v15238_v5 = vpop.permute.xlu1 %3568 }
 0x635   : > { %18592 = vst [vmem:[#allocation138_spill] sm:$0xff] %v15238_v5 }
 0x638   : > { %v15293_v61 = vpop.permute.xlu1 %3672 }
 0x639   : > { %18604 = vst [vmem:[#allocation150_spill] sm:$0xff] %v15293_v61 }
 0x6d3   : > { %v15175_v23 = vpop.f32.mrf.mxu0 }
 0x6d4   : > { %18574 = vst [vmem:[#allocation121_spill] sm:$0xff] %v15175_v23 }
 0x6d5   : > { %v15177_v30 = vpop.f32.mrf.mxu0 }
 0x6d6   : > { %18575 = vst [vmem:[#allocation122_spill] sm:$0xff] %v15177_v30 }
 0x6d7   : > { %v15179_v31 = vpop.f32.mrf.mxu0 }
 0x6d8   : > { %18576 = vst [vmem:[#allocation123_spill] sm:$0xff] %v15179_v31 }
 0x6d9   : > { %v15181_v32 = vpop.f32.mrf.mxu0 }
 0x6da   : > { %18577 = vst [vmem:[#allocation124_spill] sm:$0xff] %v15181_v32  ;;  %v15337_v32 = vld [vmem:[%s18582_s3 + $0x8] ss:$0 sm:$0xff]  ;;  %s18713_s3 = sld [smem:[#allocation86_spill]] }
 0x6db   : > { %v15183_v33 = vpop.f32.mrf.mxu0 }
 0x6dc   : > { %18578 = vst [vmem:[#allocation125_spill] sm:$0xff] %v15183_v33  ;;  %v3727_v33 = vmul.f32 %v15201_v46, %v3540_v1 }
 0x6dd   : > { %v15185_v34 = vpop.f32.mrf.mxu0 }
 0x6de   : > { %18579 = vst [vmem:[#allocation126_spill] sm:$0xff] %v15185_v34  ;;  %v3847_v34 = vld [vmem:[#allocation2 + $0x50] sm:$0xff] }
 0x6df   : > { %v15188_v36 = vpop.f32.mrf.mxu0  ;;  %v15351_v35 = vmul.f32 %v15232_v62, %v3847_v34  ;;  %v3601_v34 = vmul.f32 %v15261_v7, %v3589_v12 }
 0x6e0   : > { %18580 = vst [vmem:[#allocation127_spill] sm:$0xff] %v15188_v36  ;;  %v15320_v36 = vld [vmem:[#allocation2 + $0x21] sm:$0xff] }
 0x6e1   : > { %v15191_v20 = vpop.f32.mrf.mxu0  ;;  %18610 = vst [vmem:[#allocation156_spill] sm:$0xff] %v15351_v35 }
 0x6e2   : > { %18581 = vst [vmem:[#allocation128_spill] sm:$0xff] %v15191_v20 }
 0x6e3   : > { %v12116_v40 = vpop.f32.mrf.mxu0 }
 0x6e4   : > { %3486 = vrot.lane.b32.xlu0 %v12116_v40, %s18365_s15  ;;  %v15276_v40 = vsub.s32 2, %v3595_v51 }
 0x6e5   : > { %v3437_v41 = vpop.f32.mrf.mxu0 }
 0x6e6   : > { %3484 = vrot.lane.b32.xlu1 %v3437_v41, %s18365_s15  ;;  %18598 = vst [vmem:[#allocation144_spill] sm:$0xff] %v15276_v40  ;;  %v15278_v41 = vsub.s32 3, %v3595_v51  ;;  %v15313_v20 = vrot.slane %v15216_v49, %v15276_v40  ;;  %v3819_v40 = vmul.f32 %v15203_v29, %v3540_v1 }
 0x6e7   : > { %v12119_v42 = vpop.f32.mrf.mxu0 }
 0x6e8   : > { %3490 = vrot.lane.b32.xlu0 %v12119_v42, %s18365_s15  ;;  %18599 = vst [vmem:[#allocation145_spill] sm:$0xff] %v15278_v41  ;;  %v3614_v42 = vld [vmem:[#allocation2 + $0x8] sm:$0xff]  ;;  %v15317_v15 = vrot.slane %v15216_v49, %v15278_v41  ;;  %v3635_v41 = vadd.f32 %v3627_v6, %v3599_v63  ;;  %v3702_v8 = vmul.f32 %v15313_v20, %v3690_v56 }
 0x6e9   : > { %v3447_v28 = vpop.f32.mrf.mxu0 }
 0x6ea   : > { %3488 = vrot.lane.b32.xlu1 %v3447_v28, %s18365_s15  ;;  %v15280_v28 = vmul.f32 %v3765_v60, %v3758_v24  ;;  %v3691_v60 = vmul.f32 %v15207_v38, %v3643_v48 }
 0x6eb   : > { %v12122_v21 = vpop.f32.mrf.mxu0 }
 0x6ec   : > { %3494 = vrot.lane.b32.xlu0 %v12122_v21, %s18365_s15  ;;  %v15283_v21 = vmul.f32 %v15232_v62, %v3758_v24  ;;  %v3703_v6 = vmul.f32 %v15313_v20, %v3691_v60  ;;  %v3543_v62 = vld [vmem:[#allocation2 + $0x2f] sm:$0xff] }
 0x6ed   : > { %v3457_v43 = vpop.f32.mrf.mxu0  ;;  %v3591_v12 = vmul.f32 %v15247_v16, %v3543_v62 }
 0x6ee   : > { %3492 = vrot.lane.b32.xlu1 %v3457_v43, %s18365_s15  ;;  %18600 = vst [vmem:[#allocation146_spill] sm:$0xff] %v15283_v21  ;;  %v15285_v43 = vsub.s32 5, %v3595_v51  ;;  %v3711_v60 = vadd.f32 %v3703_v6, %v3635_v41  ;;  %v3790_v41 = vmul.f32 %v15205_v47, %v3643_v48  ;;  %v15379_v6 = vld [vmem:[#allocation2 + $0x31] sm:$0xff] }
 0x6ef   : > { %v12125_v44 = vpop.f32.mrf.mxu0  ;;  %v15388_v21 = vld [vmem:[#allocation2 + $0x37] sm:$0xff] }
 0x6f0   : > { %3498 = vrot.lane.b32.xlu0 %v12125_v44, %s18365_s15  ;;  %18601 = vst [vmem:[#allocation147_spill] sm:$0xff] %v15285_v43  ;;  %v15287_v44 = vsub.s32 6, %v3595_v51  ;;  %v15304_v51 = vpop.permute.xlu0 %3677  ;;  %v15325_v18 = vrot.slane %v15216_v49, %v15285_v43  ;;  %v3820_v43 = vmul.f32 %v15201_v46, %v3541_v2 }
 0x6f1   : > { %v3467_v45 = vpop.f32.mrf.mxu0  ;;  %18608 = vst [vmem:[#allocation154_spill] sm:$0xff] %v15304_v51 }
 0x6f2   : > { %3496 = vrot.lane.b32.xlu1 %v3467_v45, %s18365_s15  ;;  %18602 = vst [vmem:[#allocation148_spill] sm:$0xff] %v15287_v44  ;;  %v15289_v45 = vmul.f32 %v3758_v24, %v3625_v55  ;;  %v3626_v24 = vmul.f32 %v3625_v55, %v3614_v42  ;;  %v3726_v42 = vmul.f32 %v15203_v29, %v3539_v17  ;;  %v15344_v29 = vpop.permute.xlu1 %3578  ;;  %s18622_s15 = sld [smem:[#allocation69_spill]] }
 0x6f3   : > { %v3791_v55 = vmul.f32 %v15207_v38, %v3644_v0  ;;  %v15329_v19 = vrot.slane %v15216_v49, %v15287_v44  ;;  %v3870_v17 = vmul.f32 %v15207_v38, %v15320_v36  ;;  %v3588_v49 = vmul.f32 %v15209_v52, %v3540_v1  ;;  %v15342_v44 = vld [vmem:[#allocation2 + $0x27] sm:$0xff]  ;;  %18609 = vst [vmem:[#allocation155_spill] sm:$0xff] %v15344_v29 }
 0x6f4   : > { %v3634_v31 = vadd.f32 %v3626_v24, %v3598_v39  ;;  %v3738_v63 = vmul.f32 %v15317_v15, %v3726_v42  ;;  %v3693_v38 = vmul.f32 %v15224_v59, %v15320_v36  ;;  %v15353_v46 = vpop.permute.xlu0 %3583  ;;  %v3729_v24 = vmul.f32 %v15211_v53, %v15342_v44 }
 0x6f5   : > { %18611 = vst [vmem:[#allocation157_spill] sm:$0xff] %v15353_v46  ;;  %v3803_v39 = vmul.f32 %v15325_v18, %v3791_v55  ;;  %v15357_v56 = vmul.f32 %v15329_v19, %v3819_v40  ;;  %v3692_v1 = vmul.f32 %v15222_v58, %v3644_v0  ;;  %v3739_v42 = vmul.f32 %v15317_v15, %v3727_v33 }
 0x6f6   : > { %v15364_v30 = vmul.f32 %v15337_v32, %v3870_v17  ;;  %v15368_v35 = vmul.f32 %v15329_v19, %v3820_v43  ;;  %v3710_v55 = vadd.f32 %v3702_v8, %v3634_v31  ;;  %v3600_v40 = vmul.f32 %v15261_v7, %v3588_v49  ;;  %v15390_v48 = vpop.permute.xlu1 %3682 }
 0x6f7   : > { %v3590_v23 = vmul.f32 %v15238_v5, %v15342_v44  ;;  %v3705_v33 = vmul.f32 %v15313_v20, %v3693_v38  ;;  %v3822_v17 = vmul.f32 %v15211_v53, %v3543_v62  ;;  %v15382_v43 = vmul.f32 %v15205_v47, %v3644_v0  ;;  %18613 = vst [vmem:[#allocation159_spill] sm:$0xff] %v15390_v48  ;;  %v15396_v47 = vld [vmem:[#allocation2 + $0x3f] sm:$0xff] }
 0x6f8   : > { %18612 = vst [vmem:[#allocation158_spill] sm:$0xff] %v15364_v30  ;;  %v3741_v31 = vmul.f32 %v15317_v15, %v3729_v24  ;;  %v3704_v8 = vmul.f32 %v15313_v20, %v3692_v1  ;;  %v3694_v49 = vmul.f32 %v15293_v61, %v15373_v26  ;;  %v3747_v38 = vadd.f32 %v3739_v42, %v3711_v60  ;;  %v15398_v24 = vpop.permute.xlu0 %3687  ;;  %v15404_v60 = vld [vmem:[#allocation2 + $0x39] sm:$0xff] }
 0x6f9   : > { %v3637_v53 = vadd.f32 %v15266_v13, %v3601_v34  ;;  %v3695_v0 = vmul.f32 %v15304_v51, %v15379_v6  ;;  %18614 = vst [vmem:[#allocation160_spill] sm:$0xff] %v15398_v24  ;;  %v3746_v1 = vadd.f32 %v3738_v63, %v3710_v55  ;;  %v3636_v30 = vadd.f32 %v15245_v11, %v3600_v40 }
 0x6fa   : > { %v3602_v3 = vmul.f32 %v15261_v7, %v3590_v23  ;;  %v3592_v10 = vmul.f32 %v15344_v29, %v15388_v21  ;;  %v15407_v2 = vmul.f32 %v15329_v19, %v3822_v17  ;;  %v3603_v42 = vmul.f32 %v15261_v7, %v3591_v12 }
 0x6fb   : > { %v3713_v13 = vadd.f32 %v3705_v33, %v3637_v53  ;;  %v3593_v34 = vmul.f32 %v15353_v46, %v15396_v47  ;;  %v3802_v11 = vmul.f32 %v15325_v18, %v3790_v41  ;;  %v3712_v63 = vadd.f32 %v3704_v8, %v3636_v30 }
 0x6fc   : > { %18615 = vst [vmem:[#allocation161_spill] sm:$0xff] %v15407_v2  ;;  %v3706_v23 = vmul.f32 %v15313_v20, %v3694_v49  ;;  %v3696_v55 = vmul.f32 %v15390_v48, %v15404_v60  ;;  %v3775_v53 = vadd.f32 %v15236_v4, %v3747_v38  ;;  %v3740_v40 = vmul.f32 %v15317_v15, %v3728_v50 }
 0x6fd   : > { %v3707_v33 = vmul.f32 %v15313_v20, %v3695_v0  ;;  %v3697_v17 = vmul.f32 %v15398_v24, %v15412_v22  ;;  %v3774_v12 = vadd.f32 %v15240_v9, %v3746_v1  ;;  %v3638_v2 = vadd.f32 %v15256_v27, %v3602_v3 }
 0x6fe   : > { %v3730_v30 = vmul.f32 %v15238_v5, %v3543_v62  ;;  %v3604_v41 = vmul.f32 %v15261_v7, %v3592_v10  ;;  %v3749_v8 = vadd.f32 %v3741_v31, %v3713_v13  ;;  %v3639_v49 = vadd.f32 %v15289_v45, %v3603_v42  ;;  %v3725_v45 = vld [vmem:[#allocation2 + $0x47] sm:$0xff] }
 0x6ff   : > { %v3731_v4 = vmul.f32 %v15247_v16, %v15388_v21  ;;  %v3605_v50 = vmul.f32 %v15261_v7, %v3593_v34  ;;  %v3793_v38 = vmul.f32 %v15224_v59, %v15373_v26  ;;  %v3748_v0 = vadd.f32 %v3740_v40, %v3712_v63 }
 0x700   : > { %v3714_v24 = vadd.f32 %v3706_v23, %v3638_v2  ;;  %v3708_v9 = vmul.f32 %v15313_v20, %v3696_v55  ;;  %v3811_v27 = vadd.f32 %v3803_v39, %v3775_v53  ;;  %v3792_v3 = vmul.f32 %v15222_v58, %v15320_v36 }
 0x701   : > { %v3715_v10 = vadd.f32 %v3707_v33, %v3639_v49  ;;  %v3709_v62 = vmul.f32 %v15313_v20, %v3697_v17  ;;  %v3810_v31 = vadd.f32 %v3802_v11, %v3774_v12  ;;  %v3742_v1 = vmul.f32 %v15317_v15, %v3730_v30  ;;  %v18616_v49 = vld [vmem:[#allocation142_spill] sm:$0xff] }
 0x702   : > { %v3640_v7 = vadd.f32 %v15274_v37, %v3604_v41  ;;  %v3732_v13 = vmul.f32 %v15344_v29, %v15396_v47  ;;  %v3777_v2 = vadd.f32 %v15251_v25, %v3749_v8  ;;  %v3743_v42 = vmul.f32 %v15317_v15, %v3731_v4 }
 0x703   : > { %v3641_v39 = vadd.f32 %v15308_v54, %v3605_v50  ;;  %v3733_v36 = vmul.f32 %v3725_v45, %v15353_v46  ;;  %v3805_v34 = vmul.f32 %v15325_v18, %v3793_v38  ;;  %v3776_v20 = vadd.f32 %v15249_v57, %v3748_v0  ;;  %v18617_v50 = vld [vmem:[#allocation139_spill] sm:$0xff] }
 0x704   : > { %v3750_v11 = vadd.f32 %v3742_v1, %v3714_v24  ;;  %v3716_v63 = vadd.f32 %v3708_v9, %v3640_v7  ;;  %v3840_v23 = vadd.f32 %v15368_v35, %v3811_v27  ;;  %v3821_v37 = vmul.f32 %v15209_v52, %v15342_v44  ;;  %v3789_v9 = vld [vmem:[#allocation2 + $0x49] sm:$0xff] }
 0x705   : > { %v3751_v55 = vadd.f32 %v3743_v42, %v3715_v10  ;;  %v3717_v53 = vadd.f32 %v3709_v62, %v3641_v39  ;;  %v3839_v25 = vadd.f32 %v15357_v56, %v3810_v31  ;;  %v3804_v40 = vmul.f32 %v15325_v18, %v3792_v3  ;;  %v18620_v10 = vld [vmem:[#allocation160_spill] sm:$0xff] }
 0x706   : > { %v3794_v54 = vmul.f32 %v15293_v61, %v15379_v6  ;;  %v3744_v33 = vmul.f32 %v15317_v15, %v3732_v13  ;;  %v3881_v57 = vmul.f32 %v15337_v32, %v15382_v43  ;;  %v3813_v24 = vadd.f32 %v3805_v34, %v3777_v2  ;;  %v18623_v2 = vld [vmem:[#allocation158_spill] sm:$0xff]  ;;  %v18624_v34 = vld [vmem:[#allocation149_spill] sm:$0xff] }
 0x707   : > { %v3795_v35 = vmul.f32 %v15304_v51, %v15404_v60  ;;  %v3745_v44 = vmul.f32 %v15317_v15, %v3733_v36  ;;  %v3872_v17 = vmul.f32 %v15224_v59, %v15379_v6  ;;  %v3812_v56 = vadd.f32 %v3804_v40, %v3776_v20 }
 0x708   : > { %v3778_v12 = vadd.f32 %v15280_v28, %v3750_v11  ;;  %v3752_v30 = vadd.f32 %v3744_v33, %v3716_v63  ;;  %v3861_v41 = vadd.f32 %v15264_v14, %v3840_v23  ;;  %v3833_v8 = vmul.f32 %v15329_v19, %v3821_v37  ;;  %v18618_v28 = vld [vmem:[#allocation161_spill] sm:$0xff]  ;;  %v3818_v63 = vld [vmem:[#allocation2 + $0x4f] sm:$0xff]  ;;  %v15494_v33 = vld [vmem:[%s18622_s15] ss:$0 sm:$0xff]  ;;  %s18638_s15 = sld [smem:[#allocation73_spill]] }
 0x709   : > { %v3779_v4 = vadd.f32 %v18616_v49, %v3751_v55  ;;  %v3753_v43 = vadd.f32 %v3745_v44, %v3717_v53  ;;  %v3860_v38 = vadd.f32 %v18617_v50, %v3839_v25  ;;  %v3806_v0 = vmul.f32 %v15325_v18, %v3794_v54  ;;  %v18625_v55 = vld [vmem:[#allocation146_spill] sm:$0xff]  ;;  %v3868_v50 = vld [vmem:[#allocation2 + $0x51] sm:$0xff] }
 0x70a   : > { %v3823_v15 = vmul.f32 %v15238_v5, %v15388_v21  ;;  %v3796_v6 = vmul.f32 %v15390_v48, %v15412_v22  ;;  %v3842_v27 = vadd.f32 %v18618_v28, %v3813_v24  ;;  %v3807_v14 = vmul.f32 %v15325_v18, %v3795_v35  ;;  %v18621_v21 = vld [vmem:[#allocation151_spill] sm:$0xff]  ;;  %v18626_v24 = vld [vmem:[#allocation141_spill] sm:$0xff] }
 0x70b   : > { %v3824_v3 = vmul.f32 %v15247_v16, %v15396_v47  ;;  %v3797_v62 = vmul.f32 %v3789_v9, %v18620_v10  ;;  %v3841_v31 = vadd.f32 %v3833_v8, %v3812_v56  ;;  %v3871_v1 = vmul.f32 %v15222_v58, %v15373_v26  ;;  %v15487_v26 = vld [vmem:[%s18619_s22] ss:$0 sm:$0xff]  ;;  %s18641_s22 = sld [smem:[#allocation74_spill]] }
 0x70c   : > { %v3814_v7 = vadd.f32 %v3806_v0, %v3778_v12  ;;  %v3780_v13 = vadd.f32 %v18621_v21, %v3752_v30  ;;  %v3890_v42 = vadd.f32 %v18623_v2, %v3861_v41  ;;  %v3884_v39 = vmul.f32 %v15337_v32, %v3872_v17  ;;  %v18631_v21 = vld [vmem:[#allocation152_spill] sm:$0xff] }
 0x70d   : > { %v3815_v36 = vadd.f32 %v3807_v14, %v3779_v4  ;;  %v3781_v20 = vadd.f32 %v18624_v34, %v3753_v43  ;;  %v3889_v11 = vadd.f32 %v3881_v57, %v3860_v38  ;;  %v3835_v47 = vmul.f32 %v15329_v19, %v3823_v15  ;;  %v18628_v15 = vld [vmem:[#allocation122_spill] sm:$0xff] }
 0x70e   : > { %v3808_v23 = vmul.f32 %v15325_v18, %v3796_v6  ;;  %v3825_v37 = vmul.f32 %v3725_v45, %v15344_v29  ;;  %v3863_v53 = vadd.f32 %v18625_v55, %v3842_v27  ;;  %v3836_v25 = vmul.f32 %v15329_v19, %v3824_v3  ;;  %v18627_v45 = vld [vmem:[#allocation121_spill] sm:$0xff] }
 0x70f   : > { %v3809_v40 = vmul.f32 %v15325_v18, %v3797_v62  ;;  %v3826_v54 = vmul.f32 %v3818_v63, %v15353_v46  ;;  %v3862_v35 = vadd.f32 %v18626_v24, %v3841_v31  ;;  %v3883_v44 = vmul.f32 %v15337_v32, %v3871_v1  ;;  %v18629_v62 = vld [vmem:[#allocation143_spill] sm:$0xff] }
 0x710   : > { %v3843_v17 = vadd.f32 %v3835_v47, %v3814_v7  ;;  %v3816_v56 = vadd.f32 %v3808_v23, %v3780_v13  ;;  %v3844_v30 = vadd.f32 %v3836_v25, %v3815_v36  ;;  %v3874_v41 = vmul.f32 %v15304_v51, %v15412_v22  ;;  %v18630_v7 = vld [vmem:[#allocation123_spill] sm:$0xff]  ;;  %v18632_v23 = vld [vmem:[#allocation124_spill] sm:$0xff] }
 0x711   : > { %v3817_v8 = vadd.f32 %v3809_v40, %v3781_v20  ;;  %v3904_v18 = vadd.f32 %v15487_v26, %v3890_v42  ;;  %v3903_v4 = vadd.f32 %v15487_v26, %v3889_v11  ;;  %v3873_v43 = vmul.f32 %v15293_v61, %v15404_v60 }
 0x712   : > { %v3837_v38 = vmul.f32 %v15329_v19, %v3825_v37  ;;  %v3892_v28 = vadd.f32 %v3884_v39, %v3863_v53  ;;  %v3838_v22 = vmul.f32 %v15329_v19, %v3826_v54  ;;  %v3891_v3 = vadd.f32 %v3883_v44, %v3862_v35  ;;  %v18633_v54 = vld [vmem:[#allocation153_spill] sm:$0xff]  ;;  %v18635_v44 = vld [vmem:[#allocation156_spill] sm:$0xff] }
 0x713   : > { %v3864_v31 = vadd.f32 %v18629_v62, %v3843_v17  ;;  %v3865_v13 = vadd.f32 %v18631_v21, %v3844_v30  ;;  %v3876_v42 = vmul.f32 %v3868_v50, %v18620_v10  ;;  %v3886_v39 = vmul.f32 %v15337_v32, %v3874_v41 }
 0x714   : > { %v3845_v1 = vadd.f32 %v3837_v38, %v3816_v56  ;;  %v3846_v2 = vadd.f32 %v3838_v22, %v3817_v8  ;;  %v3885_v19 = vmul.f32 %v15337_v32, %v3873_v43  ;;  %v3875_v20 = vmul.f32 %v3789_v9, %v15390_v48  ;;  %v18634_v9 = vld [vmem:[#allocation125_spill] sm:$0xff] }
 0x715   : > { %v3906_v47 = vadd.f32 %v15487_v26, %v3892_v28  ;;  %v3905_v55 = vadd.f32 %v15487_v26, %v3891_v3  ;;  %v3894_v24 = vadd.f32 %v3886_v39, %v3865_v13  ;;  %v3888_v56 = vmul.f32 %v15337_v32, %v3876_v42  ;;  %v18639_v3 = vld [vmem:[#allocation128_spill] sm:$0xff]  ;;  %v11456_v13 = vld [vmem:[%s18638_s15] ss:$0 sm:$0xff]  ;;  %s18642_s15 = sld [smem:[#allocation75_spill]] }
 0x716   : > { %v3893_v40 = vadd.f32 %v3885_v19, %v3864_v31  ;;  %v3867_v17 = vadd.f32 %v18635_v44, %v3846_v2  ;;  %v3887_v30 = vmul.f32 %v15337_v32, %v3875_v20 }
 0x756   : > { %v3487_v57 = vpop.permute.xlu0 %3486 }
 0x757   : > { %v3509_v12 = vsel %vm3056_vm6, %v18627_v45, %v3487_v57  ;;  %v3866_v57 = vadd.f32 %v18633_v54, %v3845_v1 }
 0x758   : > { %v3485_v49 = vpop.permute.xlu1 %3484  ;;  %v3523_v0 = vmul.f32 %v15494_v33, %v3509_v12 }
 0x759   : > { %v3508_v6 = vsel %vm3056_vm6, %v18628_v15, %v3485_v49  ;;  %v3895_v38 = vadd.f32 %v3887_v30, %v3866_v57  ;;  %v3896_v15 = vadd.f32 %v3888_v56, %v3867_v17  ;;  %v13292_v17 = vld [vmem:[%s14840_s26 + $0x20] sm:$0xff]  ;;  %v13293_v30 = vld [vmem:[%s14840_s26 + $0x28] sm:$0xff] }
 0x75a   : > { %v3522_v27 = vmul.f32 %v15494_v33, %v3508_v6  ;;  %v3491_v14 = vpop.permute.xlu0 %3490  ;;  %v3912_v11 = vadd.f32 %v3904_v18, %v3523_v0  ;;  %v18636_v18 = vld [vmem:[#allocation126_spill] sm:$0xff]  ;;  %v3908_v0 = vadd.f32 %v15487_v26, %v3894_v24  ;;  %v18637_v6 = vld [vmem:[#allocation127_spill] sm:$0xff] }
 0x75b   : > { %v3511_v60 = vsel %vm3056_vm6, %v18630_v7, %v3491_v14  ;;  %v3909_v31 = vadd.f32 %v15487_v26, %v3895_v38  ;;  %v3910_v7 = vadd.f32 %v15487_v26, %v3896_v15 }
 0x75c   : > { %v3911_v36 = vadd.f32 %v3903_v4, %v3522_v27  ;;  %v3489_v34 = vpop.permute.xlu1 %3488  ;;  %v3525_v63 = vmul.f32 %v15494_v33, %v3511_v60  ;;  %v3907_v4 = vadd.f32 %v15487_v26, %v3893_v40  ;;  %v13289_v26 = vld [vmem:[%s14840_s26] sm:$0xff]  ;;  %v13291_v40 = vld [vmem:[%s14840_s26 + $0x18] sm:$0xff] }
 0x75d   : > { %v3510_v37 = vsel %vm3056_vm6, %v18632_v23, %v3489_v34  ;;  %v13288_v34 = vld [vmem:[%s14840_s26 + $0x8] sm:$0xff] }
 0x75e   : > { %v3524_v53 = vmul.f32 %v15494_v33, %v3510_v37  ;;  %12130 = vmatprep.mubr.msk.f32.mxu1 %vm2494_vm0, %v3911_v36  ;;  %v3495_v25 = vpop.permute.xlu0 %3494  ;;  %v3914_v41 = vadd.f32 %v3906_v47, %v3525_v63 }
 0x75f   : > { %v3513_v35 = vsel %vm3056_vm6, %v18634_v9, %v3495_v25  ;;  %12131 = vmatmul.mubr.msk.f32.vlgmr.msra.gmra.mxu1 %vm2494_vm0, %v3912_v11 }
 0x760   : > { %v3913_v45 = vadd.f32 %v3905_v55, %v3524_v53  ;;  %v3493_v12 = vpop.permute.xlu1 %3492  ;;  %v3527_v8 = vmul.f32 %v15494_v33, %v3513_v35  ;;  %v13290_v53 = vld [vmem:[%s14840_s26 + $0x10] sm:$0xff] }
 0x761   : > { %v3512_v49 = vsel %vm3056_vm6, %v18636_v18, %v3493_v12 }
 0x762   : > { %v3526_v43 = vmul.f32 %v15494_v33, %v3512_v49  ;;  %12133 = vmatprep.mubr.msk.f32.mxu1 %vm2494_vm0, %v3913_v45  ;;  %v3499_v50 = vpop.permute.xlu0 %3498  ;;  %v3916_v27 = vadd.f32 %v3908_v0, %v3527_v8 }
 0x763   : > { %v3515_v32 = vsel %vm3056_vm6, %v18637_v6, %v3499_v50  ;;  %12134 = vmatmul.mubr.msk.f32.gmra.mxu1 %vm2494_vm0, %v3914_v41  ;;  %v13295_v50 = vld [vmem:[%s14840_s26 + $0x38] sm:$0xff] }
 0x764   : > { %v3915_v28 = vadd.f32 %v3907_v4, %v3526_v43  ;;  %v3497_v22 = vpop.permute.xlu1 %3496  ;;  %v3529_v14 = vmul.f32 %v15494_v33, %v3515_v32  ;;  %v13294_v4 = vld [vmem:[%s14840_s26 + $0x30] sm:$0xff]  ;;  %s18640_s26 = sld [smem:[#allocation76_spill]] }
 0x765   : > { %v3514_v62 = vsel %vm3056_vm6, %v18639_v3, %v3497_v22 }
 0x766   : > { %v3528_v1 = vmul.f32 %v15494_v33, %v3514_v62  ;;  %12136 = vmatprep.mubr.msk.f32.mxu1 %vm2494_vm0, %v3915_v28  ;;  %v3918_v21 = vadd.f32 %v3910_v7, %v3529_v14 }
 0x767   : > { %12137 = vmatmul.mubr.msk.f32.gmra.mxu1 %vm2494_vm0, %v3916_v27 }
 0x768   : > { %v3917_v60 = vadd.f32 %v3909_v31, %v3528_v1 }
 0x76a   : > { %12139 = vmatprep.mubr.msk.f32.mxu1 %vm2494_vm0, %v3917_v60 }
 0x76b   : > { %12140 = vmatmul.mubr.msk.f32.gmra.mxu1 %vm2494_vm0, %v3918_v21 }
 0x81f   : > { %v12132_v2 = vpop.f32.mrf.mxu1 }
 0x820   : > { %v4021_v42 = vadd.f32 %v12132_v2, %v11456_v13 }
 0x821   : > { %v4015_v36 = vpop.f32.mrf.mxu1 }
 0x822   : > { %v15556_v33 = vadd.f32 %v13288_v34, %v4021_v42  ;;  %v4016_v39 = vadd.f32 %v11456_v13, %v4015_v36 }
 0x823   : > { %v12135_v19 = vpop.f32.mrf.mxu1 }
 0x824   : > { %v15559_v20 = vadd.f32 %v13289_v26, %v4016_v39  ;;  %v4065_v11 = vsel %vm2494_vm0, %v15556_v33, 0.0  ;;  %v4031_v47 = vadd.f32 %v12135_v19, %v11456_v13 }
 0x825   : > { %4066 = vadd.xlane.f32.xlu0 %v4065_v11  ;;  %v4025_v63 = vpop.f32.mrf.mxu1 }
 0x826   : > { %v4026_v23 = vadd.f32 %v11456_v13, %v4025_v63  ;;  %v4062_v37 = vsel %vm2494_vm0, %v15559_v20, 0.0  ;;  %v15569_v54 = vadd.f32 %v13291_v40, %v4031_v47 }
 0x827   : > { %4063 = vadd.xlane.f32.xlu1 %v4062_v37  ;;  %v12138_v55 = vpop.f32.mrf.mxu1 }
 0x828   : > { %v15566_v25 = vadd.f32 %v13290_v53, %v4026_v23  ;;  %v4041_v24 = vadd.f32 %v12138_v55, %v11456_v13  ;;  %v4071_v12 = vsel %vm2494_vm0, %v15569_v54, 0.0 }
 0x829   : > { %v4035_v57 = vpop.f32.mrf.mxu1 }
 0x82a   : > { %v4036_v9 = vadd.f32 %v11456_v13, %v4035_v57  ;;  %v4068_v35 = vsel %vm2494_vm0, %v15566_v25, 0.0  ;;  %v15579_v41 = vadd.f32 %v13293_v30, %v4041_v24 }
 0x82b   : > { %4069 = vadd.xlane.f32.xlu0 %v4068_v35  ;;  %v12141_v44 = vpop.f32.mrf.mxu1 }
 0x82c   : > { %v15574_v56 = vadd.f32 %v13292_v17, %v4036_v9  ;;  %v4051_v8 = vadd.f32 %v12141_v44, %v11456_v13  ;;  %v4077_v0 = vsel %vm2494_vm0, %v15579_v41, 0.0 }
 0x82d   : > { %v4045_v45 = vpop.f32.mrf.mxu1 }
 0x82e   : > { %v4046_v18 = vadd.f32 %v11456_v13, %v4045_v45  ;;  %v4074_v49 = vsel %vm2494_vm0, %v15574_v56, 0.0  ;;  %v15587_v38 = vadd.f32 %v13295_v50, %v4051_v8  ;;  %v2521_v50 = vld [vmem:[%s18640_s26] sm:$0xff] }
 0x82f   : > { %4072 = vadd.xlane.f32.xlu0 %v4071_v12  ;;  %4075 = vadd.xlane.f32.xlu1 %v4074_v49 }
 0x830   : > { %v15584_v43 = vadd.f32 %v13294_v4, %v4046_v18  ;;  %v4083_v6 = vsel %vm2494_vm0, %v15587_v38, 0.0  ;;  %v2522_v4 = vld [vmem:[%s18640_s26 + $0x8] sm:$0xff] }
 0x831   : > { %12142 = vmatprep.subr.mxu0 %v2522_v4 }
 0x832   : > { %v4080_v15 = vsel %vm2494_vm0, %v15584_v43, 0.0  ;;  %12143 = vmatpush3.msra.mxu0 %v2522_v4 }
 0x833   : > { %4078 = vadd.xlane.f32.xlu0 %v4077_v0  ;;  %4081 = vadd.xlane.f32.xlu1 %v4080_v15 }
 0x834   : > { %12144 = vmatprep.subr.mxu0 %v2521_v50 }
 0x835   : > { %12145 = vmatpush3.msra.mxu0 %v2521_v50 }
 0x837   : > { %4084 = vadd.xlane.f32.xlu0 %v4083_v6 }
 0x8ae   : > { %v4067_v32 = vpop.xlane.xlu0 %4066 }
 0x8af   : > { %v4087_v28 = vmul.f32 0.0625, %v4067_v32 }
 0x8b0   : > { %v4064_v22 = vpop.xlane.xlu1 %4063 }
 0x8b1   : > { %v15596_v27 = vsub.f32 %v15556_v33, %v4087_v28  ;;  %v4086_v14 = vmul.f32 0.0625, %v4064_v22 }
 0x8b3   : > { %v15599_v3 = vsub.f32 %v15559_v20, %v4086_v14  ;;  %v4103_v62 = vmul.f32 %v15596_v27, %v15596_v27 }
 0x8b4   : > { %v4070_v31 = vpop.xlane.xlu0 %4069 }
 0x8b5   : > { %v4088_v1 = vmul.f32 0.0625, %v4070_v31  ;;  %v4113_v7 = vsel %vm2494_vm0, %v4103_v62, 0.0  ;;  %v4102_v60 = vmul.f32 %v15599_v3, %v15599_v3 }
 0x8b6   : > { %4114 = vadd.xlane.f32.xlu0 %v4113_v7 }
 0x8b7   : > { %v15607_v21 = vsub.f32 %v15566_v25, %v4088_v1  ;;  %v4110_v13 = vsel %vm2494_vm0, %v4102_v60, 0.0 }
 0x8b8   : > { %v4076_v2 = vpop.xlane.xlu1 %4075  ;;  %4111 = vadd.xlane.f32.xlu1 %v4110_v13  ;;  %v4073_v42 = vpop.xlane.xlu0 %4072 }
 0x8b9   : > { %v4090_v36 = vmul.f32 0.0625, %v4076_v2  ;;  %v4089_v34 = vmul.f32 0.0625, %v4073_v42  ;;  %v4104_v39 = vmul.f32 %v15607_v21, %v15607_v21 }
 0x8bb   : > { %v15613_v19 = vsub.f32 %v15574_v56, %v4090_v36  ;;  %v15616_v26 = vsub.f32 %v15569_v54, %v4089_v34  ;;  %v4116_v11 = vsel %vm2494_vm0, %v4104_v39, 0.0 }
 0x8bc   : > { %v4082_v47 = vpop.xlane.xlu1 %4081  ;;  %4117 = vadd.xlane.f32.xlu1 %v4116_v11  ;;  %v4079_v63 = vpop.xlane.xlu0 %4078 }
 0x8bd   : > { %v4092_v23 = vmul.f32 0.0625, %v4082_v47  ;;  %v4091_v37 = vmul.f32 0.0625, %v4079_v63  ;;  %v4106_v55 = vmul.f32 %v15613_v19, %v15613_v19  ;;  %v4105_v53 = vmul.f32 %v15616_v26, %v15616_v26 }
 0x8bf   : > { %v15624_v40 = vsub.f32 %v15584_v43, %v4092_v23  ;;  %v15627_v57 = vsub.f32 %v15579_v41, %v4091_v37  ;;  %v4122_v24 = vsel %vm2494_vm0, %v4106_v55, 0.0  ;;  %v4119_v9 = vsel %vm2494_vm0, %v4105_v53, 0.0  ;;  %v11465_v55 = vld [vmem:[%s18641_s22] ss:$0 sm:$0xff]  ;;  %s18643_s22 = sld [smem:[#allocation78_spill]] }
 0x8c0   : > { %4123 = vadd.xlane.f32.xlu1 %v4122_v24  ;;  %4120 = vadd.xlane.f32.xlu0 %v4119_v9  ;;  %v4085_v35 = vpop.xlane.xlu0 %4084 }
 0x8c1   : > { %v4093_v44 = vmul.f32 0.0625, %v4085_v35  ;;  %v4108_v17 = vmul.f32 %v15624_v40, %v15624_v40  ;;  %v4107_v45 = vmul.f32 %v15627_v57, %v15627_v57 }
 0x8c3   : > { %v15636_v12 = vsub.f32 %v15587_v38, %v4093_v44  ;;  %v4128_v30 = vsel %vm2494_vm0, %v4108_v17, 0.0  ;;  %v4125_v8 = vsel %vm2494_vm0, %v4107_v45, 0.0  ;;  %v11466_v45 = vld [vmem:[%s18642_s15] ss:$0 sm:$0xff]  ;;  %s18644_s15 = sld [smem:[#allocation77_spill]] }
 0x8c4   : > { %4129 = vadd.xlane.f32.xlu1 %v4128_v30  ;;  %4126 = vadd.xlane.f32.xlu0 %v4125_v8 }
 0x8c5   : > { %v4109_v18 = vmul.f32 %v15636_v12, %v15636_v12 }
 0x8c7   : > { %v4131_v49 = vsel %vm2494_vm0, %v4109_v18, 0.0 }
 0x8c8   : > { %4132 = vadd.xlane.f32.xlu0 %v4131_v49 }
 0x93f   : > { %v4115_v0 = vpop.xlane.xlu0 %4114 }
 0x940   : > { %v4135_v15 = vmul.f32 0.0625, %v4115_v0 }
 0x941   : > { %v4112_v6 = vpop.xlane.xlu1 %4111 }
 0x942   : > { %v4143_v32 = vadd.f32 1e-05, %v4135_v15  ;;  %v4134_v28 = vmul.f32 0.0625, %v4112_v6 }
 0x944   : > { %13040 = vrsqrt.f32 %v4143_v32  ;;  %v4142_v22 = vadd.f32 1e-05, %v4134_v28 }
 0x945   : > { %v4118_v14 = vpop.xlane.xlu1 %4117 }
 0x946   : > { %13042 = vrsqrt.f32 %v4142_v22  ;;  %v4136_v62 = vmul.f32 0.0625, %v4118_v14 }
 0x948   : > { %v4144_v31 = vadd.f32 1e-05, %v4136_v62 }
 0x949   : > { %v4124_v1 = vpop.xlane.xlu1 %4123  ;;  %v4121_v7 = vpop.xlane.xlu0 %4120 }
 0x94a   : > { %13044 = vrsqrt.f32 %v4144_v31  ;;  %v4138_v60 = vmul.f32 0.0625, %v4124_v1  ;;  %v4137_v13 = vmul.f32 0.0625, %v4121_v7 }
 0x94c   : > { %v4146_v2 = vadd.f32 1e-05, %v4138_v60  ;;  %v4145_v42 = vadd.f32 1e-05, %v4137_v13 }
 0x94d   : > { %v4130_v36 = vpop.xlane.xlu1 %4129  ;;  %v4127_v34 = vpop.xlane.xlu0 %4126 }
 0x94e   : > { %13046 = vrsqrt.f32 %v4146_v2  ;;  %v4140_v39 = vmul.f32 0.0625, %v4130_v36  ;;  %v4139_v11 = vmul.f32 0.0625, %v4127_v34  ;;  %v2530_v36 = vld [vmem:[%s18643_s22 + $0x30] sm:$0xff]  ;;  %v2528_v34 = vld [vmem:[%s18643_s22 + $0x20] sm:$0xff] }
 0x94f   : > { %13048 = vrsqrt.f32 %v4145_v42 }
 0x950   : > { %v4148_v47 = vadd.f32 1e-05, %v4140_v39  ;;  %v4147_v63 = vadd.f32 1e-05, %v4139_v11  ;;  %v2527_v39 = vld [vmem:[%s18643_s22 + $0x18] sm:$0xff]  ;;  %v2526_v11 = vld [vmem:[%s18643_s22 + $0x10] sm:$0xff] }
 0x951   : > { %v13041_v23 = vpop.eup %13040  ;;  %v4133_v37 = vpop.xlane.xlu0 %4132 }
 0x952   : > { %v4159_v53 = vmul.f32 %v13041_v23, %v15596_v27  ;;  %13050 = vrsqrt.f32 %v4148_v47  ;;  %v4141_v24 = vmul.f32 0.0625, %v4133_v37  ;;  %v2525_v47 = vld [vmem:[%s18643_s22 + $0x8] sm:$0xff]  ;;  %v18645_v23 = vmov 0.0   ;;  %v11467_v37 = vld [vmem:[%s18644_s15] ss:$0 sm:$0xff]  ;;  %s18646_s15 = sld [smem:[#allocation79_spill]] }
 0x953   : > { %v13043_v9 = vpop.eup %13042  ;;  %13052 = vrsqrt.f32 %v4147_v63  ;;  %v2524_v63 = vld [vmem:[%s18643_s22] sm:$0xff] }
 0x954   : > { %v4149_v35 = vadd.f32 1e-05, %v4141_v24  ;;  %v4158_v44 = vmul.f32 %v13043_v9, %v15599_v3  ;;  %v4173_v17 = vmul.f32 %v11465_v55, %v4159_v53 }
 0x956   : > { %13054 = vrsqrt.f32 %v4149_v35  ;;  %v4172_v30 = vmul.f32 %v11465_v55, %v4158_v44  ;;  %v4187_v4 = vadd.f32 %v11466_v45, %v4173_v17 }
 0x957   : > { %v13045_v8 = vpop.eup %13044 }
 0x958   : > { %v4186_v18 = vadd.f32 %v11466_v45, %v4172_v30  ;;  %v4160_v49 = vmul.f32 %v13045_v8, %v15607_v21 }
 0x95a   : > { %12146 = vmatprep.mubr.msk.f32.mxu0 %vm2494_vm0, %v4186_v18  ;;  %v4174_v50 = vmul.f32 %v11465_v55, %v4160_v49 }
 0x95b   : > { %v13047_v27 = vpop.eup %13046  ;;  %12147 = vmatmul.mubr.msk.f32.vlgmr.msra.gmra.mxu0 %vm2494_vm0, %v4187_v4 }
 0x95c   : > { %v13049_v0 = vpop.eup %13048  ;;  %v4188_v15 = vadd.f32 %v11466_v45, %v4174_v50  ;;  %v4162_v6 = vmul.f32 %v13047_v27, %v15613_v19 }
 0x95d   : > { %v4161_v3 = vmul.f32 %v13049_v0, %v15616_v26 }
 0x95e   : > { %12149 = vmatprep.mubr.msk.f32.mxu0 %vm2494_vm0, %v4188_v15  ;;  %v4176_v32 = vmul.f32 %v11465_v55, %v4162_v6 }
 0x95f   : > { %v13051_v28 = vpop.eup %13050  ;;  %v4175_v22 = vmul.f32 %v11465_v55, %v4161_v3 }
 0x960   : > { %v13053_v14 = vpop.eup %13052  ;;  %v4190_v21 = vadd.f32 %v11466_v45, %v4176_v32  ;;  %v4164_v62 = vmul.f32 %v13051_v28, %v15624_v40 }
 0x961   : > { %v4189_v31 = vadd.f32 %v11466_v45, %v4175_v22  ;;  %v4163_v1 = vmul.f32 %v13053_v14, %v15627_v57  ;;  %v2531_v57 = vld [vmem:[%s18643_s22 + $0x38] sm:$0xff] }
 0x962   : > { %v4178_v7 = vmul.f32 %v11465_v55, %v4164_v62  ;;  %12158 = vmatprep.subr.mxu1 %v2531_v57 }
 0x963   : > { %v13055_v60 = vpop.eup %13054  ;;  %12150 = vmatmul.mubr.msk.f32.gmra.mxu0 %vm2494_vm0, %v4189_v31  ;;  %v4177_v19 = vmul.f32 %v11465_v55, %v4163_v1  ;;  %12159 = vmatpush3.msra.mxu1 %v2531_v57 }
 0x964   : > { %12152 = vmatprep.mubr.msk.f32.mxu0 %vm2494_vm0, %v4190_v21  ;;  %v4192_v26 = vadd.f32 %v11466_v45, %v4178_v7  ;;  %v4165_v13 = vmul.f32 %v13055_v60, %v15636_v12  ;;  %12160 = vmatprep.subr.mxu1 %v2530_v36  ;;  %v2529_v12 = vld [vmem:[%s18643_s22 + $0x28] sm:$0xff] }
 0x965   : > { %v4191_v2 = vadd.f32 %v11466_v45, %v4177_v19  ;;  %12161 = vmatpush3.msra.mxu1 %v2530_v36 }
 0x966   : > { %v4179_v42 = vmul.f32 %v11465_v55, %v4165_v13  ;;  %12162 = vmatprep.subr.mxu1 %v2529_v12 }
 0x967   : > { %12153 = vmatmul.mubr.msk.f32.gmra.mxu0 %vm2494_vm0, %v4191_v2  ;;  %12163 = vmatpush3.msra.mxu1 %v2529_v12 }
 0x968   : > { %12155 = vmatprep.mubr.msk.f32.mxu0 %vm2494_vm0, %v4192_v26  ;;  %v4193_v40 = vadd.f32 %v11466_v45, %v4179_v42  ;;  %12164 = vmatprep.subr.mxu1 %v2528_v34 }
 0x969   : > { %12165 = vmatpush3.msra.mxu1 %v2528_v34 }
 0x96a   : > { %12166 = vmatprep.subr.mxu1 %v2527_v39 }
 0x96b   : > { %12156 = vmatmul.mubr.msk.f32.gmra.mxu0 %vm2494_vm0, %v4193_v40  ;;  %12167 = vmatpush3.msra.mxu1 %v2527_v39 }
 0x96c   : > { %12168 = vmatprep.subr.mxu1 %v2526_v11 }
 0x96d   : > { %12169 = vmatpush3.msra.mxu1 %v2526_v11 }
 0x96e   : > { %12170 = vmatprep.subr.mxu1 %v2525_v47 }
 0x96f   : > { %12171 = vmatpush3.msra.mxu1 %v2525_v47 }
 0x970   : > { %12172 = vmatprep.subr.mxu1 %v2524_v63 }
 0x971   : > { %12173 = vmatpush3.msra.mxu1 %v2524_v63 }
 0x972   : > { %12202 = vmatprep.subr.mxu1 %v18645_v23 }
 0xa1b   : > { %v12148_v55 = vpop.f32.mrf.mxu0 }
 0xa1c   : > { %v4296_v53 = vadd.f32 %v12148_v55, %v11467_v37 }
 0xa1d   : > { %v4290_v24 = vpop.f32.mrf.mxu0 }
 0xa1e   : > { %v4338_v9 = vmul.f32 0.70710677, %v4296_v53  ;;  %v4291_v35 = vadd.f32 %v11467_v37, %v4290_v24  ;;  %v4330_v60 = vmul.f32 0.5, %v4296_v53 }
 0xa20   : > { %13056 = verf.f32 %v4338_v9  ;;  %v4337_v44 = vmul.f32 0.70710677, %v4291_v35  ;;  %v4329_v1 = vmul.f32 0.5, %v4291_v35 }
 0xa22   : > { %13058 = verf.f32 %v4337_v44 }
 0xa23   : > { %v12151_v17 = vpop.f32.mrf.mxu0 }
 0xa24   : > { %v4306_v45 = vadd.f32 %v12151_v17, %v11467_v37 }
 0xa25   : > { %v4300_v30 = vpop.f32.mrf.mxu0 }
 0xa26   : > { %v4340_v8 = vmul.f32 0.70710677, %v4306_v45  ;;  %v4301_v18 = vadd.f32 %v11467_v37, %v4300_v30  ;;  %v4332_v34 = vmul.f32 0.5, %v4306_v45 }
 0xa27   : > { %v12154_v49 = vpop.f32.mrf.mxu0 }
 0xa28   : > { %13060 = verf.f32 %v4340_v8  ;;  %v4339_v4 = vmul.f32 0.70710677, %v4301_v18  ;;  %v4316_v50 = vadd.f32 %v12154_v49, %v11467_v37  ;;  %v4331_v57 = vmul.f32 0.5, %v4301_v18 }
 0xa29   : > { %v4310_v27 = vpop.f32.mrf.mxu0 }
 0xa2a   : > { %13062 = verf.f32 %v4339_v4  ;;  %v4342_v0 = vmul.f32 0.70710677, %v4316_v50  ;;  %v4311_v15 = vadd.f32 %v11467_v37, %v4310_v27  ;;  %v4334_v24 = vmul.f32 0.5, %v4316_v50  ;;  %v11476_v4 = vld [vmem:[%s18646_s15] ss:$0 sm:$0xff]  ;;  %s18655_s15 = sld [smem:[#allocation82_spill]] }
 0xa2b   : > { %v12157_v6 = vpop.f32.mrf.mxu0 }
 0xa2c   : > { %13064 = verf.f32 %v4342_v0  ;;  %v4341_v3 = vmul.f32 0.70710677, %v4311_v15  ;;  %v4326_v32 = vadd.f32 %v12157_v6, %v11467_v37 }
 0xa2d   : > { %v13057_v28 = vpop.eup %13056  ;;  %v4320_v22 = vpop.f32.mrf.mxu0 }
 0xa2e   : > { %13066 = verf.f32 %v4341_v3  ;;  %v4344_v14 = vmul.f32 0.70710677, %v4326_v32  ;;  %v4354_v62 = vadd.f32 1.0, %v13057_v28  ;;  %v4321_v31 = vadd.f32 %v11467_v37, %v4320_v22 }
 0xa2f   : > { %v13059_v21 = vpop.eup %13058  ;;  %v4333_v37 = vmul.f32 0.5, %v4311_v15  ;;  %v4336_v8 = vmul.f32 0.5, %v4326_v32 }
 0xa30   : > { %v4353_v7 = vadd.f32 1.0, %v13059_v21  ;;  %13068 = verf.f32 %v4344_v14  ;;  %v4343_v19 = vmul.f32 0.70710677, %v4321_v31  ;;  %v4362_v13 = vmul.f32 %v4354_v62, %v4330_v60 }
 0xa31   : > { %v4335_v45 = vmul.f32 0.5, %v4321_v31 }
 0xa32   : > { %v4361_v26 = vmul.f32 %v4353_v7, %v4329_v1  ;;  %13070 = verf.f32 %v4343_v19 }
 0xa34   : > { %12174 = vmatprep.mubr.msk.f32.mxu1 %vm2982_vm8, %v4361_v26 }
 0xa35   : > { %v13061_v2 = vpop.eup %13060  ;;  %12175 = vmatmul.mubr.msk.f32.vlgmr.msra.gmra.mxu1 %vm2982_vm8, %v4362_v13 }
 0xa36   : > { %v4356_v40 = vadd.f32 1.0, %v13061_v2 }
 0xa37   : > { %v13063_v42 = vpop.eup %13062 }
 0xa38   : > { %v4355_v36 = vadd.f32 1.0, %v13063_v42  ;;  %v4364_v47 = vmul.f32 %v4356_v40, %v4332_v34 }
 0xa39   : > { %v13065_v12 = vpop.eup %13064 }
 0xa3a   : > { %v4363_v39 = vmul.f32 %v4355_v36, %v4331_v57  ;;  %v4358_v63 = vadd.f32 1.0, %v13065_v12 }
 0xa3b   : > { %v13067_v11 = vpop.eup %13066 }
 0xa3c   : > { %v4357_v55 = vadd.f32 1.0, %v13067_v11  ;;  %12177 = vmatprep.mubr.msk.f32.mxu1 %vm2982_vm8, %v4363_v39  ;;  %v4366_v35 = vmul.f32 %v4358_v63, %v4334_v24 }
 0xa3d   : > { %v13069_v53 = vpop.eup %13068  ;;  %12178 = vmatmul.mubr.msk.f32.gmra.mxu1 %vm2982_vm8, %v4364_v47 }
 0xa3e   : > { %v4365_v9 = vmul.f32 %v4357_v55, %v4333_v37  ;;  %v4360_v17 = vadd.f32 1.0, %v13069_v53 }
 0xa3f   : > { %v13071_v44 = vpop.eup %13070 }
 0xa40   : > { %12180 = vmatprep.mubr.msk.f32.mxu1 %vm2982_vm8, %v4365_v9  ;;  %v4359_v30 = vadd.f32 1.0, %v13071_v44  ;;  %v4368_v49 = vmul.f32 %v4360_v17, %v4336_v8 }
 0xa41   : > { %12181 = vmatmul.mubr.msk.f32.gmra.mxu1 %vm2982_vm8, %v4366_v35 }
 0xa42   : > { %v4367_v18 = vmul.f32 %v4359_v30, %v4335_v45 }
 0xa44   : > { %12183 = vmatprep.mubr.msk.f32.mxu1 %vm2982_vm8, %v4367_v18 }
 0xa45   : > { %12184 = vmatmul.mubr.msk.f32.gmra.mxu1 %vm2982_vm8, %v4368_v49 }
 0xa46   : > { %12218 = vmatprep.mubr.msk.f32.mxu1 %vm14205_vm7, %v18645_v23 }
 0xaf5   : > { %v12176_v50 = vpop.f32.mrf.mxu1 }
 0xaf6   : > { %v4471_v27 = vadd.f32 %v12176_v50, %v11476_v4 }
 0xaf7   : > { %v4465_v0 = vpop.f32.mrf.mxu1 }
 0xaf8   : > { %v15685_v15 = vadd.f32 %v4471_v27, %v15556_v33  ;;  %v4466_v6 = vadd.f32 %v11476_v4, %v4465_v0 }
 0xafa   : > { %18647 = vst [vmem:[#allocation142_spill] sm:$0xff] %v15685_v15  ;;  %v15688_v3 = vadd.f32 %v4466_v6, %v15559_v20  ;;  %v4541_v32 = vsel %vm2494_vm0, %v15685_v15, 0.0 }
 0xafb   : > { %4542 = vadd.xlane.f32.xlu0 %v4541_v32 }
 0xafc   : > { %18648 = vst [vmem:[#allocation139_spill] sm:$0xff] %v15688_v3  ;;  %v4538_v28 = vsel %vm2494_vm0, %v15688_v3, 0.0 }
 0xafd   : > { %v12179_v22 = vpop.f32.mrf.mxu1  ;;  %4539 = vadd.xlane.f32.xlu1 %v4538_v28 }
 0xafe   : > { %v4481_v14 = vadd.f32 %v12179_v22, %v11476_v4 }
 0xaff   : > { %v4475_v21 = vpop.f32.mrf.mxu1 }
 0xb00   : > { %v15695_v62 = vadd.f32 %v4481_v14, %v15569_v54  ;;  %v4476_v33 = vadd.f32 %v11476_v4, %v4475_v21 }
 0xb01   : > { %v12182_v31 = vpop.f32.mrf.mxu1 }
 0xb02   : > { %18649 = vst [vmem:[#allocation161_spill] sm:$0xff] %v15695_v62  ;;  %v15698_v1 = vadd.f32 %v4476_v33, %v15566_v25  ;;  %v4491_v20 = vadd.f32 %v12182_v31, %v11476_v4  ;;  %v4547_v7 = vsel %vm2494_vm0, %v15695_v62, 0.0 }
 0xb03   : > { %4548 = vadd.xlane.f32.xlu0 %v4547_v7  ;;  %v4485_v60 = vpop.f32.mrf.mxu1 }
 0xb04   : > { %18650 = vst [vmem:[#allocation151_spill] sm:$0xff] %v15698_v1  ;;  %v15703_v19 = vadd.f32 %v4491_v20, %v15579_v41  ;;  %v4486_v26 = vadd.f32 %v11476_v4, %v4485_v60  ;;  %v4544_v13 = vsel %vm2494_vm0, %v15698_v1, 0.0 }
 0xb05   : > { %4545 = vadd.xlane.f32.xlu1 %v4544_v13  ;;  %v12185_v2 = vpop.f32.mrf.mxu1 }
 0xb06   : > { %18651 = vst [vmem:[#allocation158_spill] sm:$0xff] %v15703_v19  ;;  %v15708_v54 = vadd.f32 %v4486_v26, %v15574_v56  ;;  %v4553_v25 = vsel %vm2494_vm0, %v15703_v19, 0.0  ;;  %v4501_v42 = vadd.f32 %v12185_v2, %v11476_v4 }
 0xb07   : > { %4554 = vadd.xlane.f32.xlu0 %v4553_v25  ;;  %v4495_v40 = vpop.f32.mrf.mxu1 }
 0xb08   : > { %18652 = vst [vmem:[#allocation149_spill] sm:$0xff] %v15708_v54  ;;  %v4550_v57 = vsel %vm2494_vm0, %v15708_v54, 0.0  ;;  %v15715_v41 = vadd.f32 %v4501_v42, %v15587_v38  ;;  %v4496_v36 = vadd.f32 %v11476_v4, %v4495_v40 }
 0xb09   : > { %4551 = vadd.xlane.f32.xlu1 %v4550_v57  ;;  %v4515_v57 = vld [vmem:[%s18655_s15 + $0x8] sm:$0xff] }
 0xb0a   : > { %18653 = vst [vmem:[#allocation146_spill] sm:$0xff] %v15715_v41  ;;  %v15718_v12 = vadd.f32 %v4496_v36, %v15584_v43  ;;  %v4559_v56 = vsel %vm2494_vm0, %v15715_v41, 0.0  ;;  %v4514_v36 = vld [vmem:[%s18655_s15] sm:$0xff]  ;;  %12186 = vmatprep.subr.mxu0 %v4515_v57 }
 0xb0b   : > { %4560 = vadd.xlane.f32.xlu0 %v4559_v56  ;;  %12187 = vmatpush3.msra.mxu0 %v4515_v57 }
 0xb0c   : > { %18654 = vst [vmem:[#allocation141_spill] sm:$0xff] %v15718_v12  ;;  %v4556_v34 = vsel %vm2494_vm0, %v15718_v12, 0.0  ;;  %12188 = vmatprep.subr.mxu0 %v4514_v36 }
 0xb0d   : > { %4557 = vadd.xlane.f32.xlu1 %v4556_v34  ;;  %12189 = vmatpush3.msra.mxu0 %v4514_v36 }
 0xb0e   : > { %12235 = vmatprep.subr.mxu0 %v18645_v23 }
 0xb84   : > { %v4543_v39 = vpop.xlane.xlu0 %4542 }
 0xb85   : > { %v4563_v11 = vmul.f32 0.0625, %v4543_v39 }
 0xb86   : > { %v4540_v47 = vpop.xlane.xlu1 %4539 }
 0xb87   : > { %v15725_v63 = vsub.f32 %v15685_v15, %v4563_v11  ;;  %v4562_v38 = vmul.f32 0.0625, %v4540_v47 }
 0xb89   : > { %v15728_v37 = vsub.f32 %v15688_v3, %v4562_v38  ;;  %v4579_v43 = vmul.f32 %v15725_v63, %v15725_v63 }
 0xb8b   : > { %v4589_v55 = vsel %vm2494_vm0, %v4579_v43, 0.0  ;;  %v4578_v53 = vmul.f32 %v15728_v37, %v15728_v37 }
 0xb8c   : > { %v4549_v24 = vpop.xlane.xlu0 %4548  ;;  %4590 = vadd.xlane.f32.xlu0 %v4589_v55 }
 0xb8d   : > { %v4565_v9 = vmul.f32 0.0625, %v4549_v24  ;;  %v4586_v35 = vsel %vm2494_vm0, %v4578_v53, 0.0 }
 0xb8e   : > { %v4546_v44 = vpop.xlane.xlu1 %4545  ;;  %4587 = vadd.xlane.f32.xlu1 %v4586_v35 }
 0xb8f   : > { %v15737_v17 = vsub.f32 %v15695_v62, %v4565_v9  ;;  %v4564_v45 = vmul.f32 0.0625, %v4546_v44 }
 0xb90   : > { %v4555_v30 = vpop.xlane.xlu0 %4554 }
 0xb91   : > { %v15740_v8 = vsub.f32 %v15698_v1, %v4564_v45  ;;  %v4567_v18 = vmul.f32 0.0625, %v4555_v30  ;;  %v4581_v49 = vmul.f32 %v15737_v17, %v15737_v17 }
 0xb92   : > { %v4552_v4 = vpop.xlane.xlu1 %4551 }
 0xb93   : > { %v15745_v50 = vsub.f32 %v15703_v19, %v4567_v18  ;;  %v4566_v27 = vmul.f32 0.0625, %v4552_v4  ;;  %v4595_v0 = vsel %vm2494_vm0, %v4581_v49, 0.0  ;;  %v4580_v6 = vmul.f32 %v15740_v8, %v15740_v8 }
 0xb94   : > { %4596 = vadd.xlane.f32.xlu0 %v4595_v0  ;;  %v4561_v28 = vpop.xlane.xlu0 %4560 }
 0xb95   : > { %v15751_v32 = vsub.f32 %v15708_v54, %v4566_v27  ;;  %v4592_v22 = vsel %vm2494_vm0, %v4580_v6, 0.0  ;;  %v4583_v14 = vmul.f32 %v15745_v50, %v15745_v50  ;;  %v4569_v21 = vmul.f32 0.0625, %v4561_v28  ;;  %v11485_v28 = vld [vmem:[%s18656_s9] ss:$0 sm:$0xff]  ;;  %s18659_s9 = smov 96   ;;  %v18696_v54 = vld [vmem:[#allocation133_spill] sm:$0xff] }
 0xb96   : > { %4593 = vadd.xlane.f32.xlu1 %v4592_v22  ;;  %v4558_v33 = vpop.xlane.xlu1 %4557 }
 0xb97   : > { %v4601_v31 = vsel %vm2494_vm0, %v4583_v14, 0.0  ;;  %v4582_v20 = vmul.f32 %v15751_v32, %v15751_v32  ;;  %v15760_v7 = vsub.f32 %v15715_v41, %v4569_v21  ;;  %v4568_v60 = vmul.f32 0.0625, %v4558_v33 }
 0xb98   : > { %4602 = vadd.xlane.f32.xlu0 %v4601_v31 }
 0xb99   : > { %v4598_v26 = vsel %vm2494_vm0, %v4582_v20, 0.0  ;;  %v15764_v13 = vsub.f32 %v15718_v12, %v4568_v60  ;;  %v4585_v2 = vmul.f32 %v15760_v7, %v15760_v7 }
 0xb9a   : > { %4599 = vadd.xlane.f32.xlu1 %v4598_v26 }
 0xb9b   : > { %v4607_v25 = vsel %vm2494_vm0, %v4585_v2, 0.0  ;;  %v4584_v42 = vmul.f32 %v15764_v13, %v15764_v13  ;;  %v11486_v2 = vld [vmem:[%s18657_s0] ss:$0 sm:$0xff]  ;;  %s18658_s0 = sld [smem:[#allocation83_spill]] }
 0xb9c   : > { %4608 = vadd.xlane.f32.xlu0 %v4607_v25 }
 0xb9d   : > { %v4604_v40 = vsel %vm2494_vm0, %v4584_v42, 0.0 }
 0xb9e   : > { %4605 = vadd.xlane.f32.xlu1 %v4604_v40 }
 0xc15   : > { %v4591_v56 = vpop.xlane.xlu0 %4590 }
 0xc16   : > { %v4611_v34 = vmul.f32 0.0625, %v4591_v56 }
 0xc17   : > { %v4588_v39 = vpop.xlane.xlu1 %4587 }
 0xc18   : > { %v4619_v11 = vadd.f32 1e-05, %v4611_v34  ;;  %v4610_v47 = vmul.f32 0.0625, %v4588_v39 }
 0xc1a   : > { %13072 = vrsqrt.f32 %v4619_v11  ;;  %v4618_v38 = vadd.f32 1e-05, %v4610_v47 }
 0xc1c   : > { %13074 = vrsqrt.f32 %v4618_v38 }
 0xc1d   : > { %v4597_v43 = vpop.xlane.xlu0 %4596 }
 0xc1e   : > { %v4613_v55 = vmul.f32 0.0625, %v4597_v43 }
 0xc1f   : > { %v4594_v53 = vpop.xlane.xlu1 %4593 }
 0xc20   : > { %v4621_v24 = vadd.f32 1e-05, %v4613_v55  ;;  %v4612_v9 = vmul.f32 0.0625, %v4594_v53 }
 0xc21   : > { %v4603_v35 = vpop.xlane.xlu0 %4602 }
 0xc22   : > { %13076 = vrsqrt.f32 %v4621_v24  ;;  %v4620_v44 = vadd.f32 1e-05, %v4612_v9  ;;  %v4615_v45 = vmul.f32 0.0625, %v4603_v35 }
 0xc23   : > { %v4600_v30 = vpop.xlane.xlu1 %4599 }
 0xc24   : > { %13078 = vrsqrt.f32 %v4620_v44  ;;  %v4623_v18 = vadd.f32 1e-05, %v4615_v45  ;;  %v4614_v49 = vmul.f32 0.0625, %v4600_v30 }
 0xc25   : > { %v4609_v27 = vpop.xlane.xlu0 %4608 }
 0xc26   : > { %13080 = vrsqrt.f32 %v4623_v18  ;;  %v4622_v4 = vadd.f32 1e-05, %v4614_v49  ;;  %v4617_v6 = vmul.f32 0.0625, %v4609_v27 }
 0xc27   : > { %v13073_v0 = vpop.eup %13072  ;;  %v4606_v14 = vpop.xlane.xlu1 %4605 }
 0xc28   : > { %v4635_v22 = vmul.f32 %v13073_v0, %v15725_v63  ;;  %13082 = vrsqrt.f32 %v4622_v4  ;;  %v4625_v33 = vadd.f32 1e-05, %v4617_v6  ;;  %v4616_v31 = vmul.f32 0.0625, %v4606_v14 }
 0xc29   : > { %v13075_v21 = vpop.eup %13074 }
 0xc2a   : > { %v4634_v20 = vmul.f32 %v13075_v21, %v15728_v37  ;;  %v4649_v60 = vmul.f32 %v11485_v28, %v4635_v22  ;;  %13084 = vrsqrt.f32 %v4625_v33  ;;  %v4624_v26 = vadd.f32 1e-05, %v4616_v31 }
 0xc2c   : > { %v4648_v25 = vmul.f32 %v11485_v28, %v4634_v20  ;;  %13086 = vrsqrt.f32 %v4624_v26  ;;  %v4663_v57 = vadd.f32 %v11486_v2, %v4649_v60 }
 0xc2e   : > { %v4662_v42 = vadd.f32 %v11486_v2, %v4648_v25 }
 0xc2f   : > { %v13077_v40 = vpop.eup %13076 }
 0xc30   : > { %12190 = vmatprep.mubr.msk.f32.mxu0 %vm2494_vm0, %v4662_v42  ;;  %v4637_v63 = vmul.f32 %v13077_v40, %v15737_v17 }
 0xc31   : > { %v13079_v36 = vpop.eup %13078  ;;  %12191 = vmatmul.mubr.msk.f32.vlgmr.msra.gmra.mxu0 %vm2494_vm0, %v4663_v57 }
 0xc32   : > { %v4636_v56 = vmul.f32 %v13079_v36, %v15740_v8  ;;  %v4651_v37 = vmul.f32 %v11485_v28, %v4637_v63 }
 0xc33   : > { %v13081_v34 = vpop.eup %13080 }
 0xc34   : > { %v4650_v39 = vmul.f32 %v11485_v28, %v4636_v56  ;;  %v4639_v11 = vmul.f32 %v13081_v34, %v15745_v50  ;;  %v4665_v55 = vadd.f32 %v11486_v2, %v4651_v37 }
 0xc35   : > { %v13083_v47 = vpop.eup %13082 }
 0xc36   : > { %v4664_v38 = vadd.f32 %v11486_v2, %v4650_v39  ;;  %v4638_v43 = vmul.f32 %v13083_v47, %v15751_v32  ;;  %v4653_v53 = vmul.f32 %v11485_v28, %v4639_v11 }
 0xc37   : > { %v13085_v24 = vpop.eup %13084 }
 0xc38   : > { %12193 = vmatprep.mubr.msk.f32.mxu0 %vm2494_vm0, %v4664_v38  ;;  %v4652_v17 = vmul.f32 %v11485_v28, %v4638_v43  ;;  %v4641_v8 = vmul.f32 %v13085_v24, %v15760_v7  ;;  %v4667_v44 = vadd.f32 %v11486_v2, %v4653_v53  ;;  %v11487_v7 = vld [vmem:[%s18658_s0] ss:$0 sm:$0xff]  ;;  %s18660_s0 = smov 120  }
 0xc39   : > { %12194 = vmatmul.mubr.msk.f32.gmra.mxu0 %vm2494_vm0, %v4665_v55  ;;  %v13087_v9 = vpop.eup %13086 }
 0xc3a   : > { %v4666_v35 = vadd.f32 %v11486_v2, %v4652_v17  ;;  %v4640_v50 = vmul.f32 %v13087_v9, %v15764_v13  ;;  %v4655_v45 = vmul.f32 %v11485_v28, %v4641_v8 }
 0xc3c   : > { %12196 = vmatprep.mubr.msk.f32.mxu0 %vm2494_vm0, %v4666_v35  ;;  %v4654_v32 = vmul.f32 %v11485_v28, %v4640_v50  ;;  %v4669_v18 = vadd.f32 %v11486_v2, %v4655_v45 }
 0xc3d   : > { %12197 = vmatmul.mubr.msk.f32.gmra.mxu0 %vm2494_vm0, %v4667_v44 }
 0xc3e   : > { %v4668_v30 = vadd.f32 %v11486_v2, %v4654_v32 }
 0xc40   : > { %12199 = vmatprep.mubr.msk.f32.mxu0 %vm2494_vm0, %v4668_v30 }
 0xc41   : > { %12200 = vmatmul.mubr.msk.f32.gmra.mxu0 %vm2494_vm0, %v4669_v18 }
 0xc42   : > { %12251 = vmatprep.mubr.msk.f32.mxu0 %vm14205_vm7, %v18645_v23 }
 0xcf1   : > { %v12192_v49 = vpop.f32.mrf.mxu0 }
 0xcf2   : > { %v15796_v4 = vadd.f32 %v12192_v49, %v11487_v7 }
 0xcf3   : > { %v4766_v13 = vpop.f32.mrf.mxu0 }
 0xcf4   : > { %v4806_v27 = vmul.f32 %v15796_v4, %v15796_v4  ;;  %v15800_v0 = vadd.f32 %v11487_v7, %v4766_v13 }
 0xcf6   : > { %v4805_v6 = vmul.f32 %v15800_v0, %v15800_v0  ;;  %v4814_v28 = vsel %vm2494_vm0, %v4806_v27, 0.0  ;;  %v4852_v2 = vsel %vm2847_vm1, %v4806_v27, 0.0 }
 0xcf8   : > { %v4813_v22 = vsel %vm2494_vm0, %v4805_v6, 0.0  ;;  %v4851_v20 = vsel %vm2847_vm1, %v4805_v6, 0.0 }
 0xcf9   : > { %v4815_v14 = vadd.f32 %v4814_v28, %v4813_v22  ;;  %v12195_v21 = vpop.f32.mrf.mxu0  ;;  %v4853_v57 = vadd.f32 %v4852_v2, %v4851_v20 }
 0xcfa   : > { %v15806_v33 = vadd.f32 %v12195_v21, %v11487_v7 }
 0xcfb   : > { %v4776_v31 = vpop.f32.mrf.mxu0 }
 0xcfc   : > { %v15809_v60 = vadd.f32 %v11487_v7, %v4776_v31  ;;  %v4808_v25 = vmul.f32 %v15806_v33, %v15806_v33 }
 0xcfd   : > { %v12198_v26 = vpop.f32.mrf.mxu0 }
 0xcfe   : > { %v4807_v42 = vmul.f32 %v15809_v60, %v15809_v60  ;;  %v15816_v40 = vadd.f32 %v12198_v26, %v11487_v7  ;;  %v4818_v11 = vsel %vm2494_vm0, %v4808_v25, 0.0  ;;  %v4856_v47 = vsel %vm2847_vm1, %v4808_v25, 0.0 }
 0xcff   : > { %v4786_v63 = vpop.f32.mrf.mxu0 }
 0xd00   : > { %v4816_v36 = vsel %vm2494_vm0, %v4807_v42, 0.0  ;;  %v4854_v56 = vsel %vm2847_vm1, %v4807_v42, 0.0  ;;  %v15820_v34 = vadd.f32 %v11487_v7, %v4786_v63  ;;  %v4810_v38 = vmul.f32 %v15816_v40, %v15816_v40 }
 0xd01   : > { %v4817_v37 = vadd.f32 %v4816_v36, %v4815_v14  ;;  %v4855_v39 = vadd.f32 %v4854_v56, %v4853_v57  ;;  %v12201_v55 = vpop.f32.mrf.mxu0 }
 0xd02   : > { %v4809_v43 = vmul.f32 %v15820_v34, %v15820_v34  ;;  %v15828_v17 = vadd.f32 %v12201_v55, %v11487_v7  ;;  %v4822_v32 = vsel %vm2494_vm0, %v4810_v38, 0.0  ;;  %v4860_v30 = vsel %vm2847_vm1, %v4810_v38, 0.0 }
 0xd03   : > { %v4819_v53 = vadd.f32 %v4818_v11, %v4817_v37  ;;  %v4857_v24 = vadd.f32 %v4856_v47, %v4855_v39  ;;  %v4796_v35 = vpop.f32.mrf.mxu0 }
 0xd04   : > { %v4820_v8 = vsel %vm2494_vm0, %v4809_v43, 0.0  ;;  %v4858_v9 = vsel %vm2847_vm1, %v4809_v43, 0.0  ;;  %v15832_v45 = vadd.f32 %v11487_v7, %v4796_v35  ;;  %5257 = vrot.lane.b32.xlu1 %v15828_v17, %s18375_s23  ;;  %v4812_v18 = vmul.f32 %v15828_v17, %v15828_v17 }
 0xd05   : > { %v4821_v44 = vadd.f32 %v4820_v8, %v4819_v53  ;;  %v4859_v50 = vadd.f32 %v4858_v9, %v4857_v24 }
 0xd06   : > { %v4811_v49 = vmul.f32 %v15832_v45, %v15832_v45  ;;  %v4826_v14 = vsel %vm2494_vm0, %v4812_v18, 0.0  ;;  %v4864_v21 = vsel %vm2847_vm1, %v4812_v18, 0.0 }
 0xd07   : > { %v4823_v13 = vadd.f32 %v4822_v32, %v4821_v44  ;;  %v4861_v27 = vadd.f32 %v4860_v30, %v4859_v50 }
 0xd08   : > { %v4824_v6 = vsel %vm2494_vm0, %v4811_v49, 0.0  ;;  %v4862_v7 = vsel %vm2847_vm1, %v4811_v49, 0.0 }
 0xd09   : > { %v4825_v28 = vadd.f32 %v4824_v6, %v4823_v13  ;;  %v4863_v22 = vadd.f32 %v4862_v7, %v4861_v27 }
 0xd0b   : > { %v4827_v31 = vadd.f32 %v4826_v14, %v4825_v28  ;;  %v4865_v20 = vadd.f32 %v4864_v21, %v4863_v22 }
 0xd0d   : > { %v4866_v26 = vrot.slane %v4865_v20, 4  ;;  %v4828_v32 = vrot.slane %v4827_v31, 4 }
 0xd0f   : > { %v4867_v2 = vadd.f32 %v4866_v26, %v4865_v20  ;;  %v4829_v30 = vadd.f32 %v4828_v32, %v4827_v31 }
 0xd11   : > { %v4868_v25 = vrot.slane %v4867_v2, 2  ;;  %v4830_v18 = vrot.slane %v4829_v30, 2 }
 0xd13   : > { %v4869_v42 = vadd.f32 %v4868_v25, %v4867_v2  ;;  %v4831_v49 = vadd.f32 %v4830_v18, %v4829_v30 }
 0xd15   : > { %v4870_v57 = vrot.slane %v4869_v42, 1  ;;  %v4832_v6 = vrot.slane %v4831_v49, 1 }
 0xd17   : > { %v4871_v63 = vadd.f32 %v4870_v57, %v4869_v42  ;;  %v4833_v22 = vadd.f32 %v4832_v6, %v4831_v49 }
 0xd19   : > { %13088 = vrsqrt.f32 %v4871_v63  ;;  %vm4874_vm9 = vcmp.eq.f32.partialorder %v4871_v63, inf  ;;  %v4877_v37 = vand.u32 2147483648, %v4871_v63  ;;  %vm4876_vm10 = vcmp.eq.f32.partialorder %v4871_v63, 0.0 }
 0xd1a   : > { %vm4836_vm11 = vcmp.eq.f32.partialorder %v4833_v22, inf  ;;  %vm4838_vm12 = vcmp.eq.f32.partialorder %v4833_v22, 0.0 }
 0xd26   : > { %v13089_v36 = vpop.eup %13088 }
 0xd27   : > { %v4873_v56 = vmul.f32 %v13089_v36, %v4871_v63 }
 0xd29   : > { %v4875_v39 = vsel %vm4874_vm9, %v4871_v63, %v4873_v56 }
 0xd2a   : > { %v4878_v11 = vsel %vm4876_vm10, %v4877_v37, %v4875_v39 }
 0xd2b   : > { %v4879_v47 = vmax.f32 %v4878_v11, 1e-12 }
 0xd2d   : > { %13090 = vrcp.f32 %v4879_v47  ;;  %v4839_v47 = vand.u32 2147483648, %v4833_v22 }
 0xd2e   : > { %13092 = vrsqrt.f32 %v4833_v22 }
 0xd3a   : > { %v13091_v38 = vpop.eup %13090 }
 0xd3b   : > { %v4882_v43 = vmul.f32 %v13091_v38, %v15796_v4  ;;  %v4881_v55 = vmul.f32 %v13091_v38, %v15800_v0  ;;  %v4886_v53 = vmul.f32 %v13091_v38, %v15816_v40  ;;  %v4883_v24 = vmul.f32 %v13091_v38, %v15809_v60  ;;  %v13093_v57 = vpop.eup %13092 }
 0xd3c   : > { %v4888_v8 = vmul.f32 %v13091_v38, %v15828_v17  ;;  %v4884_v9 = vmul.f32 %v13091_v38, %v15806_v33  ;;  %v4885_v35 = vmul.f32 %v13091_v38, %v15820_v34  ;;  %v4887_v44 = vmul.f32 %v13091_v38, %v15832_v45 }
 0xd3d   : > { %5189 = vrot.lane.b32.xlu0 %v4882_v43, %s18373_s1  ;;  %5187 = vrot.lane.b32.xlu1 %v4881_v55, %s18373_s1  ;;  %v4835_v56 = vmul.f32 %v13093_v57, %v4833_v22 }
 0xd3f   : > { %v4837_v11 = vsel %vm4836_vm11, %v4833_v22, %v4835_v56 }
 0xd41   : > { %5255 = vrot.lane.b32.xlu0 %v15832_v45, %s18375_s23  ;;  %5253 = vrot.lane.b32.xlu1 %v15816_v40, %s18375_s23 }
 0xd45   : > { %5197 = vrot.lane.b32.xlu0 %v4886_v53, %s18373_s1  ;;  %5191 = vrot.lane.b32.xlu1 %v4883_v24, %s18373_s1 }
 0xd49   : > { %5201 = vrot.lane.b32.xlu0 %v4888_v8, %s18373_s1  ;;  %5193 = vrot.lane.b32.xlu1 %v4884_v9, %s18373_s1 }
 0xd4d   : > { %5251 = vrot.lane.b32.xlu0 %v15820_v34, %s18375_s23  ;;  %5195 = vrot.lane.b32.xlu1 %v4885_v35, %s18373_s1 }
 0xd51   : > { %5247 = vrot.lane.b32.xlu0 %v15809_v60, %s18375_s23  ;;  %5199 = vrot.lane.b32.xlu1 %v4887_v44, %s18373_s1  ;;  %s18662_s1 = smov 8  }
 0xd55   : > { %5243 = vrot.lane.b32.xlu0 %v15800_v0, %s18375_s23  ;;  %5249 = vrot.lane.b32.xlu1 %v15806_v33, %s18375_s23 }
 0xd59   : > { %4899 = vrot.lane.b32.xlu0 %v4882_v43, %s18371_s16  ;;  %5245 = vrot.lane.b32.xlu1 %v15796_v4, %s18375_s23  ;;  %s18663_s23 = sld [smem:[#allocation85_spill]] }
 0xd5d   : > { %4903 = vrot.lane.b32.xlu0 %v4884_v9, %s18371_s16  ;;  %4897 = vrot.lane.b32.xlu1 %v4881_v55, %s18371_s16  ;;  %v4840_v55 = vsel %vm4838_vm12, %v4839_v47, %v4837_v11 }
 0xd61   : > { %4907 = vrot.lane.b32.xlu0 %v4886_v53, %s18371_s16  ;;  %4901 = vrot.lane.b32.xlu1 %v4883_v24, %s18371_s16  ;;  %v4841_v24 = vmax.f32 %v4840_v55, 1e-12 }
 0xd63   : > { %13094 = vrcp.f32 %v4841_v24 }
 0xd65   : > { %4911 = vrot.lane.b32.xlu0 %v4888_v8, %s18371_s16  ;;  %4905 = vrot.lane.b32.xlu1 %v4885_v35, %s18371_s16 }
 0xd69   : > { %4975 = vrot.lane.b32.xlu0 %v15828_v17, %s18659_s9  ;;  %4909 = vrot.lane.b32.xlu1 %v4887_v44, %s18371_s16  ;;  %s18661_s16 = sld [smem:[#allocation87_spill]] }
 0xd6d   : > { %4973 = vrot.lane.b32.xlu0 %v15832_v45, %s18659_s9 }
 0xd70   : > { %v13095_v30 = vpop.eup %13094 }
 0xd71   : > { %4971 = vrot.lane.b32.xlu0 %v15816_v40, %s18659_s9  ;;  %v4845_v6 = vmul.f32 %v13095_v30, %v15809_v60 }
 0xd75   : > { %4969 = vrot.lane.b32.xlu0 %v15820_v34, %s18659_s9 }
 0xd76   : > { %v5258_v50 = vpop.permute.xlu1 %5257 }
 0xd77   : > { %12236 = vmatpush3.msra.mxu0 %v5258_v50 }
 0xd78   : > { %12237 = vmatprep.subr.mxu0 %v18645_v23 }
 0xd79   : > { %4967 = vrot.lane.b32.xlu0 %v15806_v33, %s18659_s9 }
 0xd7d   : > { %4965 = vrot.lane.b32.xlu0 %v15809_v60, %s18659_s9  ;;  %v4847_v60 = vmul.f32 %v13095_v30, %v15820_v34  ;;  %v4844_v34 = vmul.f32 %v13095_v30, %v15796_v4 }
 0xd81   : > { %4963 = vrot.lane.b32.xlu0 %v15796_v4, %s18659_s9 }
 0xd85   : > { %4961 = vrot.lane.b32.xlu0 %v15800_v0, %s18659_s9 }
 0xdaf   : > { %v5190_v13 = vpop.permute.xlu0 %5189  ;;  %v5188_v27 = vpop.permute.xlu1 %5187 }
 0xdb0   : > { %5211 = vxpose.xlu1.b32.start [1/8] (short) (narrow) %v5188_v27, 8 }
 0xdb3   : > { %v5256_v7 = vpop.permute.xlu0 %5255  ;;  %v5254_v28 = vpop.permute.xlu1 %5253 }
 0xdb4   : > { %12238 = vmatpush3.msra.mxu0 %v5256_v7  ;;  %5212 = vxpose.xlu1.b32.cont [2/8] (short) (narrow) %v5190_v13, 8  ;;  %v4843_v13 = vmul.f32 %v13095_v30, %v15800_v0  ;;  %v4846_v0 = vmul.f32 %v13095_v30, %v15806_v33  ;;  %v4848_v33 = vmul.f32 %v13095_v30, %v15816_v40 }
 0xdb5   : > { %12239 = vmatprep.subr.mxu0 %v18645_v23 }
 0xdb6   : > { %12240 = vmatpush3.msra.mxu0 %v5254_v28 }
 0xdb7   : > { %v5198_v14 = vpop.permute.xlu0 %5197  ;;  %v5192_v21 = vpop.permute.xlu1 %5191  ;;  %12241 = vmatprep.subr.mxu0 %v18645_v23 }
 0xdb8   : > { %5213 = vxpose.xlu1.b32.cont [3/8] (short) (narrow) %v5192_v21, 8  ;;  %v4850_v21 = vmul.f32 %v13095_v30, %v15828_v17 }
 0xdbb   : > { %v5202_v31 = vpop.permute.xlu0 %5201  ;;  %v5194_v20 = vpop.permute.xlu1 %5193 }
 0xdbc   : > { %5214 = vxpose.xlu1.b32.cont [4/8] (short) (narrow) %v5194_v20, 8 }
 0xdbf   : > { %v5252_v26 = vpop.permute.xlu0 %5251  ;;  %v5196_v2 = vpop.permute.xlu1 %5195 }
 0xdc0   : > { %12242 = vmatpush3.msra.mxu0 %v5252_v26  ;;  %5215 = vxpose.xlu1.b32.cont [5/8] (short) (narrow) %v5196_v2, 8 }
 0xdc1   : > { %12243 = vmatprep.subr.mxu0 %v18645_v23 }
 0xdc3   : > { %v5248_v25 = vpop.permute.xlu0 %5247  ;;  %v5200_v42 = vpop.permute.xlu1 %5199 }
 0xdc4   : > { %5216 = vxpose.xlu1.b32.cont [6/8] (short) (narrow) %v5198_v14, 8  ;;  %v4849_v14 = vmul.f32 %v13095_v30, %v15832_v45 }
 0xdc7   : > { %v5244_v63 = vpop.permute.xlu0 %5243  ;;  %v5250_v36 = vpop.permute.xlu1 %5249 }
 0xdc8   : > { %5217 = vxpose.xlu1.b32.cont [7/8] (short) (narrow) %v5200_v42, 8  ;;  %12244 = vmatpush3.msra.mxu0 %v5250_v36 }
 0xdc9   : > { %12245 = vmatprep.subr.mxu0 %v18645_v23 }
 0xdca   : > { %12246 = vmatpush3.msra.mxu0 %v5248_v25 }
 0xdcb   : > { %v4900_v37 = vpop.permute.xlu0 %4899  ;;  %12247 = vmatprep.subr.mxu0 %v18645_v23  ;;  %v5246_v39 = vpop.permute.xlu1 %5245 }
 0xdcc   : > { %5218 = vxpose.xlu1.b32.end [8/8] (short) (narrow) %v5202_v31, 8  ;;  %12248 = vmatpush3.msra.mxu0 %v5246_v39  ;;  %v4521_v39 = vld [vmem:[%s18661_s16] sm:$0xff] }
 0xdcd   : > { %12249 = vmatprep.subr.mxu0 %v18645_v23 }
 0xdce   : > { %12250 = vmatpush3.msra.mxu0 %v5244_v63 }
 0xdcf   : > { %v4904_v38 = vpop.permute.xlu0 %4903  ;;  %v4898_v43 = vpop.permute.xlu1 %4897 }
 0xdd0   : > { %4921 = vxpose.xlu0.b32.start [1/8] (short) (narrow) %v4898_v43, 8 }
 0xdd3   : > { %v4908_v53 = vpop.permute.xlu0 %4907  ;;  %v4902_v8 = vpop.permute.xlu1 %4901 }
 0xdd4   : > { %4922 = vxpose.xlu0.b32.cont [2/8] (short) (narrow) %v4900_v37, 8  ;;  %v4522_v37 = vld [vmem:[%s18661_s16 + $0x8] sm:$0xff] }
 0xdd7   : > { %v4912_v9 = vpop.permute.xlu0 %4911  ;;  %v4906_v44 = vpop.permute.xlu1 %4905 }
 0xdd8   : > { %4923 = vxpose.xlu0.b32.cont [3/8] (short) (narrow) %v4902_v8, 8 }
 0xddb   : > { %v4976_v35 = vpop.permute.xlu0 %4975  ;;  %v4910_v18 = vpop.permute.xlu1 %4909 }
 0xddc   : > { %5538 = vst.msk [vmem:[#allocation2 + $0x48] sm:$0xff] %vm2494_vm0, %v4976_v35  ;;  %12203 = vmatpush3.msra.mxu1 %v4976_v35  ;;  %4924 = vxpose.xlu0.b32.cont [4/8] (short) (narrow) %v4904_v38, 8  ;;  %v5539_v35 = vld [vmem:[#allocation2 + $0x7] sm:$0xff] }
 0xddd   : > { %12204 = vmatprep.subr.mxu1 %v18645_v23 }
 0xddf   : > { %v4974_v50 = vpop.permute.xlu0 %4973 }
 0xde0   : > { %5537 = vst.msk [vmem:[#allocation2 + $0x40] sm:$0xff] %vm2494_vm0, %v4974_v50  ;;  %12205 = vmatpush3.msra.mxu1 %v4974_v50  ;;  %4925 = vxpose.xlu0.b32.cont [5/8] (short) (narrow) %v4906_v44, 8  ;;  %v18664_v44 = vld [vmem:[#allocation137_spill] sm:$0xff] }
 0xde1   : > { %12206 = vmatprep.subr.mxu1 %v18645_v23 }
 0xde3   : > { %v4972_v32 = vpop.permute.xlu0 %4971 }
 0xde4   : > { %5536 = vst.msk [vmem:[#allocation2 + $0x38] sm:$0xff] %vm2494_vm0, %v4972_v32  ;;  %12207 = vmatpush3.msra.mxu1 %v4972_v32  ;;  %4926 = vxpose.xlu0.b32.cont [6/8] (short) (narrow) %v4908_v53, 8  ;;  %v18665_v32 = vld [vmem:[#allocation135_spill] sm:$0xff] }
 0xde5   : > { %12208 = vmatprep.subr.mxu1 %v18645_v23 }
 0xde7   : > { %v4970_v49 = vpop.permute.xlu0 %4969 }
 0xde8   : > { %5535 = vst.msk [vmem:[#allocation2 + $0x30] sm:$0xff] %vm2494_vm0, %v4970_v49  ;;  %12209 = vmatpush3.msra.mxu1 %v4970_v49  ;;  %4927 = vxpose.xlu0.b32.cont [7/8] (short) (narrow) %v4910_v18, 8  ;;  %v18666_v18 = vld [vmem:[#allocation130_spill] sm:$0xff] }
 0xde9   : > { %12210 = vmatprep.subr.mxu1 %v18645_v23  ;;  %v5547_v49 = vmul.f32 %v5539_v35, %v18666_v18 }
 0xdea   : > { %5340 = vrot.lane.b32.xlu1 %v4843_v13, %s18660_s0 }
 0xdeb   : > { %v4968_v27 = vpop.permute.xlu0 %4967  ;;  %v16018_v35 = vld [vmem:[#allocation2 + $0x39] sm:$0xff] }
 0xdec   : > { %5534 = vst.msk [vmem:[#allocation2 + $0x28] sm:$0xff] %vm2494_vm0, %v4968_v27  ;;  %12211 = vmatpush3.msra.mxu1 %v4968_v27  ;;  %4928 = vxpose.xlu0.b32.end [8/8] (short) (narrow) %v4912_v9, 8  ;;  %v4518_v9 = vld [vmem:[%s18663_s23] sm:$0xff]  ;;  %v15974_v27 = vld [vmem:[#allocation2 + $0x49] sm:$0xff]  ;;  %18679 = vst [vmem:[#allocation153_spill] sm:$0xff] %v16018_v35 }
 0xded   : > { %12212 = vmatprep.subr.mxu1 %v18645_v23  ;;  %v15968_v50 = vrot.slane %v4518_v9, %v18664_v44  ;;  %v15971_v30 = vrot.slane %v4518_v9, %v18665_v32  ;;  %18667 = vst [vmem:[#allocation121_spill] sm:$0xff] %v15974_v27 }
 0xdee   : > { %5344 = vrot.lane.b32.xlu1 %v4845_v6, %s18660_s0 }
 0xdef   : > { %v4966_v7 = vpop.permute.xlu0 %4965  ;;  %v5545_v32 = vld [vmem:[#allocation2 + $0x37] sm:$0xff] }
 0xdf0   : > { %5533 = vst.msk [vmem:[#allocation2 + $0x20] sm:$0xff] %vm2494_vm0, %v4966_v7  ;;  %12213 = vmatpush3.msra.mxu1 %v4966_v7  ;;  %v18668_v7 = vld [vmem:[#allocation134_spill] sm:$0xff] }
 0xdf1   : > { %12214 = vmatprep.subr.mxu1 %v18645_v23 }
 0xdf2   : > { %5346 = vrot.lane.b32.xlu1 %v4846_v0, %s18660_s0 }
 0xdf3   : > { %v4964_v28 = vpop.permute.xlu0 %4963  ;;  %v16087_v19 = vld [vmem:[#allocation2 + $0x2f] sm:$0xff] }
 0xdf4   : > { %5532 = vst.msk [vmem:[#allocation2 + $0x18] sm:$0xff] %vm2494_vm0, %v4964_v28  ;;  %12215 = vmatpush3.msra.mxu1 %v4964_v28  ;;  %v5559_v28 = vmul.f32 %v15968_v50, %v5547_v49 }
 0xdf5   : > { %12216 = vmatprep.subr.mxu1 %v18645_v23 }
 0xdf6   : > { %5348 = vrot.lane.b32.xlu1 %v4847_v60, %s18660_s0 }
 0xdf7   : > { %v4962_v22 = vpop.permute.xlu0 %4961  ;;  %v16096_v3 = vld [vmem:[#allocation2 + $0x20] sm:$0xff] }
 0xdf8   : > { %5531 = vst.msk [vmem:[#allocation2 + $0x10] sm:$0xff] %vm2494_vm0, %v4962_v22  ;;  %12217 = vmatpush3.msra.mxu1 %v4962_v22  ;;  %v5546_v22 = vld [vmem:[#allocation2 + $0x3f] sm:$0xff] }
 0xdf9   : > { %v16078_v23 = vmul.f32 %v5546_v22, %v15247_v16  ;;  %v16094_v1 = vmul.f32 %v5546_v22, %v15344_v29 }
 0xdfa   : > { %5350 = vrot.lane.b32.xlu1 %v4848_v33, %s18660_s0 }
 0xdfb   : > { %18695 = vst [vmem:[#allocation167_spill] sm:$0xff] %v16078_v23  ;;  %v16128_v23 = vld [vmem:[#allocation2 + $0x28] sm:$0xff] }
 0xdfe   : > { %5352 = vrot.lane.b32.xlu1 %v4849_v14, %s18660_s0 }
 0xdff   : > { %v16071_v44 = vld [vmem:[#allocation2 + $0x11] sm:$0xff] }
 0xe02   : > { %5354 = vrot.lane.b32.xlu1 %v4850_v21, %s18660_s0 }
 0xe15   : > { %5342 = vrot.lane.b32.xlu0 %v4844_v34, %s18660_s0 }
 0xe2c   : > { %v5227_v31 = vpop.trf.xlu1 }
 0xe2d   : > { %12252 = vmatmul.mubr.msk.f32.vlgmr.msra.gmra.mxu0 %vm2982_vm8, %v5227_v31  ;;  %v18670_v31 = vld [vmem:[#allocation148_spill] sm:$0xff] }
 0xe4c   : > { %v4937_v20 = vpop.trf.xlu0 }
 0xe4d   : > { %12219 = vmatmul.mubr.msk.f32.vlgmr.msra.gmra.mxu1 %vm2982_vm8, %v4937_v20  ;;  %v15985_v20 = vrot.slane %v4518_v9, %v18670_v31 }
 0xe4e   : > { %12223 = vmatprep.mubr.msk.f32.mxu1 %vm3056_vm6, %v4843_v13  ;;  %v5575_v13 = vld [vmem:[#allocation2 + $0x8] sm:$0xff] }
 0xe5c   : > { %v5341_v40 = vpop.permute.xlu1 %5340 }
 0xe5d   : > { %12256 = vmatprep.mubr.msk.f32.mxu0 %vm3056_vm6, %v5341_v40  ;;  %v5697_v40 = vmul.f32 %v15974_v27, %v18620_v10  ;;  %v16107_v27 = vld [vmem:[#allocation2 + $0x18] sm:$0xff] }
 0xe60   : > { %v5345_v45 = vpop.permute.xlu1 %5344 }
 0xe64   : > { %v5347_v26 = vpop.permute.xlu1 %5346 }
 0xe68   : > { %v5349_v17 = vpop.permute.xlu1 %5348 }
 0xe6c   : > { %v5351_v25 = vpop.permute.xlu1 %5350 }
 0xe70   : > { %v5353_v57 = vpop.permute.xlu1 %5352 }
 0xe74   : > { %v5355_v63 = vpop.permute.xlu1 %5354 }
 0xe87   : > { %v5343_v4 = vpop.permute.xlu0 %5342 }
 0xeed   : > { %v5336_v2 = vpop.f32.mrf.mxu0 }
 0xeee   : > { %12254 = vmatprep.subr.mxu0 %v5336_v2 }
 0xeef   : > { %12255 = vmatpush3.msra.mxu0 %v5336_v2  ;;  %v12253_v42 = vpop.f32.mrf.mxu0  ;;  %v18671_v2 = vld [vmem:[#allocation144_spill] sm:$0xff] }
 0xef0   : > { %12257 = vmatmul.mubr.msk.f32.vlgmr.msra.gmra.mxu0 %vm3056_vm6, %v5343_v4  ;;  %v18672_v4 = vld [vmem:[#allocation136_spill] sm:$0xff] }
 0xef1   : > { %12259 = vmatprep.mubr.msk.f32.mxu0 %vm3056_vm6, %v5345_v45  ;;  %v15994_v42 = vrot.slane %v4518_v9, %v18672_v4 }
 0xef3   : > { %18673 = vst [vmem:[#allocation122_spill] sm:$0xff] %v15994_v42 }
 0xef4   : > { %12260 = vmatmul.mubr.msk.f32.gmra.mxu0 %vm3056_vm6, %v5347_v26  ;;  %v5747_v26 = vld [vmem:[#allocation2 + $0x50] sm:$0xff] }
 0xef5   : > { %12262 = vmatprep.mubr.msk.f32.mxu0 %vm3056_vm6, %v5349_v17  ;;  %v5768_v17 = vld [vmem:[#allocation2 + $0x51] sm:$0xff] }
 0xef8   : > { %12263 = vmatmul.mubr.msk.f32.gmra.mxu0 %vm3056_vm6, %v5351_v25  ;;  %v15991_v25 = vrot.slane %v4518_v9, %v18671_v2 }
 0xef9   : > { %12265 = vmatprep.mubr.msk.f32.mxu0 %vm3056_vm6, %v5353_v57  ;;  %v5582_v57 = vld [vmem:[#allocation2 + $0x40] sm:$0xff] }
 0xefc   : > { %12266 = vmatmul.mubr.msk.f32.gmra.mxu0 %vm3056_vm6, %v5355_v63  ;;  %v15996_v63 = vld [vmem:[#allocation2 + $0x48] sm:$0xff] }
 0xefd   : > { %18674 = vst [vmem:[#allocation143_spill] sm:$0xff] %v15996_v63 }
 0xf0d   : > { %v5054_v36 = vpop.f32.mrf.mxu1 }
 0xf0e   : > { %12221 = vmatprep.subr.mxu1 %v5054_v36 }
 0xf0f   : > { %12222 = vmatpush3.msra.mxu1 %v5054_v36  ;;  %v12220_v56 = vpop.f32.mrf.mxu1  ;;  %v15998_v36 = vld [vmem:[#allocation2 + $0xf] sm:$0xff] }
 0xf10   : > { %12224 = vmatmul.mubr.msk.f32.vlgmr.msra.gmra.mxu1 %vm3056_vm6, %v4844_v34  ;;  %12268 = vmatprep.subr.mxu1 %v4522_v37  ;;  %v18675_v56 = vld [vmem:[#allocation145_spill] sm:$0xff] }
 0xf11   : > { %12226 = vmatprep.mubr.msk.f32.mxu1 %vm3056_vm6, %v4845_v6  ;;  %12269 = vmatpush3.msra.mxu1 %v4522_v37  ;;  %v5718_v6 = vld [vmem:[#allocation2 + $0x4f] sm:$0xff]  ;;  %v16001_v37 = vrot.slane %v4518_v9, %v18675_v56  ;;  %v16037_v56 = vmul.f32 %v15994_v42, %v5582_v57 }
 0xf12   : > { %12270 = vmatprep.subr.mxu1 %v4521_v39  ;;  %v5726_v45 = vmul.f32 %v5718_v6, %v15353_v46 }
 0xf13   : > { %12271 = vmatpush3.msra.mxu1 %v4521_v39  ;;  %v5554_v39 = vmul.f32 %v5546_v22, %v15353_v46  ;;  %18685 = vst [vmem:[#allocation128_spill] sm:$0xff] %v16037_v56  ;;  %v16112_v22 = vld [vmem:[#allocation2 + $0x21] sm:$0xff] }
 0xf14   : > { %12227 = vmatmul.mubr.msk.f32.gmra.mxu1 %vm3056_vm6, %v4846_v0  ;;  %v15977_v0 = vrot.slane %v4518_v9, %v18668_v7  ;;  %v16028_v6 = vmul.f32 %v15985_v20, %v5726_v45 }
 0xf15   : > { %12229 = vmatprep.mubr.msk.f32.mxu1 %vm3056_vm6, %v4847_v60  ;;  %v5587_v60 = vmul.f32 %v15971_v30, %v5575_v13  ;;  %v5566_v45 = vmul.f32 %v15968_v50, %v5554_v39  ;;  %v16066_v39 = vmul.f32 %v16018_v35, %v15304_v51 }
 0xf16   : > { %v16022_v49 = vmul.f32 %v15977_v0, %v15996_v63  ;;  %18682 = vst [vmem:[#allocation126_spill] sm:$0xff] %v16028_v6  ;;  %v16043_v2 = vmul.f32 %v15977_v0, %v5582_v57  ;;  %v16110_v63 = vld [vmem:[#allocation2 + $0x19] sm:$0xff] }
 0xf17   : > { %18693 = vst [vmem:[#allocation165_spill] sm:$0xff] %v16066_v39  ;;  %v5591_v39 = vmul.f32 %v15971_v30, %v16128_v23 }
 0xf18   : > { %12230 = vmatmul.mubr.msk.f32.gmra.mxu1 %vm3056_vm6, %v4848_v33  ;;  %v5610_v33 = vld [vmem:[#allocation2 + $0x41] sm:$0xff]  ;;  %18680 = vst [vmem:[#allocation125_spill] sm:$0xff] %v16022_v49 }
 0xf19   : > { %12232 = vmatprep.mubr.msk.f32.mxu1 %vm3056_vm6, %v4849_v14  ;;  %v5639_v14 = vld [vmem:[#allocation2 + $0x47] sm:$0xff]  ;;  %v16040_v4 = vmul.f32 %v5610_v33, %v15304_v51 }
 0xf1a   : > { %v16055_v31 = vmul.f32 %v5639_v14, %v15344_v29 }
 0xf1b   : > { %18686 = vst [vmem:[#allocation130_spill] sm:$0xff] %v16040_v4  ;;  %v18698_v4 = vld [vmem:[#allocation132_spill] sm:$0xff] }
 0xf1c   : > { %12233 = vmatmul.mubr.msk.f32.gmra.mxu1 %vm3056_vm6, %v4850_v21  ;;  %v18669_v21 = vld [vmem:[#allocation147_spill] sm:$0xff]  ;;  %18689 = vst [vmem:[#allocation163_spill] sm:$0xff] %v16055_v31  ;;  %v5612_v6 = vmul.f32 %v16071_v44, %v18698_v4 }
 0xf1d   : > { %v15982_v34 = vrot.slane %v4518_v9, %v18669_v21  ;;  %v5594_v9 = vmul.f32 %v15971_v30, %v5582_v57  ;;  %v16057_v21 = vld [vmem:[#allocation2 + $0x30] sm:$0xff] }
 0xf1e   : > { %18690 = vst [vmem:[#allocation164_spill] sm:$0xff] %v16057_v21  ;;  %v5592_v15 = vmul.f32 %v15971_v30, %v16057_v21 }
 0xf1f   : > { %v16025_v13 = vmul.f32 %v15982_v34, %v5697_v40  ;;  %v16045_v40 = vld [vmem:[#allocation2 + $0x1f] sm:$0xff] }
 0xf20   : > { %v5550_v62 = vmul.f32 %v16045_v40, %v18696_v54 }
 0xf21   : > { %18681 = vst [vmem:[#allocation156_spill] sm:$0xff] %v16025_v13 }
 0xfb0   : > { %v12258_v11 = vpop.f32.mrf.mxu0 }
 0xfb1   : > { %5487 = vrot.lane.b32.xlu1 %v12258_v11, %s18662_s1  ;;  %v5618_v11 = vmul.f32 %v5610_v33, %v18620_v10 }
 0xfb2   : > { %v5438_v47 = vpop.f32.mrf.mxu0 }
 0xfb4   : > { %v12261_v38 = vpop.f32.mrf.mxu0 }
 0xfb5   : > { %5485 = vrot.lane.b32.xlu1 %v5438_v47, %s18662_s1  ;;  %5491 = vrot.lane.b32.xlu0 %v12261_v38, %s18662_s1  ;;  %v5647_v47 = vmul.f32 %v5639_v14, %v15353_v46  ;;  %v16006_v38 = vadd.f32 %v5587_v60, %v5559_v28  ;;  %v16030_v28 = vld [vmem:[#allocation2 + $0x17] sm:$0xff]  ;;  %v16049_v46 = vmul.f32 %v15991_v25, %v5618_v11  ;;  %v16073_v14 = vld [vmem:[#allocation2 + $0x27] sm:$0xff] }
 0xfb6   : > { %v5448_v43 = vpop.f32.mrf.mxu0  ;;  %v18683_v60 = vld [vmem:[#allocation129_spill] sm:$0xff]  ;;  %v5549_v41 = vmul.f32 %v16030_v28, %v15209_v52 }
 0xfb7   : > { %18687 = vst [vmem:[#allocation129_spill] sm:$0xff] %v16043_v2  ;;  %v16133_v2 = vmul.f32 %v5545_v32, %v15238_v5 }
 0xfb8   : > { %v12264_v55 = vpop.f32.mrf.mxu0  ;;  %v5561_v13 = vmul.f32 %v15968_v50, %v5549_v41  ;;  %v5614_v41 = vmul.f32 %v16112_v22, %v15224_v59 }
 0xfb9   : > { %5489 = vrot.lane.b32.xlu1 %v5448_v43, %s18662_s1  ;;  %5495 = vrot.lane.b32.xlu0 %v12264_v55, %s18662_s1  ;;  %v16009_v43 = vmul.f32 %v15994_v42, %v5747_v26  ;;  %v16012_v55 = vmul.f32 %v5768_v17, %v18620_v10  ;;  %v5548_v26 = vmul.f32 %v15998_v36, %v18683_v60  ;;  %v16034_v17 = vld [vmem:[#allocation2 + $0x31] sm:$0xff] }
 0xfba   : > { %v5458_v53 = vpop.f32.mrf.mxu0  ;;  %18684 = vst [vmem:[#allocation127_spill] sm:$0xff] %v16034_v17  ;;  %v16052_v10 = vmul.f32 %v16001_v37, %v5647_v47  ;;  %v5576_v47 = vld [vmem:[#allocation2 + $0x10] sm:$0xff]  ;;  %18699 = vst [vmem:[#allocation132_spill] sm:$0xff] %v16133_v2 }
 0xfbb   : > { %18676 = vst [vmem:[#allocation123_spill] sm:$0xff] %v16009_v43  ;;  %18677 = vst [vmem:[#allocation152_spill] sm:$0xff] %v16012_v55  ;;  %v5645_v55 = vmul.f32 %v5545_v32, %v15247_v16  ;;  %v16101_v43 = vadd.f32 %v5594_v9, %v5566_v45  ;;  %v5551_v9 = vmul.f32 %v16073_v14, %v15238_v5 }
 0xfbc   : > { %v12267_v24 = vpop.f32.mrf.mxu0  ;;  %18688 = vst [vmem:[#allocation162_spill] sm:$0xff] %v16052_v10  ;;  %v5552_v45 = vmul.f32 %v16087_v19, %v15247_v16  ;;  %v16137_v16 = vld [vmem:[#allocation2 + $0x29] sm:$0xff] }
 0xfbd   : > { %5493 = vrot.lane.b32.xlu1 %v5458_v53, %s18662_s1  ;;  %5499 = vrot.lane.b32.xlu0 %v12267_v24, %s18662_s1  ;;  %v5696_v53 = vmul.f32 %v5610_v33, %v15390_v48  ;;  %v5603_v24 = vld [vmem:[#allocation2 + $0x9] sm:$0xff]  ;;  %v5563_v2 = vmul.f32 %v15968_v50, %v5551_v9 }
 0xfbe   : > { %v5468_v8 = vpop.f32.mrf.mxu0  ;;  %v18691_v33 = vld [vmem:[#allocation131_spill] sm:$0xff]  ;;  %v5564_v49 = vmul.f32 %v15968_v50, %v5552_v45  ;;  %v5673_v45 = vmul.f32 %v15977_v0, %v5576_v47 }
 0xfbf   : > { %v5611_v7 = vmul.f32 %v5603_v24, %v18691_v33  ;;  %v16069_v11 = vmul.f32 %v15982_v34, %v5696_v53  ;;  %v5616_v24 = vmul.f32 %v16034_v17, %v15304_v51  ;;  %v5560_v53 = vmul.f32 %v15968_v50, %v5548_v26 }
 0xfc0   : > { %v5617_v51 = vmul.f32 %v16018_v35, %v15390_v48  ;;  %v16105_v26 = vmul.f32 %v15977_v0, %v16057_v21  ;;  %v5588_v48 = vmul.f32 %v15971_v30, %v5576_v47  ;;  %v5562_v21 = vmul.f32 %v15968_v50, %v5550_v62 }
 0xfc1   : > { %5497 = vrot.lane.b32.xlu1 %v5468_v8, %s18662_s1  ;;  %v16015_v8 = vld [vmem:[#allocation2 + $0x38] sm:$0xff]  ;;  %18694 = vst [vmem:[#allocation166_spill] sm:$0xff] %v16069_v11  ;;  %v5623_v56 = vmul.f32 %v15991_v25, %v5611_v7  ;;  %v5628_v31 = vmul.f32 %v15991_v25, %v5616_v24  ;;  %v16125_v11 = vmul.f32 %v16034_v17, %v15293_v61 }
 0xfc2   : > { %18678 = vst [vmem:[#allocation124_spill] sm:$0xff] %v16015_v8  ;;  %v16062_v57 = vmul.f32 %v15977_v0, %v16015_v8  ;;  %v16084_v12 = vmul.f32 %v15971_v30, %v16015_v8  ;;  %18697 = vst [vmem:[#allocation133_spill] sm:$0xff] %v16105_v26  ;;  %v5596_v8 = vadd.f32 %v5588_v48, %v5560_v53 }
 0xfc3   : > { %v5640_v7 = vmul.f32 %v15998_v36, %v18666_v18  ;;  %v5590_v24 = vmul.f32 %v15971_v30, %v16096_v3  ;;  %v5589_v48 = vmul.f32 %v15971_v30, %v16107_v27  ;;  %v5613_v62 = vmul.f32 %v16110_v63, %v15222_v58 }
 0xfc4   : > { %18692 = vst [vmem:[#allocation131_spill] sm:$0xff] %v16062_v57  ;;  %v5624_v53 = vmul.f32 %v15991_v25, %v5612_v6  ;;  %v5641_v36 = vmul.f32 %v16030_v28, %v18683_v60  ;;  %v5631_v17 = vadd.f32 %v5623_v56, %v16006_v38  ;;  %v5553_v57 = vmul.f32 %v5545_v32, %v15344_v29 }
 0xfc5   : > { %v5597_v35 = vadd.f32 %v5589_v48, %v5561_v13  ;;  %v5598_v42 = vadd.f32 %v5590_v24, %v5562_v21  ;;  %v5652_v26 = vmul.f32 %v16001_v37, %v5640_v7  ;;  %v5615_v6 = vmul.f32 %v16137_v16, %v15293_v61 }
 0xfc6   : > { %v5632_v10 = vadd.f32 %v5624_v53, %v5596_v8  ;;  %v5643_v56 = vmul.f32 %v16073_v14, %v18696_v54  ;;  %v5625_v38 = vmul.f32 %v15991_v25, %v5613_v62  ;;  %v5642_v13 = vmul.f32 %v16045_v40, %v15209_v52 }
 0xfc7   : > { %v5644_v30 = vmul.f32 %v16087_v19, %v15238_v5  ;;  %v5653_v32 = vmul.f32 %v16001_v37, %v5641_v36  ;;  %v5626_v21 = vmul.f32 %v15991_v25, %v5614_v41  ;;  %v5660_v8 = vadd.f32 %v5652_v26, %v5631_v17 }
 0xfc8   : > { %v5599_v9 = vadd.f32 %v5591_v39, %v5563_v2  ;;  %v5600_v7 = vadd.f32 %v5592_v15, %v5564_v49  ;;  %v5633_v24 = vadd.f32 %v5625_v38, %v5597_v35  ;;  %v5565_v48 = vmul.f32 %v15968_v50, %v5553_v57 }
 0xfc9   : > { %v5661_v53 = vadd.f32 %v5653_v32, %v5632_v10  ;;  %v5634_v62 = vadd.f32 %v5626_v21, %v5598_v42  ;;  %v5690_v29 = vmul.f32 %v16071_v44, %v18691_v33  ;;  %v5627_v61 = vmul.f32 %v15991_v25, %v5615_v6 }
 0xfca   : > { %v5655_v5 = vmul.f32 %v16001_v37, %v5643_v56  ;;  %v5657_v36 = vmul.f32 %v16001_v37, %v5645_v55  ;;  %v5654_v17 = vmul.f32 %v16001_v37, %v5642_v13  ;;  %v5629_v2 = vmul.f32 %v15991_v25, %v5617_v51 }
 0xfcb   : > { %v5674_v15 = vmul.f32 %v15977_v0, %v16107_v27  ;;  %v5691_v10 = vmul.f32 %v16110_v63, %v18698_v4  ;;  %v5681_v50 = vadd.f32 %v5673_v45, %v5660_v8  ;;  %v5635_v42 = vadd.f32 %v5627_v61, %v5599_v9 }
 0xfcc   : > { %v5719_v44 = vmul.f32 %v16030_v28, %v18666_v18  ;;  %v5636_v35 = vadd.f32 %v5628_v31, %v5600_v7  ;;  %v5662_v49 = vadd.f32 %v5654_v17, %v5633_v24  ;;  %v5601_v57 = vadd.f32 %v16084_v12, %v5565_v48  ;;  %v18700_v24 = vld [vmem:[#allocation133_spill] sm:$0xff] }
 0xfcd   : > { %v5682_v39 = vadd.f32 %v5674_v15, %v5661_v53  ;;  %v5663_v47 = vadd.f32 %v5655_v5, %v5634_v62  ;;  %v5702_v51 = vmul.f32 %v15982_v34, %v5690_v29  ;;  %v5656_v25 = vmul.f32 %v16001_v37, %v5644_v30  ;;  %v18701_v53 = vld [vmem:[#allocation122_spill] sm:$0xff] }
 0xfce   : > { %v5676_v26 = vmul.f32 %v15977_v0, %v16128_v23  ;;  %v5693_v61 = vmul.f32 %v16137_v16, %v15224_v59  ;;  %v5675_v31 = vmul.f32 %v15977_v0, %v16096_v3  ;;  %v5692_v12 = vmul.f32 %v16112_v22, %v15222_v58 }
 0xfcf   : > { %v5703_v28 = vmul.f32 %v15982_v34, %v5691_v10  ;;  %v5720_v5 = vmul.f32 %v16045_v40, %v18683_v60  ;;  %v5710_v29 = vadd.f32 %v5702_v51, %v5681_v50  ;;  %v5664_v41 = vadd.f32 %v5656_v25, %v5635_v42 }
 0xfd0   : > { %v16182_v55 = vpop.f32.mrf.mxu1  ;;  %v5683_v6 = vadd.f32 %v5675_v31, %v5662_v49  ;;  %v5638_v56 = vadd.f32 %v16049_v46, %v16101_v43  ;;  %v5706_v38 = vmul.f32 %v15982_v34, %v16125_v11  ;;  %v5637_v13 = vadd.f32 %v5629_v2, %v5601_v57  ;;  %v18705_v49 = vld [vmem:[#allocation150_spill] sm:$0xff]  ;;  %v18706_v57 = vld [vmem:[#allocation153_spill] sm:$0xff] }
 0xfd1   : > { %v5711_v0 = vadd.f32 %v5703_v28, %v5682_v39  ;;  %v5684_v32 = vadd.f32 %v5676_v26, %v5663_v47  ;;  %v5731_v21 = vmul.f32 %v15985_v20, %v5719_v44  ;;  %v5665_v8 = vadd.f32 %v5657_v36, %v5636_v35  ;;  %v18704_v44 = vld [vmem:[#allocation165_spill] sm:$0xff]  ;;  %v16231_v26 = vld [vmem:[%s18663_s23 + $0x8] ss:$0 sm:$0xff]  ;;  %v18708_v28 = vld [vmem:[#allocation132_spill] sm:$0xff] }
 0xfd2   : > { %v16201_v30 = vpop.f32.mrf.mxu1  ;;  %v5722_v40 = vmul.f32 %v16087_v19, %v18696_v54  ;;  %v5704_v9 = vmul.f32 %v15982_v34, %v5692_v12  ;;  %v5721_v45 = vmul.f32 %v16073_v14, %v15209_v52  ;;  %v5658_v46 = vmul.f32 %v16001_v37, %v16094_v1  ;;  %v18702_v19 = vld [vmem:[#allocation162_spill] sm:$0xff]  ;;  %v18703_v37 = vld [vmem:[#allocation131_spill] sm:$0xff]  ;;  %v18707_v31 = vld [vmem:[#allocation125_spill] sm:$0xff] }
 0xfd3   : > { %v5732_v43 = vmul.f32 %v15985_v20, %v5720_v5  ;;  %v5705_v11 = vmul.f32 %v15982_v34, %v5693_v61  ;;  %v5739_v7 = vadd.f32 %v5731_v21, %v5710_v29  ;;  %v5685_v48 = vadd.f32 %v18700_v24, %v5664_v41  ;;  %v18709_v5 = vld [vmem:[#allocation129_spill] sm:$0xff] }
 0xfd4   : > { %v5752_v62 = vmul.f32 %v18701_v53, %v16107_v27  ;;  %v5712_v36 = vadd.f32 %v5704_v9, %v5683_v6  ;;  %v5667_v17 = vadd.f32 %v18702_v19, %v5638_v56  ;;  %v5666_v2 = vadd.f32 %v5658_v46, %v5637_v13  ;;  %v12228_v15 = vpop.f32.mrf.mxu1 }
 0xfd5   : > { %v5740_v14 = vadd.f32 %v5732_v43, %v5711_v0  ;;  %v5713_v10 = vadd.f32 %v5705_v11, %v5684_v32  ;;  %v5769_v1 = vmul.f32 %v16110_v63, %v18691_v33  ;;  %v5686_v50 = vadd.f32 %v18703_v37, %v5665_v8  ;;  %v18712_v32 = vld [vmem:[#allocation167_spill] sm:$0xff]  ;;  %v16259_v37 = vld [vmem:[%s18713_s3] ss:$0 sm:$0xff]  ;;  %s18733_s3 = sld [smem:[#allocation62_spill]] }
 0xfd6   : > { %v5734_v42 = vmul.f32 %v15985_v20, %v5722_v40  ;;  %v5707_v35 = vmul.f32 %v15982_v34, %v18704_v44  ;;  %v5733_v27 = vmul.f32 %v15985_v20, %v5721_v45  ;;  %v5773_v39 = vmul.f32 %v18706_v57, %v18705_v49  ;;  %v5158_v41 = vpop.f32.mrf.mxu1  ;;  %v18714_v45 = vld [vmem:[#allocation164_spill] sm:$0xff] }
 0xfd7   : > { %v5753_v47 = vmul.f32 %v18701_v53, %v16096_v3  ;;  %v5770_v51 = vmul.f32 %v16112_v22, %v18698_v4  ;;  %v5760_v25 = vadd.f32 %v5752_v62, %v5739_v7  ;;  %v5714_v63 = vadd.f32 %v5706_v38, %v5685_v48  ;;  %v18711_v38 = vld [vmem:[#allocation127_spill] sm:$0xff]  ;;  %v16250_v7 = vld [vmem:[%s18710_s2] ss:$0 sm:$0xff]  ;;  %v18715_v62 = vld [vmem:[#allocation124_spill] sm:$0xff]  ;;  %s18727_s2 = sld [smem:[#allocation88_spill]] }
 0xfd8   : > { %v5741_v61 = vadd.f32 %v5733_v27, %v5712_v36  ;;  %v5688_v12 = vadd.f32 %v18707_v31, %v5667_v17  ;;  %v5735_v34 = vmul.f32 %v15985_v20, %v18708_v28  ;;  %v5687_v29 = vadd.f32 %v18709_v5, %v5666_v2  ;;  %v18716_v36 = vld [vmem:[#allocation166_spill] sm:$0xff]  ;;  %v12231_v17 = vpop.f32.mrf.mxu1  ;;  %v18718_v27 = vld [vmem:[#allocation163_spill] sm:$0xff] }
 0xfd9   : > { %v5761_v6 = vadd.f32 %v5753_v47, %v5740_v14  ;;  %v5742_v56 = vadd.f32 %v5734_v42, %v5713_v10  ;;  %v5781_v3 = vmul.f32 %v16231_v26, %v5769_v1  ;;  %v5715_v13 = vadd.f32 %v5707_v35, %v5686_v50  ;;  %v18717_v10 = vld [vmem:[#allocation156_spill] sm:$0xff] }
 0xfda   : > { %v5772_v0 = vmul.f32 %v18711_v38, %v15224_v59  ;;  %v5736_v21 = vmul.f32 %v15985_v20, %v18712_v32  ;;  %v5754_v8 = vmul.f32 %v18701_v53, %v16128_v23  ;;  %v5771_v40 = vmul.f32 %v16137_v16, %v15222_v58  ;;  %v18723_v32 = vld [vmem:[#allocation159_spill] sm:$0xff] }
 0xfdb   : > { %v5782_v9 = vmul.f32 %v16231_v26, %v5770_v51  ;;  %v5755_v46 = vmul.f32 %v18701_v53, %v18714_v45  ;;  %v5789_v43 = vadd.f32 %v5781_v3, %v5760_v25  ;;  %v5743_v11 = vadd.f32 %v5735_v34, %v5714_v63  ;;  %v5168_v34 = vpop.f32.mrf.mxu1 }
 0xfdc   : > { %v5762_v48 = vadd.f32 %v5754_v8, %v5741_v61  ;;  %v5756_v23 = vmul.f32 %v18701_v53, %v18715_v62  ;;  %v5716_v19 = vadd.f32 %v18716_v36, %v5687_v29  ;;  %v5744_v14 = vadd.f32 %v5736_v21, %v5715_v13  ;;  %v18719_v29 = vld [vmem:[#allocation128_spill] sm:$0xff]  ;;  %v18721_v13 = vld [vmem:[#allocation130_spill] sm:$0xff]  ;;  %v18724_v21 = vld [vmem:[#allocation121_spill] sm:$0xff] }
 0xfdd   : > { %v5790_v16 = vadd.f32 %v5782_v9, %v5761_v6  ;;  %v5763_v2 = vadd.f32 %v5755_v46, %v5742_v56  ;;  %v5717_v1 = vadd.f32 %v18717_v10, %v5688_v12  ;;  %v5784_v50 = vmul.f32 %v16231_v26, %v5772_v0  ;;  %v18720_v6 = vld [vmem:[#allocation126_spill] sm:$0xff]  ;;  %v18722_v0 = vld [vmem:[#allocation143_spill] sm:$0xff]  ;;  %v12234_v62 = vpop.f32.mrf.mxu1 }
 0xfde   : > { %v5785_v35 = vmul.f32 %v16231_v26, %v5773_v39  ;;  %v5737_v57 = vmul.f32 %v15985_v20, %v18718_v27  ;;  %v5803_v51 = vadd.f32 %v16259_v37, %v5789_v43  ;;  %v5764_v63 = vadd.f32 %v5756_v23, %v5743_v11  ;;  %v18725_v36 = vld [vmem:[#allocation123_spill] sm:$0xff] }
 0xfdf   : > { %v5804_v39 = vadd.f32 %v16259_v37, %v5790_v16  ;;  %v5792_v5 = vadd.f32 %v5784_v50, %v5763_v2  ;;  %v5765_v20 = vadd.f32 %v18719_v29, %v5744_v14  ;;  %v5746_v56 = vadd.f32 %v18720_v6, %v5717_v1  ;;  %v18726_v1 = vld [vmem:[#allocation152_spill] sm:$0xff]  ;;  %v11517_v29 = vld [vmem:[%s18727_s2] ss:$0 sm:$0xff]  ;;  %s16341_s2 = scalar_lea.vmem %s18733_s3, %s14836_s18  ;;  %s18745_s3 = sld [smem:[#allocation91_spill]] }
 0xfe0   : > { %v5745_v28 = vadd.f32 %v5737_v57, %v5716_v19  ;;  %v5775_v8 = vmul.f32 %v18724_v21, %v18723_v32  ;;  %v5793_v46 = vadd.f32 %v5785_v35, %v5764_v63  ;;  %v5788_v50 = vmul.f32 %v16231_v26, %v18726_v1  ;;  %v18741_v1 = vld [vmem:[#allocation141_spill] sm:$0xff] }
 0xfe1   : > { %v5767_v19 = vadd.f32 %v18725_v36, %v5746_v56 }
0x1023   : > { %v5488_v22 = vpop.permute.xlu1 %5487 }
0x1024   : > { %v5510_v24 = vsel %vm3056_vm6, %v16182_v55, %v5488_v22  ;;  %v5783_v55 = vmul.f32 %v16231_v26, %v5771_v40  ;;  %v5786_v22 = vmul.f32 %v16231_v26, %v18721_v13 }
0x1025   : > { %v5524_v47 = vmul.f32 %v16250_v7, %v5510_v24 }
0x1026   : > { %v5791_v12 = vadd.f32 %v5783_v55, %v5762_v48  ;;  %v5794_v23 = vadd.f32 %v5786_v22, %v5765_v20  ;;  %v5807_v55 = vadd.f32 %v16259_v37, %v5793_v46  ;;  %v18735_v46 = vld [vmem:[#allocation161_spill] sm:$0xff] }
0x1027   : > { %v5492_v42 = vpop.permute.xlu0 %5491  ;;  %v5486_v44 = vpop.permute.xlu1 %5485  ;;  %v5812_v40 = vadd.f32 %v5804_v39, %v5524_v47  ;;  %v5796_v47 = vadd.f32 %v5788_v50, %v5767_v19 }
0x1028   : > { %v5509_v25 = vsel %vm3056_vm6, %v16201_v30, %v5486_v44  ;;  %v5512_v61 = vsel %vm3056_vm6, %v12228_v15, %v5492_v42  ;;  %v5758_v15 = vmul.f32 %v18701_v53, %v18722_v0  ;;  %v5805_v11 = vadd.f32 %v16259_v37, %v5791_v12 }
0x1029   : > { %v5523_v31 = vmul.f32 %v16250_v7, %v5509_v25  ;;  %v5526_v9 = vmul.f32 %v16250_v7, %v5512_v61  ;;  %v5806_v53 = vadd.f32 %v16259_v37, %v5792_v5  ;;  %v5808_v57 = vadd.f32 %v16259_v37, %v5794_v23  ;;  %v18737_v23 = vld [vmem:[#allocation149_spill] sm:$0xff] }
0x102a   : > { %v5766_v48 = vadd.f32 %v5758_v15, %v5745_v28 }
0x102b   : > { %v5811_v3 = vadd.f32 %v5803_v51, %v5523_v31  ;;  %v5496_v30 = vpop.permute.xlu0 %5495  ;;  %v5490_v38 = vpop.permute.xlu1 %5489  ;;  %v5814_v14 = vadd.f32 %v5806_v53, %v5526_v9  ;;  %v18732_v9 = vld [vmem:[#allocation151_spill] sm:$0xff] }
0x102c   : > { %v5511_v45 = vsel %vm3056_vm6, %v5158_v41, %v5490_v38  ;;  %v5514_v43 = vsel %vm3056_vm6, %v12231_v17, %v5496_v30  ;;  %v5787_v17 = vmul.f32 %v16231_v26, %v5775_v8  ;;  %v5178_v51 = vpop.f32.mrf.mxu1  ;;  %v18730_v30 = vld [vmem:[#allocation139_spill] sm:$0xff] }
0x102d   : > { %v5525_v24 = vmul.f32 %v16250_v7, %v5511_v45  ;;  %12272 = vmatprep.mubr.msk.f32.mxu1 %vm2494_vm0, %v5811_v3  ;;  %v5528_v10 = vmul.f32 %v16250_v7, %v5514_v43  ;;  %v18728_v3 = vld [vmem:[#allocation142_spill] sm:$0xff] }
0x102e   : > { %12273 = vmatmul.mubr.msk.f32.vlgmr.msra.gmra.mxu1 %vm2494_vm0, %v5812_v40  ;;  %v5795_v27 = vadd.f32 %v5787_v17, %v5766_v48 }
0x102f   : > { %v5813_v16 = vadd.f32 %v5805_v11, %v5525_v24  ;;  %v5500_v41 = vpop.permute.xlu0 %5499  ;;  %v5494_v2 = vpop.permute.xlu1 %5493  ;;  %v5816_v63 = vadd.f32 %v5808_v57, %v5528_v10 }
0x1030   : > { %v5513_v42 = vsel %vm3056_vm6, %v5168_v34, %v5494_v2  ;;  %v5516_v44 = vsel %vm3056_vm6, %v12234_v62, %v5500_v41  ;;  %v5809_v12 = vadd.f32 %v16259_v37, %v5795_v27  ;;  %v5810_v34 = vadd.f32 %v16259_v37, %v5796_v47  ;;  %v18739_v41 = vld [vmem:[#allocation158_spill] sm:$0xff]  ;;  %v16359_v47 = vld [vmem:[%s16341_s2 + $0x8] sm:$0xff] }
0x1031   : > { %v5527_v35 = vmul.f32 %v16250_v7, %v5513_v42  ;;  %12275 = vmatprep.mubr.msk.f32.mxu1 %vm2494_vm0, %v5813_v16  ;;  %v5530_v61 = vmul.f32 %v16250_v7, %v5516_v44  ;;  %v16347_v42 = vld [vmem:[%s16341_s2] sm:$0xff] }
0x1032   : > { %12276 = vmatmul.mubr.msk.f32.gmra.mxu1 %vm2494_vm0, %v5814_v14  ;;  %v18743_v44 = vld [vmem:[#allocation146_spill] sm:$0xff]  ;;  %v6580_v57 = vsel %vm2494_vm0, %v16347_v42, 0.0 }
0x1033   : > { %v5815_v25 = vadd.f32 %v5807_v55, %v5527_v35  ;;  %v5498_v26 = vpop.permute.xlu1 %5497  ;;  %v5818_v5 = vadd.f32 %v5810_v34, %v5530_v61  ;;  %v16371_v61 = vld [vmem:[%s16341_s2 + $0x18] sm:$0xff]  ;;  %v16381_v34 = vld [vmem:[%s16341_s2 + $0x28] sm:$0xff] }
0x1034   : > { %v5515_v31 = vsel %vm3056_vm6, %v5178_v51, %v5498_v26  ;;  %v16362_v51 = vld [vmem:[%s16341_s2 + $0x10] sm:$0xff]  ;;  %v6583_v26 = vsel %vm2494_vm0, %v16359_v47, 0.0 }
0x1035   : > { %v5529_v28 = vmul.f32 %v16250_v7, %v5515_v31  ;;  %12278 = vmatprep.mubr.msk.f32.mxu1 %vm2494_vm0, %v5815_v25  ;;  %v16374_v31 = vld [vmem:[%s16341_s2 + $0x20] sm:$0xff] }
0x1036   : > { %12279 = vmatmul.mubr.msk.f32.gmra.mxu1 %vm2494_vm0, %v5816_v63  ;;  %v6586_v63 = vsel %vm2494_vm0, %v16362_v51, 0.0 }
0x1037   : > { %v5817_v39 = vadd.f32 %v5809_v12, %v5529_v28  ;;  %v6589_v12 = vsel %vm2494_vm0, %v16371_v61, 0.0  ;;  %v6592_v28 = vsel %vm2494_vm0, %v16374_v31, 0.0 }
0x1039   : > { %12281 = vmatprep.mubr.msk.f32.mxu1 %vm2494_vm0, %v5817_v39  ;;  %v16384_v39 = vld [vmem:[%s16341_s2 + $0x30] sm:$0xff] }
0x103a   : > { %12282 = vmatmul.mubr.msk.f32.gmra.mxu1 %vm2494_vm0, %v5818_v5  ;;  %v6595_v5 = vsel %vm2494_vm0, %v16381_v34, 0.0 }
0x10ee   : > { %v12274_v20 = vpop.f32.mrf.mxu1 }
0x10ef   : > { %v5921_v6 = vadd.f32 %v12274_v20, %v11517_v29  ;;  %v16391_v20 = vld [vmem:[%s16341_s2 + $0x38] sm:$0xff] }
0x10f0   : > { %v5915_v56 = vpop.f32.mrf.mxu1 }
0x10f1   : > { %v16312_v13 = vadd.f32 %v5921_v6, %v18728_v3  ;;  %v5916_v7 = vadd.f32 %v11517_v29, %v5915_v56  ;;  %v6601_v6 = vsel %vm2494_vm0, %v16391_v20, 0.0 }
0x10f2   : > { %v12277_v22 = vpop.f32.mrf.mxu1 }
0x10f3   : > { %18729 = vst [vmem:[#allocation133_spill] sm:$0xff] %v16312_v13  ;;  %v16315_v38 = vadd.f32 %v5916_v7, %v18730_v30  ;;  %v5965_v37 = vsel %vm2494_vm0, %v16312_v13, 0.0  ;;  %v5931_v0 = vadd.f32 %v12277_v22, %v11517_v29 }
0x10f4   : > { %5966 = vadd.xlane.f32.xlu0 %v5965_v37  ;;  %v5925_v15 = vpop.f32.mrf.mxu1 }
0x10f5   : > { %18731 = vst [vmem:[#allocation122_spill] sm:$0xff] %v16315_v38  ;;  %v5926_v21 = vadd.f32 %v11517_v29, %v5925_v15  ;;  %v5962_v8 = vsel %vm2494_vm0, %v16315_v38, 0.0  ;;  %v16325_v43 = vadd.f32 %v5931_v0, %v18735_v46 }
0x10f6   : > { %v12280_v40 = vpop.f32.mrf.mxu1  ;;  %5963 = vadd.xlane.f32.xlu1 %v5962_v8 }
0x10f7   : > { %v16322_v45 = vadd.f32 %v5926_v21, %v18732_v9  ;;  %18736 = vst [vmem:[#allocation131_spill] sm:$0xff] %v16325_v43  ;;  %v5941_v24 = vadd.f32 %v12280_v40, %v11517_v29  ;;  %v5971_v16 = vsel %vm2494_vm0, %v16325_v43, 0.0 }
0x10f8   : > { %v5935_v11 = vpop.f32.mrf.mxu1 }
0x10f9   : > { %18734 = vst [vmem:[#allocation162_spill] sm:$0xff] %v16322_v45  ;;  %v5936_v48 = vadd.f32 %v11517_v29, %v5935_v11  ;;  %v5968_v62 = vsel %vm2494_vm0, %v16322_v45, 0.0  ;;  %v16335_v2 = vadd.f32 %v5941_v24, %v18739_v41 }
0x10fa   : > { %5969 = vadd.xlane.f32.xlu0 %v5968_v62  ;;  %v12283_v53 = vpop.f32.mrf.mxu1 }
0x10fb   : > { %v16330_v36 = vadd.f32 %v5936_v48, %v18737_v23  ;;  %18740 = vst [vmem:[#allocation153_spill] sm:$0xff] %v16335_v2  ;;  %v5951_v17 = vadd.f32 %v12283_v53, %v11517_v29  ;;  %v5977_v35 = vsel %vm2494_vm0, %v16335_v2, 0.0 }
0x10fc   : > { %v5945_v19 = vpop.f32.mrf.mxu1 }
0x10fd   : > { %18738 = vst [vmem:[#allocation165_spill] sm:$0xff] %v16330_v36  ;;  %v5946_v14 = vadd.f32 %v11517_v29, %v5945_v19  ;;  %v5974_v10 = vsel %vm2494_vm0, %v16330_v36, 0.0  ;;  %v16350_v55 = vadd.f32 %v5951_v17, %v18743_v44  ;;  %v6598_v29 = vsel %vm2494_vm0, %v16384_v39, 0.0 }
0x10fe   : > { %5972 = vadd.xlane.f32.xlu0 %v5971_v16  ;;  %5975 = vadd.xlane.f32.xlu1 %v5974_v10 }
0x10ff   : > { %v16344_v50 = vadd.f32 %v5946_v14, %v18741_v1  ;;  %18744 = vst [vmem:[#allocation132_spill] sm:$0xff] %v16350_v55  ;;  %v5983_v25 = vsel %vm2494_vm0, %v16350_v55, 0.0 }
0x1101   : > { %18742 = vst [vmem:[#allocation125_spill] sm:$0xff] %v16344_v50  ;;  %v5980_v27 = vsel %vm2494_vm0, %v16344_v50, 0.0 }
0x1102   : > { %5978 = vadd.xlane.f32.xlu0 %v5977_v35  ;;  %5981 = vadd.xlane.f32.xlu1 %v5980_v27 }
0x1106   : > { %5984 = vadd.xlane.f32.xlu0 %v5983_v25  ;;  %6581 = vadd.xlane.f32.xlu1 %v6580_v57 }
0x110a   : > { %6584 = vadd.xlane.f32.xlu0 %v6583_v26  ;;  %6587 = vadd.xlane.f32.xlu1 %v6586_v63 }
0x110e   : > { %6590 = vadd.xlane.f32.xlu0 %v6589_v12  ;;  %6593 = vadd.xlane.f32.xlu1 %v6592_v28 }
0x1112   : > { %6596 = vadd.xlane.f32.xlu0 %v6595_v5  ;;  %6599 = vadd.xlane.f32.xlu1 %v6598_v29 }
0x1116   : > { %6602 = vadd.xlane.f32.xlu0 %v6601_v6 }
0x117d   : > { %v5967_v56 = vpop.xlane.xlu0 %5966 }
0x117e   : > { %v5987_v3 = vmul.f32 0.0625, %v5967_v56 }
0x117f   : > { %v5964_v7 = vpop.xlane.xlu1 %5963 }
0x1180   : > { %v16396_v22 = vsub.f32 %v16312_v13, %v5987_v3  ;;  %v5986_v30 = vmul.f32 0.0625, %v5964_v7 }
0x1182   : > { %v16399_v37 = vsub.f32 %v16315_v38, %v5986_v30  ;;  %v6003_v0 = vmul.f32 %v16396_v22, %v16396_v22  ;;  %v18791_v38 = vld [vmem:[#allocation155_spill] sm:$0xff] }
0x1183   : > { %v5970_v15 = vpop.xlane.xlu0 %5969 }
0x1184   : > { %v5988_v21 = vmul.f32 0.0625, %v5970_v15  ;;  %v6013_v8 = vsel %vm2494_vm0, %v6003_v0, 0.0  ;;  %v6002_v40 = vmul.f32 %v16399_v37, %v16399_v37 }
0x1185   : > { %6014 = vadd.xlane.f32.xlu0 %v6013_v8 }
0x1186   : > { %v16407_v9 = vsub.f32 %v16322_v45, %v5988_v21  ;;  %v6010_v46 = vsel %vm2494_vm0, %v6002_v40, 0.0 }
0x1187   : > { %v5973_v11 = vpop.xlane.xlu0 %5972  ;;  %v5976_v24 = vpop.xlane.xlu1 %5975  ;;  %6011 = vadd.xlane.f32.xlu1 %v6010_v46 }
0x1188   : > { %v5989_v48 = vmul.f32 0.0625, %v5973_v11  ;;  %v5990_v62 = vmul.f32 0.0625, %v5976_v24  ;;  %v6004_v53 = vmul.f32 %v16407_v9, %v16407_v9 }
0x118a   : > { %v16413_v23 = vsub.f32 %v16325_v43, %v5989_v48  ;;  %v16416_v19 = vsub.f32 %v16330_v36, %v5990_v62  ;;  %v6016_v16 = vsel %vm2494_vm0, %v6004_v53, 0.0  ;;  %v18787_v43 = vld [vmem:[#allocation154_spill] sm:$0xff] }
0x118b   : > { %v5979_v41 = vpop.xlane.xlu0 %5978  ;;  %6017 = vadd.xlane.f32.xlu1 %v6016_v16  ;;  %v5982_v17 = vpop.xlane.xlu1 %5981 }
0x118c   : > { %v5991_v14 = vmul.f32 0.0625, %v5979_v41  ;;  %v5992_v10 = vmul.f32 0.0625, %v5982_v17  ;;  %v6005_v1 = vmul.f32 %v16413_v23, %v16413_v23  ;;  %v6006_v44 = vmul.f32 %v16416_v19, %v16416_v19 }
0x118e   : > { %v16424_v35 = vsub.f32 %v16335_v2, %v5991_v14  ;;  %v16427_v27 = vsub.f32 %v16344_v50, %v5992_v10  ;;  %v6019_v57 = vsel %vm2494_vm0, %v6005_v1, 0.0  ;;  %v6022_v25 = vsel %vm2494_vm0, %v6006_v44, 0.0 }
0x118f   : > { %6020 = vadd.xlane.f32.xlu0 %v6019_v57  ;;  %v5985_v26 = vpop.xlane.xlu0 %5984  ;;  %6023 = vadd.xlane.f32.xlu1 %v6022_v25  ;;  %v6582_v63 = vpop.xlane.xlu1 %6581 }
0x1190   : > { %v5993_v12 = vmul.f32 0.0625, %v5985_v26  ;;  %v6604_v28 = vmul.f32 0.0625, %v6582_v63  ;;  %v6007_v5 = vmul.f32 %v16424_v35, %v16424_v35  ;;  %v6008_v29 = vmul.f32 %v16427_v27, %v16427_v27 }
0x1192   : > { %v16436_v6 = vsub.f32 %v16350_v55, %v5993_v12  ;;  %v16439_v56 = vsub.f32 %v16347_v42, %v6604_v28  ;;  %v6025_v3 = vsel %vm2494_vm0, %v6007_v5, 0.0  ;;  %v6028_v7 = vsel %vm2494_vm0, %v6008_v29, 0.0 }
0x1193   : > { %6026 = vadd.xlane.f32.xlu0 %v6025_v3  ;;  %v6585_v30 = vpop.xlane.xlu0 %6584  ;;  %6029 = vadd.xlane.f32.xlu1 %v6028_v7  ;;  %v6588_v0 = vpop.xlane.xlu1 %6587 }
0x1194   : > { %v6605_v15 = vmul.f32 0.0625, %v6585_v30  ;;  %v6606_v21 = vmul.f32 0.0625, %v6588_v0  ;;  %v6009_v8 = vmul.f32 %v16436_v6, %v16436_v6  ;;  %v6620_v40 = vmul.f32 %v16439_v56, %v16439_v56 }
0x1196   : > { %v16448_v46 = vsub.f32 %v16359_v47, %v6605_v15  ;;  %v16451_v42 = vsub.f32 %v16362_v51, %v6606_v21  ;;  %v6031_v11 = vsel %vm2494_vm0, %v6009_v8, 0.0  ;;  %v6628_v24 = vsel %vm2494_vm0, %v6620_v40, 0.0  ;;  %v4527_v21 = vld [vmem:[%s18745_s3 + $0x8] sm:$0xff]  ;;  %v4526_v8 = vld [vmem:[%s18745_s3] sm:$0xff]  ;;  %s18747_s3 = sld [smem:[#allocation89_spill]] }
0x1197   : > { %6032 = vadd.xlane.f32.xlu0 %v6031_v11  ;;  %v6591_v48 = vpop.xlane.xlu0 %6590  ;;  %6629 = vadd.xlane.f32.xlu1 %v6628_v24  ;;  %v6594_v62 = vpop.xlane.xlu1 %6593  ;;  %v16494_v40 = vld [vmem:[%s18746_s4 + $0x8] sm:$0xff] }
0x1198   : > { %v6607_v53 = vmul.f32 0.0625, %v6591_v48  ;;  %v6608_v16 = vmul.f32 0.0625, %v6594_v62  ;;  %v6621_v41 = vmul.f32 %v16448_v46, %v16448_v46  ;;  %v6622_v47 = vmul.f32 %v16451_v42, %v16451_v42  ;;  %12284 = vmatprep.subr.mxu0 %v4527_v21 }
0x1199   : > { %12285 = vmatpush3.msra.mxu0 %v4527_v21 }
0x119a   : > { %v16460_v17 = vsub.f32 %v16371_v61, %v6607_v53  ;;  %v16463_v51 = vsub.f32 %v16374_v31, %v6608_v16  ;;  %v6631_v14 = vsel %vm2494_vm0, %v6621_v41, 0.0  ;;  %v6634_v10 = vsel %vm2494_vm0, %v6622_v47, 0.0  ;;  %12286 = vmatprep.subr.mxu0 %v4526_v8 }
0x119b   : > { %6632 = vadd.xlane.f32.xlu0 %v6631_v14  ;;  %v6597_v1 = vpop.xlane.xlu0 %6596  ;;  %6635 = vadd.xlane.f32.xlu1 %v6634_v10  ;;  %v6600_v44 = vpop.xlane.xlu1 %6599 }
0x119c   : > { %v6609_v57 = vmul.f32 0.0625, %v6597_v1  ;;  %v6610_v25 = vmul.f32 0.0625, %v6600_v44  ;;  %v6623_v26 = vmul.f32 %v16460_v17, %v16460_v17  ;;  %v6624_v61 = vmul.f32 %v16463_v51, %v16463_v51  ;;  %12287 = vmatpush3.msra.mxu0 %v4526_v8 }
0x119d   : > { %12328 = vmatprep.subr.mxu0 %v16494_v40 }
0x119e   : > { %v16472_v63 = vsub.f32 %v16381_v34, %v6609_v57  ;;  %v16475_v31 = vsub.f32 %v16384_v39, %v6610_v25  ;;  %v6637_v12 = vsel %vm2494_vm0, %v6623_v26, 0.0  ;;  %v6640_v28 = vsel %vm2494_vm0, %v6624_v61, 0.0 }
0x119f   : > { %6638 = vadd.xlane.f32.xlu0 %v6637_v12  ;;  %v6603_v5 = vpop.xlane.xlu0 %6602  ;;  %6641 = vadd.xlane.f32.xlu1 %v6640_v28 }
0x11a0   : > { %v6611_v29 = vmul.f32 0.0625, %v6603_v5  ;;  %v6625_v3 = vmul.f32 %v16472_v63, %v16472_v63  ;;  %v6626_v34 = vmul.f32 %v16475_v31, %v16475_v31 }
0x11a2   : > { %v16484_v39 = vsub.f32 %v16391_v20, %v6611_v29  ;;  %v6643_v7 = vsel %vm2494_vm0, %v6625_v3, 0.0  ;;  %v6646_v30 = vsel %vm2494_vm0, %v6626_v34, 0.0 }
0x11a3   : > { %6644 = vadd.xlane.f32.xlu0 %v6643_v7  ;;  %6647 = vadd.xlane.f32.xlu1 %v6646_v30  ;;  %v16498_v30 = vld [vmem:[%s18747_s3] ss:$0 sm:$0xff]  ;;  %s18751_s3 = sld [smem:[#allocation92_spill]] }
0x11a4   : > { %v6627_v0 = vmul.f32 %v16484_v39, %v16484_v39 }
0x11a6   : > { %v6649_v15 = vsel %vm2494_vm0, %v6627_v0, 0.0 }
0x11a7   : > { %6650 = vadd.xlane.f32.xlu0 %v6649_v15 }
0x120e   : > { %v6015_v20 = vpop.xlane.xlu0 %6014 }
0x120f   : > { %v6035_v11 = vmul.f32 0.0625, %v6015_v20 }
0x1210   : > { %v6012_v24 = vpop.xlane.xlu1 %6011 }
0x1211   : > { %v6043_v48 = vadd.f32 1e-05, %v6035_v11  ;;  %v6034_v62 = vmul.f32 0.0625, %v6012_v24 }
0x1213   : > { %13096 = vrsqrt.f32 %v6043_v48  ;;  %v6042_v53 = vadd.f32 1e-05, %v6034_v62 }
0x1214   : > { %v6018_v16 = vpop.xlane.xlu1 %6017 }
0x1215   : > { %13098 = vrsqrt.f32 %v6042_v53  ;;  %v6036_v41 = vmul.f32 0.0625, %v6018_v16 }
0x1217   : > { %v6044_v47 = vadd.f32 1e-05, %v6036_v41 }
0x1218   : > { %v6021_v14 = vpop.xlane.xlu0 %6020  ;;  %v6024_v10 = vpop.xlane.xlu1 %6023 }
0x1219   : > { %13100 = vrsqrt.f32 %v6044_v47  ;;  %v6037_v1 = vmul.f32 0.0625, %v6021_v14  ;;  %v6038_v44 = vmul.f32 0.0625, %v6024_v10  ;;  %v16504_v47 = vld [vmem:[%s18748_s5] ss:$0 sm:$0xff]  ;;  %s18750_s5 = sld [smem:[#allocation93_spill]] }
0x121b   : > { %v6045_v57 = vadd.f32 1e-05, %v6037_v1  ;;  %v6046_v25 = vadd.f32 1e-05, %v6038_v44 }
0x121c   : > { %v6027_v26 = vpop.xlane.xlu0 %6026  ;;  %v6030_v61 = vpop.xlane.xlu1 %6029 }
0x121d   : > { %13102 = vrsqrt.f32 %v6045_v57  ;;  %v6039_v12 = vmul.f32 0.0625, %v6027_v26  ;;  %v6040_v28 = vmul.f32 0.0625, %v6030_v61 }
0x121e   : > { %13104 = vrsqrt.f32 %v6046_v25 }
0x121f   : > { %v6047_v5 = vadd.f32 1e-05, %v6039_v12  ;;  %v6048_v29 = vadd.f32 1e-05, %v6040_v28 }
0x1220   : > { %v13097_v3 = vpop.eup %13096  ;;  %v6033_v34 = vpop.xlane.xlu0 %6032 }
0x1221   : > { %v6630_v7 = vpop.xlane.xlu1 %6629  ;;  %v6059_v0 = vmul.f32 %v13097_v3, %v16396_v22  ;;  %13106 = vrsqrt.f32 %v6047_v5  ;;  %v6041_v15 = vmul.f32 0.0625, %v6033_v34  ;;  %v6556_v5 = vld [vmem:[%s18746_s4] sm:$0xff]  ;;  %s18753_s4 = smov 104  }
0x1222   : > { %v6652_v21 = vmul.f32 0.0625, %v6630_v7  ;;  %v13099_v8 = vpop.eup %13098  ;;  %13108 = vrsqrt.f32 %v6048_v29 }
0x1223   : > { %v6049_v20 = vadd.f32 1e-05, %v6041_v15  ;;  %v6058_v24 = vmul.f32 %v13099_v8, %v16399_v37  ;;  %v6073_v48 = vmul.f32 %v16498_v30, %v6059_v0 }
0x1224   : > { %v6660_v11 = vadd.f32 1e-05, %v6652_v21  ;;  %v6633_v62 = vpop.xlane.xlu0 %6632 }
0x1225   : > { %v6636_v53 = vpop.xlane.xlu1 %6635  ;;  %13110 = vrsqrt.f32 %v6049_v20  ;;  %v6653_v16 = vmul.f32 0.0625, %v6633_v62  ;;  %v6072_v22 = vmul.f32 %v16498_v30, %v6058_v24  ;;  %v6087_v26 = vadd.f32 %v16504_v47, %v6073_v48 }
0x1226   : > { %v6654_v41 = vmul.f32 0.0625, %v6636_v53  ;;  %v13101_v14 = vpop.eup %13100  ;;  %13112 = vrsqrt.f32 %v6660_v11 }
0x1227   : > { %v6661_v10 = vadd.f32 1e-05, %v6653_v16  ;;  %v6086_v44 = vadd.f32 %v16504_v47, %v6072_v22  ;;  %v6060_v37 = vmul.f32 %v13101_v14, %v16407_v9 }
0x1228   : > { %v6662_v1 = vadd.f32 1e-05, %v6654_v41  ;;  %v6639_v57 = vpop.xlane.xlu0 %6638 }
0x1229   : > { %v6642_v25 = vpop.xlane.xlu1 %6641  ;;  %13114 = vrsqrt.f32 %v6661_v10  ;;  %v6655_v61 = vmul.f32 0.0625, %v6639_v57  ;;  %12288 = vmatprep.mubr.msk.f32.mxu0 %vm2494_vm0, %v6086_v44  ;;  %v6074_v28 = vmul.f32 %v16498_v30, %v6060_v37 }
0x122a   : > { %v6656_v12 = vmul.f32 0.0625, %v6642_v25  ;;  %v13103_v29 = vpop.eup %13102  ;;  %13116 = vrsqrt.f32 %v6662_v1  ;;  %12289 = vmatmul.mubr.msk.f32.vlgmr.msra.gmra.mxu0 %vm2494_vm0, %v6087_v26  ;;  %v11548_v26 = vld [vmem:[#allocation8] ss:$0 sm:$0xff] }
0x122b   : > { %v13105_v3 = vpop.eup %13104  ;;  %v6663_v34 = vadd.f32 1e-05, %v6655_v61  ;;  %v6088_v9 = vadd.f32 %v16504_v47, %v6074_v28  ;;  %v6061_v0 = vmul.f32 %v13103_v29, %v16413_v23  ;;  %12329 = vmatpush3.msra.mxu0 %v16494_v40  ;;  %v18749_v23 = vmov 0.0   ;;  %v11549_v29 = vld [vmem:[#allocation10] ss:$0 sm:$0xff] }
0x122c   : > { %v6664_v7 = vadd.f32 1e-05, %v6656_v12  ;;  %v6645_v15 = vpop.xlane.xlu0 %6644  ;;  %v6062_v8 = vmul.f32 %v13105_v3, %v16416_v19  ;;  %12330 = vmatprep.subr.mxu0 %v6556_v5 }
0x122d   : > { %v6648_v21 = vpop.xlane.xlu1 %6647  ;;  %13118 = vrsqrt.f32 %v6663_v34  ;;  %v6657_v20 = vmul.f32 0.0625, %v6645_v15  ;;  %12291 = vmatprep.mubr.msk.f32.mxu0 %vm2494_vm0, %v6088_v9  ;;  %v6075_v24 = vmul.f32 %v16498_v30, %v6061_v0  ;;  %12331 = vmatpush3.msra.mxu0 %v6556_v5 }
0x122e   : > { %v6658_v11 = vmul.f32 0.0625, %v6648_v21  ;;  %v13107_v48 = vpop.eup %13106  ;;  %13120 = vrsqrt.f32 %v6664_v7  ;;  %v6076_v62 = vmul.f32 %v16498_v30, %v6062_v8  ;;  %12377 = vmatprep.subr.mxu0 %v18749_v23 }
0x122f   : > { %v13109_v40 = vpop.eup %13108  ;;  %v6665_v53 = vadd.f32 1e-05, %v6657_v20  ;;  %v6089_v19 = vadd.f32 %v16504_v47, %v6075_v24  ;;  %v6063_v41 = vmul.f32 %v13107_v48, %v16424_v35 }
0x1230   : > { %v6666_v16 = vadd.f32 1e-05, %v6658_v11  ;;  %v6651_v22 = vpop.xlane.xlu0 %6650  ;;  %v6090_v14 = vadd.f32 %v16504_v47, %v6076_v62  ;;  %v6064_v10 = vmul.f32 %v13109_v40, %v16427_v27 }
0x1231   : > { %13122 = vrsqrt.f32 %v6665_v53  ;;  %v6659_v1 = vmul.f32 0.0625, %v6651_v22  ;;  %12292 = vmatmul.mubr.msk.f32.gmra.mxu0 %vm2494_vm0, %v6089_v19  ;;  %v6077_v44 = vmul.f32 %v16498_v30, %v6063_v41 }
0x1232   : > { %v13111_v37 = vpop.eup %13110  ;;  %13124 = vrsqrt.f32 %v6666_v16  ;;  %12294 = vmatprep.mubr.msk.f32.mxu0 %vm2494_vm0, %v6090_v14  ;;  %v6078_v57 = vmul.f32 %v16498_v30, %v6064_v10 }
0x1233   : > { %v13113_v25 = vpop.eup %13112  ;;  %v6667_v35 = vadd.f32 1e-05, %v6659_v1  ;;  %v6091_v61 = vadd.f32 %v16504_v47, %v6077_v44  ;;  %v6065_v12 = vmul.f32 %v13111_v37, %v16436_v6  ;;  %v4536_v1 = vld [vmem:[%s18750_s5 + $0x38] sm:$0xff]  ;;  %v4534_v44 = vld [vmem:[%s18750_s5 + $0x28] sm:$0xff]  ;;  %v4533_v37 = vld [vmem:[%s18750_s5 + $0x20] sm:$0xff] }
0x1234   : > { %v6092_v27 = vadd.f32 %v16504_v47, %v6078_v57  ;;  %v6676_v28 = vmul.f32 %v13113_v25, %v16439_v56  ;;  %12300 = vmatprep.subr.mxu1 %v4536_v1  ;;  %v4532_v57 = vld [vmem:[%s18750_s5 + $0x18] sm:$0xff]  ;;  %v4531_v25 = vld [vmem:[%s18750_s5 + $0x10] sm:$0xff] }
0x1235   : > { %13126 = vrsqrt.f32 %v6667_v35  ;;  %12295 = vmatmul.mubr.msk.f32.gmra.mxu0 %vm2494_vm0, %v6091_v61  ;;  %v6079_v5 = vmul.f32 %v16498_v30, %v6065_v12  ;;  %12301 = vmatpush3.msra.mxu1 %v4536_v1  ;;  %v4529_v35 = vld [vmem:[%s18750_s5] sm:$0xff] }
0x1236   : > { %v13115_v3 = vpop.eup %13114  ;;  %12297 = vmatprep.mubr.msk.f32.mxu0 %vm2494_vm0, %v6092_v27  ;;  %v6690_v34 = vmul.f32 %v11548_v26, %v6676_v28  ;;  %v11528_v61 = vld [vmem:[%s18751_s3] ss:$0 sm:$0xff]  ;;  %s18752_s3 = smov 88  }
0x1237   : > { %v13117_v7 = vpop.eup %13116  ;;  %v6677_v9 = vmul.f32 %v13115_v3, %v16448_v46  ;;  %v6093_v0 = vadd.f32 %v16504_v47, %v6079_v5 }
0x1238   : > { %v6704_v6 = vadd.f32 %v11549_v29, %v6690_v34  ;;  %v6678_v15 = vmul.f32 %v13117_v7, %v16451_v42 }
0x1239   : > { %v6691_v21 = vmul.f32 %v11548_v26, %v6677_v9  ;;  %12298 = vmatmul.mubr.msk.f32.gmra.mxu0 %vm2494_vm0, %v6093_v0 }
0x123a   : > { %v13119_v56 = vpop.eup %13118  ;;  %12332 = vmatprep.mubr.msk.f32.mxu0 %vm2494_vm0, %v6704_v6  ;;  %v6692_v30 = vmul.f32 %v11548_v26, %v6678_v15 }
0x123b   : > { %v13121_v8 = vpop.eup %13120  ;;  %v6705_v20 = vadd.f32 %v11549_v29, %v6691_v21  ;;  %v6679_v11 = vmul.f32 %v13119_v56, %v16460_v17 }
0x123c   : > { %v6706_v24 = vadd.f32 %v11549_v29, %v6692_v30  ;;  %v6680_v48 = vmul.f32 %v13121_v8, %v16463_v51 }
0x123d   : > { %12333 = vmatmul.mubr.msk.f32.vlgmr.msra.gmra.mxu0 %vm2494_vm0, %v6705_v20  ;;  %v6693_v46 = vmul.f32 %v11548_v26, %v6679_v11 }
0x123e   : > { %v13123_v47 = vpop.eup %13122  ;;  %12335 = vmatprep.mubr.msk.f32.mxu0 %vm2494_vm0, %v6706_v24  ;;  %v6694_v42 = vmul.f32 %v11548_v26, %v6680_v48 }
0x123f   : > { %v13125_v62 = vpop.eup %13124  ;;  %v6707_v40 = vadd.f32 %v11549_v29, %v6693_v46  ;;  %v6681_v53 = vmul.f32 %v13123_v47, %v16472_v63  ;;  %v16566_v47 = vld [vmem:[#allocation11] ss:$0 sm:$0xff] }
0x1240   : > { %v6708_v16 = vadd.f32 %v11549_v29, %v6694_v42  ;;  %v6682_v19 = vmul.f32 %v13125_v62, %v16475_v31 }
0x1241   : > { %12336 = vmatmul.mubr.msk.f32.gmra.mxu0 %vm2494_vm0, %v6707_v40  ;;  %v6695_v17 = vmul.f32 %v11548_v26, %v6681_v53 }
0x1242   : > { %v13127_v51 = vpop.eup %13126  ;;  %12338 = vmatprep.mubr.msk.f32.mxu0 %vm2494_vm0, %v6708_v16  ;;  %v6696_v41 = vmul.f32 %v11548_v26, %v6682_v19 }
0x1243   : > { %v6709_v22 = vadd.f32 %v11549_v29, %v6695_v17  ;;  %v6683_v14 = vmul.f32 %v13127_v51, %v16484_v39  ;;  %v4535_v39 = vld [vmem:[%s18750_s5 + $0x30] sm:$0xff] }
0x1244   : > { %v6710_v10 = vadd.f32 %v11549_v29, %v6696_v41  ;;  %12302 = vmatprep.subr.mxu1 %v4535_v39 }
0x1245   : > { %12339 = vmatmul.mubr.msk.f32.gmra.mxu0 %vm2494_vm0, %v6709_v22  ;;  %v6697_v63 = vmul.f32 %v11548_v26, %v6683_v14  ;;  %12303 = vmatpush3.msra.mxu1 %v4535_v39  ;;  %v4530_v26 = vld [vmem:[%s18750_s5 + $0x8] sm:$0xff]  ;;  %s18754_s5 = smov 112  }
0x1246   : > { %12341 = vmatprep.mubr.msk.f32.mxu0 %vm2494_vm0, %v6710_v10  ;;  %12304 = vmatprep.subr.mxu1 %v4534_v44 }
0x1247   : > { %v6711_v31 = vadd.f32 %v11549_v29, %v6697_v63  ;;  %12305 = vmatpush3.msra.mxu1 %v4534_v44 }
0x1248   : > { %12306 = vmatprep.subr.mxu1 %v4533_v37 }
0x1249   : > { %12342 = vmatmul.mubr.msk.f32.gmra.mxu0 %vm2494_vm0, %v6711_v31  ;;  %12307 = vmatpush3.msra.mxu1 %v4533_v37 }
0x124a   : > { %12393 = vmatprep.mubr.msk.f32.mxu0 %vm14205_vm7, %v18749_v23  ;;  %12308 = vmatprep.subr.mxu1 %v4532_v57 }
0x124b   : > { %12309 = vmatpush3.msra.mxu1 %v4532_v57 }
0x124c   : > { %12310 = vmatprep.subr.mxu1 %v4531_v25 }
0x124d   : > { %12311 = vmatpush3.msra.mxu1 %v4531_v25 }
0x124e   : > { %12312 = vmatprep.subr.mxu1 %v4530_v26 }
0x124f   : > { %12313 = vmatpush3.msra.mxu1 %v4530_v26 }
0x1250   : > { %12314 = vmatprep.subr.mxu1 %v4529_v35 }
0x1251   : > { %12315 = vmatpush3.msra.mxu1 %v4529_v35 }
0x1252   : > { %12344 = vmatprep.subr.mxu1 %v18749_v23 }
0x12ea   : > { %v12290_v12 = vpop.f32.mrf.mxu0 }
0x12eb   : > { %v6196_v27 = vadd.f32 %v12290_v12, %v11528_v61 }
0x12ec   : > { %v6190_v28 = vpop.f32.mrf.mxu0 }
0x12ed   : > { %v6238_v5 = vmul.f32 0.70710677, %v6196_v27  ;;  %v6191_v29 = vadd.f32 %v11528_v61, %v6190_v28  ;;  %v6230_v10 = vmul.f32 0.5, %v6196_v27 }
0x12ef   : > { %13128 = verf.f32 %v6238_v5  ;;  %v6237_v3 = vmul.f32 0.70710677, %v6191_v29  ;;  %v6229_v41 = vmul.f32 0.5, %v6191_v29 }
0x12f1   : > { %13130 = verf.f32 %v6237_v3  ;;  %v12293_v34 = vpop.f32.mrf.mxu0 }
0x12f2   : > { %v6206_v7 = vadd.f32 %v12293_v34, %v11528_v61 }
0x12f3   : > { %v6200_v9 = vpop.f32.mrf.mxu0 }
0x12f4   : > { %v6240_v0 = vmul.f32 0.70710677, %v6206_v7  ;;  %v6201_v6 = vadd.f32 %v11528_v61, %v6200_v9  ;;  %v6232_v35 = vmul.f32 0.5, %v6206_v7 }
0x12f5   : > { %v12296_v15 = vpop.f32.mrf.mxu0 }
0x12f6   : > { %13132 = verf.f32 %v6240_v0  ;;  %v6239_v21 = vmul.f32 0.70710677, %v6201_v6  ;;  %v6216_v56 = vadd.f32 %v12296_v15, %v11528_v61  ;;  %v6231_v9 = vmul.f32 0.5, %v6201_v6 }
0x12f7   : > { %v6210_v30 = vpop.f32.mrf.mxu0 }
0x12f8   : > { %13134 = verf.f32 %v6239_v21  ;;  %v6242_v8 = vmul.f32 0.70710677, %v6216_v56  ;;  %v6211_v20 = vadd.f32 %v11528_v61, %v6210_v30  ;;  %v6234_v15 = vmul.f32 0.5, %v6216_v56 }
0x12f9   : > { %v12299_v11 = vpop.f32.mrf.mxu0 }
0x12fa   : > { %13136 = verf.f32 %v6242_v8  ;;  %v6241_v24 = vmul.f32 0.70710677, %v6211_v20  ;;  %v6226_v48 = vadd.f32 %v12299_v11, %v11528_v61  ;;  %v6233_v30 = vmul.f32 0.5, %v6211_v20 }
0x12fb   : > { %v6220_v46 = vpop.f32.mrf.mxu0 }
0x12fc   : > { %v13129_v42 = vpop.eup %13128  ;;  %13138 = verf.f32 %v6241_v24  ;;  %v6244_v62 = vmul.f32 0.70710677, %v6226_v48  ;;  %v16568_v40 = vadd.f32 %v11528_v61, %v6220_v46 }
0x12fd   : > { %v12334_v53 = vpop.f32.mrf.mxu0  ;;  %v6254_v19 = vadd.f32 1.0, %v13129_v42 }
0x12fe   : > { %v13131_v16 = vpop.eup %13130  ;;  %13140 = verf.f32 %v6244_v62  ;;  %v6243_v17 = vmul.f32 0.70710677, %v16568_v40  ;;  %v16572_v51 = vadd.f32 %v12334_v53, %v16566_v47 }
0x12ff   : > { %v6253_v22 = vadd.f32 1.0, %v13131_v16  ;;  %v6808_v14 = vpop.f32.mrf.mxu0  ;;  %v6262_v44 = vmul.f32 %v6254_v19, %v6230_v10  ;;  %v6236_v19 = vmul.f32 0.5, %v6226_v48 }
0x1300   : > { %13142 = verf.f32 %v6243_v17  ;;  %v6848_v63 = vmul.f32 %v16572_v51, %v16572_v51  ;;  %v16577_v31 = vadd.f32 %v16566_v47, %v6808_v14 }
0x1301   : > { %v6261_v1 = vmul.f32 %v6253_v22, %v6229_v41  ;;  %v12337_v39 = vpop.f32.mrf.mxu0 }
0x1302   : > { %v6847_v37 = vmul.f32 %v16577_v31, %v16577_v31  ;;  %v16582_v57 = vadd.f32 %v12337_v39, %v16566_v47  ;;  %v6856_v61 = vsel %vm2494_vm0, %v6848_v63, 0.0  ;;  %v6894_v8 = vsel %vm2847_vm1, %v6848_v63, 0.0 }
0x1303   : > { %v13133_v25 = vpop.eup %13132  ;;  %12316 = vmatprep.mubr.msk.f32.mxu1 %vm2982_vm8, %v6261_v1  ;;  %v6818_v26 = vpop.f32.mrf.mxu0 }
0x1304   : > { %v6855_v12 = vsel %vm2494_vm0, %v6847_v37, 0.0  ;;  %12317 = vmatmul.mubr.msk.f32.vlgmr.msra.gmra.mxu1 %vm2982_vm8, %v6262_v44  ;;  %v6256_v28 = vadd.f32 1.0, %v13133_v25  ;;  %v6893_v29 = vsel %vm2847_vm1, %v6847_v37, 0.0  ;;  %v16590_v3 = vadd.f32 %v16566_v47, %v6818_v26 }
0x1305   : > { %v13135_v27 = vpop.eup %13134  ;;  %v6857_v5 = vadd.f32 %v6856_v61, %v6855_v12  ;;  %v12340_v34 = vpop.f32.mrf.mxu0  ;;  %v6850_v7 = vmul.f32 %v16582_v57, %v16582_v57  ;;  %v6895_v53 = vadd.f32 %v6894_v8, %v6893_v29 }
0x1306   : > { %v6255_v0 = vadd.f32 1.0, %v13135_v27  ;;  %v6849_v11 = vmul.f32 %v16590_v3, %v16590_v3  ;;  %v16598_v24 = vadd.f32 %v12340_v34, %v16566_v47  ;;  %v6264_v16 = vmul.f32 %v6256_v28, %v6232_v35 }
0x1307   : > { %v13137_v21 = vpop.eup %13136  ;;  %v6828_v46 = vpop.f32.mrf.mxu0  ;;  %v6860_v14 = vsel %vm2494_vm0, %v6850_v7, 0.0  ;;  %v6898_v39 = vsel %vm2847_vm1, %v6850_v7, 0.0 }
0x1308   : > { %v6263_v42 = vmul.f32 %v6255_v0, %v6231_v9  ;;  %v6258_v62 = vadd.f32 1.0, %v13137_v21  ;;  %v16601_v6 = vadd.f32 %v16566_v47, %v6828_v46  ;;  %v6858_v20 = vsel %vm2494_vm0, %v6849_v11, 0.0 }
0x1309   : > { %v13139_v56 = vpop.eup %13138  ;;  %v6896_v17 = vsel %vm2847_vm1, %v6849_v11, 0.0  ;;  %v12343_v41 = vpop.f32.mrf.mxu0  ;;  %v6859_v10 = vadd.f32 %v6858_v20, %v6857_v5  ;;  %v6852_v44 = vmul.f32 %v16598_v24, %v16598_v24  ;;  %v6235_v9 = vmul.f32 0.5, %v16568_v40 }
0x130a   : > { %v6257_v22 = vadd.f32 1.0, %v13139_v56  ;;  %v6897_v63 = vadd.f32 %v6896_v17, %v6895_v53  ;;  %12319 = vmatprep.mubr.msk.f32.mxu1 %vm2982_vm8, %v6263_v42  ;;  %v6851_v48 = vmul.f32 %v16601_v6, %v16601_v6  ;;  %v16613_v37 = vadd.f32 %v12343_v41, %v16566_v47 }
0x130b   : > { %v13141_v1 = vpop.eup %13140  ;;  %12320 = vmatmul.mubr.msk.f32.gmra.mxu1 %vm2982_vm8, %v6264_v16  ;;  %v6838_v25 = vpop.f32.mrf.mxu0  ;;  %v6266_v26 = vmul.f32 %v6258_v62, %v6234_v15  ;;  %v6861_v61 = vadd.f32 %v6860_v14, %v6859_v10  ;;  %v6864_v21 = vsel %vm2494_vm0, %v6852_v44, 0.0 }
0x130c   : > { %v6265_v35 = vmul.f32 %v6257_v22, %v6233_v30  ;;  %v6899_v12 = vadd.f32 %v6898_v39, %v6897_v63  ;;  %v6260_v28 = vadd.f32 1.0, %v13141_v1  ;;  %v6862_v5 = vsel %vm2494_vm0, %v6851_v48, 0.0  ;;  %7299 = vrot.lane.b32.xlu1 %v16613_v37, %s18752_s3 }
0x130d   : > { %v13143_v27 = vpop.eup %13142  ;;  %v6900_v29 = vsel %vm2847_vm1, %v6851_v48, 0.0  ;;  %v16619_v34 = vadd.f32 %v16566_v47, %v6838_v25  ;;  %v6863_v7 = vadd.f32 %v6862_v5, %v6861_v61  ;;  %v6902_v30 = vsel %vm2847_vm1, %v6852_v44, 0.0 }
0x130e   : > { %v6259_v0 = vadd.f32 1.0, %v13143_v27  ;;  %v6901_v15 = vadd.f32 %v6900_v29, %v6899_v12  ;;  %12322 = vmatprep.mubr.msk.f32.mxu1 %vm2982_vm8, %v6265_v35  ;;  %v6854_v8 = vmul.f32 %v16613_v37, %v16613_v37  ;;  %v6268_v42 = vmul.f32 %v6260_v28, %v6236_v19 }
0x130f   : > { %v6853_v47 = vmul.f32 %v16619_v34, %v16619_v34  ;;  %12323 = vmatmul.mubr.msk.f32.gmra.mxu1 %vm2982_vm8, %v6266_v26  ;;  %v6865_v46 = vadd.f32 %v6864_v21, %v6863_v7 }
0x1310   : > { %v6267_v11 = vmul.f32 %v6259_v0, %v6235_v9  ;;  %v6903_v40 = vadd.f32 %v6902_v30, %v6901_v15  ;;  %v6868_v20 = vsel %vm2494_vm0, %v6854_v8, 0.0  ;;  %v6906_v17 = vsel %vm2847_vm1, %v6854_v8, 0.0 }
0x1311   : > { %v6866_v62 = vsel %vm2494_vm0, %v6853_v47, 0.0  ;;  %v6904_v53 = vsel %vm2847_vm1, %v6853_v47, 0.0 }
0x1312   : > { %v6867_v56 = vadd.f32 %v6866_v62, %v6865_v46  ;;  %v6905_v16 = vadd.f32 %v6904_v53, %v6903_v40  ;;  %12325 = vmatprep.mubr.msk.f32.mxu1 %vm2982_vm8, %v6267_v11 }
0x1313   : > { %12326 = vmatmul.mubr.msk.f32.gmra.mxu1 %vm2982_vm8, %v6268_v42 }
0x1314   : > { %v16638_v41 = vadd.f32 %v6868_v20, %v6867_v56  ;;  %v6907_v22 = vadd.f32 %v6906_v17, %v6905_v16  ;;  %12360 = vmatprep.mubr.msk.f32.mxu1 %vm14205_vm7, %v18749_v23 }
0x1316   : > { %v6908_v19 = vrot.slane %v6907_v22, 4  ;;  %v6870_v30 = vrot.slane %v16638_v41, 4 }
0x1318   : > { %v6909_v14 = vadd.f32 %v6908_v19, %v6907_v22  ;;  %v6871_v8 = vadd.f32 %v6870_v30, %v16638_v41 }
0x131a   : > { %v6910_v10 = vrot.slane %v6909_v14, 2  ;;  %v6872_v47 = vrot.slane %v6871_v8, 2 }
0x131c   : > { %v6911_v63 = vadd.f32 %v6910_v10, %v6909_v14  ;;  %v6873_v11 = vadd.f32 %v6872_v47, %v6871_v8 }
0x131e   : > { %v6912_v1 = vrot.slane %v6911_v63, 1  ;;  %v6874_v42 = vrot.slane %v6873_v11, 1 }
0x1320   : > { %v6913_v39 = vadd.f32 %v6912_v1, %v6911_v63  ;;  %v6875_v56 = vadd.f32 %v6874_v42, %v6873_v11 }
0x1322   : > { %13144 = vrsqrt.f32 %v6913_v39  ;;  %vm6916_vm13 = vcmp.eq.f32.partialorder %v6913_v39, inf  ;;  %v6919_v25 = vand.u32 2147483648, %v6913_v39  ;;  %vm6918_vm14 = vcmp.eq.f32.partialorder %v6913_v39, 0.0 }
0x1323   : > { %vm6878_vm15 = vcmp.eq.f32.partialorder %v6875_v56, inf  ;;  %vm6880_vm2 = vcmp.eq.f32.partialorder %v6875_v56, 0.0 }
0x132f   : > { %v13145_v44 = vpop.eup %13144 }
0x1330   : > { %v6915_v48 = vmul.f32 %v13145_v44, %v6913_v39 }
0x1332   : > { %v6917_v26 = vsel %vm6916_vm13, %v6913_v39, %v6915_v48 }
0x1333   : > { %v6920_v35 = vsel %vm6918_vm14, %v6919_v25, %v6917_v26 }
0x1334   : > { %v6921_v61 = vmax.f32 %v6920_v35, 1e-12  ;;  %v6881_v35 = vand.u32 2147483648, %v6875_v56 }
0x1336   : > { %13146 = vrcp.f32 %v6921_v61 }
0x1337   : > { %13148 = vrsqrt.f32 %v6875_v56 }
0x1343   : > { %v13147_v12 = vpop.eup %13146 }
0x1344   : > { %v6924_v27 = vmul.f32 %v13147_v12, %v16572_v51  ;;  %v6923_v28 = vmul.f32 %v13147_v12, %v16577_v31  ;;  %v6928_v5 = vmul.f32 %v13147_v12, %v16598_v24  ;;  %v6925_v29 = vmul.f32 %v13147_v12, %v16590_v3  ;;  %v13149_v63 = vpop.eup %13148 }
0x1345   : > { %v6930_v9 = vmul.f32 %v13147_v12, %v16613_v37  ;;  %v6926_v0 = vmul.f32 %v13147_v12, %v16582_v57  ;;  %v6927_v7 = vmul.f32 %v13147_v12, %v16601_v6  ;;  %v6929_v15 = vmul.f32 %v13147_v12, %v16619_v34 }
0x1346   : > { %7231 = vrot.lane.b32.xlu0 %v6924_v27, %s18753_s4  ;;  %7229 = vrot.lane.b32.xlu1 %v6923_v28, %s18753_s4  ;;  %v6877_v44 = vmul.f32 %v13149_v63, %v6875_v56 }
0x1348   : > { %v6879_v26 = vsel %vm6878_vm15, %v6875_v56, %v6877_v44 }
0x134a   : > { %7297 = vrot.lane.b32.xlu0 %v16619_v34, %s18752_s3  ;;  %7295 = vrot.lane.b32.xlu1 %v16598_v24, %s18752_s3 }
0x134e   : > { %7239 = vrot.lane.b32.xlu0 %v6928_v5, %s18753_s4  ;;  %7233 = vrot.lane.b32.xlu1 %v6925_v29, %s18753_s4 }
0x1352   : > { %7243 = vrot.lane.b32.xlu0 %v6930_v9, %s18753_s4  ;;  %7235 = vrot.lane.b32.xlu1 %v6926_v0, %s18753_s4 }
0x1356   : > { %7293 = vrot.lane.b32.xlu0 %v16601_v6, %s18752_s3  ;;  %7237 = vrot.lane.b32.xlu1 %v6927_v7, %s18753_s4 }
0x135a   : > { %7289 = vrot.lane.b32.xlu0 %v16590_v3, %s18752_s3  ;;  %7241 = vrot.lane.b32.xlu1 %v6929_v15, %s18753_s4 }
0x135e   : > { %7285 = vrot.lane.b32.xlu0 %v16577_v31, %s18752_s3  ;;  %7291 = vrot.lane.b32.xlu1 %v16582_v57, %s18752_s3 }
0x1362   : > { %6941 = vrot.lane.b32.xlu0 %v6924_v27, %s18754_s5  ;;  %7287 = vrot.lane.b32.xlu1 %v16572_v51, %s18752_s3  ;;  %v6882_v27 = vsel %vm6880_vm2, %v6881_v35, %v6879_v26 }
0x1366   : > { %6945 = vrot.lane.b32.xlu0 %v6926_v0, %s18754_s5  ;;  %6939 = vrot.lane.b32.xlu1 %v6923_v28, %s18754_s5 }
0x136a   : > { %6949 = vrot.lane.b32.xlu0 %v6928_v5, %s18754_s5  ;;  %6943 = vrot.lane.b32.xlu1 %v6925_v29, %s18754_s5  ;;  %v6883_v5 = vmax.f32 %v6882_v27, 1e-12 }
0x136c   : > { %13150 = vrcp.f32 %v6883_v5  ;;  %v6563_v5 = vld [vmem:[%s18759_s6] sm:$0xff] }
0x136e   : > { %6953 = vrot.lane.b32.xlu0 %v6930_v9, %s18754_s5  ;;  %6947 = vrot.lane.b32.xlu1 %v6927_v7, %s18754_s5 }
0x1372   : > { %7017 = vrot.lane.b32.xlu0 %v16613_v37, %s18659_s9  ;;  %6951 = vrot.lane.b32.xlu1 %v6929_v15, %s18754_s5 }
0x1376   : > { %7015 = vrot.lane.b32.xlu0 %v16619_v34, %s18659_s9 }
0x1379   : > { %v13151_v30 = vpop.eup %13150 }
0x137a   : > { %7013 = vrot.lane.b32.xlu0 %v16598_v24, %s18659_s9  ;;  %v6885_v11 = vmul.f32 %v13151_v30, %v16577_v31  ;;  %v6891_v56 = vmul.f32 %v13151_v30, %v16619_v34 }
0x137e   : > { %7011 = vrot.lane.b32.xlu0 %v16601_v6, %s18659_s9  ;;  %v7300_v21 = vpop.permute.xlu1 %7299 }
0x137f   : > { %12378 = vmatpush3.msra.mxu0 %v7300_v21 }
0x1380   : > { %12379 = vmatprep.subr.mxu0 %v18749_v23 }
0x1382   : > { %7009 = vrot.lane.b32.xlu0 %v16582_v57, %s18659_s9 }
0x1386   : > { %7007 = vrot.lane.b32.xlu0 %v16590_v3, %s18659_s9 }
0x138a   : > { %7005 = vrot.lane.b32.xlu0 %v16572_v51, %s18659_s9 }
0x138e   : > { %7003 = vrot.lane.b32.xlu0 %v16577_v31, %s18659_s9  ;;  %v6888_v31 = vmul.f32 %v13151_v30, %v16582_v57  ;;  %v6890_v57 = vmul.f32 %v13151_v30, %v16598_v24 }
0x13b8   : > { %v7232_v46 = vpop.permute.xlu0 %7231  ;;  %v7230_v40 = vpop.permute.xlu1 %7229 }
0x13b9   : > { %7253 = vxpose.xlu1.b32.start [1/8] (short) (narrow) %v7230_v40, 8  ;;  %v16717_v40 = vmul.f32 %v13151_v30, %v16590_v3  ;;  %v6889_v3 = vmul.f32 %v13151_v30, %v16601_v6  ;;  %v6886_v6 = vmul.f32 %v13151_v30, %v16572_v51 }
0x13bc   : > { %v7298_v62 = vpop.permute.xlu0 %7297  ;;  %v7296_v53 = vpop.permute.xlu1 %7295 }
0x13bd   : > { %12380 = vmatpush3.msra.mxu0 %v7298_v62  ;;  %7254 = vxpose.xlu1.b32.cont [2/8] (short) (narrow) %v7232_v46, 8 }
0x13be   : > { %12381 = vmatprep.subr.mxu0 %v18749_v23 }
0x13bf   : > { %12382 = vmatpush3.msra.mxu0 %v7296_v53 }
0x13c0   : > { %v7240_v16 = vpop.permute.xlu0 %7239  ;;  %v7234_v20 = vpop.permute.xlu1 %7233  ;;  %12383 = vmatprep.subr.mxu0 %v18749_v23 }
0x13c1   : > { %7255 = vxpose.xlu1.b32.cont [3/8] (short) (narrow) %v7234_v20, 8 }
0x13c4   : > { %v7244_v17 = vpop.permute.xlu0 %7243  ;;  %v7236_v41 = vpop.permute.xlu1 %7235 }
0x13c5   : > { %7256 = vxpose.xlu1.b32.cont [4/8] (short) (narrow) %v7236_v41, 8 }
0x13c8   : > { %v7294_v22 = vpop.permute.xlu0 %7293  ;;  %v7238_v19 = vpop.permute.xlu1 %7237 }
0x13c9   : > { %12384 = vmatpush3.msra.mxu0 %v7294_v22  ;;  %7257 = vxpose.xlu1.b32.cont [5/8] (short) (narrow) %v7238_v19, 8 }
0x13ca   : > { %12385 = vmatprep.subr.mxu0 %v18749_v23 }
0x13cc   : > { %v7290_v14 = vpop.permute.xlu0 %7289  ;;  %v7242_v10 = vpop.permute.xlu1 %7241 }
0x13cd   : > { %7258 = vxpose.xlu1.b32.cont [6/8] (short) (narrow) %v7240_v16, 8  ;;  %v6892_v16 = vmul.f32 %v13151_v30, %v16613_v37 }
0x13d0   : > { %v7286_v1 = vpop.permute.xlu0 %7285  ;;  %v7292_v39 = vpop.permute.xlu1 %7291 }
0x13d1   : > { %7259 = vxpose.xlu1.b32.cont [7/8] (short) (narrow) %v7242_v10, 8  ;;  %12386 = vmatpush3.msra.mxu0 %v7292_v39  ;;  %v16744_v10 = vpop.f32.mrf.mxu1 }
0x13d2   : > { %12387 = vmatprep.subr.mxu0 %v18749_v23  ;;  %18755 = vst [vmem:[#allocation129_spill] sm:$0xff] %v16744_v10 }
0x13d3   : > { %12388 = vmatpush3.msra.mxu0 %v7290_v14  ;;  %v16748_v63 = vpop.f32.mrf.mxu1 }
0x13d4   : > { %v6942_v48 = vpop.permute.xlu0 %6941  ;;  %12389 = vmatprep.subr.mxu0 %v18749_v23  ;;  %v7288_v25 = vpop.permute.xlu1 %7287  ;;  %18756 = vst [vmem:[#allocation127_spill] sm:$0xff] %v16748_v63 }
0x13d5   : > { %7260 = vxpose.xlu1.b32.end [8/8] (short) (narrow) %v7244_v17, 8  ;;  %12390 = vmatpush3.msra.mxu0 %v7288_v25  ;;  %v16751_v39 = vpop.f32.mrf.mxu1 }
0x13d6   : > { %12391 = vmatprep.subr.mxu0 %v18749_v23  ;;  %18757 = vst [vmem:[#allocation167_spill] sm:$0xff] %v16751_v39 }
0x13d7   : > { %12392 = vmatpush3.msra.mxu0 %v7286_v1  ;;  %v16755_v44 = vpop.f32.mrf.mxu1 }
0x13d8   : > { %v6946_v61 = vpop.permute.xlu0 %6945  ;;  %v6940_v12 = vpop.permute.xlu1 %6939  ;;  %18758 = vst [vmem:[#allocation164_spill] sm:$0xff] %v16755_v44 }
0x13d9   : > { %6963 = vxpose.xlu0.b32.start [1/8] (short) (narrow) %v6940_v12, 8  ;;  %v16758_v25 = vpop.f32.mrf.mxu1 }
0x13da   : > { %18760 = vst [vmem:[#allocation124_spill] sm:$0xff] %v16758_v25 }
0x13db   : > { %v16760_v26 = vpop.f32.mrf.mxu1 }
0x13dc   : > { %v6950_v28 = vpop.permute.xlu0 %6949  ;;  %v6944_v29 = vpop.permute.xlu1 %6943  ;;  %18761 = vst [vmem:[#allocation166_spill] sm:$0xff] %v16760_v26 }
0x13dd   : > { %6964 = vxpose.xlu0.b32.cont [2/8] (short) (narrow) %v6942_v48, 8  ;;  %v16762_v35 = vpop.f32.mrf.mxu1 }
0x13de   : > { %18762 = vst [vmem:[#allocation156_spill] sm:$0xff] %v16762_v35 }
0x13e0   : > { %v6954_v9 = vpop.permute.xlu0 %6953  ;;  %v6948_v7 = vpop.permute.xlu1 %6947 }
0x13e1   : > { %6965 = vxpose.xlu0.b32.cont [3/8] (short) (narrow) %v6944_v29, 8 }
0x13e4   : > { %v7018_v0 = vpop.permute.xlu0 %7017  ;;  %v6952_v8 = vpop.permute.xlu1 %6951 }
0x13e5   : > { %7580 = vst.msk [vmem:[#allocation2 + $0x48] sm:$0xff] %vm2494_vm0, %v7018_v0  ;;  %12345 = vmatpush3.msra.mxu1 %v7018_v0  ;;  %6966 = vxpose.xlu0.b32.cont [4/8] (short) (narrow) %v6946_v61, 8  ;;  %v16764_v61 = vpop.f32.mrf.mxu1 }
0x13e6   : > { %12346 = vmatprep.subr.mxu1 %v18749_v23  ;;  %18763 = vst [vmem:[#allocation163_spill] sm:$0xff] %v16764_v61 }
0x13e8   : > { %v7016_v15 = vpop.permute.xlu0 %7015 }
0x13e9   : > { %7579 = vst.msk [vmem:[#allocation2 + $0x40] sm:$0xff] %vm2494_vm0, %v7016_v15  ;;  %12347 = vmatpush3.msra.mxu1 %v7016_v15  ;;  %6967 = vxpose.xlu0.b32.cont [5/8] (short) (narrow) %v6948_v7, 8 }
0x13ea   : > { %12348 = vmatprep.subr.mxu1 %v18749_v23 }
0x13ec   : > { %v7014_v21 = vpop.permute.xlu0 %7013 }
0x13ed   : > { %7578 = vst.msk [vmem:[#allocation2 + $0x38] sm:$0xff] %vm2494_vm0, %v7014_v21  ;;  %12349 = vmatpush3.msra.mxu1 %v7014_v21  ;;  %6968 = vxpose.xlu0.b32.cont [6/8] (short) (narrow) %v6950_v28, 8  ;;  %v6564_v28 = vld [vmem:[%s18759_s6 + $0x8] sm:$0xff] }
0x13ee   : > { %12350 = vmatprep.subr.mxu1 %v18749_v23 }
0x13f0   : > { %v7012_v47 = vpop.permute.xlu0 %7011 }
0x13f1   : > { %7577 = vst.msk [vmem:[#allocation2 + $0x30] sm:$0xff] %vm2494_vm0, %v7012_v47  ;;  %12351 = vmatpush3.msra.mxu1 %v7012_v47  ;;  %6969 = vxpose.xlu0.b32.cont [7/8] (short) (narrow) %v6952_v8, 8  ;;  %v6560_v47 = vld [vmem:[%s18764_s7] sm:$0xff] }
0x13f2   : > { %12352 = vmatprep.subr.mxu1 %v18749_v23 }
0x13f3   : > { %7382 = vrot.lane.b32.xlu1 %v6885_v11, %s18660_s0 }
0x13f4   : > { %v7010_v46 = vpop.permute.xlu0 %7009  ;;  %v16833_v61 = vld [vmem:[#allocation2 + $0x38] sm:$0xff] }
0x13f5   : > { %7576 = vst.msk [vmem:[#allocation2 + $0x28] sm:$0xff] %vm2494_vm0, %v7010_v46  ;;  %12353 = vmatpush3.msra.mxu1 %v7010_v46  ;;  %6970 = vxpose.xlu0.b32.end [8/8] (short) (narrow) %v6954_v9, 8  ;;  %v18765_v46 = vld [vmem:[#allocation137_spill] sm:$0xff]  ;;  %18780 = vst [vmem:[#allocation123_spill] sm:$0xff] %v16833_v61 }
0x13f6   : > { %12354 = vmatprep.subr.mxu1 %v18749_v23  ;;  %v16836_v2 = vld [vmem:[#allocation2 + $0x39] sm:$0xff] }
0x13f7   : > { %7386 = vrot.lane.b32.xlu1 %v16717_v40, %s18660_s0  ;;  %18781 = vst [vmem:[#allocation152_spill] sm:$0xff] %v16836_v2 }
0x13f8   : > { %v7008_v42 = vpop.permute.xlu0 %7007  ;;  %v16852_v25 = vld [vmem:[#allocation2 + $0x31] sm:$0xff] }
0x13f9   : > { %7575 = vst.msk [vmem:[#allocation2 + $0x20] sm:$0xff] %vm2494_vm0, %v7008_v42  ;;  %12355 = vmatpush3.msra.mxu1 %v7008_v42  ;;  %v18766_v42 = vld [vmem:[#allocation135_spill] sm:$0xff]  ;;  %18785 = vst [vmem:[#allocation161_spill] sm:$0xff] %v16852_v25  ;;  %v16875_v63 = vld [vmem:[#allocation2 + $0x30] sm:$0xff] }
0x13fa   : > { %12356 = vmatprep.subr.mxu1 %v18749_v23  ;;  %18793 = vst [vmem:[#allocation169_spill] sm:$0xff] %v16875_v63 }
0x13fb   : > { %7388 = vrot.lane.b32.xlu1 %v6888_v31, %s18660_s0 }
0x13fc   : > { %v7006_v62 = vpop.permute.xlu0 %7005 }
0x13fd   : > { %7574 = vst.msk [vmem:[#allocation2 + $0x18] sm:$0xff] %vm2494_vm0, %v7006_v62  ;;  %12357 = vmatpush3.msra.mxu1 %v7006_v62 }
0x13fe   : > { %12358 = vmatprep.subr.mxu1 %v18749_v23 }
0x13ff   : > { %7390 = vrot.lane.b32.xlu1 %v6889_v3, %s18660_s0 }
0x1400   : > { %v7004_v53 = vpop.permute.xlu0 %7003 }
0x1401   : > { %7573 = vst.msk [vmem:[#allocation2 + $0x10] sm:$0xff] %vm2494_vm0, %v7004_v53  ;;  %12359 = vmatpush3.msra.mxu1 %v7004_v53  ;;  %v16792_v53 = vld [vmem:[#allocation2 + $0x49] sm:$0xff] }
0x1402   : > { %18767 = vst [vmem:[#allocation128_spill] sm:$0xff] %v16792_v53 }
0x1403   : > { %7392 = vrot.lane.b32.xlu1 %v6890_v57, %s18660_s0 }
0x1407   : > { %7394 = vrot.lane.b32.xlu1 %v6891_v56, %s18660_s0 }
0x1408   : > { %v7645_v35 = vld [vmem:[#allocation2 + $0x9] sm:$0xff] }
0x140b   : > { %7396 = vrot.lane.b32.xlu1 %v6892_v16, %s18660_s0 }
0x141e   : > { %7384 = vrot.lane.b32.xlu0 %v6886_v6, %s18660_s0 }
0x1435   : > { %v7269_v20 = vpop.trf.xlu1 }
0x1436   : > { %12394 = vmatmul.mubr.msk.f32.vlgmr.msra.gmra.mxu0 %vm2982_vm8, %v7269_v20 }
0x1455   : > { %v6979_v17 = vpop.trf.xlu0 }
0x1456   : > { %12361 = vmatmul.mubr.msk.f32.vlgmr.msra.gmra.mxu1 %vm2982_vm8, %v6979_v17  ;;  %v7588_v17 = vld [vmem:[#allocation2 + $0x3f] sm:$0xff] }
0x1457   : > { %12365 = vmatprep.mubr.msk.f32.mxu1 %vm3056_vm6, %v6885_v11  ;;  %v7581_v11 = vld [vmem:[#allocation2 + $0x7] sm:$0xff] }
0x1458   : > { %v7589_v62 = vmul.f32 %v7581_v11, %v18666_v18 }
0x1465   : > { %v7383_v24 = vpop.permute.xlu1 %7382 }
0x1466   : > { %12398 = vmatprep.mubr.msk.f32.mxu0 %vm3056_vm6, %v7383_v24  ;;  %v7652_v24 = vld [vmem:[#allocation2 + $0x41] sm:$0xff] }
0x1467   : > { %v7738_v50 = vmul.f32 %v7652_v24, %v18723_v32  ;;  %v16858_v45 = vmul.f32 %v7652_v24, %v18787_v43 }
0x1469   : > { %v7387_v34 = vpop.permute.xlu1 %7386  ;;  %18788 = vst [vmem:[#allocation158_spill] sm:$0xff] %v16858_v45 }
0x146d   : > { %v7389_v41 = vpop.permute.xlu1 %7388 }
0x1471   : > { %v7391_v37 = vpop.permute.xlu1 %7390 }
0x1475   : > { %v7393_v19 = vpop.permute.xlu1 %7392 }
0x1479   : > { %v7395_v1 = vpop.permute.xlu1 %7394 }
0x147d   : > { %v7397_v48 = vpop.permute.xlu1 %7396 }
0x1490   : > { %v7385_v51 = vpop.permute.xlu0 %7384 }
0x14f6   : > { %v7378_v22 = vpop.f32.mrf.mxu0 }
0x14f7   : > { %12396 = vmatprep.subr.mxu0 %v7378_v22 }
0x14f8   : > { %12397 = vmatpush3.msra.mxu0 %v7378_v22  ;;  %v12395_v14 = vpop.f32.mrf.mxu0  ;;  %v18770_v22 = vld [vmem:[#allocation148_spill] sm:$0xff] }
0x14f9   : > { %12399 = vmatmul.mubr.msk.f32.vlgmr.msra.gmra.mxu0 %vm3056_vm6, %v7385_v51  ;;  %v18771_v51 = vld [vmem:[#allocation160_spill] sm:$0xff] }
0x14fa   : > { %12401 = vmatprep.mubr.msk.f32.mxu0 %vm3056_vm6, %v7387_v34  ;;  %v7681_v34 = vld [vmem:[#allocation2 + $0x47] sm:$0xff]  ;;  %v7739_v14 = vmul.f32 %v16792_v53, %v18771_v51  ;;  %v7660_v11 = vmul.f32 %v7652_v24, %v18771_v51  ;;  %v7653_v24 = vmul.f32 %v7645_v35, %v18691_v33  ;;  %v7658_v35 = vmul.f32 %v16852_v25, %v18787_v43  ;;  %v16925_v53 = vld [vmem:[#allocation2 + $0x18] sm:$0xff] }
0x14fb   : > { %v16873_v10 = vmul.f32 %v7681_v34, %v18791_v38 }
0x14fd   : > { %12402 = vmatmul.mubr.msk.f32.gmra.mxu0 %vm3056_vm6, %v7389_v41  ;;  %v18769_v41 = vld [vmem:[#allocation147_spill] sm:$0xff]  ;;  %18792 = vst [vmem:[#allocation168_spill] sm:$0xff] %v16873_v10 }
0x14fe   : > { %12404 = vmatprep.mubr.msk.f32.mxu0 %vm3056_vm6, %v7391_v37  ;;  %v16800_v37 = vrot.slane %v6560_v47, %v18769_v41 }
0x1501   : > { %12405 = vmatmul.mubr.msk.f32.gmra.mxu0 %vm3056_vm6, %v7393_v19  ;;  %v16803_v19 = vrot.slane %v6560_v47, %v18770_v22 }
0x1502   : > { %12407 = vmatprep.mubr.msk.f32.mxu0 %vm3056_vm6, %v7395_v1  ;;  %v18772_v1 = vld [vmem:[#allocation157_spill] sm:$0xff] }
0x1505   : > { %12408 = vmatmul.mubr.msk.f32.gmra.mxu0 %vm3056_vm6, %v7397_v48 }
0x1516   : > { %v7096_v12 = vpop.f32.mrf.mxu1 }
0x1517   : > { %12363 = vmatprep.subr.mxu1 %v7096_v12 }
0x1518   : > { %12364 = vmatpush3.msra.mxu1 %v7096_v12  ;;  %v12362_v27 = vpop.f32.mrf.mxu1  ;;  %v7789_v12 = vld [vmem:[#allocation2 + $0x50] sm:$0xff] }
0x1519   : > { %12366 = vmatmul.mubr.msk.f32.vlgmr.msra.gmra.mxu1 %vm3056_vm6, %v6886_v6  ;;  %12410 = vmatprep.subr.mxu1 %v6564_v28  ;;  %v7810_v27 = vld [vmem:[#allocation2 + $0x51] sm:$0xff] }
0x151a   : > { %12368 = vmatprep.mubr.msk.f32.mxu1 %vm3056_vm6, %v16717_v40  ;;  %12411 = vmatpush3.msra.mxu1 %v6564_v28  ;;  %v16786_v40 = vrot.slane %v6560_v47, %v18765_v46  ;;  %v18773_v28 = vld [vmem:[#allocation144_spill] sm:$0xff]  ;;  %v16830_v55 = vmul.f32 %v7810_v27, %v18771_v51  ;;  %v16914_v46 = vld [vmem:[#allocation2 + $0x20] sm:$0xff] }
0x151b   : > { %12412 = vmatprep.subr.mxu1 %v6563_v5 }
0x151c   : > { %12413 = vmatpush3.msra.mxu1 %v6563_v5  ;;  %v7601_v6 = vmul.f32 %v16786_v40, %v7589_v62  ;;  %v16809_v5 = vrot.slane %v6560_v47, %v18773_v28  ;;  %v7689_v62 = vmul.f32 %v7681_v34, %v18772_v1  ;;  %18779 = vst [vmem:[#allocation121_spill] sm:$0xff] %v16830_v55  ;;  %v16889_v28 = vld [vmem:[#allocation2 + $0x11] sm:$0xff]  ;;  %v16891_v34 = vld [vmem:[#allocation2 + $0x27] sm:$0xff] }
0x151d   : > { %12369 = vmatmul.mubr.msk.f32.gmra.mxu1 %vm3056_vm6, %v6888_v31  ;;  %v16789_v31 = vrot.slane %v6560_v47, %v18766_v42  ;;  %v16912_v42 = vmul.f32 %v7588_v17, %v18791_v38  ;;  %v7654_v45 = vmul.f32 %v16889_v28, %v18698_v4 }
0x151e   : > { %12371 = vmatprep.mubr.msk.f32.mxu1 %vm3056_vm6, %v6889_v3  ;;  %v7617_v3 = vld [vmem:[#allocation2 + $0x8] sm:$0xff]  ;;  %v16867_v44 = vmul.f32 %v16809_v5, %v7660_v11  ;;  %v16887_v11 = vmul.f32 %v16800_v37, %v7738_v50  ;;  %v7670_v10 = vmul.f32 %v16809_v5, %v7658_v35 }
0x151f   : > { %v7629_v20 = vmul.f32 %v16789_v31, %v7617_v3  ;;  %v16902_v41 = vmul.f32 %v16789_v31, %v16833_v61  ;;  %v7634_v23 = vmul.f32 %v16789_v31, %v16875_v63  ;;  %v7632_v35 = vmul.f32 %v16789_v31, %v16914_v46 }
0x1520   : > { %18796 = vst [vmem:[#allocation172_spill] sm:$0xff] %v16887_v11  ;;  %v16943_v11 = vmul.f32 %v16852_v25, %v18705_v49 }
0x1521   : > { %12372 = vmatmul.mubr.msk.f32.gmra.mxu1 %vm3056_vm6, %v6890_v57  ;;  %v7760_v57 = vld [vmem:[#allocation2 + $0x4f] sm:$0xff]  ;;  %v16824_v3 = vadd.f32 %v7629_v20, %v7601_v6  ;;  %v16843_v6 = vmul.f32 %v16800_v37, %v7739_v14  ;;  %v16863_v14 = vld [vmem:[#allocation2 + $0x1f] sm:$0xff] }
0x1522   : > { %12374 = vmatprep.mubr.msk.f32.mxu1 %vm3056_vm6, %v6891_v56  ;;  %v18768_v56 = vld [vmem:[#allocation134_spill] sm:$0xff]  ;;  %v7768_v48 = vmul.f32 %v7760_v57, %v18772_v1 }
0x1523   : > { %18783 = vst [vmem:[#allocation139_spill] sm:$0xff] %v16843_v6 }
0x1524   : > { %v16846_v20 = vmul.f32 %v16803_v19, %v7768_v48 }
0x1525   : > { %12375 = vmatmul.mubr.msk.f32.gmra.mxu1 %vm3056_vm6, %v6892_v16  ;;  %v16795_v16 = vrot.slane %v6560_v47, %v18768_v56  ;;  %v7592_v56 = vmul.f32 %v16863_v14, %v18696_v54 }
0x1526   : > { %18784 = vst [vmem:[#allocation151_spill] sm:$0xff] %v16846_v20  ;;  %v7665_v20 = vmul.f32 %v16809_v5, %v7653_v24 }
0x1528   : > { %v7673_v25 = vadd.f32 %v7665_v20, %v16824_v3  ;;  %v7685_v3 = vmul.f32 %v16891_v34, %v18696_v54 }
0x15b9   : > { %v12400_v29 = vpop.f32.mrf.mxu0 }
0x15ba   : > { %7529 = vrot.lane.b32.xlu1 %v12400_v29, %s18662_s1  ;;  %v18774_v29 = vld [vmem:[#allocation136_spill] sm:$0xff] }
0x15bb   : > { %v7480_v9 = vpop.f32.mrf.mxu0 }
0x15bd   : > { %v12403_v0 = vpop.f32.mrf.mxu0 }
0x15be   : > { %7527 = vrot.lane.b32.xlu1 %v7480_v9, %s18662_s1  ;;  %7533 = vrot.lane.b32.xlu0 %v12403_v0, %s18662_s1  ;;  %v16812_v9 = vrot.slane %v6560_v47, %v18774_v29  ;;  %v7624_v0 = vld [vmem:[#allocation2 + $0x40] sm:$0xff]  ;;  %v16905_v29 = vld [vmem:[#allocation2 + $0x2f] sm:$0xff] }
0x15bf   : > { %v7490_v7 = vpop.f32.mrf.mxu0  ;;  %v16861_v39 = vmul.f32 %v16795_v16, %v7624_v0 }
0x15c0   : > { %18775 = vst [vmem:[#allocation126_spill] sm:$0xff] %v16812_v9  ;;  %v16827_v57 = vmul.f32 %v16812_v9, %v7789_v12  ;;  %v16848_v12 = vld [vmem:[#allocation2 + $0x17] sm:$0xff]  ;;  %v16855_v26 = vmul.f32 %v16812_v9, %v7624_v0 }
0x15c1   : > { %v12406_v15 = vpop.f32.mrf.mxu0  ;;  %18789 = vst [vmem:[#allocation141_spill] sm:$0xff] %v16861_v39  ;;  %v7591_v22 = vmul.f32 %v16848_v12, %v15209_v52 }
0x15c2   : > { %7531 = vrot.lane.b32.xlu1 %v7490_v7, %s18662_s1  ;;  %7537 = vrot.lane.b32.xlu0 %v12406_v15, %s18662_s1  ;;  %v16814_v7 = vld [vmem:[#allocation2 + $0x48] sm:$0xff]  ;;  %18778 = vst [vmem:[#allocation143_spill] sm:$0xff] %v16827_v57  ;;  %18786 = vst [vmem:[#allocation149_spill] sm:$0xff] %v16855_v26  ;;  %v18800_v26 = vld [vmem:[#allocation138_spill] sm:$0xff] }
0x15c3   : > { %v7500_v21 = vpop.f32.mrf.mxu0  ;;  %18776 = vst [vmem:[#allocation130_spill] sm:$0xff] %v16814_v7  ;;  %v16816_v15 = vld [vmem:[#allocation2 + $0xf] sm:$0xff]  ;;  %v16840_v36 = vmul.f32 %v16795_v16, %v16814_v7  ;;  %v16928_v7 = vld [vmem:[#allocation2 + $0x19] sm:$0xff]  ;;  %v7603_v6 = vmul.f32 %v16786_v40, %v7591_v22 }
0x15c4   : > { %v7590_v27 = vmul.f32 %v16816_v15, %v18683_v60  ;;  %v7682_v24 = vmul.f32 %v16816_v15, %v18666_v18  ;;  %v7683_v15 = vmul.f32 %v16848_v12, %v18683_v60 }
0x15c5   : > { %v12409_v30 = vpop.f32.mrf.mxu0  ;;  %18782 = vst [vmem:[#allocation142_spill] sm:$0xff] %v16840_v36 }
0x15c6   : > { %7535 = vrot.lane.b32.xlu1 %v7500_v21, %s18662_s1  ;;  %7541 = vrot.lane.b32.xlu0 %v12409_v30, %s18662_s1  ;;  %v18777_v21 = vld [vmem:[#allocation145_spill] sm:$0xff]  ;;  %v7602_v50 = vmul.f32 %v16786_v40, %v7590_v27  ;;  %v16923_v27 = vmul.f32 %v16795_v16, %v16875_v63  ;;  %v7604_v63 = vmul.f32 %v16786_v40, %v7592_v56 }
0x15c7   : > { %v7510_v8 = vpop.f32.mrf.mxu0  ;;  %v16819_v30 = vrot.slane %v6560_v47, %v18777_v21  ;;  %v7636_v47 = vmul.f32 %v16789_v31, %v7624_v0  ;;  %v7587_v21 = vld [vmem:[#allocation2 + $0x37] sm:$0xff]  ;;  %v16880_v0 = vmul.f32 %v16795_v16, %v16833_v61  ;;  %v7655_v56 = vmul.f32 %v16928_v7, %v15222_v58 }
0x15c8   : > { %18799 = vst [vmem:[#allocation174_spill] sm:$0xff] %v16923_v27  ;;  %v16951_v39 = vmul.f32 %v7587_v21, %v18800_v26  ;;  %v7640_v9 = vadd.f32 %v7632_v35, %v7604_v63 }
0x15c9   : > { %v16870_v13 = vmul.f32 %v16819_v30, %v7689_v62  ;;  %18794 = vst [vmem:[#allocation170_spill] sm:$0xff] %v16880_v0  ;;  %v7618_v62 = vld [vmem:[#allocation2 + $0x10] sm:$0xff]  ;;  %v7595_v0 = vmul.f32 %v7587_v21, %v18791_v38  ;;  %v7694_v27 = vmul.f32 %v16819_v30, %v7682_v24  ;;  %v7667_v20 = vmul.f32 %v16809_v5, %v7655_v56 }
0x15ca   : > { %7539 = vrot.lane.b32.xlu1 %v7510_v8, %s18662_s1  ;;  %v7596_v8 = vmul.f32 %v7588_v17, %v18772_v1  ;;  %v18797_v1 = vld [vmem:[#allocation140_spill] sm:$0xff]  ;;  %18801 = vst [vmem:[#allocation175_spill] sm:$0xff] %v16951_v39  ;;  %v7732_v38 = vmul.f32 %v16889_v28, %v18691_v33 }
0x15cb   : > { %18790 = vst [vmem:[#allocation146_spill] sm:$0xff] %v16870_v13  ;;  %v16896_v51 = vmul.f32 %v7588_v17, %v18797_v1  ;;  %v7687_v55 = vmul.f32 %v7587_v21, %v18797_v1  ;;  %v16930_v17 = vld [vmem:[#allocation2 + $0x21] sm:$0xff]  ;;  %v7695_v21 = vmul.f32 %v16819_v30, %v7683_v15 }
0x15cc   : > { %v7608_v48 = vmul.f32 %v16786_v40, %v7596_v8  ;;  %v16884_v8 = vmul.f32 %v16836_v2, %v18787_v43  ;;  %v7659_v43 = vmul.f32 %v16836_v2, %v18723_v32  ;;  %v7630_v32 = vmul.f32 %v16789_v31, %v7618_v62 }
0x15cd   : > { %18798 = vst [vmem:[#allocation173_spill] sm:$0xff] %v16896_v51  ;;  %v16946_v51 = vld [vmem:[#allocation2 + $0x28] sm:$0xff]  ;;  %v7656_v22 = vmul.f32 %v16930_v17, %v15224_v59  ;;  %v7699_v15 = vmul.f32 %v16819_v30, %v7687_v55 }
0x15ce   : > { %18795 = vst [vmem:[#allocation171_spill] sm:$0xff] %v16884_v8  ;;  %v16919_v57 = vadd.f32 %v7636_v47, %v7608_v48  ;;  %v7593_v47 = vmul.f32 %v16891_v34, %v18800_v26  ;;  %v7594_v48 = vmul.f32 %v16905_v29, %v18797_v1  ;;  %v7638_v61 = vadd.f32 %v7630_v32, %v7602_v50  ;;  %v16955_v1 = vld [vmem:[#allocation2 + $0x29] sm:$0xff] }
0x15cf   : > { %v7631_v32 = vmul.f32 %v16789_v31, %v16925_v53  ;;  %v7666_v50 = vmul.f32 %v16809_v5, %v7654_v45  ;;  %v7633_v8 = vmul.f32 %v16789_v31, %v16946_v51  ;;  %v7657_v45 = vmul.f32 %v16955_v1, %v18705_v49 }
0x15d0   : > { %v7605_v39 = vmul.f32 %v16786_v40, %v7593_v47  ;;  %v7606_v36 = vmul.f32 %v16786_v40, %v7594_v48  ;;  %v7686_v31 = vmul.f32 %v16905_v29, %v18800_v26  ;;  %v7668_v63 = vmul.f32 %v16809_v5, %v7656_v22 }
0x15d1   : > { %v7639_v2 = vadd.f32 %v7631_v32, %v7603_v6  ;;  %v7674_v13 = vadd.f32 %v7666_v50, %v7638_v61  ;;  %v7684_v6 = vmul.f32 %v16863_v14, %v15209_v52  ;;  %v7702_v61 = vadd.f32 %v7694_v27, %v7673_v25 }
0x15d2   : > { %v7641_v47 = vadd.f32 %v7633_v8, %v7605_v39  ;;  %v7715_v48 = vmul.f32 %v16795_v16, %v7618_v62  ;;  %v7642_v24 = vadd.f32 %v7634_v23, %v7606_v36  ;;  %v7607_v32 = vmul.f32 %v16786_v40, %v7595_v0 }
0x15d3   : > { %v7675_v35 = vadd.f32 %v7667_v20, %v7639_v2  ;;  %v7703_v50 = vadd.f32 %v7695_v21, %v7674_v13  ;;  %v7676_v56 = vadd.f32 %v7668_v63, %v7640_v9  ;;  %v7669_v49 = vmul.f32 %v16809_v5, %v7657_v45 }
0x15d4   : > { %v7697_v26 = vmul.f32 %v16819_v30, %v7685_v3  ;;  %v7696_v25 = vmul.f32 %v16819_v30, %v7684_v6  ;;  %v7671_v39 = vmul.f32 %v16809_v5, %v7659_v43  ;;  %v7716_v36 = vmul.f32 %v16795_v16, %v16925_v53 }
0x15d5   : > { %v7733_v13 = vmul.f32 %v16928_v7, %v18698_v4  ;;  %v7723_v2 = vadd.f32 %v7715_v48, %v7702_v61  ;;  %v7677_v23 = vadd.f32 %v7669_v49, %v7641_v47  ;;  %v7761_v40 = vmul.f32 %v16848_v12, %v18666_v18 }
0x15d6   : > { %v7678_v28 = vadd.f32 %v7670_v10, %v7642_v24  ;;  %v7704_v9 = vadd.f32 %v7696_v25, %v7675_v35  ;;  %v7643_v0 = vadd.f32 %v16902_v41, %v7607_v32  ;;  %v7724_v8 = vadd.f32 %v7716_v36, %v7703_v50  ;;  %v18802_v35 = vld [vmem:[#allocation174_spill] sm:$0xff] }
0x15d7   : > { %v7705_v62 = vadd.f32 %v7697_v26, %v7676_v56  ;;  %v7744_v43 = vmul.f32 %v16800_v37, %v7732_v38  ;;  %v7698_v5 = vmul.f32 %v16819_v30, %v7686_v31  ;;  %v7718_v27 = vmul.f32 %v16795_v16, %v16946_v51  ;;  %v18803_v50 = vld [vmem:[#allocation126_spill] sm:$0xff] }
0x15d8   : > { %v7735_v49 = vmul.f32 %v16955_v1, %v15224_v59  ;;  %v7717_v10 = vmul.f32 %v16795_v16, %v16914_v46  ;;  %v7734_v41 = vmul.f32 %v16930_v17, %v15222_v58  ;;  %v7745_v12 = vmul.f32 %v16800_v37, %v7733_v13 }
0x15d9   : > { %v17000_v55 = vpop.f32.mrf.mxu1  ;;  %v7762_v26 = vmul.f32 %v16863_v14, %v18683_v60  ;;  %v7752_v38 = vadd.f32 %v7744_v43, %v7723_v2  ;;  %v7706_v22 = vadd.f32 %v7698_v5, %v7677_v23  ;;  %v7680_v3 = vadd.f32 %v16867_v44, %v16919_v57 }
0x15da   : > { %v7725_v45 = vadd.f32 %v7717_v10, %v7704_v9  ;;  %v7748_v20 = vmul.f32 %v16800_v37, %v16943_v11  ;;  %v7679_v6 = vadd.f32 %v7671_v39, %v7643_v0  ;;  %v7753_v16 = vadd.f32 %v7745_v12, %v7724_v8  ;;  %v18807_v9 = vld [vmem:[#allocation150_spill] sm:$0xff]  ;;  %v18808_v0 = vld [vmem:[#allocation152_spill] sm:$0xff]  ;;  %v18810_v12 = vld [vmem:[#allocation175_spill] sm:$0xff] }
0x15db   : > { %v17019_v31 = vpop.f32.mrf.mxu1  ;;  %v7726_v21 = vadd.f32 %v7718_v27, %v7705_v62  ;;  %v7773_v63 = vmul.f32 %v16803_v19, %v7761_v40  ;;  %v7707_v61 = vadd.f32 %v7699_v15, %v7678_v28  ;;  %v7764_v14 = vmul.f32 %v16905_v29, %v18696_v54  ;;  %v18804_v29 = vld [vmem:[#allocation146_spill] sm:$0xff]  ;;  %v18806_v40 = vld [vmem:[#allocation171_spill] sm:$0xff] }
0x15dc   : > { %v7746_v47 = vmul.f32 %v16800_v37, %v7734_v41  ;;  %v7763_v48 = vmul.f32 %v16891_v34, %v15209_v52  ;;  %v7700_v44 = vmul.f32 %v16819_v30, %v16912_v42  ;;  %v7774_v57 = vmul.f32 %v16803_v19, %v7762_v26  ;;  %v18805_v30 = vld [vmem:[#allocation170_spill] sm:$0xff]  ;;  %v17049_v27 = vld [vmem:[%s18764_s7 + $0x8] ss:$0 sm:$0xff]  ;;  %v18811_v26 = vld [vmem:[#allocation141_spill] sm:$0xff] }
0x15dd   : > { %v7747_v11 = vmul.f32 %v16800_v37, %v7735_v49  ;;  %v7781_v24 = vadd.f32 %v7773_v63, %v7752_v38  ;;  %v7727_v32 = vadd.f32 %v18802_v35, %v7706_v22  ;;  %v7794_v56 = vmul.f32 %v18803_v50, %v16925_v53  ;;  %v12370_v36 = vpop.f32.mrf.mxu1  ;;  %v18809_v10 = vld [vmem:[#allocation142_spill] sm:$0xff] }
0x15de   : > { %v7754_v15 = vadd.f32 %v7746_v47, %v7725_v45  ;;  %v7709_v25 = vadd.f32 %v18804_v29, %v7680_v3  ;;  %v7708_v39 = vadd.f32 %v7700_v44, %v7679_v6  ;;  %v7782_v34 = vadd.f32 %v7774_v57, %v7753_v16 }
0x15df   : > { %v7755_v13 = vadd.f32 %v7747_v11, %v7726_v21  ;;  %v7811_v42 = vmul.f32 %v16928_v7, %v18691_v33  ;;  %v7728_v2 = vadd.f32 %v18805_v30, %v7707_v61  ;;  %v7776_v23 = vmul.f32 %v16803_v19, %v7764_v14  ;;  %v7200_v22 = vpop.f32.mrf.mxu1  ;;  %v18813_v21 = vld [vmem:[#allocation173_spill] sm:$0xff]  ;;  %v17075_v30 = vld [vmem:[#allocation14] ss:$0 sm:$0xff] }
0x15e0   : > { %v7749_v28 = vmul.f32 %v16800_v37, %v18806_v40  ;;  %v7775_v53 = vmul.f32 %v16803_v19, %v7763_v48  ;;  %v7815_v8 = vmul.f32 %v18808_v0, %v18807_v9  ;;  %v7795_v62 = vmul.f32 %v18803_v50, %v16914_v46  ;;  %v18814_v48 = vld [vmem:[#allocation169_spill] sm:$0xff] }
0x15e1   : > { %v7812_v43 = vmul.f32 %v16930_v17, %v18698_v4  ;;  %v7802_v5 = vadd.f32 %v7794_v56, %v7781_v24  ;;  %v7756_v7 = vadd.f32 %v7748_v20, %v7727_v32  ;;  %v7730_v41 = vadd.f32 %v18809_v10, %v7709_v25  ;;  %v18812_v17 = vld [vmem:[#allocation161_spill] sm:$0xff]  ;;  %v17067_v24 = vld [vmem:[#allocation13] ss:$0 sm:$0xff]  ;;  %v12373_v25 = vpop.f32.mrf.mxu1 }
0x15e2   : > { %v7783_v49 = vadd.f32 %v7775_v53, %v7754_v15  ;;  %v7777_v37 = vmul.f32 %v16803_v19, %v18810_v12  ;;  %v7729_v38 = vadd.f32 %v18811_v26, %v7708_v39  ;;  %v7803_v45 = vadd.f32 %v7795_v62, %v7782_v34  ;;  %v18815_v56 = vld [vmem:[#allocation123_spill] sm:$0xff]  ;;  %v18818_v53 = vld [vmem:[#allocation168_spill] sm:$0xff] }
0x15e3   : > { %v7784_v3 = vadd.f32 %v7776_v23, %v7755_v13  ;;  %v7823_v46 = vmul.f32 %v17049_v27, %v7811_v42  ;;  %v7757_v6 = vadd.f32 %v7749_v28, %v7728_v2  ;;  %v7814_v20 = vmul.f32 %v18812_v17, %v15224_v59  ;;  %v18817_v13 = vld [vmem:[#allocation139_spill] sm:$0xff] }
0x15e4   : > { %v7778_v63 = vmul.f32 %v16803_v19, %v18813_v21  ;;  %v7796_v61 = vmul.f32 %v18803_v50, %v16946_v51  ;;  %v7813_v14 = vmul.f32 %v16955_v1, %v15222_v58  ;;  %v7824_v47 = vmul.f32 %v17049_v27, %v7812_v43  ;;  %v18816_v51 = vld [vmem:[#allocation172_spill] sm:$0xff]  ;;  %v18823_v21 = vld [vmem:[#allocation159_spill] sm:$0xff] }
0x15e5   : > { %v7797_v44 = vmul.f32 %v18803_v50, %v18814_v48  ;;  %v7831_v57 = vadd.f32 %v7823_v46, %v7802_v5  ;;  %v7785_v11 = vadd.f32 %v7777_v37, %v7756_v7  ;;  %v7798_v15 = vmul.f32 %v18803_v50, %v18815_v56  ;;  %v7210_v37 = vpop.f32.mrf.mxu1 }
0x15e6   : > { %v7804_v32 = vadd.f32 %v7796_v61, %v7783_v49  ;;  %v7758_v29 = vadd.f32 %v18816_v51, %v7729_v38  ;;  %v7832_v1 = vadd.f32 %v7824_v47, %v7803_v45  ;;  %v7786_v34 = vadd.f32 %v7778_v63, %v7757_v6  ;;  %v18819_v38 = vld [vmem:[#allocation149_spill] sm:$0xff]  ;;  %v18820_v45 = vld [vmem:[#allocation151_spill] sm:$0xff]  ;;  %v18821_v6 = vld [vmem:[#allocation158_spill] sm:$0xff] }
0x15e7   : > { %v7805_v39 = vadd.f32 %v7797_v44, %v7784_v3  ;;  %v7759_v42 = vadd.f32 %v18817_v13, %v7730_v41  ;;  %v7826_v2 = vmul.f32 %v17049_v27, %v7814_v20  ;;  %v7827_v28 = vmul.f32 %v17049_v27, %v7815_v8  ;;  %v18822_v20 = vld [vmem:[#allocation130_spill] sm:$0xff]  ;;  %v18824_v63 = vld [vmem:[#allocation128_spill] sm:$0xff]  ;;  %v12376_v56 = vpop.f32.mrf.mxu1  ;;  %v18825_v51 = vld [vmem:[#allocation143_spill] sm:$0xff] }
0x15e8   : > { %v7779_v0 = vmul.f32 %v16803_v19, %v18818_v53  ;;  %v7845_v43 = vadd.f32 %v17075_v30, %v7831_v57  ;;  %v7806_v7 = vadd.f32 %v7798_v15, %v7785_v11  ;;  %v7846_v8 = vadd.f32 %v17075_v30, %v7832_v1 }
0x15e9   : > { %v7834_v26 = vadd.f32 %v7826_v2, %v7805_v39  ;;  %v7807_v19 = vadd.f32 %v18819_v38, %v7786_v34  ;;  %v7788_v3 = vadd.f32 %v18820_v45, %v7759_v42  ;;  %v7817_v61 = vmul.f32 %v18824_v63, %v18823_v21  ;;  %v18826_v42 = vld [vmem:[#allocation121_spill] sm:$0xff]  ;;  %v11580_v38 = vld [vmem:[#allocation16] ss:$0 sm:$0xff] }
0x15ea   : > { %v7787_v12 = vadd.f32 %v7779_v0, %v7758_v29  ;;  %v7835_v44 = vadd.f32 %v7827_v28, %v7806_v7  ;;  %v7830_v2 = vmul.f32 %v17049_v27, %v18826_v42  ;;  %v13302_v42 = vld [vmem:[%s16341_s2 + $0x30] sm:$0xff] }
0x15eb   : > { %v7809_v29 = vadd.f32 %v18825_v51, %v7788_v3 }
0x162c   : > { %v7530_v16 = vpop.permute.xlu1 %7529 }
0x162d   : > { %v7552_v35 = vsel %vm3056_vm6, %v17000_v55, %v7530_v16  ;;  %v7825_v55 = vmul.f32 %v17049_v27, %v7813_v14  ;;  %v7828_v16 = vmul.f32 %v17049_v27, %v18821_v6 }
0x162e   : > { %v7566_v62 = vmul.f32 %v17067_v24, %v7552_v35 }
0x162f   : > { %v7833_v41 = vadd.f32 %v7825_v55, %v7804_v32  ;;  %v7836_v15 = vadd.f32 %v7828_v16, %v7807_v19  ;;  %v7849_v55 = vadd.f32 %v17075_v30, %v7835_v44  ;;  %v13299_v44 = vld [vmem:[%s16341_s2 + $0x18] sm:$0xff] }
0x1630   : > { %v7534_v23 = vpop.permute.xlu0 %7533  ;;  %v7528_v40 = vpop.permute.xlu1 %7527  ;;  %v7854_v14 = vadd.f32 %v7846_v8, %v7566_v62  ;;  %v7838_v62 = vadd.f32 %v7830_v2, %v7809_v29 }
0x1631   : > { %v7551_v5 = vsel %vm3056_vm6, %v17019_v31, %v7528_v40  ;;  %v7554_v49 = vsel %vm3056_vm6, %v12370_v36, %v7534_v23  ;;  %v7800_v36 = vmul.f32 %v18803_v50, %v18822_v20  ;;  %v7847_v11 = vadd.f32 %v17075_v30, %v7833_v41 }
0x1632   : > { %v7565_v10 = vmul.f32 %v17067_v24, %v7551_v5  ;;  %v7568_v47 = vmul.f32 %v17067_v24, %v7554_v49  ;;  %v7848_v50 = vadd.f32 %v17075_v30, %v7834_v26  ;;  %v7850_v0 = vadd.f32 %v17075_v30, %v7836_v15  ;;  %v13300_v15 = vld [vmem:[%s16341_s2 + $0x20] sm:$0xff] }
0x1633   : > { %v7808_v32 = vadd.f32 %v7800_v36, %v7787_v12 }
0x1634   : > { %v7853_v46 = vadd.f32 %v7845_v43, %v7565_v10  ;;  %v7538_v31 = vpop.permute.xlu0 %7537  ;;  %v7532_v17 = vpop.permute.xlu1 %7531  ;;  %v7856_v34 = vadd.f32 %v7848_v50, %v7568_v47  ;;  %v13298_v47 = vld [vmem:[%s16341_s2 + $0x10] sm:$0xff] }
0x1635   : > { %v7553_v48 = vsel %vm3056_vm6, %v7200_v22, %v7532_v17  ;;  %v7556_v57 = vsel %vm3056_vm6, %v12373_v25, %v7538_v31  ;;  %v7829_v25 = vmul.f32 %v17049_v27, %v7817_v61  ;;  %v7220_v43 = vpop.f32.mrf.mxu1 }
0x1636   : > { %v7567_v35 = vmul.f32 %v17067_v24, %v7553_v48  ;;  %12414 = vmatprep.mubr.msk.f32.mxu1 %vm2494_vm0, %v7853_v46  ;;  %v7570_v13 = vmul.f32 %v17067_v24, %v7556_v57  ;;  %v13296_v46 = vld [vmem:[%s16341_s2 + $0x8] sm:$0xff] }
0x1637   : > { %12415 = vmatmul.mubr.msk.f32.vlgmr.msra.gmra.mxu1 %vm2494_vm0, %v7854_v14  ;;  %v7837_v53 = vadd.f32 %v7829_v25, %v7808_v32 }
0x1638   : > { %v7855_v1 = vadd.f32 %v7847_v11, %v7567_v35  ;;  %v7542_v22 = vpop.permute.xlu0 %7541  ;;  %v7536_v39 = vpop.permute.xlu1 %7535  ;;  %v7858_v27 = vadd.f32 %v7850_v0, %v7570_v13 }
0x1639   : > { %v7555_v23 = vsel %vm3056_vm6, %v7210_v37, %v7536_v39  ;;  %v7558_v40 = vsel %vm3056_vm6, %v12376_v56, %v7542_v22  ;;  %v7851_v41 = vadd.f32 %v17075_v30, %v7837_v53  ;;  %v7852_v37 = vadd.f32 %v17075_v30, %v7838_v62  ;;  %v13297_v30 = vld [vmem:[%s16341_s2] sm:$0xff]  ;;  %v13301_v22 = vld [vmem:[%s16341_s2 + $0x28] sm:$0xff] }
0x163a   : > { %v7569_v28 = vmul.f32 %v17067_v24, %v7555_v23  ;;  %12417 = vmatprep.mubr.msk.f32.mxu1 %vm2494_vm0, %v7855_v1  ;;  %v7572_v49 = vmul.f32 %v17067_v24, %v7558_v40  ;;  %v13303_v23 = vld [vmem:[%s16341_s2 + $0x38] sm:$0xff]  ;;  %s18827_s2 = sld [smem:[#allocation103_spill]] }
0x163b   : > { %12418 = vmatmul.mubr.msk.f32.gmra.mxu1 %vm2494_vm0, %v7856_v34 }
0x163c   : > { %v7857_v5 = vadd.f32 %v7849_v55, %v7569_v28  ;;  %v7540_v7 = vpop.permute.xlu1 %7539  ;;  %v7860_v26 = vadd.f32 %v7852_v37, %v7572_v49 }
0x163d   : > { %v7557_v10 = vsel %vm3056_vm6, %v7220_v43, %v7540_v7 }
0x163e   : > { %v7571_v12 = vmul.f32 %v17067_v24, %v7557_v10  ;;  %12420 = vmatprep.mubr.msk.f32.mxu1 %vm2494_vm0, %v7857_v5 }
0x163f   : > { %12421 = vmatmul.mubr.msk.f32.gmra.mxu1 %vm2494_vm0, %v7858_v27 }
0x1640   : > { %v7859_v8 = vadd.f32 %v7851_v41, %v7571_v12 }
0x1642   : > { %12423 = vmatprep.mubr.msk.f32.mxu1 %vm2494_vm0, %v7859_v8 }
0x1643   : > { %12424 = vmatmul.mubr.msk.f32.gmra.mxu1 %vm2494_vm0, %v7860_v26 }
0x16f7   : > { %v12416_v19 = vpop.f32.mrf.mxu1 }
0x16f8   : > { %v7963_v45 = vadd.f32 %v12416_v19, %v11580_v38 }
0x16f9   : > { %v7957_v3 = vpop.f32.mrf.mxu1 }
0x16fa   : > { %v17127_v24 = vadd.f32 %v13296_v46, %v7963_v45  ;;  %v7958_v6 = vadd.f32 %v11580_v38, %v7957_v3 }
0x16fb   : > { %v12419_v16 = vpop.f32.mrf.mxu1 }
0x16fc   : > { %v17130_v31 = vadd.f32 %v13297_v30, %v7958_v6  ;;  %v8007_v17 = vsel %vm2494_vm0, %v17127_v24, 0.0  ;;  %v7973_v20 = vadd.f32 %v12419_v16, %v11580_v38 }
0x16fd   : > { %8008 = vadd.xlane.f32.xlu0 %v8007_v17  ;;  %v7967_v36 = vpop.f32.mrf.mxu1 }
0x16fe   : > { %v7968_v63 = vadd.f32 %v11580_v38, %v7967_v36  ;;  %v8004_v61 = vsel %vm2494_vm0, %v17130_v31, 0.0  ;;  %v17140_v57 = vadd.f32 %v13299_v44, %v7973_v20 }
0x16ff   : > { %v12422_v14 = vpop.f32.mrf.mxu1  ;;  %8005 = vadd.xlane.f32.xlu1 %v8004_v61 }
0x1700   : > { %v17137_v48 = vadd.f32 %v13298_v47, %v7968_v63  ;;  %v7983_v35 = vadd.f32 %v12422_v14, %v11580_v38  ;;  %v8013_v1 = vsel %vm2494_vm0, %v17140_v57, 0.0 }
0x1701   : > { %v7977_v11 = vpop.f32.mrf.mxu1 }
0x1702   : > { %v7978_v32 = vadd.f32 %v11580_v38, %v7977_v11  ;;  %v8010_v56 = vsel %vm2494_vm0, %v17137_v48, 0.0  ;;  %v17150_v39 = vadd.f32 %v13301_v22, %v7983_v35 }
0x1703   : > { %8011 = vadd.xlane.f32.xlu0 %v8010_v56  ;;  %v12425_v50 = vpop.f32.mrf.mxu1 }
0x1704   : > { %v17145_v51 = vadd.f32 %v13300_v15, %v7978_v32  ;;  %v7993_v25 = vadd.f32 %v12425_v50, %v11580_v38  ;;  %v8019_v55 = vsel %vm2494_vm0, %v17150_v39, 0.0 }
0x1705   : > { %v7987_v29 = vpop.f32.mrf.mxu1 }
0x1706   : > { %v7988_v34 = vadd.f32 %v11580_v38, %v7987_v29  ;;  %v8016_v13 = vsel %vm2494_vm0, %v17145_v51, 0.0  ;;  %v17158_v40 = vadd.f32 %v13303_v23, %v7993_v25 }
0x1707   : > { %8014 = vadd.xlane.f32.xlu0 %v8013_v1  ;;  %8017 = vadd.xlane.f32.xlu1 %v8016_v13  ;;  %v6569_v13 = vld [vmem:[%s18827_s2 + $0x8] sm:$0xff] }
0x1708   : > { %v17155_v2 = vadd.f32 %v13302_v42, %v7988_v34  ;;  %v8025_v53 = vsel %vm2494_vm0, %v17158_v40, 0.0  ;;  %v6568_v42 = vld [vmem:[%s18827_s2] sm:$0xff]  ;;  %12426 = vmatprep.subr.mxu0 %v6569_v13  ;;  %s18828_s2 = sld [smem:[#allocation104_spill]] }
0x1709   : > { %12427 = vmatpush3.msra.mxu0 %v6569_v13 }
0x170a   : > { %v8022_v28 = vsel %vm2494_vm0, %v17155_v2, 0.0  ;;  %12428 = vmatprep.subr.mxu0 %v6568_v42 }
0x170b   : > { %8020 = vadd.xlane.f32.xlu0 %v8019_v55  ;;  %8023 = vadd.xlane.f32.xlu1 %v8022_v28 }
0x170c   : > { %12429 = vmatpush3.msra.mxu0 %v6568_v42 }
0x170f   : > { %8026 = vadd.xlane.f32.xlu0 %v8025_v53 }
0x1786   : > { %v8009_v0 = vpop.xlane.xlu0 %8008 }
0x1787   : > { %v8029_v62 = vmul.f32 0.0625, %v8009_v0 }
0x1788   : > { %v8006_v43 = vpop.xlane.xlu1 %8005 }
0x1789   : > { %v17167_v5 = vsub.f32 %v17127_v24, %v8029_v62  ;;  %v8028_v7 = vmul.f32 0.0625, %v8006_v43 }
0x178b   : > { %v17170_v27 = vsub.f32 %v17130_v31, %v8028_v7  ;;  %v8045_v49 = vmul.f32 %v17167_v5, %v17167_v5 }
0x178c   : > { %v8012_v10 = vpop.xlane.xlu0 %8011 }
0x178d   : > { %v8030_v41 = vmul.f32 0.0625, %v8012_v10  ;;  %v8055_v12 = vsel %vm2494_vm0, %v8045_v49, 0.0  ;;  %v8044_v37 = vmul.f32 %v17170_v27, %v17170_v27 }
0x178e   : > { %8056 = vadd.xlane.f32.xlu0 %v8055_v12 }
0x178f   : > { %v17178_v8 = vsub.f32 %v17137_v48, %v8030_v41  ;;  %v8052_v26 = vsel %vm2494_vm0, %v8044_v37, 0.0 }
0x1790   : > { %v8015_v38 = vpop.xlane.xlu0 %8014  ;;  %v8018_v19 = vpop.xlane.xlu1 %8017  ;;  %8053 = vadd.xlane.f32.xlu1 %v8052_v26 }
0x1791   : > { %v8031_v45 = vmul.f32 0.0625, %v8015_v38  ;;  %v8032_v3 = vmul.f32 0.0625, %v8018_v19  ;;  %v8046_v46 = vmul.f32 %v17178_v8, %v17178_v8 }
0x1793   : > { %v17184_v6 = vsub.f32 %v17140_v57, %v8031_v45  ;;  %v17187_v16 = vsub.f32 %v17145_v51, %v8032_v3  ;;  %v8058_v30 = vsel %vm2494_vm0, %v8046_v46, 0.0 }
0x1794   : > { %v8021_v17 = vpop.xlane.xlu0 %8020  ;;  %8059 = vadd.xlane.f32.xlu1 %v8058_v30  ;;  %v8024_v20 = vpop.xlane.xlu1 %8023 }
0x1795   : > { %v8033_v36 = vmul.f32 0.0625, %v8021_v17  ;;  %v8034_v63 = vmul.f32 0.0625, %v8024_v20  ;;  %v8047_v61 = vmul.f32 %v17184_v6, %v17184_v6  ;;  %v8048_v14 = vmul.f32 %v17187_v16, %v17187_v16 }
0x1797   : > { %v17195_v47 = vsub.f32 %v17150_v39, %v8033_v36  ;;  %v17198_v44 = vsub.f32 %v17155_v2, %v8034_v63  ;;  %v8061_v11 = vsel %vm2494_vm0, %v8047_v61, 0.0  ;;  %v8064_v35 = vsel %vm2494_vm0, %v8048_v14, 0.0  ;;  %v11589_v63 = vld [vmem:[#allocation17] ss:$0 sm:$0xff] }
0x1798   : > { %8062 = vadd.xlane.f32.xlu0 %v8061_v11  ;;  %v8027_v32 = vpop.xlane.xlu0 %8026  ;;  %8065 = vadd.xlane.f32.xlu1 %v8064_v35 }
0x1799   : > { %v8035_v56 = vmul.f32 0.0625, %v8027_v32  ;;  %v8049_v50 = vmul.f32 %v17195_v47, %v17195_v47  ;;  %v8050_v15 = vmul.f32 %v17198_v44, %v17198_v44 }
0x179b   : > { %v17207_v29 = vsub.f32 %v17158_v40, %v8035_v56  ;;  %v8067_v1 = vsel %vm2494_vm0, %v8049_v50, 0.0  ;;  %v8070_v22 = vsel %vm2494_vm0, %v8050_v15, 0.0  ;;  %v11590_v50 = vld [vmem:[#allocation19] ss:$0 sm:$0xff] }
0x179c   : > { %8068 = vadd.xlane.f32.xlu0 %v8067_v1  ;;  %8071 = vadd.xlane.f32.xlu1 %v8070_v22 }
0x179d   : > { %v8051_v25 = vmul.f32 %v17207_v29, %v17207_v29 }
0x179f   : > { %v8073_v34 = vsel %vm2494_vm0, %v8051_v25, 0.0 }
0x17a0   : > { %8074 = vadd.xlane.f32.xlu0 %v8073_v34 }
0x1817   : > { %v8057_v23 = vpop.xlane.xlu0 %8056 }
0x1818   : > { %v8077_v55 = vmul.f32 0.0625, %v8057_v23 }
0x1819   : > { %v8054_v28 = vpop.xlane.xlu1 %8053 }
0x181a   : > { %v8085_v53 = vadd.f32 1e-05, %v8077_v55  ;;  %v8076_v0 = vmul.f32 0.0625, %v8054_v28 }
0x181c   : > { %13152 = vrsqrt.f32 %v8085_v53  ;;  %v8084_v62 = vadd.f32 1e-05, %v8076_v0 }
0x181d   : > { %v8060_v43 = vpop.xlane.xlu1 %8059 }
0x181e   : > { %13154 = vrsqrt.f32 %v8084_v62  ;;  %v8078_v7 = vmul.f32 0.0625, %v8060_v43 }
0x1820   : > { %v8086_v49 = vadd.f32 1e-05, %v8078_v7 }
0x1821   : > { %v8063_v10 = vpop.xlane.xlu0 %8062  ;;  %v8066_v41 = vpop.xlane.xlu1 %8065 }
0x1822   : > { %13156 = vrsqrt.f32 %v8086_v49  ;;  %v8079_v12 = vmul.f32 0.0625, %v8063_v10  ;;  %v8080_v37 = vmul.f32 0.0625, %v8066_v41 }
0x1824   : > { %v8087_v26 = vadd.f32 1e-05, %v8079_v12  ;;  %v8088_v38 = vadd.f32 1e-05, %v8080_v37 }
0x1825   : > { %v8069_v19 = vpop.xlane.xlu0 %8068  ;;  %v8072_v45 = vpop.xlane.xlu1 %8071 }
0x1826   : > { %13158 = vrsqrt.f32 %v8087_v26  ;;  %v8081_v3 = vmul.f32 0.0625, %v8069_v19  ;;  %v8082_v46 = vmul.f32 0.0625, %v8072_v45  ;;  %v6578_v26 = vld [vmem:[%s18828_s2 + $0x38] sm:$0xff]  ;;  %v6575_v19 = vld [vmem:[%s18828_s2 + $0x20] sm:$0xff] }
0x1827   : > { %13160 = vrsqrt.f32 %v8088_v38  ;;  %12442 = vmatprep.subr.mxu1 %v6578_v26  ;;  %v6577_v38 = vld [vmem:[%s18828_s2 + $0x30] sm:$0xff]  ;;  %v6574_v45 = vld [vmem:[%s18828_s2 + $0x18] sm:$0xff] }
0x1828   : > { %v8089_v30 = vadd.f32 1e-05, %v8081_v3  ;;  %v8090_v17 = vadd.f32 1e-05, %v8082_v46  ;;  %12443 = vmatpush3.msra.mxu1 %v6578_v26  ;;  %v6573_v3 = vld [vmem:[%s18828_s2 + $0x10] sm:$0xff]  ;;  %v6572_v46 = vld [vmem:[%s18828_s2 + $0x8] sm:$0xff] }
0x1829   : > { %v13153_v20 = vpop.eup %13152  ;;  %v8075_v36 = vpop.xlane.xlu0 %8074  ;;  %12444 = vmatprep.subr.mxu1 %v6577_v38 }
0x182a   : > { %v8101_v61 = vmul.f32 %v13153_v20, %v17167_v5  ;;  %13162 = vrsqrt.f32 %v8089_v30  ;;  %v8083_v14 = vmul.f32 0.0625, %v8075_v36  ;;  %12445 = vmatpush3.msra.mxu1 %v6577_v38  ;;  %v6571_v30 = vld [vmem:[%s18828_s2] sm:$0xff]  ;;  %v11591_v20 = vld [vmem:[#allocation20] ss:$0 sm:$0xff] }
0x182b   : > { %v13155_v11 = vpop.eup %13154  ;;  %13164 = vrsqrt.f32 %v8090_v17  ;;  %v18829_v17 = vmov 0.0  }
0x182c   : > { %v8091_v35 = vadd.f32 1e-05, %v8083_v14  ;;  %v8100_v32 = vmul.f32 %v13155_v11, %v17170_v27  ;;  %v8115_v56 = vmul.f32 %v11589_v63, %v8101_v61 }
0x182e   : > { %13166 = vrsqrt.f32 %v8091_v35  ;;  %v8114_v15 = vmul.f32 %v11589_v63, %v8100_v32  ;;  %v8129_v34 = vadd.f32 %v11590_v50, %v8115_v56 }
0x182f   : > { %v13157_v1 = vpop.eup %13156 }
0x1830   : > { %v8128_v22 = vadd.f32 %v11590_v50, %v8114_v15  ;;  %v8102_v25 = vmul.f32 %v13157_v1, %v17178_v8 }
0x1832   : > { %12430 = vmatprep.mubr.msk.f32.mxu0 %vm2494_vm0, %v8128_v22  ;;  %v8116_v13 = vmul.f32 %v11589_v63, %v8102_v25 }
0x1833   : > { %v13159_v5 = vpop.eup %13158  ;;  %12431 = vmatmul.mubr.msk.f32.vlgmr.msra.gmra.mxu0 %vm2494_vm0, %v8129_v34 }
0x1834   : > { %v13161_v42 = vpop.eup %13160  ;;  %v8130_v23 = vadd.f32 %v11590_v50, %v8116_v13  ;;  %v8103_v55 = vmul.f32 %v13159_v5, %v17184_v6 }
0x1835   : > { %v8104_v27 = vmul.f32 %v13161_v42, %v17187_v16 }
0x1836   : > { %12433 = vmatprep.mubr.msk.f32.mxu0 %vm2494_vm0, %v8130_v23  ;;  %v8117_v28 = vmul.f32 %v11589_v63, %v8103_v55 }
0x1837   : > { %v13163_v53 = vpop.eup %13162  ;;  %v8118_v0 = vmul.f32 %v11589_v63, %v8104_v27 }
0x1838   : > { %v13165_v62 = vpop.eup %13164  ;;  %v8131_v8 = vadd.f32 %v11590_v50, %v8117_v28  ;;  %v8105_v43 = vmul.f32 %v13163_v53, %v17195_v47 }
0x1839   : > { %v8132_v7 = vadd.f32 %v11590_v50, %v8118_v0  ;;  %v8106_v49 = vmul.f32 %v13165_v62, %v17198_v44 }
0x183a   : > { %12434 = vmatmul.mubr.msk.f32.gmra.mxu0 %vm2494_vm0, %v8131_v8  ;;  %v8119_v10 = vmul.f32 %v11589_v63, %v8105_v43 }
0x183b   : > { %v13167_v6 = vpop.eup %13166  ;;  %12436 = vmatprep.mubr.msk.f32.mxu0 %vm2494_vm0, %v8132_v7  ;;  %v8120_v16 = vmul.f32 %v11589_v63, %v8106_v49 }
0x183c   : > { %v8133_v41 = vadd.f32 %v11590_v50, %v8119_v10  ;;  %v8107_v12 = vmul.f32 %v13167_v6, %v17207_v29  ;;  %v6576_v29 = vld [vmem:[%s18828_s2 + $0x28] sm:$0xff]  ;;  %s18838_s2 = sld [smem:[#allocation107_spill]] }
0x183d   : > { %v8134_v37 = vadd.f32 %v11590_v50, %v8120_v16  ;;  %12446 = vmatprep.subr.mxu1 %v6576_v29 }
0x183e   : > { %12437 = vmatmul.mubr.msk.f32.gmra.mxu0 %vm2494_vm0, %v8133_v41  ;;  %v8121_v47 = vmul.f32 %v11589_v63, %v8107_v12  ;;  %12447 = vmatpush3.msra.mxu1 %v6576_v29 }
0x183f   : > { %12439 = vmatprep.mubr.msk.f32.mxu0 %vm2494_vm0, %v8134_v37  ;;  %12448 = vmatprep.subr.mxu1 %v6575_v19 }
0x1840   : > { %v8135_v44 = vadd.f32 %v11590_v50, %v8121_v47  ;;  %12449 = vmatpush3.msra.mxu1 %v6575_v19 }
0x1841   : > { %12450 = vmatprep.subr.mxu1 %v6574_v45 }
0x1842   : > { %12440 = vmatmul.mubr.msk.f32.gmra.mxu0 %vm2494_vm0, %v8135_v44  ;;  %12451 = vmatpush3.msra.mxu1 %v6574_v45 }
0x1843   : > { %12452 = vmatprep.subr.mxu1 %v6573_v3 }
0x1844   : > { %12453 = vmatpush3.msra.mxu1 %v6573_v3 }
0x1845   : > { %12454 = vmatprep.subr.mxu1 %v6572_v46 }
0x1846   : > { %12455 = vmatpush3.msra.mxu1 %v6572_v46 }
0x1847   : > { %12456 = vmatprep.subr.mxu1 %v6571_v30 }
0x1848   : > { %12457 = vmatpush3.msra.mxu1 %v6571_v30 }
0x1849   : > { %12486 = vmatprep.subr.mxu1 %v18829_v17 }
0x18f3   : > { %v12432_v36 = vpop.f32.mrf.mxu0 }
0x18f4   : > { %v8238_v63 = vadd.f32 %v12432_v36, %v11591_v20 }
0x18f5   : > { %v8232_v61 = vpop.f32.mrf.mxu0 }
0x18f6   : > { %v8280_v14 = vmul.f32 0.70710677, %v8238_v63  ;;  %v8233_v11 = vadd.f32 %v11591_v20, %v8232_v61  ;;  %v8272_v6 = vmul.f32 0.5, %v8238_v63 }
0x18f8   : > { %13168 = verf.f32 %v8280_v14  ;;  %v8279_v35 = vmul.f32 0.70710677, %v8233_v11  ;;  %v8271_v49 = vmul.f32 0.5, %v8233_v11 }
0x18fa   : > { %13170 = verf.f32 %v8279_v35  ;;  %v12435_v32 = vpop.f32.mrf.mxu0 }
0x18fb   : > { %v8248_v56 = vadd.f32 %v12435_v32, %v11591_v20 }
0x18fc   : > { %v8242_v50 = vpop.f32.mrf.mxu0 }
0x18fd   : > { %v8282_v15 = vmul.f32 0.70710677, %v8248_v56  ;;  %v8243_v1 = vadd.f32 %v11591_v20, %v8242_v50  ;;  %v8274_v29 = vmul.f32 0.5, %v8248_v56 }
0x18fe   : > { %v12438_v22 = vpop.f32.mrf.mxu0 }
0x18ff   : > { %13172 = verf.f32 %v8282_v15  ;;  %v8281_v25 = vmul.f32 0.70710677, %v8243_v1  ;;  %v8258_v34 = vadd.f32 %v12438_v22, %v11591_v20  ;;  %v8273_v44 = vmul.f32 0.5, %v8243_v1  ;;  %v11600_v22 = vld [vmem:[#allocation22] ss:$0 sm:$0xff] }
0x1900   : > { %v8252_v13 = vpop.f32.mrf.mxu0 }
0x1901   : > { %13174 = verf.f32 %v8281_v25  ;;  %v8284_v5 = vmul.f32 0.70710677, %v8258_v34  ;;  %v8253_v42 = vadd.f32 %v11591_v20, %v8252_v13  ;;  %v8276_v63 = vmul.f32 0.5, %v8258_v34 }
0x1902   : > { %v12441_v23 = vpop.f32.mrf.mxu0 }
0x1903   : > { %13176 = verf.f32 %v8284_v5  ;;  %v8283_v55 = vmul.f32 0.70710677, %v8253_v42  ;;  %v8268_v27 = vadd.f32 %v12441_v23, %v11591_v20  ;;  %v8275_v30 = vmul.f32 0.5, %v8253_v42 }
0x1904   : > { %v8262_v28 = vpop.f32.mrf.mxu0 }
0x1905   : > { %v13169_v53 = vpop.eup %13168  ;;  %13178 = verf.f32 %v8283_v55  ;;  %v8286_v0 = vmul.f32 0.70710677, %v8268_v27  ;;  %v8263_v62 = vadd.f32 %v11591_v20, %v8262_v28  ;;  %v8278_v56 = vmul.f32 0.5, %v8268_v27 }
0x1906   : > { %v8296_v43 = vadd.f32 1.0, %v13169_v53 }
0x1907   : > { %v13171_v8 = vpop.eup %13170  ;;  %13180 = verf.f32 %v8286_v0  ;;  %v8285_v7 = vmul.f32 0.70710677, %v8263_v62  ;;  %v8277_v32 = vmul.f32 0.5, %v8263_v62 }
0x1908   : > { %v8295_v10 = vadd.f32 1.0, %v13171_v8  ;;  %v8304_v41 = vmul.f32 %v8296_v43, %v8272_v6 }
0x1909   : > { %13182 = verf.f32 %v8285_v7 }
0x190a   : > { %v8303_v16 = vmul.f32 %v8295_v10, %v8271_v49 }
0x190c   : > { %v13173_v12 = vpop.eup %13172  ;;  %12458 = vmatprep.mubr.msk.f32.mxu1 %vm2982_vm8, %v8303_v16 }
0x190d   : > { %12459 = vmatmul.mubr.msk.f32.vlgmr.msra.gmra.mxu1 %vm2982_vm8, %v8304_v41  ;;  %v8298_v47 = vadd.f32 1.0, %v13173_v12 }
0x190e   : > { %v13175_v37 = vpop.eup %13174 }
0x190f   : > { %v8297_v26 = vadd.f32 1.0, %v13175_v37  ;;  %v8306_v3 = vmul.f32 %v8298_v47, %v8274_v29 }
0x1910   : > { %v13177_v38 = vpop.eup %13176 }
0x1911   : > { %v8305_v19 = vmul.f32 %v8297_v26, %v8273_v44  ;;  %v8300_v46 = vadd.f32 1.0, %v13177_v38 }
0x1912   : > { %v13179_v45 = vpop.eup %13178 }
0x1913   : > { %v8299_v20 = vadd.f32 1.0, %v13179_v45  ;;  %12461 = vmatprep.mubr.msk.f32.mxu1 %vm2982_vm8, %v8305_v19  ;;  %v8308_v11 = vmul.f32 %v8300_v46, %v8276_v63 }
0x1914   : > { %v13181_v36 = vpop.eup %13180  ;;  %12462 = vmatmul.mubr.msk.f32.gmra.mxu1 %vm2982_vm8, %v8306_v3 }
0x1915   : > { %v8307_v61 = vmul.f32 %v8299_v20, %v8275_v30  ;;  %v8302_v35 = vadd.f32 1.0, %v13181_v36 }
0x1916   : > { %v13183_v14 = vpop.eup %13182 }
0x1917   : > { %v8301_v50 = vadd.f32 1.0, %v13183_v14  ;;  %12464 = vmatprep.mubr.msk.f32.mxu1 %vm2982_vm8, %v8307_v61  ;;  %v8310_v1 = vmul.f32 %v8302_v35, %v8278_v56 }
0x1918   : > { %12465 = vmatmul.mubr.msk.f32.gmra.mxu1 %vm2982_vm8, %v8308_v11 }
0x1919   : > { %v8309_v15 = vmul.f32 %v8301_v50, %v8277_v32 }
0x191b   : > { %12467 = vmatprep.mubr.msk.f32.mxu1 %vm2982_vm8, %v8309_v15 }
0x191c   : > { %12468 = vmatmul.mubr.msk.f32.gmra.mxu1 %vm2982_vm8, %v8310_v1 }
0x191d   : > { %12502 = vmatprep.mubr.msk.f32.mxu1 %vm14205_vm7, %v18829_v17 }
0x19cd   : > { %v12460_v25 = vpop.f32.mrf.mxu1 }
0x19ce   : > { %v8413_v34 = vadd.f32 %v12460_v25, %v11600_v22 }
0x19cf   : > { %v8407_v13 = vpop.f32.mrf.mxu1 }
0x19d0   : > { %v17252_v5 = vadd.f32 %v8413_v34, %v17127_v24  ;;  %v8408_v42 = vadd.f32 %v11600_v22, %v8407_v13 }
0x19d2   : > { %18830 = vst [vmem:[#allocation174_spill] sm:$0xff] %v17252_v5  ;;  %v17255_v23 = vadd.f32 %v8408_v42, %v17130_v31  ;;  %v8483_v55 = vsel %vm2494_vm0, %v17252_v5, 0.0 }
0x19d3   : > { %8484 = vadd.xlane.f32.xlu0 %v8483_v55 }
0x19d4   : > { %18831 = vst [vmem:[#allocation126_spill] sm:$0xff] %v17255_v23  ;;  %v12463_v27 = vpop.f32.mrf.mxu1  ;;  %v8480_v28 = vsel %vm2494_vm0, %v17255_v23, 0.0 }
0x19d5   : > { %v8423_v53 = vadd.f32 %v12463_v27, %v11600_v22  ;;  %8481 = vadd.xlane.f32.xlu1 %v8480_v28 }
0x19d6   : > { %v8417_v0 = vpop.f32.mrf.mxu1 }
0x19d7   : > { %v17262_v62 = vadd.f32 %v8423_v53, %v17140_v57  ;;  %v8418_v24 = vadd.f32 %v11600_v22, %v8417_v0 }
0x19d8   : > { %v12466_v8 = vpop.f32.mrf.mxu1 }
0x19d9   : > { %18832 = vst [vmem:[#allocation146_spill] sm:$0xff] %v17262_v62  ;;  %v17265_v43 = vadd.f32 %v8418_v24, %v17137_v48  ;;  %v8433_v31 = vadd.f32 %v12466_v8, %v11600_v22  ;;  %v8489_v7 = vsel %vm2494_vm0, %v17262_v62, 0.0 }
0x19da   : > { %8490 = vadd.xlane.f32.xlu0 %v8489_v7  ;;  %v8427_v49 = vpop.f32.mrf.mxu1 }
0x19db   : > { %18833 = vst [vmem:[#allocation170_spill] sm:$0xff] %v17265_v43  ;;  %v17270_v10 = vadd.f32 %v8433_v31, %v17150_v39  ;;  %v8428_v6 = vadd.f32 %v11600_v22, %v8427_v49  ;;  %v8486_v16 = vsel %vm2494_vm0, %v17265_v43, 0.0 }
0x19dc   : > { %8487 = vadd.xlane.f32.xlu1 %v8486_v16  ;;  %v12469_v57 = vpop.f32.mrf.mxu1 }
0x19dd   : > { %18834 = vst [vmem:[#allocation171_spill] sm:$0xff] %v17270_v10  ;;  %v17275_v41 = vadd.f32 %v8428_v6, %v17145_v51  ;;  %v8443_v48 = vadd.f32 %v12469_v57, %v11600_v22  ;;  %v8495_v12 = vsel %vm2494_vm0, %v17270_v10, 0.0 }
0x19de   : > { %8496 = vadd.xlane.f32.xlu0 %v8495_v12  ;;  %v8437_v37 = vpop.f32.mrf.mxu1 }
0x19df   : > { %18835 = vst [vmem:[#allocation150_spill] sm:$0xff] %v17275_v41  ;;  %v17280_v47 = vadd.f32 %v8443_v48, %v17158_v40  ;;  %v8438_v39 = vadd.f32 %v11600_v22, %v8437_v37  ;;  %v8492_v44 = vsel %vm2494_vm0, %v17275_v41, 0.0  ;;  %v8457_v37 = vld [vmem:[%s18838_s2 + $0x8] sm:$0xff] }
0x19e0   : > { %8493 = vadd.xlane.f32.xlu1 %v8492_v44  ;;  %12470 = vmatprep.subr.mxu0 %v8457_v37 }
0x19e1   : > { %18836 = vst [vmem:[#allocation152_spill] sm:$0xff] %v17280_v47  ;;  %v17285_v26 = vadd.f32 %v8438_v39, %v17155_v2  ;;  %v8501_v51 = vsel %vm2494_vm0, %v17280_v47, 0.0  ;;  %v8456_v39 = vld [vmem:[%s18838_s2] sm:$0xff]  ;;  %12471 = vmatpush3.msra.mxu0 %v8457_v37 }
0x19e2   : > { %8502 = vadd.xlane.f32.xlu0 %v8501_v51  ;;  %12472 = vmatprep.subr.mxu0 %v8456_v39 }
0x19e3   : > { %18837 = vst [vmem:[#allocation142_spill] sm:$0xff] %v17285_v26  ;;  %v8498_v38 = vsel %vm2494_vm0, %v17285_v26, 0.0  ;;  %12473 = vmatpush3.msra.mxu0 %v8456_v39 }
0x19e4   : > { %8499 = vadd.xlane.f32.xlu1 %v8498_v38  ;;  %12519 = vmatprep.subr.mxu0 %v18829_v17 }
0x1a5c   : > { %v8485_v29 = vpop.xlane.xlu0 %8484 }
0x1a5d   : > { %v8505_v19 = vmul.f32 0.0625, %v8485_v29 }
0x1a5e   : > { %v8482_v40 = vpop.xlane.xlu1 %8481 }
0x1a5f   : > { %v17292_v45 = vsub.f32 %v17252_v5, %v8505_v19  ;;  %v8504_v3 = vmul.f32 0.0625, %v8482_v40 }
0x1a61   : > { %v17295_v46 = vsub.f32 %v17255_v23, %v8504_v3  ;;  %v8521_v2 = vmul.f32 %v17292_v45, %v17292_v45 }
0x1a63   : > { %v8491_v30 = vpop.xlane.xlu0 %8490  ;;  %v8531_v20 = vsel %vm2494_vm0, %v8521_v2, 0.0  ;;  %v8520_v36 = vmul.f32 %v17295_v46, %v17295_v46 }
0x1a64   : > { %v8507_v63 = vmul.f32 0.0625, %v8491_v30  ;;  %8532 = vadd.xlane.f32.xlu0 %v8531_v20 }
0x1a65   : > { %v8488_v61 = vpop.xlane.xlu1 %8487  ;;  %v8528_v14 = vsel %vm2494_vm0, %v8520_v36, 0.0 }
0x1a66   : > { %v17304_v11 = vsub.f32 %v17262_v62, %v8507_v63  ;;  %v8506_v35 = vmul.f32 0.0625, %v8488_v61  ;;  %8529 = vadd.xlane.f32.xlu1 %v8528_v14  ;;  %v18870_v62 = vld [vmem:[#allocation140_spill] sm:$0xff] }
0x1a67   : > { %v8497_v32 = vpop.xlane.xlu0 %8496 }
0x1a68   : > { %v17307_v50 = vsub.f32 %v17265_v43, %v8506_v35  ;;  %v8509_v56 = vmul.f32 0.0625, %v8497_v32  ;;  %v8523_v15 = vmul.f32 %v17304_v11, %v17304_v11 }
0x1a69   : > { %v8494_v1 = vpop.xlane.xlu1 %8493 }
0x1a6a   : > { %v17312_v22 = vsub.f32 %v17270_v10, %v8509_v56  ;;  %v8508_v25 = vmul.f32 0.0625, %v8494_v1  ;;  %v8537_v34 = vsel %vm2494_vm0, %v8523_v15, 0.0  ;;  %v8522_v13 = vmul.f32 %v17307_v50, %v17307_v50 }
0x1a6b   : > { %8538 = vadd.xlane.f32.xlu0 %v8537_v34  ;;  %v8503_v42 = vpop.xlane.xlu0 %8502 }
0x1a6c   : > { %v17318_v55 = vsub.f32 %v17275_v41, %v8508_v25  ;;  %v8511_v27 = vmul.f32 0.0625, %v8503_v42  ;;  %v8534_v28 = vsel %vm2494_vm0, %v8522_v13, 0.0  ;;  %v8525_v53 = vmul.f32 %v17312_v22, %v17312_v22 }
0x1a6d   : > { %8535 = vadd.xlane.f32.xlu1 %v8534_v28  ;;  %v8500_v0 = vpop.xlane.xlu1 %8499  ;;  %v11609_v28 = vld [vmem:[#allocation23] ss:$0 sm:$0xff] }
0x1a6e   : > { %v17324_v24 = vsub.f32 %v17280_v47, %v8511_v27  ;;  %v8510_v8 = vmul.f32 0.0625, %v8500_v0  ;;  %v8543_v31 = vsel %vm2494_vm0, %v8525_v53, 0.0  ;;  %v8524_v7 = vmul.f32 %v17318_v55, %v17318_v55 }
0x1a6f   : > { %8544 = vadd.xlane.f32.xlu0 %v8543_v31 }
0x1a70   : > { %v17330_v49 = vsub.f32 %v17285_v26, %v8510_v8  ;;  %v8540_v6 = vsel %vm2494_vm0, %v8524_v7, 0.0  ;;  %v8527_v16 = vmul.f32 %v17324_v24, %v17324_v24 }
0x1a71   : > { %8541 = vadd.xlane.f32.xlu1 %v8540_v6  ;;  %v11610_v6 = vld [vmem:[#allocation25] ss:$0 sm:$0xff] }
0x1a72   : > { %v8549_v57 = vsel %vm2494_vm0, %v8527_v16, 0.0  ;;  %v8526_v48 = vmul.f32 %v17330_v49, %v17330_v49 }
0x1a73   : > { %8550 = vadd.xlane.f32.xlu0 %v8549_v57 }
0x1a74   : > { %v8546_v12 = vsel %vm2494_vm0, %v8526_v48, 0.0 }
0x1a75   : > { %8547 = vadd.xlane.f32.xlu1 %v8546_v12 }
0x1aed   : > { %v8533_v44 = vpop.xlane.xlu0 %8532 }
0x1aee   : > { %v8553_v51 = vmul.f32 0.0625, %v8533_v44 }
0x1aef   : > { %v8530_v38 = vpop.xlane.xlu1 %8529 }
0x1af0   : > { %v8561_v29 = vadd.f32 1e-05, %v8553_v51  ;;  %v8552_v19 = vmul.f32 0.0625, %v8530_v38 }
0x1af2   : > { %13184 = vrsqrt.f32 %v8561_v29  ;;  %v8560_v40 = vadd.f32 1e-05, %v8552_v19 }
0x1af4   : > { %13186 = vrsqrt.f32 %v8560_v40  ;;  %v8539_v3 = vpop.xlane.xlu0 %8538 }
0x1af5   : > { %v8555_v2 = vmul.f32 0.0625, %v8539_v3 }
0x1af6   : > { %v8536_v30 = vpop.xlane.xlu1 %8535 }
0x1af7   : > { %v8563_v20 = vadd.f32 1e-05, %v8555_v2  ;;  %v8554_v36 = vmul.f32 0.0625, %v8536_v30 }
0x1af8   : > { %v8545_v63 = vpop.xlane.xlu0 %8544 }
0x1af9   : > { %13188 = vrsqrt.f32 %v8563_v20  ;;  %v8562_v61 = vadd.f32 1e-05, %v8554_v36  ;;  %v8557_v14 = vmul.f32 0.0625, %v8545_v63 }
0x1afa   : > { %v8542_v35 = vpop.xlane.xlu1 %8541 }
0x1afb   : > { %13190 = vrsqrt.f32 %v8562_v61  ;;  %v8565_v32 = vadd.f32 1e-05, %v8557_v14  ;;  %v8556_v56 = vmul.f32 0.0625, %v8542_v35 }
0x1afc   : > { %v8551_v15 = vpop.xlane.xlu0 %8550 }
0x1afd   : > { %13192 = vrsqrt.f32 %v8565_v32  ;;  %v8564_v1 = vadd.f32 1e-05, %v8556_v56  ;;  %v8559_v25 = vmul.f32 0.0625, %v8551_v15 }
0x1afe   : > { %v8548_v34 = vpop.xlane.xlu1 %8547 }
0x1aff   : > { %v13185_v13 = vpop.eup %13184  ;;  %13194 = vrsqrt.f32 %v8564_v1  ;;  %v8567_v42 = vadd.f32 1e-05, %v8559_v25  ;;  %v8558_v27 = vmul.f32 0.0625, %v8548_v34 }
0x1b00   : > { %v8577_v53 = vmul.f32 %v13185_v13, %v17292_v45 }
0x1b01   : > { %v13187_v0 = vpop.eup %13186  ;;  %13196 = vrsqrt.f32 %v8567_v42  ;;  %v8566_v8 = vadd.f32 1e-05, %v8558_v27 }
0x1b02   : > { %v8576_v31 = vmul.f32 %v13187_v0, %v17295_v46  ;;  %v8591_v7 = vmul.f32 %v11609_v28, %v8577_v53 }
0x1b03   : > { %13198 = vrsqrt.f32 %v8566_v8 }
0x1b04   : > { %v8590_v16 = vmul.f32 %v11609_v28, %v8576_v31  ;;  %v8605_v12 = vadd.f32 %v11610_v6, %v8591_v7 }
0x1b06   : > { %v13189_v57 = vpop.eup %13188  ;;  %v8604_v48 = vadd.f32 %v11610_v6, %v8590_v16 }
0x1b07   : > { %v8579_v37 = vmul.f32 %v13189_v57, %v17304_v11 }
0x1b08   : > { %v13191_v39 = vpop.eup %13190  ;;  %12474 = vmatprep.mubr.msk.f32.mxu0 %vm2494_vm0, %v8604_v48 }
0x1b09   : > { %12475 = vmatmul.mubr.msk.f32.vlgmr.msra.gmra.mxu0 %vm2494_vm0, %v8605_v12  ;;  %v8578_v45 = vmul.f32 %v13191_v39, %v17307_v50  ;;  %v8593_v51 = vmul.f32 %v11609_v28, %v8579_v37 }
0x1b0a   : > { %v13193_v44 = vpop.eup %13192 }
0x1b0b   : > { %v8592_v38 = vmul.f32 %v11609_v28, %v8578_v45  ;;  %v8581_v46 = vmul.f32 %v13193_v44, %v17312_v22  ;;  %v8607_v2 = vadd.f32 %v11610_v6, %v8593_v51 }
0x1b0c   : > { %v13195_v29 = vpop.eup %13194 }
0x1b0d   : > { %v8606_v19 = vadd.f32 %v11610_v6, %v8592_v38  ;;  %v8580_v40 = vmul.f32 %v13195_v29, %v17318_v55  ;;  %v8595_v30 = vmul.f32 %v11609_v28, %v8581_v46 }
0x1b0e   : > { %v13197_v3 = vpop.eup %13196 }
0x1b0f   : > { %12477 = vmatprep.mubr.msk.f32.mxu0 %vm2494_vm0, %v8606_v19  ;;  %v8594_v11 = vmul.f32 %v11609_v28, %v8580_v40  ;;  %v8583_v20 = vmul.f32 %v13197_v3, %v17324_v24  ;;  %v8609_v61 = vadd.f32 %v11610_v6, %v8595_v30  ;;  %v11611_v24 = vld [vmem:[#allocation26] ss:$0 sm:$0xff] }
0x1b10   : > { %v13199_v36 = vpop.eup %13198  ;;  %12478 = vmatmul.mubr.msk.f32.gmra.mxu0 %vm2494_vm0, %v8607_v2 }
0x1b11   : > { %v8608_v50 = vadd.f32 %v11610_v6, %v8594_v11  ;;  %v8582_v63 = vmul.f32 %v13199_v36, %v17330_v49  ;;  %v8597_v22 = vmul.f32 %v11609_v28, %v8583_v20 }
0x1b13   : > { %12480 = vmatprep.mubr.msk.f32.mxu0 %vm2494_vm0, %v8608_v50  ;;  %v8596_v14 = vmul.f32 %v11609_v28, %v8582_v63  ;;  %v8611_v35 = vadd.f32 %v11610_v6, %v8597_v22 }
0x1b14   : > { %12481 = vmatmul.mubr.msk.f32.gmra.mxu0 %vm2494_vm0, %v8609_v61 }
0x1b15   : > { %v8610_v55 = vadd.f32 %v11610_v6, %v8596_v14 }
0x1b17   : > { %12483 = vmatprep.mubr.msk.f32.mxu0 %vm2494_vm0, %v8610_v55 }
0x1b18   : > { %12484 = vmatmul.mubr.msk.f32.gmra.mxu0 %vm2494_vm0, %v8611_v35 }
0x1b19   : > { %12535 = vmatprep.mubr.msk.f32.mxu0 %vm14205_vm7, %v18829_v17 }
0x1bc9   : > { %v12476_v32 = vpop.f32.mrf.mxu0 }
0x1bca   : > { %v17360_v56 = vadd.f32 %v12476_v32, %v11611_v24 }
0x1bcb   : > { %v8708_v49 = vpop.f32.mrf.mxu0 }
0x1bcc   : > { %v8748_v15 = vmul.f32 %v17360_v56, %v17360_v56  ;;  %v17364_v1 = vadd.f32 %v11611_v24, %v8708_v49 }
0x1bce   : > { %v8747_v25 = vmul.f32 %v17364_v1, %v17364_v1  ;;  %v8756_v34 = vsel %vm2494_vm0, %v8748_v15, 0.0  ;;  %v8794_v6 = vsel %vm2847_vm1, %v8748_v15, 0.0 }
0x1bd0   : > { %v8755_v13 = vsel %vm2494_vm0, %v8747_v25, 0.0  ;;  %v12479_v42 = vpop.f32.mrf.mxu0  ;;  %v8793_v0 = vsel %vm2847_vm1, %v8747_v25, 0.0 }
0x1bd1   : > { %v8757_v27 = vadd.f32 %v8756_v34, %v8755_v13  ;;  %v17370_v28 = vadd.f32 %v12479_v42, %v11611_v24  ;;  %v8795_v48 = vadd.f32 %v8794_v6, %v8793_v0 }
0x1bd2   : > { %v8718_v53 = vpop.f32.mrf.mxu0 }
0x1bd3   : > { %v17373_v8 = vadd.f32 %v11611_v24, %v8718_v53  ;;  %v8750_v31 = vmul.f32 %v17370_v28, %v17370_v28 }
0x1bd4   : > { %v12482_v7 = vpop.f32.mrf.mxu0 }
0x1bd5   : > { %v8749_v16 = vmul.f32 %v17373_v8, %v17373_v8  ;;  %v17380_v57 = vadd.f32 %v12482_v7, %v11611_v24  ;;  %v8760_v44 = vsel %vm2494_vm0, %v8750_v31, 0.0  ;;  %v8798_v29 = vsel %vm2847_vm1, %v8750_v31, 0.0 }
0x1bd6   : > { %v8728_v12 = vpop.f32.mrf.mxu0 }
0x1bd7   : > { %v8758_v37 = vsel %vm2494_vm0, %v8749_v16, 0.0  ;;  %v8796_v39 = vsel %vm2847_vm1, %v8749_v16, 0.0  ;;  %v17384_v45 = vadd.f32 %v11611_v24, %v8728_v12  ;;  %v8752_v19 = vmul.f32 %v17380_v57, %v17380_v57 }
0x1bd8   : > { %v8759_v51 = vadd.f32 %v8758_v37, %v8757_v27  ;;  %v8797_v38 = vadd.f32 %v8796_v39, %v8795_v48  ;;  %v12485_v46 = vpop.f32.mrf.mxu0 }
0x1bd9   : > { %v8751_v40 = vmul.f32 %v17384_v45, %v17384_v45  ;;  %v17392_v3 = vadd.f32 %v12485_v46, %v11611_v24  ;;  %v8764_v22 = vsel %vm2494_vm0, %v8752_v19, 0.0  ;;  %v8802_v14 = vsel %vm2847_vm1, %v8752_v19, 0.0 }
0x1bda   : > { %v8761_v2 = vadd.f32 %v8760_v44, %v8759_v51  ;;  %v8799_v30 = vadd.f32 %v8798_v29, %v8797_v38  ;;  %v8738_v11 = vpop.f32.mrf.mxu0 }
0x1bdb   : > { %v8762_v20 = vsel %vm2494_vm0, %v8751_v40, 0.0  ;;  %v8800_v36 = vsel %vm2847_vm1, %v8751_v40, 0.0  ;;  %v17396_v50 = vadd.f32 %v11611_v24, %v8738_v11  ;;  %9199 = vrot.lane.b32.xlu1 %v17392_v3, %s18752_s3  ;;  %v8754_v55 = vmul.f32 %v17392_v3, %v17392_v3 }
0x1bdc   : > { %v8763_v63 = vadd.f32 %v8762_v20, %v8761_v2  ;;  %v8801_v61 = vadd.f32 %v8800_v36, %v8799_v30 }
0x1bdd   : > { %v8753_v35 = vmul.f32 %v17396_v50, %v17396_v50  ;;  %v8768_v13 = vsel %vm2494_vm0, %v8754_v55, 0.0  ;;  %v8806_v42 = vsel %vm2847_vm1, %v8754_v55, 0.0 }
0x1bde   : > { %v8765_v32 = vadd.f32 %v8764_v22, %v8763_v63  ;;  %v8803_v49 = vadd.f32 %v8802_v14, %v8801_v61 }
0x1bdf   : > { %v8766_v24 = vsel %vm2494_vm0, %v8753_v35, 0.0  ;;  %v8804_v15 = vsel %vm2847_vm1, %v8753_v35, 0.0 }
0x1be0   : > { %v8767_v25 = vadd.f32 %v8766_v24, %v8765_v32  ;;  %v8805_v34 = vadd.f32 %v8804_v15, %v8803_v49 }
0x1be2   : > { %v8769_v27 = vadd.f32 %v8768_v13, %v8767_v25  ;;  %v8807_v53 = vadd.f32 %v8806_v42, %v8805_v34 }
0x1be4   : > { %v8808_v0 = vrot.slane %v8807_v53, 4  ;;  %v8770_v61 = vrot.slane %v8769_v27, 4 }
0x1be6   : > { %v8809_v31 = vadd.f32 %v8808_v0, %v8807_v53  ;;  %v8771_v22 = vadd.f32 %v8770_v61, %v8769_v27 }
0x1be8   : > { %v8810_v7 = vrot.slane %v8809_v31, 2  ;;  %v8772_v14 = vrot.slane %v8771_v22, 2 }
0x1bea   : > { %v8811_v6 = vadd.f32 %v8810_v7, %v8809_v31  ;;  %v8773_v55 = vadd.f32 %v8772_v14, %v8771_v22 }
0x1bec   : > { %v8812_v16 = vrot.slane %v8811_v6, 1  ;;  %v8774_v49 = vrot.slane %v8773_v55, 1 }
0x1bee   : > { %v8813_v48 = vadd.f32 %v8812_v16, %v8811_v6  ;;  %v8775_v25 = vadd.f32 %v8774_v49, %v8773_v55 }
0x1bf0   : > { %13200 = vrsqrt.f32 %v8813_v48  ;;  %vm8816_vm3 = vcmp.eq.f32.partialorder %v8813_v48, inf  ;;  %v8819_v39 = vand.u32 2147483648, %v8813_v48  ;;  %vm8818_vm4 = vcmp.eq.f32.partialorder %v8813_v48, 0.0 }
0x1bf1   : > { %vm8778_vm1 = vcmp.eq.f32.partialorder %v8775_v25, inf  ;;  %vm8780_vm5 = vcmp.eq.f32.partialorder %v8775_v25, 0.0 }
0x1bfd   : > { %v13201_v12 = vpop.eup %13200 }
0x1bfe   : > { %v8815_v37 = vmul.f32 %v13201_v12, %v8813_v48 }
0x1c00   : > { %v8817_v44 = vsel %vm8816_vm3, %v8813_v48, %v8815_v37 }
0x1c01   : > { %v8820_v51 = vsel %vm8818_vm4, %v8819_v39, %v8817_v44 }
0x1c02   : > { %v8821_v38 = vmax.f32 %v8820_v51, 1e-12  ;;  %v8781_v51 = vand.u32 2147483648, %v8775_v25 }
0x1c04   : > { %13202 = vrcp.f32 %v8821_v38 }
0x1c05   : > { %13204 = vrsqrt.f32 %v8775_v25 }
0x1c11   : > { %v13203_v46 = vpop.eup %13202 }
0x1c12   : > { %v8824_v29 = vmul.f32 %v13203_v46, %v17360_v56  ;;  %v8823_v19 = vmul.f32 %v13203_v46, %v17364_v1  ;;  %v8828_v40 = vmul.f32 %v13203_v46, %v17380_v57  ;;  %v8825_v2 = vmul.f32 %v13203_v46, %v17373_v8  ;;  %v13205_v6 = vpop.eup %13204 }
0x1c13   : > { %v8830_v30 = vmul.f32 %v13203_v46, %v17392_v3  ;;  %v8826_v11 = vmul.f32 %v13203_v46, %v17370_v28  ;;  %v8827_v20 = vmul.f32 %v13203_v46, %v17384_v45  ;;  %v8829_v36 = vmul.f32 %v13203_v46, %v17396_v50 }
0x1c14   : > { %9131 = vrot.lane.b32.xlu0 %v8824_v29, %s18753_s4  ;;  %9129 = vrot.lane.b32.xlu1 %v8823_v19, %s18753_s4  ;;  %v8777_v12 = vmul.f32 %v13205_v6, %v8775_v25 }
0x1c16   : > { %v8779_v44 = vsel %vm8778_vm1, %v8775_v25, %v8777_v12 }
0x1c18   : > { %9197 = vrot.lane.b32.xlu0 %v17396_v50, %s18752_s3  ;;  %9195 = vrot.lane.b32.xlu1 %v17380_v57, %s18752_s3 }
0x1c1c   : > { %9139 = vrot.lane.b32.xlu0 %v8828_v40, %s18753_s4  ;;  %9133 = vrot.lane.b32.xlu1 %v8825_v2, %s18753_s4 }
0x1c20   : > { %9143 = vrot.lane.b32.xlu0 %v8830_v30, %s18753_s4  ;;  %9135 = vrot.lane.b32.xlu1 %v8826_v11, %s18753_s4 }
0x1c24   : > { %9193 = vrot.lane.b32.xlu0 %v17384_v45, %s18752_s3  ;;  %9137 = vrot.lane.b32.xlu1 %v8827_v20, %s18753_s4 }
0x1c28   : > { %9189 = vrot.lane.b32.xlu0 %v17373_v8, %s18752_s3  ;;  %9141 = vrot.lane.b32.xlu1 %v8829_v36, %s18753_s4  ;;  %s18839_s4 = sld [smem:[#allocation111_spill]] }
0x1c2c   : > { %9185 = vrot.lane.b32.xlu0 %v17364_v1, %s18752_s3  ;;  %9191 = vrot.lane.b32.xlu1 %v17370_v28, %s18752_s3 }
0x1c2e   : > { %v8463_v12 = vld [vmem:[%s18839_s4] sm:$0xff] }
0x1c30   : > { %8841 = vrot.lane.b32.xlu0 %v8824_v29, %s18754_s5  ;;  %9187 = vrot.lane.b32.xlu1 %v17360_v56, %s18752_s3  ;;  %v8782_v29 = vsel %vm8780_vm5, %v8781_v51, %v8779_v44  ;;  %s18275_s3 = scalar_lea.vmem %s14577_s24, %s14836_s18 }
0x1c34   : > { %8845 = vrot.lane.b32.xlu0 %v8826_v11, %s18754_s5  ;;  %8839 = vrot.lane.b32.xlu1 %v8823_v19, %s18754_s5 }
0x1c38   : > { %8849 = vrot.lane.b32.xlu0 %v8828_v40, %s18754_s5  ;;  %8843 = vrot.lane.b32.xlu1 %v8825_v2, %s18754_s5  ;;  %v8783_v40 = vmax.f32 %v8782_v29, 1e-12 }
0x1c3a   : > { %13206 = vrcp.f32 %v8783_v40 }
0x1c3c   : > { %8853 = vrot.lane.b32.xlu0 %v8830_v30, %s18754_s5  ;;  %8847 = vrot.lane.b32.xlu1 %v8827_v20, %s18754_s5 }
0x1c40   : > { %8917 = vrot.lane.b32.xlu0 %v17392_v3, %s18659_s9  ;;  %8851 = vrot.lane.b32.xlu1 %v8829_v36, %s18754_s5  ;;  %s18924_s5 = sld [smem:[#allocation119_spill]] }
0x1c44   : > { %8915 = vrot.lane.b32.xlu0 %v17396_v50, %s18659_s9 }
0x1c47   : > { %v13207_v61 = vpop.eup %13206 }
0x1c48   : > { %8913 = vrot.lane.b32.xlu0 %v17380_v57, %s18659_s9  ;;  %v8785_v55 = vmul.f32 %v13207_v61, %v17364_v1  ;;  %v8791_v25 = vmul.f32 %v13207_v61, %v17396_v50 }
0x1c4c   : > { %8911 = vrot.lane.b32.xlu0 %v17384_v45, %s18659_s9 }
0x1c4d   : > { %v9200_v63 = vpop.permute.xlu1 %9199 }
0x1c4e   : > { %12520 = vmatpush3.msra.mxu0 %v9200_v63 }
0x1c4f   : > { %12521 = vmatprep.subr.mxu0 %v18829_v17 }
0x1c50   : > { %8909 = vrot.lane.b32.xlu0 %v17370_v28, %s18659_s9 }
0x1c54   : > { %8907 = vrot.lane.b32.xlu0 %v17373_v8, %s18659_s9 }
0x1c58   : > { %8905 = vrot.lane.b32.xlu0 %v17360_v56, %s18659_s9 }
0x1c5c   : > { %8903 = vrot.lane.b32.xlu0 %v17364_v1, %s18659_s9  ;;  %v8788_v1 = vmul.f32 %v13207_v61, %v17370_v28  ;;  %v8790_v28 = vmul.f32 %v13207_v61, %v17380_v57  ;;  %s18840_s9 = sld [smem:[#allocation109_spill]] }
0x1c62   : > { %v8460_v40 = vld [vmem:[%s18840_s9] sm:$0xff] }
0x1c86   : > { %v9132_v35 = vpop.permute.xlu0 %9131  ;;  %v9130_v32 = vpop.permute.xlu1 %9129 }
0x1c87   : > { %9153 = vxpose.xlu1.b32.start [1/8] (short) (narrow) %v9130_v32, 8  ;;  %v8787_v32 = vmul.f32 %v13207_v61, %v17373_v8  ;;  %v8789_v8 = vmul.f32 %v13207_v61, %v17384_v45 }
0x1c8a   : > { %v9198_v24 = vpop.permute.xlu0 %9197  ;;  %v9196_v15 = vpop.permute.xlu1 %9195 }
0x1c8b   : > { %12522 = vmatpush3.msra.mxu0 %v9198_v24  ;;  %9154 = vxpose.xlu1.b32.cont [2/8] (short) (narrow) %v9132_v35, 8 }
0x1c8c   : > { %12523 = vmatprep.subr.mxu0 %v18829_v17 }
0x1c8d   : > { %12524 = vmatpush3.msra.mxu0 %v9196_v15 }
0x1c8e   : > { %v9140_v34 = vpop.permute.xlu0 %9139  ;;  %v9134_v13 = vpop.permute.xlu1 %9133  ;;  %12525 = vmatprep.subr.mxu0 %v18829_v17 }
0x1c8f   : > { %9155 = vxpose.xlu1.b32.cont [3/8] (short) (narrow) %v9134_v13, 8 }
0x1c92   : > { %v9144_v42 = vpop.permute.xlu0 %9143  ;;  %v9136_v27 = vpop.permute.xlu1 %9135 }
0x1c93   : > { %9156 = vxpose.xlu1.b32.cont [4/8] (short) (narrow) %v9136_v27, 8 }
0x1c96   : > { %v9194_v53 = vpop.permute.xlu0 %9193  ;;  %v9138_v0 = vpop.permute.xlu1 %9137 }
0x1c97   : > { %12526 = vmatpush3.msra.mxu0 %v9194_v53  ;;  %9157 = vxpose.xlu1.b32.cont [5/8] (short) (narrow) %v9138_v0, 8 }
0x1c98   : > { %12527 = vmatprep.subr.mxu0 %v18829_v17 }
0x1c9a   : > { %v9190_v31 = vpop.permute.xlu0 %9189  ;;  %v9142_v7 = vpop.permute.xlu1 %9141 }
0x1c9b   : > { %9158 = vxpose.xlu1.b32.cont [6/8] (short) (narrow) %v9140_v34, 8  ;;  %v8792_v34 = vmul.f32 %v13207_v61, %v17392_v3 }
0x1c9e   : > { %v9186_v16 = vpop.permute.xlu0 %9185  ;;  %v9192_v48 = vpop.permute.xlu1 %9191 }
0x1c9f   : > { %9159 = vxpose.xlu1.b32.cont [7/8] (short) (narrow) %v9142_v7, 8  ;;  %12528 = vmatpush3.msra.mxu0 %v9192_v48  ;;  %v8464_v48 = vld [vmem:[%s18839_s4 + $0x8] sm:$0xff] }
0x1ca0   : > { %12529 = vmatprep.subr.mxu0 %v18829_v17 }
0x1ca1   : > { %12530 = vmatpush3.msra.mxu0 %v9190_v31 }
0x1ca2   : > { %v8842_v37 = vpop.permute.xlu0 %8841  ;;  %12531 = vmatprep.subr.mxu0 %v18829_v17  ;;  %v9188_v39 = vpop.permute.xlu1 %9187 }
0x1ca3   : > { %9160 = vxpose.xlu1.b32.end [8/8] (short) (narrow) %v9144_v42, 8  ;;  %12532 = vmatpush3.msra.mxu0 %v9188_v39 }
0x1ca4   : > { %12533 = vmatprep.subr.mxu0 %v18829_v17 }
0x1ca5   : > { %12534 = vmatpush3.msra.mxu0 %v9186_v16 }
0x1ca6   : > { %v8846_v38 = vpop.permute.xlu0 %8845  ;;  %v8840_v46 = vpop.permute.xlu1 %8839 }
0x1ca7   : > { %8863 = vxpose.xlu0.b32.start [1/8] (short) (narrow) %v8840_v46, 8 }
0x1caa   : > { %v8850_v19 = vpop.permute.xlu0 %8849  ;;  %v8844_v2 = vpop.permute.xlu1 %8843 }
0x1cab   : > { %8864 = vxpose.xlu0.b32.cont [2/8] (short) (narrow) %v8842_v37, 8 }
0x1cae   : > { %v8854_v30 = vpop.permute.xlu0 %8853  ;;  %v8848_v20 = vpop.permute.xlu1 %8847 }
0x1caf   : > { %8865 = vxpose.xlu0.b32.cont [3/8] (short) (narrow) %v8844_v2, 8  ;;  %v9481_v2 = vld [vmem:[#allocation2 + $0x7] sm:$0xff] }
0x1cb2   : > { %v8918_v11 = vpop.permute.xlu0 %8917  ;;  %v8852_v22 = vpop.permute.xlu1 %8851 }
0x1cb3   : > { %9480 = vst.msk [vmem:[#allocation2 + $0x48] sm:$0xff] %vm2494_vm0, %v8918_v11  ;;  %12487 = vmatpush3.msra.mxu1 %v8918_v11  ;;  %8866 = vxpose.xlu0.b32.cont [4/8] (short) (narrow) %v8846_v38, 8 }
0x1cb4   : > { %12488 = vmatprep.subr.mxu1 %v18829_v17 }
0x1cb6   : > { %v8916_v36 = vpop.permute.xlu0 %8915 }
0x1cb7   : > { %9479 = vst.msk [vmem:[#allocation2 + $0x40] sm:$0xff] %vm2494_vm0, %v8916_v36  ;;  %12489 = vmatpush3.msra.mxu1 %v8916_v36  ;;  %8867 = vxpose.xlu0.b32.cont [5/8] (short) (narrow) %v8848_v20, 8  ;;  %v18842_v20 = vld [vmem:[#allocation135_spill] sm:$0xff] }
0x1cb8   : > { %12490 = vmatprep.subr.mxu1 %v18829_v17  ;;  %v17535_v36 = vrot.slane %v8460_v40, %v18842_v20 }
0x1cba   : > { %v8914_v63 = vpop.permute.xlu0 %8913 }
0x1cbb   : > { %9478 = vst.msk [vmem:[#allocation2 + $0x38] sm:$0xff] %vm2494_vm0, %v8914_v63  ;;  %12491 = vmatpush3.msra.mxu1 %v8914_v63  ;;  %8868 = vxpose.xlu0.b32.cont [6/8] (short) (narrow) %v8850_v19, 8  ;;  %v9489_v63 = vmul.f32 %v9481_v2, %v18666_v18 }
0x1cbc   : > { %12492 = vmatprep.subr.mxu1 %v18829_v17 }
0x1cbe   : > { %v8912_v14 = vpop.permute.xlu0 %8911 }
0x1cbf   : > { %9477 = vst.msk [vmem:[#allocation2 + $0x30] sm:$0xff] %vm2494_vm0, %v8912_v14  ;;  %12493 = vmatpush3.msra.mxu1 %v8912_v14  ;;  %8869 = vxpose.xlu0.b32.cont [7/8] (short) (narrow) %v8852_v22, 8  ;;  %v17538_v22 = vld [vmem:[#allocation2 + $0x49] sm:$0xff] }
0x1cc0   : > { %12494 = vmatprep.subr.mxu1 %v18829_v17  ;;  %18843 = vst [vmem:[#allocation175_spill] sm:$0xff] %v17538_v22  ;;  %v9660_v14 = vld [vmem:[#allocation2 + $0x4f] sm:$0xff] }
0x1cc1   : > { %9282 = vrot.lane.b32.xlu1 %v8785_v55, %s18660_s0 }
0x1cc2   : > { %v8910_v35 = vpop.permute.xlu0 %8909 }
0x1cc3   : > { %9476 = vst.msk [vmem:[#allocation2 + $0x28] sm:$0xff] %vm2494_vm0, %v8910_v35  ;;  %12495 = vmatpush3.msra.mxu1 %v8910_v35  ;;  %8870 = vxpose.xlu0.b32.end [8/8] (short) (narrow) %v8854_v30, 8  ;;  %v18841_v30 = vld [vmem:[#allocation137_spill] sm:$0xff] }
0x1cc4   : > { %12496 = vmatprep.subr.mxu1 %v18829_v17  ;;  %v17532_v11 = vrot.slane %v8460_v40, %v18841_v30 }
0x1cc5   : > { %9286 = vrot.lane.b32.xlu1 %v8787_v32, %s18660_s0 }
0x1cc6   : > { %v8908_v49 = vpop.permute.xlu0 %8907  ;;  %v17630_v47 = vld [vmem:[#allocation2 + $0x31] sm:$0xff] }
0x1cc7   : > { %9475 = vst.msk [vmem:[#allocation2 + $0x20] sm:$0xff] %vm2494_vm0, %v8908_v49  ;;  %12497 = vmatpush3.msra.mxu1 %v8908_v49  ;;  %v18844_v49 = vld [vmem:[#allocation134_spill] sm:$0xff]  ;;  %v17658_v23 = vld [vmem:[#allocation2 + $0x37] sm:$0xff] }
0x1cc8   : > { %12498 = vmatprep.subr.mxu1 %v18829_v17  ;;  %18872 = vst [vmem:[#allocation134_spill] sm:$0xff] %v17658_v23 }
0x1cc9   : > { %9288 = vrot.lane.b32.xlu1 %v8788_v1, %s18660_s0 }
0x1cca   : > { %v8906_v24 = vpop.permute.xlu0 %8905  ;;  %v17647_v41 = vld [vmem:[#allocation2 + $0x2f] sm:$0xff] }
0x1ccb   : > { %9474 = vst.msk [vmem:[#allocation2 + $0x18] sm:$0xff] %vm2494_vm0, %v8906_v24  ;;  %12499 = vmatpush3.msra.mxu1 %v8906_v24  ;;  %v18845_v24 = vld [vmem:[#allocation136_spill] sm:$0xff] }
0x1ccc   : > { %12500 = vmatprep.subr.mxu1 %v18829_v17  ;;  %v8786_v17 = vmul.f32 %v13207_v61, %v17360_v56  ;;  %v9517_v61 = vld [vmem:[#allocation2 + $0x8] sm:$0xff] }
0x1ccd   : > { %9290 = vrot.lane.b32.xlu1 %v8789_v8, %s18660_s0  ;;  %v9529_v35 = vmul.f32 %v17535_v36, %v9517_v61  ;;  %v17595_v61 = vld [vmem:[#allocation2 + $0x38] sm:$0xff] }
0x1cce   : > { %v8904_v15 = vpop.permute.xlu0 %8903  ;;  %18860 = vst [vmem:[#allocation149_spill] sm:$0xff] %v17595_v61  ;;  %v17645_v10 = vld [vmem:[#allocation2 + $0x27] sm:$0xff] }
0x1ccf   : > { %9473 = vst.msk [vmem:[#allocation2 + $0x10] sm:$0xff] %vm2494_vm0, %v8904_v15  ;;  %12501 = vmatpush3.msra.mxu1 %v8904_v15  ;;  %v9689_v15 = vld [vmem:[#allocation2 + $0x50] sm:$0xff] }
0x1cd1   : > { %9292 = vrot.lane.b32.xlu1 %v8790_v28, %s18660_s0 }
0x1cd5   : > { %9294 = vrot.lane.b32.xlu1 %v8791_v25, %s18660_s0 }
0x1cd6   : > { %v17591_v20 = vld [vmem:[#allocation2 + $0x17] sm:$0xff] }
0x1cd9   : > { %9296 = vrot.lane.b32.xlu1 %v8792_v34, %s18660_s0 }
0x1cec   : > { %9284 = vrot.lane.b32.xlu0 %v8786_v17, %s18660_s0  ;;  %s18923_s0 = sld [smem:[#allocation116_spill]] }
0x1d03   : > { %v9169_v45 = vpop.trf.xlu1 }
0x1d04   : > { %12536 = vmatmul.mubr.msk.f32.vlgmr.msra.gmra.mxu0 %vm2982_vm8, %v9169_v45  ;;  %v9552_v45 = vld [vmem:[#allocation2 + $0x41] sm:$0xff] }
0x1d23   : > { %v8879_v13 = vpop.trf.xlu0 }
0x1d24   : > { %12503 = vmatmul.mubr.msk.f32.vlgmr.msra.gmra.mxu1 %vm2982_vm8, %v8879_v13  ;;  %v9581_v13 = vld [vmem:[#allocation2 + $0x47] sm:$0xff] }
0x1d25   : > { %12507 = vmatprep.mubr.msk.f32.mxu1 %vm3056_vm6, %v8785_v55  ;;  %v9501_v55 = vmul.f32 %v17532_v11, %v9489_v63 }
0x1d33   : > { %v9283_v57 = vpop.permute.xlu1 %9282 }
0x1d34   : > { %12540 = vmatprep.mubr.msk.f32.mxu0 %vm3056_vm6, %v9283_v57  ;;  %v9610_v57 = vld [vmem:[#allocation2 + $0x48] sm:$0xff] }
0x1d37   : > { %v9287_v50 = vpop.permute.xlu1 %9286 }
0x1d3b   : > { %v9289_v42 = vpop.permute.xlu1 %9288 }
0x1d3f   : > { %v9291_v3 = vpop.permute.xlu1 %9290 }
0x1d43   : > { %v9293_v53 = vpop.permute.xlu1 %9292 }
0x1d47   : > { %v9295_v31 = vpop.permute.xlu1 %9294 }
0x1d4b   : > { %v9297_v7 = vpop.permute.xlu1 %9296 }
0x1d5e   : > { %v9285_v56 = vpop.permute.xlu0 %9284 }
0x1dc4   : > { %v9278_v27 = vpop.f32.mrf.mxu0 }
0x1dc5   : > { %12538 = vmatprep.subr.mxu0 %v9278_v27 }
0x1dc6   : > { %12539 = vmatpush3.msra.mxu0 %v9278_v27  ;;  %v12537_v0 = vpop.f32.mrf.mxu0 }
0x1dc7   : > { %12541 = vmatmul.mubr.msk.f32.vlgmr.msra.gmra.mxu0 %vm3056_vm6, %v9285_v56  ;;  %v17560_v0 = vld [vmem:[#allocation2 + $0xf] sm:$0xff] }
0x1dc8   : > { %12543 = vmatprep.mubr.msk.f32.mxu0 %vm3056_vm6, %v9287_v50  ;;  %v18849_v50 = vld [vmem:[#allocation160_spill] sm:$0xff]  ;;  %v9490_v63 = vmul.f32 %v17560_v0, %v18683_v60 }
0x1dca   : > { %v9502_v26 = vmul.f32 %v17532_v11, %v9490_v63 }
0x1dcb   : > { %12544 = vmatmul.mubr.msk.f32.gmra.mxu0 %vm3056_vm6, %v9289_v42  ;;  %v9639_v42 = vmul.f32 %v17538_v22, %v18849_v50  ;;  %v17675_v22 = vld [vmem:[#allocation2 + $0x19] sm:$0xff] }
0x1dcc   : > { %12546 = vmatprep.mubr.msk.f32.mxu0 %vm3056_vm6, %v9291_v3  ;;  %v18850_v3 = vld [vmem:[#allocation157_spill] sm:$0xff] }
0x1dcd   : > { %v9668_v27 = vmul.f32 %v9660_v14, %v18850_v3 }
0x1dcf   : > { %12547 = vmatmul.mubr.msk.f32.gmra.mxu0 %vm3056_vm6, %v9293_v53  ;;  %v9488_v53 = vld [vmem:[#allocation2 + $0x3f] sm:$0xff] }
0x1dd0   : > { %12549 = vmatprep.mubr.msk.f32.mxu0 %vm3056_vm6, %v9295_v31  ;;  %v18852_v31 = vld [vmem:[#allocation144_spill] sm:$0xff]  ;;  %v17654_v43 = vmul.f32 %v9488_v53, %v18870_v62 }
0x1dd2   : > { %18871 = vst [vmem:[#allocation135_spill] sm:$0xff] %v17654_v43 }
0x1dd3   : > { %12550 = vmatmul.mubr.msk.f32.gmra.mxu0 %vm3056_vm6, %v9297_v7  ;;  %v17563_v7 = vrot.slane %v8460_v40, %v18852_v31 }
0x1de4   : > { %v8996_v6 = vpop.f32.mrf.mxu1 }
0x1de5   : > { %12505 = vmatprep.subr.mxu1 %v8996_v6 }
0x1de6   : > { %12506 = vmatpush3.msra.mxu1 %v8996_v6  ;;  %v12504_v16 = vpop.f32.mrf.mxu1  ;;  %v18853_v6 = vld [vmem:[#allocation145_spill] sm:$0xff] }
0x1de7   : > { %12508 = vmatmul.mubr.msk.f32.vlgmr.msra.gmra.mxu1 %vm3056_vm6, %v8786_v17  ;;  %12552 = vmatprep.subr.mxu1 %v8464_v48  ;;  %v17566_v16 = vrot.slane %v8460_v40, %v18853_v6  ;;  %v17626_v6 = vld [vmem:[#allocation2 + $0x10] sm:$0xff] }
0x1de8   : > { %12510 = vmatprep.mubr.msk.f32.mxu1 %vm3056_vm6, %v8787_v32  ;;  %12553 = vmatpush3.msra.mxu1 %v8464_v48  ;;  %v9710_v32 = vld [vmem:[#allocation2 + $0x51] sm:$0xff]  ;;  %v17568_v48 = vadd.f32 %v9529_v35, %v9501_v55 }
0x1de9   : > { %12554 = vmatprep.subr.mxu1 %v8463_v12  ;;  %v17558_v56 = vmul.f32 %v9710_v32, %v18849_v50  ;;  %v17604_v32 = vld [vmem:[#allocation2 + $0x1f] sm:$0xff] }
0x1dea   : > { %12555 = vmatpush3.msra.mxu1 %v8463_v12  ;;  %v9524_v12 = vld [vmem:[#allocation2 + $0x40] sm:$0xff] }
0x1deb   : > { %12511 = vmatmul.mubr.msk.f32.gmra.mxu1 %vm3056_vm6, %v8788_v1  ;;  %v17543_v1 = vrot.slane %v8460_v40, %v18844_v49  ;;  %18851 = vst [vmem:[#allocation161_spill] sm:$0xff] %v17558_v56  ;;  %v9536_v14 = vmul.f32 %v17535_v36, %v9524_v12 }
0x1dec   : > { %12513 = vmatprep.mubr.msk.f32.mxu1 %vm3056_vm6, %v8789_v8  ;;  %v17546_v8 = vrot.slane %v8460_v40, %v18845_v24  ;;  %v18863_v24 = vld [vmem:[#allocation155_spill] sm:$0xff] }
0x1ded   : > { %v17599_v55 = vmul.f32 %v17543_v1, %v9524_v12  ;;  %v17624_v31 = vmul.f32 %v9581_v13, %v18863_v24 }
0x1dee   : > { %18846 = vst [vmem:[#allocation141_spill] sm:$0xff] %v17546_v8  ;;  %v17602_v35 = vmul.f32 %v17546_v8, %v9524_v12  ;;  %v17628_v12 = vld [vmem:[#allocation2 + $0x11] sm:$0xff] }
0x1def   : > { %12514 = vmatmul.mubr.msk.f32.gmra.mxu1 %vm3056_vm6, %v8790_v28  ;;  %v18847_v28 = vld [vmem:[#allocation147_spill] sm:$0xff]  ;;  %18861 = vst [vmem:[#allocation151_spill] sm:$0xff] %v17599_v55  ;;  %18867 = vst [vmem:[#allocation143_spill] sm:$0xff] %v17624_v31 }
0x1df0   : > { %12516 = vmatprep.mubr.msk.f32.mxu1 %vm3056_vm6, %v8791_v25  ;;  %v17549_v25 = vrot.slane %v8460_v40, %v18847_v28  ;;  %18862 = vst [vmem:[#allocation158_spill] sm:$0xff] %v17602_v35  ;;  %v18864_v28 = vld [vmem:[#allocation154_spill] sm:$0xff] }
0x1df2   : > { %v17586_v2 = vmul.f32 %v17549_v25, %v9639_v42 }
0x1df3   : > { %12517 = vmatmul.mubr.msk.f32.gmra.mxu1 %vm3056_vm6, %v8792_v34  ;;  %v18848_v34 = vld [vmem:[#allocation148_spill] sm:$0xff] }
0x1df4   : > { %v17552_v17 = vrot.slane %v8460_v40, %v18848_v34  ;;  %v9638_v40 = vmul.f32 %v9552_v45, %v18823_v21  ;;  %18858 = vst [vmem:[#allocation139_spill] sm:$0xff] %v17586_v2 }
0x1df6   : > { %v17589_v30 = vmul.f32 %v17552_v17, %v9668_v27 }
0x1df8   : > { %18859 = vst [vmem:[#allocation168_spill] sm:$0xff] %v17589_v30 }
0x1e87   : > { %v12542_v37 = vpop.f32.mrf.mxu0 }
0x1e88   : > { %9429 = vrot.lane.b32.xlu1 %v12542_v37, %s18662_s1  ;;  %v17571_v37 = vmul.f32 %v17546_v8, %v9689_v15  ;;  %v9588_v15 = vmul.f32 %v9488_v53, %v18863_v24 }
0x1e89   : > { %v9380_v39 = vpop.f32.mrf.mxu0 }
0x1e8a   : > { %18854 = vst [vmem:[#allocation173_spill] sm:$0xff] %v17571_v37  ;;  %v17667_v56 = vmul.f32 %v17566_v16, %v9588_v15  ;;  %v17669_v37 = vld [vmem:[#allocation2 + $0x18] sm:$0xff]  ;;  %v9494_v15 = vmul.f32 %v17647_v41, %v18870_v62 }
0x1e8b   : > { %v12545_v44 = vpop.f32.mrf.mxu0 }
0x1e8c   : > { %9427 = vrot.lane.b32.xlu1 %v9380_v39, %s18662_s1  ;;  %9433 = vrot.lane.b32.xlu0 %v12545_v44, %s18662_s1  ;;  %v17573_v39 = vld [vmem:[#allocation2 + $0x39] sm:$0xff]  ;;  %v9560_v44 = vmul.f32 %v9552_v45, %v18849_v50  ;;  %v17614_v50 = vld [vmem:[#allocation2 + $0x30] sm:$0xff]  ;;  %18874 = vst [vmem:[#allocation147_spill] sm:$0xff] %v17667_v56  ;;  %v9615_v56 = vmul.f32 %v17543_v1, %v17626_v6 }
0x1e8d   : > { %v9390_v51 = vpop.f32.mrf.mxu0  ;;  %18855 = vst [vmem:[#allocation169_spill] sm:$0xff] %v17573_v39  ;;  %v9559_v49 = vmul.f32 %v17573_v39, %v18823_v21  ;;  %v9637_v34 = vmul.f32 %v17573_v39, %v18864_v28  ;;  %v9554_v21 = vmul.f32 %v17628_v12, %v18698_v4  ;;  %v18875_v39 = vld [vmem:[#allocation138_spill] sm:$0xff] }
0x1e8f   : > { %v12548_v38 = vpop.f32.mrf.mxu0  ;;  %v17661_v5 = vmul.f32 %v17549_v25, %v9637_v34  ;;  %v17664_v63 = vmul.f32 %v17563_v7, %v9559_v49  ;;  %v9558_v34 = vmul.f32 %v17630_v47, %v18864_v28 }
0x1e90   : > { %9431 = vrot.lane.b32.xlu1 %v9390_v51, %s18662_s1  ;;  %9437 = vrot.lane.b32.xlu0 %v12548_v38, %s18662_s1  ;;  %v9589_v51 = vmul.f32 %v9581_v13, %v18850_v3  ;;  %v17578_v38 = vmul.f32 %v17543_v1, %v9610_v57  ;;  %v9492_v13 = vmul.f32 %v17604_v32, %v18696_v54 }
0x1e91   : > { %v9400_v46 = vpop.f32.mrf.mxu0  ;;  %18873 = vst [vmem:[#allocation136_spill] sm:$0xff] %v17661_v5  ;;  %v9570_v43 = vmul.f32 %v17563_v7, %v9558_v34 }
0x1e92   : > { %18856 = vst [vmem:[#allocation123_spill] sm:$0xff] %v17578_v38  ;;  %v17621_v27 = vmul.f32 %v17566_v16, %v9589_v51  ;;  %v17640_v51 = vmul.f32 %v17549_v25, %v9638_v40  ;;  %v9534_v40 = vmul.f32 %v17535_v36, %v17614_v50  ;;  %v9504_v2 = vmul.f32 %v17532_v11, %v9492_v13 }
0x1e93   : > { %v12551_v29 = vpop.f32.mrf.mxu0  ;;  %v9566_v13 = vmul.f32 %v17563_v7, %v9554_v21  ;;  %v9506_v38 = vmul.f32 %v17532_v11, %v9494_v15 }
0x1e94   : > { %9435 = vrot.lane.b32.xlu1 %v9400_v46, %s18662_s1  ;;  %9441 = vrot.lane.b32.xlu0 %v12551_v29, %s18662_s1  ;;  %v17581_v46 = vmul.f32 %v17546_v8, %v9610_v57  ;;  %v9545_v29 = vld [vmem:[#allocation2 + $0x9] sm:$0xff]  ;;  %v17612_v57 = vmul.f32 %v9552_v45, %v18864_v28  ;;  %18866 = vst [vmem:[#allocation128_spill] sm:$0xff] %v17621_v27  ;;  %18868 = vst [vmem:[#allocation121_spill] sm:$0xff] %v17640_v51 }
0x1e95   : > { %v9410_v19 = vpop.f32.mrf.mxu0  ;;  %v9553_v42 = vmul.f32 %v9545_v29, %v18691_v33  ;;  %v17635_v29 = vmul.f32 %v17535_v36, %v17595_v61  ;;  %v9582_v28 = vmul.f32 %v17560_v0, %v18666_v18  ;;  %v9531_v51 = vmul.f32 %v17535_v36, %v17669_v37 }
0x1e96   : > { %18857 = vst [vmem:[#allocation172_spill] sm:$0xff] %v17581_v46  ;;  %18865 = vst [vmem:[#allocation130_spill] sm:$0xff] %v17612_v57  ;;  %v17671_v46 = vld [vmem:[#allocation2 + $0x20] sm:$0xff]  ;;  %v9584_v8 = vmul.f32 %v17604_v32, %v15209_v52 }
0x1e97   : > { %v9565_v49 = vmul.f32 %v17563_v7, %v9553_v42  ;;  %v17682_v57 = vld [vmem:[#allocation2 + $0x21] sm:$0xff]  ;;  %v9587_v42 = vmul.f32 %v17658_v23, %v18870_v62  ;;  %v9583_v62 = vmul.f32 %v17591_v20, %v18683_v60  ;;  %v9594_v21 = vmul.f32 %v17566_v16, %v9582_v28 }
0x1e98   : > { %9439 = vrot.lane.b32.xlu1 %v9410_v19, %s18662_s1  ;;  %v9496_v19 = vmul.f32 %v9488_v53, %v18850_v3  ;;  %v17618_v3 = vmul.f32 %v17563_v7, %v9560_v44  ;;  %v9491_v44 = vmul.f32 %v17591_v20, %v15209_v52  ;;  %v9530_v53 = vmul.f32 %v17535_v36, %v17626_v6  ;;  %s18913_s1 = sld [smem:[#allocation114_spill]] }
0x1e99   : > { %v9556_v0 = vmul.f32 %v17682_v57, %v15224_v59  ;;  %v9573_v5 = vadd.f32 %v9565_v49, %v17568_v48  ;;  %v9585_v49 = vmul.f32 %v17645_v10, %v18696_v54  ;;  %v9599_v34 = vmul.f32 %v17566_v16, %v9587_v42 }
0x1e9a   : > { %v9508_v45 = vmul.f32 %v17532_v11, %v9496_v19  ;;  %v17651_v19 = vmul.f32 %v17543_v1, %v17595_v61  ;;  %v9503_v35 = vmul.f32 %v17532_v11, %v9491_v44  ;;  %v9493_v61 = vmul.f32 %v17645_v10, %v18875_v39  ;;  %v17702_v44 = vld [vmem:[#allocation2 + $0x28] sm:$0xff] }
0x1e9b   : > { %v9538_v31 = vadd.f32 %v9530_v53, %v9502_v26  ;;  %v9495_v26 = vmul.f32 %v17658_v23, %v18863_v24  ;;  %v17711_v53 = vld [vmem:[#allocation2 + $0x29] sm:$0xff]  ;;  %v9533_v27 = vmul.f32 %v17535_v36, %v17702_v44 }
0x1e9c   : > { %18869 = vst [vmem:[#allocation137_spill] sm:$0xff] %v17651_v19  ;;  %v17686_v30 = vadd.f32 %v9536_v14, %v9508_v45  ;;  %v9532_v14 = vmul.f32 %v17535_v36, %v17671_v46  ;;  %v9555_v45 = vmul.f32 %v17675_v22, %v15222_v58  ;;  %v9539_v55 = vadd.f32 %v9531_v51, %v9503_v35 }
0x1e9d   : > { %v9505_v19 = vmul.f32 %v17532_v11, %v9493_v61  ;;  %v9574_v23 = vadd.f32 %v9566_v13, %v9538_v31  ;;  %v9557_v48 = vmul.f32 %v17711_v53, %v18807_v9  ;;  %v9568_v61 = vmul.f32 %v17563_v7, %v9556_v0 }
0x1e9e   : > { %v9540_v24 = vadd.f32 %v9532_v14, %v9504_v2  ;;  %v9567_v35 = vmul.f32 %v17563_v7, %v9555_v45  ;;  %v9595_v2 = vmul.f32 %v17566_v16, %v9583_v62  ;;  %v9602_v31 = vadd.f32 %v9594_v21, %v9573_v5 }
0x1e9f   : > { %v9507_v36 = vmul.f32 %v17532_v11, %v9495_v26  ;;  %v9542_v51 = vadd.f32 %v9534_v40, %v9506_v38  ;;  %v9541_v28 = vadd.f32 %v9533_v27, %v9505_v19  ;;  %v9632_v45 = vmul.f32 %v17628_v12, %v18691_v33 }
0x1ea0   : > { %v9575_v15 = vadd.f32 %v9567_v35, %v9539_v55  ;;  %v9603_v14 = vadd.f32 %v9595_v2, %v9574_v23  ;;  %v9576_v13 = vadd.f32 %v9568_v61, %v9540_v24  ;;  %v9586_v0 = vmul.f32 %v17647_v41, %v18875_v39 }
0x1ea1   : > { %v9597_v5 = vmul.f32 %v17566_v16, %v9585_v49  ;;  %v9596_v11 = vmul.f32 %v17566_v16, %v9584_v8  ;;  %v9569_v38 = vmul.f32 %v17563_v7, %v9557_v48  ;;  %v9616_v55 = vmul.f32 %v17543_v1, %v17669_v37 }
0x1ea2   : > { %v9633_v23 = vmul.f32 %v17675_v22, %v18698_v4  ;;  %v9623_v27 = vadd.f32 %v9615_v56, %v9602_v31  ;;  %v9543_v6 = vadd.f32 %v17635_v29, %v9507_v36  ;;  %v9618_v12 = vmul.f32 %v17543_v1, %v17702_v44 }
0x1ea3   : > { %v9578_v19 = vadd.f32 %v9570_v43, %v9542_v51  ;;  %v9604_v40 = vadd.f32 %v9596_v11, %v9575_v15  ;;  %v9577_v42 = vadd.f32 %v9569_v38, %v9541_v28  ;;  %v9624_v8 = vadd.f32 %v9616_v55, %v9603_v14  ;;  %v18878_v11 = vld [vmem:[#allocation128_spill] sm:$0xff] }
0x1ea4   : > { %v9605_v62 = vadd.f32 %v9597_v5, %v9576_v13  ;;  %v9644_v7 = vmul.f32 %v17549_v25, %v9632_v45  ;;  %v9661_v24 = vmul.f32 %v17591_v20, %v18666_v18  ;;  %v9617_v56 = vmul.f32 %v17543_v1, %v17671_v46  ;;  %v18876_v13 = vld [vmem:[#allocation147_spill] sm:$0xff] }
0x1ea5   : > { %v9634_v29 = vmul.f32 %v17682_v57, %v15222_v58  ;;  %v9635_v43 = vmul.f32 %v17711_v53, %v15224_v59  ;;  %v9598_v21 = vmul.f32 %v17566_v16, %v9586_v0  ;;  %v9645_v48 = vmul.f32 %v17549_v25, %v9633_v23 }
0x1ea6   : > { %v9662_v49 = vmul.f32 %v17604_v32, %v18683_v60  ;;  %v9652_v35 = vadd.f32 %v9644_v7, %v9623_v27  ;;  %v9579_v61 = vadd.f32 %v17664_v63, %v9543_v6  ;;  %v9619_v18 = vmul.f32 %v17543_v1, %v17614_v50  ;;  %v18881_v7 = vld [vmem:[#allocation151_spill] sm:$0xff] }
0x1ea7   : > { %v17747_v26 = vpop.f32.mrf.mxu1  ;;  %v9625_v20 = vadd.f32 %v9617_v56, %v9604_v40  ;;  %v9580_v2 = vadd.f32 %v17618_v3, %v17686_v30  ;;  %v9606_v31 = vadd.f32 %v9598_v21, %v9577_v42  ;;  %v9653_v51 = vadd.f32 %v9645_v48, %v9624_v8 }
0x1ea8   : > { %v9626_v16 = vadd.f32 %v9618_v12, %v9605_v62  ;;  %v9673_v15 = vmul.f32 %v17552_v17, %v9661_v24  ;;  %v9607_v28 = vadd.f32 %v9599_v34, %v9578_v19  ;;  %v9636_v60 = vmul.f32 %v17630_v47, %v18807_v9  ;;  %v18877_v34 = vld [vmem:[#allocation141_spill] sm:$0xff]  ;;  %v18882_v24 = vld [vmem:[#allocation135_spill] sm:$0xff] }
0x1ea9   : > { %v17767_v36 = vpop.f32.mrf.mxu1  ;;  %v9664_v32 = vmul.f32 %v17647_v41, %v18696_v54  ;;  %v9646_v1 = vmul.f32 %v17549_v25, %v9634_v29  ;;  %v9663_v63 = vmul.f32 %v17645_v10, %v15209_v52  ;;  %v9674_v30 = vmul.f32 %v17552_v17, %v9662_v49  ;;  %v18879_v10 = vld [vmem:[#allocation137_spill] sm:$0xff] }
0x1eaa   : > { %v9647_v3 = vmul.f32 %v17549_v25, %v9635_v43  ;;  %v9681_v14 = vadd.f32 %v9673_v15, %v9652_v35  ;;  %v9608_v45 = vadd.f32 %v18876_v13, %v9579_v61  ;;  %v9694_v0 = vmul.f32 %v18877_v34, %v17669_v37  ;;  %v18880_v37 = vld [vmem:[#allocation134_spill] sm:$0xff]  ;;  %v18883_v43 = vld [vmem:[#allocation123_spill] sm:$0xff]  ;;  %v18884_v35 = vld [vmem:[#allocation136_spill] sm:$0xff] }
0x1eab   : > { %v9654_v5 = vadd.f32 %v9646_v1, %v9625_v20  ;;  %v9609_v38 = vadd.f32 %v18878_v11, %v9580_v2  ;;  %v9627_v54 = vadd.f32 %v9619_v18, %v9606_v31  ;;  %v12512_v41 = vpop.f32.mrf.mxu1  ;;  %v9682_v55 = vadd.f32 %v9674_v30, %v9653_v51  ;;  %v18885_v15 = vld [vmem:[#allocation121_spill] sm:$0xff] }
0x1eac   : > { %v9655_v23 = vadd.f32 %v9647_v3, %v9626_v16  ;;  %v9711_v52 = vmul.f32 %v17675_v22, %v18691_v33  ;;  %v9628_v27 = vadd.f32 %v18879_v10, %v9607_v28  ;;  %v9676_v6 = vmul.f32 %v17552_v17, %v9664_v32  ;;  %v17797_v22 = vld [vmem:[%s18840_s9 + $0x8] ss:$0 sm:$0xff] }
0x1ead   : > { %v9675_v12 = vmul.f32 %v17552_v17, %v9663_v63  ;;  %v9648_v19 = vmul.f32 %v17549_v25, %v9636_v60  ;;  %v9665_v40 = vmul.f32 %v18880_v37, %v18875_v39  ;;  %v9695_v42 = vmul.f32 %v18877_v34, %v17671_v46  ;;  %v9100_v48 = vpop.f32.mrf.mxu1  ;;  %v17815_v60 = vld [vmem:[#allocation28] ss:$0 sm:$0xff]  ;;  %v18886_v32 = vld [vmem:[#allocation143_spill] sm:$0xff] }
0x1eae   : > { %v9712_v8 = vmul.f32 %v17682_v57, %v18698_v4  ;;  %v9702_v62 = vadd.f32 %v9694_v0, %v9681_v14  ;;  %v9629_v33 = vadd.f32 %v18881_v7, %v9608_v45  ;;  %v9678_v56 = vmul.f32 %v17552_v17, %v18882_v24  ;;  %v18887_v3 = vld [vmem:[#allocation139_spill] sm:$0xff]  ;;  %v18892_v7 = vld [vmem:[#allocation130_spill] sm:$0xff] }
0x1eaf   : > { %v9683_v29 = vadd.f32 %v9675_v12, %v9654_v5  ;;  %v9630_v25 = vadd.f32 %v18883_v43, %v9609_v38  ;;  %v9656_v21 = vadd.f32 %v9648_v19, %v9627_v54  ;;  %v9703_v39 = vadd.f32 %v9695_v42, %v9682_v55  ;;  %v18889_v38 = vld [vmem:[#allocation169_spill] sm:$0xff]  ;;  %v18891_v42 = vld [vmem:[#allocation168_spill] sm:$0xff] }
0x1eb0   : > { %v9684_v49 = vadd.f32 %v9676_v6, %v9655_v23  ;;  %v9723_v46 = vmul.f32 %v17797_v22, %v9711_v52  ;;  %v9657_v61 = vadd.f32 %v18884_v35, %v9628_v27  ;;  %v9714_v57 = vmul.f32 %v17630_v47, %v15224_v59 }
0x1eb1   : > { %v9696_v18 = vmul.f32 %v18877_v34, %v17702_v44  ;;  %v9713_v20 = vmul.f32 %v17711_v53, %v15222_v58  ;;  %v9677_v2 = vmul.f32 %v17552_v17, %v9665_v40  ;;  %v9724_v31 = vmul.f32 %v17797_v22, %v9712_v8  ;;  %v12515_v53 = vpop.f32.mrf.mxu1  ;;  %v18890_v40 = vld [vmem:[#allocation158_spill] sm:$0xff] }
0x1eb2   : > { %v9697_v51 = vmul.f32 %v18877_v34, %v17614_v50  ;;  %v9731_v16 = vadd.f32 %v9723_v46, %v9702_v62  ;;  %v9658_v28 = vadd.f32 %v18885_v15, %v9629_v33  ;;  %v9679_v58 = vmul.f32 %v17552_v17, %v18886_v32  ;;  %v17822_v50 = vld [vmem:[#allocation29] ss:$0 sm:$0xff] }
0x1eb3   : > { %v9704_v47 = vadd.f32 %v9696_v18, %v9683_v29  ;;  %v9685_v44 = vadd.f32 %v9677_v2, %v9656_v21  ;;  %v9732_v1 = vadd.f32 %v9724_v31, %v9703_v39  ;;  %v9686_v30 = vadd.f32 %v9678_v56, %v9657_v61  ;;  %v9110_v19 = vpop.f32.mrf.mxu1  ;;  %v18893_v56 = vld [vmem:[#allocation159_spill] sm:$0xff]  ;;  %v18896_v31 = vld [vmem:[#allocation173_spill] sm:$0xff] }
0x1eb4   : > { %v9705_v63 = vadd.f32 %v9697_v51, %v9684_v49  ;;  %v9659_v14 = vadd.f32 %v18887_v3, %v9630_v25  ;;  %v9726_v13 = vmul.f32 %v17797_v22, %v9714_v57  ;;  %v9725_v5 = vmul.f32 %v17797_v22, %v9713_v20  ;;  %v18894_v29 = vld [vmem:[#allocation175_spill] sm:$0xff]  ;;  %v18895_v49 = vld [vmem:[#allocation172_spill] sm:$0xff] }
0x1eb5   : > { %v9715_v17 = vmul.f32 %v18889_v38, %v18807_v9  ;;  %v9745_v55 = vadd.f32 %v17822_v50, %v9731_v16  ;;  %v9687_v52 = vadd.f32 %v9679_v58, %v9658_v28  ;;  %v9707_v9 = vadd.f32 %v18890_v40, %v9686_v30  ;;  %v12518_v18 = vpop.f32.mrf.mxu1 }
0x1eb6   : > { %v9733_v6 = vadd.f32 %v9725_v5, %v9704_v47  ;;  %v9734_v37 = vadd.f32 %v9726_v13, %v9705_v63  ;;  %v9688_v8 = vadd.f32 %v18891_v42, %v9659_v14  ;;  %v9728_v33 = vmul.f32 %v17797_v22, %v18892_v7  ;;  %v18900_v7 = vld [vmem:[#allocation170_spill] sm:$0xff] }
0x1eb7   : > { %v9717_v43 = vmul.f32 %v18894_v29, %v18893_v56  ;;  %v9708_v46 = vadd.f32 %v18895_v49, %v9687_v52  ;;  %v9120_v13 = vpop.f32.mrf.mxu1 }
0x1eb8   : > { %v9747_v61 = vadd.f32 %v17822_v50, %v9733_v6  ;;  %v9748_v20 = vadd.f32 %v17822_v50, %v9734_v37  ;;  %v9736_v2 = vadd.f32 %v9728_v33, %v9707_v9  ;;  %v9709_v51 = vadd.f32 %v18896_v31, %v9688_v8  ;;  %v18898_v6 = vld [vmem:[#allocation174_spill] sm:$0xff]  ;;  %v18905_v31 = vld [vmem:[#allocation152_spill] sm:$0xff] }
0x1eb9   : > { %v9729_v28 = vmul.f32 %v17797_v22, %v9717_v43 }
0x1eba   : > { %v9750_v3 = vadd.f32 %v17822_v50, %v9736_v2 }
0x1ebb   : > { %v9737_v30 = vadd.f32 %v9729_v28, %v9708_v46 }
0x1efa   : > { %v9430_v4 = vpop.permute.xlu1 %9429 }
0x1efb   : > { %v9452_v59 = vsel %vm3056_vm6, %v17747_v26, %v9430_v4  ;;  %v18888_v26 = vld [vmem:[#allocation149_spill] sm:$0xff] }
0x1efc   : > { %v9698_v11 = vmul.f32 %v18877_v34, %v18888_v26  ;;  %v9466_v54 = vmul.f32 %v17815_v60, %v9452_v59  ;;  %v9746_v34 = vadd.f32 %v17822_v50, %v9732_v1 }
0x1efe   : > { %v9434_v45 = vpop.permute.xlu0 %9433  ;;  %v9428_v0 = vpop.permute.xlu1 %9427  ;;  %v9706_v12 = vadd.f32 %v9698_v11, %v9685_v44  ;;  %v9754_v25 = vadd.f32 %v9746_v34, %v9466_v54  ;;  %v18897_v44 = vld [vmem:[#allocation161_spill] sm:$0xff]  ;;  %v9751_v11 = vadd.f32 %v17822_v50, %v9737_v30  ;;  %v18899_v34 = vld [vmem:[#allocation126_spill] sm:$0xff] }
0x1eff   : > { %v9451_v23 = vsel %vm3056_vm6, %v17767_v36, %v9428_v0  ;;  %v9454_v10 = vsel %vm3056_vm6, %v12512_v41, %v9434_v45  ;;  %v9727_v41 = vmul.f32 %v17797_v22, %v9715_v17  ;;  %v9730_v32 = vmul.f32 %v17797_v22, %v18897_v44 }
0x1f00   : > { %v9465_v27 = vmul.f32 %v17815_v60, %v9451_v23  ;;  %v9468_v21 = vmul.f32 %v17815_v60, %v9454_v10  ;;  %v11641_v23 = vld [vmem:[#allocation31] ss:$0 sm:$0xff] }
0x1f01   : > { %v9735_v57 = vadd.f32 %v9727_v41, %v9706_v12  ;;  %v9738_v14 = vadd.f32 %v9730_v32, %v9709_v51 }
0x1f02   : > { %v9753_v62 = vadd.f32 %v9745_v55, %v9465_v27  ;;  %v9438_v36 = vpop.permute.xlu0 %9437  ;;  %v9432_v24 = vpop.permute.xlu1 %9431  ;;  %v9756_v59 = vadd.f32 %v9748_v20, %v9468_v21  ;;  %v18902_v21 = vld [vmem:[#allocation150_spill] sm:$0xff] }
0x1f03   : > { %v9453_v39 = vsel %vm3056_vm6, %v9100_v48, %v9432_v24  ;;  %v9456_v35 = vsel %vm3056_vm6, %v12515_v53, %v9438_v36  ;;  %v9749_v1 = vadd.f32 %v17822_v50, %v9735_v57  ;;  %v9752_v17 = vadd.f32 %v17822_v50, %v9738_v14  ;;  %v18901_v36 = vld [vmem:[#allocation146_spill] sm:$0xff] }
0x1f04   : > { %v9467_v4 = vmul.f32 %v17815_v60, %v9453_v39  ;;  %12556 = vmatprep.mubr.msk.f32.mxu1 %vm2494_vm0, %v9753_v62  ;;  %v9470_v47 = vmul.f32 %v17815_v60, %v9456_v35  ;;  %v18903_v35 = vld [vmem:[#allocation171_spill] sm:$0xff]  ;;  %v18904_v20 = vld [vmem:[#allocation142_spill] sm:$0xff] }
0x1f05   : > { %12557 = vmatmul.mubr.msk.f32.vlgmr.msra.gmra.mxu1 %vm2494_vm0, %v9754_v25 }
0x1f06   : > { %v9755_v48 = vadd.f32 %v9747_v61, %v9467_v4  ;;  %v9442_v16 = vpop.permute.xlu0 %9441  ;;  %v9436_v15 = vpop.permute.xlu1 %9435  ;;  %v9758_v22 = vadd.f32 %v9750_v3, %v9470_v47 }
0x1f07   : > { %v9455_v58 = vsel %vm3056_vm6, %v9110_v19, %v9436_v15  ;;  %v9458_v53 = vsel %vm3056_vm6, %v12518_v18, %v9442_v16 }
0x1f08   : > { %v9469_v63 = vmul.f32 %v17815_v60, %v9455_v58  ;;  %12559 = vmatprep.mubr.msk.f32.mxu1 %vm2494_vm0, %v9755_v48  ;;  %v9472_v5 = vmul.f32 %v17815_v60, %v9458_v53 }
0x1f09   : > { %12560 = vmatmul.mubr.msk.f32.gmra.mxu1 %vm2494_vm0, %v9756_v59 }
0x1f0a   : > { %v9757_v45 = vadd.f32 %v9749_v1, %v9469_v63  ;;  %v9440_v0 = vpop.permute.xlu1 %9439  ;;  %v9760_v55 = vadd.f32 %v9752_v17, %v9472_v5 }
0x1f0b   : > { %v9457_v26 = vsel %vm3056_vm6, %v9120_v13, %v9440_v0  ;;  %vm10767_vm6 = vcmask 261120  }
0x1f0c   : > { %v9471_v38 = vmul.f32 %v17815_v60, %v9457_v26  ;;  %12562 = vmatprep.mubr.msk.f32.mxu1 %vm2494_vm0, %v9757_v45 }
0x1f0d   : > { %12563 = vmatmul.mubr.msk.f32.gmra.mxu1 %vm2494_vm0, %v9758_v22 }
0x1f0e   : > { %v9759_v54 = vadd.f32 %v9751_v11, %v9471_v38 }
0x1f10   : > { %12565 = vmatprep.mubr.msk.f32.mxu1 %vm2494_vm0, %v9759_v54 }
0x1f11   : > { %12566 = vmatmul.mubr.msk.f32.gmra.mxu1 %vm2494_vm0, %v9760_v55 }
0x1fc5   : > { %v12558_v52 = vpop.f32.mrf.mxu1 }
0x1fc6   : > { %v9863_v10 = vadd.f32 %v12558_v52, %v11641_v23 }
0x1fc7   : > { %v9857_v27 = vpop.f32.mrf.mxu1 }
0x1fc8   : > { %v17875_v12 = vadd.f32 %v9863_v10, %v18898_v6  ;;  %v9858_v60 = vadd.f32 %v11641_v23, %v9857_v27 }
0x1fc9   : > { %v12561_v19 = vpop.f32.mrf.mxu1 }
0x1fca   : > { %v17878_v37 = vadd.f32 %v9858_v60, %v18899_v34  ;;  %v9907_v50 = vsel %vm2494_vm0, %v17875_v12, 0.0  ;;  %v9873_v40 = vadd.f32 %v12561_v19, %v11641_v23  ;;  %v18906_v60 = vld [vmem:[#allocation127_spill] sm:$0xff] }
0x1fcb   : > { %9908 = vadd.xlane.f32.xlu0 %v9907_v50  ;;  %v9867_v9 = vpop.f32.mrf.mxu1 }
0x1fcc   : > { %v9868_v42 = vadd.f32 %v11641_v23, %v9867_v9  ;;  %v9904_v8 = vsel %vm2494_vm0, %v17878_v37, 0.0  ;;  %v17888_v24 = vadd.f32 %v9873_v40, %v18901_v36  ;;  %v18907_v36 = vld [vmem:[#allocation129_spill] sm:$0xff] }
0x1fcd   : > { %v12564_v62 = vpop.f32.mrf.mxu1  ;;  %9905 = vadd.xlane.f32.xlu1 %v9904_v8 }
0x1fce   : > { %v17885_v33 = vadd.f32 %v9868_v42, %v18900_v7  ;;  %v9883_v56 = vadd.f32 %v12564_v62, %v11641_v23  ;;  %v9913_v46 = vsel %vm2494_vm0, %v17888_v24, 0.0 }
0x1fcf   : > { %v9877_v41 = vpop.f32.mrf.mxu1 }
0x1fd0   : > { %v9878_v29 = vadd.f32 %v11641_v23, %v9877_v41  ;;  %v9910_v43 = vsel %vm2494_vm0, %v17885_v33, 0.0  ;;  %v17898_v61 = vadd.f32 %v9883_v56, %v18903_v35  ;;  %v18908_v56 = vld [vmem:[#allocation122_spill] sm:$0xff] }
0x1fd1   : > { %9911 = vadd.xlane.f32.xlu0 %v9910_v43  ;;  %v12567_v25 = vpop.f32.mrf.mxu1 }
0x1fd2   : > { %v17893_v39 = vadd.f32 %v9878_v29, %v18902_v21  ;;  %v9893_v4 = vadd.f32 %v12567_v25, %v11641_v23  ;;  %v9919_v48 = vsel %vm2494_vm0, %v17898_v61, 0.0 }
0x1fd3   : > { %v9887_v49 = vpop.f32.mrf.mxu1 }
0x1fd4   : > { %v9888_v57 = vadd.f32 %v11641_v23, %v9887_v49  ;;  %v9916_v18 = vsel %vm2494_vm0, %v17893_v39, 0.0  ;;  %v17906_v51 = vadd.f32 %v9893_v4, %v18905_v31  ;;  %v11537_v23 = vld [vmem:[#allocation3] ss:$0 sm:$0xff]  ;;  %v18910_v4 = vld [vmem:[#allocation164_spill] sm:$0xff]  ;;  %v18911_v31 = vld [vmem:[#allocation167_spill] sm:$0xff] }
0x1fd5   : > { %9914 = vadd.xlane.f32.xlu0 %v9913_v46  ;;  %9917 = vadd.xlane.f32.xlu1 %v9916_v18  ;;  %v6366_v19 = vadd.f32 %v11537_v23, %v18906_v60  ;;  %v6371_v41 = vadd.f32 %v18907_v36, %v11537_v23  ;;  %v18909_v46 = vld [vmem:[#allocation133_spill] sm:$0xff] }
0x1fd6   : > { %v17903_v2 = vadd.f32 %v9888_v57, %v18904_v20  ;;  %v9925_v15 = vsel %vm2494_vm0, %v17906_v51, 0.0  ;;  %v6376_v57 = vadd.f32 %v11537_v23, %v18910_v4 }
0x1fd7   : > { %v17957_v29 = vadd.f32 %v6366_v19, %v18908_v56  ;;  %v17967_v35 = vadd.f32 %v6371_v41, %v18909_v46  ;;  %v18922_v19 = vld [vmem:[#allocation132_spill] sm:$0xff] }
0x1fd8   : > { %v9922_v16 = vsel %vm2494_vm0, %v17903_v2, 0.0 }
0x1fd9   : > { %9920 = vadd.xlane.f32.xlu0 %v9919_v48  ;;  %9923 = vadd.xlane.f32.xlu1 %v9922_v16  ;;  %v6414_v20 = vsel %vm2494_vm0, %v17957_v29, 0.0  ;;  %v6381_v48 = vadd.f32 %v18911_v31, %v11537_v23  ;;  %v18912_v16 = vld [vmem:[#allocation162_spill] sm:$0xff] }
0x1fdd   : > { %9926 = vadd.xlane.f32.xlu0 %v9925_v15  ;;  %v17975_v15 = vadd.f32 %v6376_v57, %v18912_v16 }
0x2054   : > { %v9909_v28 = vpop.xlane.xlu0 %9908 }
0x2055   : > { %v9929_v59 = vmul.f32 0.0625, %v9909_v28  ;;  %v6417_v28 = vsel %vm2494_vm0, %v17967_v35, 0.0 }
0x2056   : > { %v9906_v47 = vpop.xlane.xlu1 %9905 }
0x2057   : > { %v17915_v44 = vsub.f32 %v17875_v12, %v9929_v59  ;;  %v9928_v32 = vmul.f32 0.0625, %v9906_v47  ;;  %v18914_v59 = vld [vmem:[#allocation131_spill] sm:$0xff] }
0x2058   : > { %v17980_v47 = vadd.f32 %v6381_v48, %v18914_v59 }
0x2059   : > { %v17918_v58 = vsub.f32 %v17878_v37, %v9928_v32  ;;  %v9945_v53 = vmul.f32 %v17915_v44, %v17915_v44  ;;  %v18915_v32 = vld [vmem:[#allocation166_spill] sm:$0xff] }
0x205a   : > { %v9912_v1 = vpop.xlane.xlu0 %9911 }
0x205b   : > { %v9930_v63 = vmul.f32 0.0625, %v9912_v1  ;;  %v9955_v30 = vsel %vm2494_vm0, %v9945_v53, 0.0  ;;  %v9944_v3 = vmul.f32 %v17918_v58, %v17918_v58  ;;  %v6386_v53 = vadd.f32 %v11537_v23, %v18915_v32 }
0x205c   : > { %9956 = vadd.xlane.f32.xlu0 %v9955_v30  ;;  %v6420_v1 = vsel %vm2494_vm0, %v17975_v15, 0.0 }
0x205d   : > { %v17926_v14 = vsub.f32 %v17885_v33, %v9930_v63  ;;  %v9952_v13 = vsel %vm2494_vm0, %v9944_v3, 0.0  ;;  %v18916_v63 = vld [vmem:[#allocation124_spill] sm:$0xff]  ;;  %v18917_v3 = vld [vmem:[#allocation165_spill] sm:$0xff] }
0x205e   : > { %v9915_v45 = vpop.xlane.xlu0 %9914  ;;  %v9918_v0 = vpop.xlane.xlu1 %9917  ;;  %9953 = vadd.xlane.f32.xlu1 %v9952_v13  ;;  %v6391_v30 = vadd.f32 %v18916_v63, %v11537_v23  ;;  %v17987_v13 = vadd.f32 %v6386_v53, %v18917_v3 }
0x205f   : > { %v9931_v22 = vmul.f32 0.0625, %v9915_v45  ;;  %v9932_v5 = vmul.f32 0.0625, %v9918_v0  ;;  %v9946_v26 = vmul.f32 %v17926_v14, %v17926_v14  ;;  %v6423_v45 = vsel %vm2494_vm0, %v17980_v47, 0.0  ;;  %v18918_v0 = vld [vmem:[#allocation153_spill] sm:$0xff] }
0x2061   : > { %v17932_v11 = vsub.f32 %v17888_v24, %v9931_v22  ;;  %v17935_v38 = vsub.f32 %v17893_v39, %v9932_v5  ;;  %v9958_v17 = vsel %vm2494_vm0, %v9946_v26, 0.0  ;;  %v17992_v22 = vadd.f32 %v6391_v30, %v18918_v0  ;;  %v18919_v5 = vld [vmem:[#allocation163_spill] sm:$0xff]  ;;  %v18012_v30 = vld [vmem:[#allocation32] ss:$0 sm:$0xff] }
0x2062   : > { %v9921_v54 = vpop.xlane.xlu0 %9920  ;;  %9959 = vadd.xlane.f32.xlu1 %v9958_v17  ;;  %v9924_v55 = vpop.xlane.xlu1 %9923  ;;  %v6396_v26 = vadd.f32 %v11537_v23, %v18919_v5  ;;  %v6426_v17 = vsel %vm2494_vm0, %v17987_v13, 0.0 }
0x2063   : > { %v9933_v52 = vmul.f32 0.0625, %v9921_v54  ;;  %v9934_v10 = vmul.f32 0.0625, %v9924_v55  ;;  %v9947_v27 = vmul.f32 %v17932_v11, %v17932_v11  ;;  %v9948_v6 = vmul.f32 %v17935_v38, %v17935_v38  ;;  %v8469_v54 = vld [vmem:[%s18913_s1 + $0x8] sm:$0xff]  ;;  %v8468_v55 = vld [vmem:[%s18913_s1] sm:$0xff] }
0x2064   : > { %12568 = vmatprep.subr.mxu0 %v8469_v54  ;;  %v6429_v60 = vsel %vm2494_vm0, %v17992_v22, 0.0 }
0x2065   : > { %v17944_v34 = vsub.f32 %v17898_v61, %v9933_v52  ;;  %v17947_v50 = vsub.f32 %v17903_v2, %v9934_v10  ;;  %v9961_v40 = vsel %vm2494_vm0, %v9947_v27, 0.0  ;;  %v9964_v9 = vsel %vm2494_vm0, %v9948_v6, 0.0  ;;  %12569 = vmatpush3.msra.mxu0 %v8469_v54  ;;  %v18920_v52 = vld [vmem:[#allocation156_spill] sm:$0xff]  ;;  %v18921_v27 = vld [vmem:[#allocation125_spill] sm:$0xff] }
0x2066   : > { %9962 = vadd.xlane.f32.xlu0 %v9961_v40  ;;  %v9927_v42 = vpop.xlane.xlu0 %9926  ;;  %9965 = vadd.xlane.f32.xlu1 %v9964_v9  ;;  %v6401_v10 = vadd.f32 %v18920_v52, %v11537_v23  ;;  %v18001_v6 = vadd.f32 %v6396_v26, %v18921_v27 }
0x2067   : > { %v9935_v8 = vmul.f32 0.0625, %v9927_v42  ;;  %v9949_v62 = vmul.f32 %v17944_v34, %v17944_v34  ;;  %v9950_v7 = vmul.f32 %v17947_v50, %v17947_v50  ;;  %12570 = vmatprep.subr.mxu0 %v8468_v55 }
0x2068   : > { %12571 = vmatpush3.msra.mxu0 %v8468_v55  ;;  %v18006_v40 = vadd.f32 %v6401_v10, %v18922_v19  ;;  %v6432_v9 = vsel %vm2494_vm0, %v18001_v6, 0.0 }
0x2069   : > { %v17960_v43 = vsub.f32 %v17906_v51, %v9935_v8  ;;  %v9967_v25 = vsel %vm2494_vm0, %v9949_v62, 0.0  ;;  %v9970_v21 = vsel %vm2494_vm0, %v9950_v7, 0.0 }
0x206a   : > { %9968 = vadd.xlane.f32.xlu0 %v9967_v25  ;;  %9971 = vadd.xlane.f32.xlu1 %v9970_v21  ;;  %v6435_v42 = vsel %vm2494_vm0, %v18006_v40, 0.0 }
0x206b   : > { %v9951_v49 = vmul.f32 %v17960_v43, %v17960_v43 }
0x206d   : > { %v9973_v18 = vsel %vm2494_vm0, %v9951_v49, 0.0 }
0x206e   : > { %9974 = vadd.xlane.f32.xlu0 %v9973_v18  ;;  %6415 = vadd.xlane.f32.xlu1 %v6414_v20 }
0x2072   : > { %6418 = vadd.xlane.f32.xlu1 %v6417_v28 }
0x2076   : > { %6421 = vadd.xlane.f32.xlu1 %v6420_v1 }
0x207a   : > { %6424 = vadd.xlane.f32.xlu1 %v6423_v45 }
0x207e   : > { %6427 = vadd.xlane.f32.xlu1 %v6426_v17 }
0x2082   : > { %6430 = vadd.xlane.f32.xlu1 %v6429_v60 }
0x2086   : > { %6433 = vadd.xlane.f32.xlu1 %v6432_v9 }
0x208a   : > { %6436 = vadd.xlane.f32.xlu1 %v6435_v42 }
0x20e5   : > { %v9957_v23 = vpop.xlane.xlu0 %9956 }
0x20e6   : > { %v9977_v8 = vmul.f32 0.0625, %v9957_v23 }
0x20e7   : > { %v9954_v62 = vpop.xlane.xlu1 %9953 }
0x20e8   : > { %v9985_v7 = vadd.f32 1e-05, %v9977_v8  ;;  %v9976_v36 = vmul.f32 0.0625, %v9954_v62 }
0x20ea   : > { %13208 = vrsqrt.f32 %v9985_v7  ;;  %v9984_v41 = vadd.f32 1e-05, %v9976_v36 }
0x20eb   : > { %v9960_v56 = vpop.xlane.xlu1 %9959 }
0x20ec   : > { %13210 = vrsqrt.f32 %v9984_v41  ;;  %v9978_v25 = vmul.f32 0.0625, %v9960_v56 }
0x20ee   : > { %v9986_v21 = vadd.f32 1e-05, %v9978_v25 }
0x20ef   : > { %v9963_v49 = vpop.xlane.xlu0 %9962  ;;  %v9966_v46 = vpop.xlane.xlu1 %9965 }
0x20f0   : > { %13212 = vrsqrt.f32 %v9986_v21  ;;  %v9979_v4 = vmul.f32 0.0625, %v9963_v49  ;;  %v9980_v57 = vmul.f32 0.0625, %v9966_v46 }
0x20f2   : > { %v9987_v18 = vadd.f32 1e-05, %v9979_v4  ;;  %v9988_v20 = vadd.f32 1e-05, %v9980_v57 }
0x20f3   : > { %v9969_v31 = vpop.xlane.xlu0 %9968  ;;  %v9972_v48 = vpop.xlane.xlu1 %9971 }
0x20f4   : > { %13214 = vrsqrt.f32 %v9987_v18  ;;  %v9981_v16 = vmul.f32 0.0625, %v9969_v31  ;;  %v9982_v28 = vmul.f32 0.0625, %v9972_v48 }
0x20f5   : > { %13216 = vrsqrt.f32 %v9988_v20 }
0x20f6   : > { %v9989_v59 = vadd.f32 1e-05, %v9981_v16  ;;  %v9990_v32 = vadd.f32 1e-05, %v9982_v28 }
0x20f7   : > { %v13209_v53 = vpop.eup %13208  ;;  %v9975_v1 = vpop.xlane.xlu0 %9974 }
0x20f8   : > { %v6416_v63 = vpop.xlane.xlu1 %6415  ;;  %v10001_v3 = vmul.f32 %v13209_v53, %v17915_v44  ;;  %13218 = vrsqrt.f32 %v9989_v59  ;;  %v9983_v45 = vmul.f32 0.0625, %v9975_v1  ;;  %v11651_v44 = vld [vmem:[#allocation34] ss:$0 sm:$0xff] }
0x20f9   : > { %v6438_v0 = vmul.f32 0.0625, %v6416_v63  ;;  %v13211_v5 = vpop.eup %13210  ;;  %13220 = vrsqrt.f32 %v9990_v32 }
0x20fa   : > { %v9991_v26 = vadd.f32 1e-05, %v9983_v45  ;;  %v10000_v54 = vmul.f32 %v13211_v5, %v17918_v58  ;;  %v10015_v55 = vmul.f32 %v18012_v30, %v10001_v3 }
0x20fb   : > { %v18016_v17 = vsub.f32 %v17957_v29, %v6438_v0 }
0x20fc   : > { %v6419_v52 = vpop.xlane.xlu1 %6418  ;;  %13222 = vrsqrt.f32 %v9991_v26  ;;  %v10014_v60 = vmul.f32 %v18012_v30, %v10000_v54  ;;  %v10029_v8 = vadd.f32 %v11651_v44, %v10015_v55 }
0x20fd   : > { %v6439_v10 = vmul.f32 0.0625, %v6419_v52  ;;  %v6454_v27 = vmul.f32 %v18016_v17, %v18016_v17  ;;  %v13213_v19 = vpop.eup %13212 }
0x20fe   : > { %v10028_v42 = vadd.f32 %v11651_v44, %v10014_v60  ;;  %v10002_v58 = vmul.f32 %v13213_v19, %v17926_v14 }
0x20ff   : > { %v18024_v9 = vsub.f32 %v17967_v35, %v6439_v10  ;;  %v6462_v29 = vsel %vm2494_vm0, %v6454_v27, 0.0 }
0x2100   : > { %6463 = vadd.xlane.f32.xlu1 %v6462_v29  ;;  %v6422_v23 = vpop.xlane.xlu1 %6421  ;;  %12572 = vmatprep.mubr.msk.f32.mxu0 %vm2494_vm0, %v10028_v42  ;;  %v10016_v36 = vmul.f32 %v18012_v30, %v10002_v58 }
0x2101   : > { %v6440_v62 = vmul.f32 0.0625, %v6422_v23  ;;  %v6455_v7 = vmul.f32 %v18024_v9, %v18024_v9  ;;  %v13215_v41 = vpop.eup %13214  ;;  %12573 = vmatmul.mubr.msk.f32.vlgmr.msra.gmra.mxu0 %vm2494_vm0, %v10029_v8 }
0x2102   : > { %v13217_v35 = vpop.eup %13216  ;;  %v10030_v25 = vadd.f32 %v11651_v44, %v10016_v36  ;;  %v10003_v21 = vmul.f32 %v13215_v41, %v17932_v11  ;;  %v8475_v36 = vld [vmem:[%s18923_s0 + $0x20] sm:$0xff]  ;;  %v8474_v41 = vld [vmem:[%s18923_s0 + $0x18] sm:$0xff] }
0x2103   : > { %v18034_v56 = vsub.f32 %v17975_v15, %v6440_v62  ;;  %v6465_v14 = vsel %vm2494_vm0, %v6455_v7, 0.0  ;;  %v10004_v46 = vmul.f32 %v13217_v35, %v17935_v38  ;;  %v8478_v62 = vld [vmem:[%s18923_s0 + $0x38] sm:$0xff]  ;;  %v8477_v7 = vld [vmem:[%s18923_s0 + $0x30] sm:$0xff] }
0x2104   : > { %6466 = vadd.xlane.f32.xlu1 %v6465_v14  ;;  %v6425_v49 = vpop.xlane.xlu1 %6424  ;;  %12575 = vmatprep.mubr.msk.f32.mxu0 %vm2494_vm0, %v10030_v25  ;;  %v10017_v18 = vmul.f32 %v18012_v30, %v10003_v21  ;;  %v8473_v35 = vld [vmem:[%s18923_s0 + $0x10] sm:$0xff]  ;;  %v8472_v14 = vld [vmem:[%s18923_s0 + $0x8] sm:$0xff]  ;;  %v8471_v25 = vld [vmem:[%s18923_s0] sm:$0xff] }
0x2105   : > { %v6441_v4 = vmul.f32 0.0625, %v6425_v49  ;;  %v6456_v57 = vmul.f32 %v18034_v56, %v18034_v56  ;;  %v13219_v20 = vpop.eup %13218  ;;  %v10018_v15 = vmul.f32 %v18012_v30, %v10004_v46  ;;  %12584 = vmatprep.subr.mxu1 %v8478_v62  ;;  %v18095_v21 = vld [vmem:[%s18924_s5 + $0x8] sm:$0xff] }
0x2106   : > { %v13221_v31 = vpop.eup %13220  ;;  %v10031_v16 = vadd.f32 %v11651_v44, %v10017_v18  ;;  %v10005_v38 = vmul.f32 %v13219_v20, %v17944_v34  ;;  %12585 = vmatpush3.msra.mxu1 %v8478_v62  ;;  %v11652_v18 = vld [vmem:[#allocation35] ss:$0 sm:$0xff] }
0x2107   : > { %v18045_v48 = vsub.f32 %v17980_v47, %v6441_v4  ;;  %v6468_v11 = vsel %vm2494_vm0, %v6456_v57, 0.0  ;;  %v10032_v59 = vadd.f32 %v11651_v44, %v10018_v15  ;;  %v10006_v32 = vmul.f32 %v13221_v31, %v17947_v50  ;;  %12586 = vmatprep.subr.mxu1 %v8477_v7 }
0x2108   : > { %6469 = vadd.xlane.f32.xlu1 %v6468_v11  ;;  %v6428_v28 = vpop.xlane.xlu1 %6427  ;;  %12576 = vmatmul.mubr.msk.f32.gmra.mxu0 %vm2494_vm0, %v10031_v16  ;;  %v10019_v63 = vmul.f32 %v18012_v30, %v10005_v38 }
0x2109   : > { %v6442_v53 = vmul.f32 0.0625, %v6428_v28  ;;  %v6457_v1 = vmul.f32 %v18045_v48, %v18045_v48  ;;  %v13223_v47 = vpop.eup %13222  ;;  %12578 = vmatprep.mubr.msk.f32.mxu0 %vm2494_vm0, %v10032_v59  ;;  %v10020_v3 = vmul.f32 %v18012_v30, %v10006_v32  ;;  %12587 = vmatpush3.msra.mxu1 %v8477_v7 }
0x210a   : > { %v10033_v0 = vadd.f32 %v11651_v44, %v10019_v63  ;;  %v10007_v50 = vmul.f32 %v13223_v47, %v17960_v43 }
0x210b   : > { %v18057_v34 = vsub.f32 %v17987_v13, %v6442_v53  ;;  %v6471_v45 = vsel %vm2494_vm0, %v6457_v1, 0.0  ;;  %v10034_v26 = vadd.f32 %v11651_v44, %v10020_v3 }
0x210c   : > { %6472 = vadd.xlane.f32.xlu1 %v6471_v45  ;;  %v6431_v5 = vpop.xlane.xlu1 %6430  ;;  %12579 = vmatmul.mubr.msk.f32.gmra.mxu0 %vm2494_vm0, %v10033_v0  ;;  %v10021_v52 = vmul.f32 %v18012_v30, %v10007_v50 }
0x210d   : > { %v6443_v54 = vmul.f32 0.0625, %v6431_v5  ;;  %v6458_v55 = vmul.f32 %v18057_v34, %v18057_v34  ;;  %12581 = vmatprep.mubr.msk.f32.mxu0 %vm2494_vm0, %v10034_v26 }
0x210e   : > { %v10035_v27 = vadd.f32 %v11651_v44, %v10021_v52 }
0x210f   : > { %v18067_v13 = vsub.f32 %v17992_v22, %v6443_v54  ;;  %v6474_v10 = vsel %vm2494_vm0, %v6458_v55, 0.0 }
0x2110   : > { %6475 = vadd.xlane.f32.xlu1 %v6474_v10  ;;  %v6434_v43 = vpop.xlane.xlu1 %6433  ;;  %12582 = vmatmul.mubr.msk.f32.gmra.mxu0 %vm2494_vm0, %v10035_v27 }
0x2111   : > { %v6444_v60 = vmul.f32 0.0625, %v6434_v43  ;;  %v6459_v19 = vmul.f32 %v18067_v13, %v18067_v13 }
0x2113   : > { %v18074_v30 = vsub.f32 %v18001_v6, %v6444_v60  ;;  %v6477_v29 = vsel %vm2494_vm0, %v6459_v19, 0.0 }
0x2114   : > { %6478 = vadd.xlane.f32.xlu1 %v6477_v29  ;;  %v6437_v22 = vpop.xlane.xlu1 %6436 }
0x2115   : > { %v6445_v42 = vmul.f32 0.0625, %v6437_v22  ;;  %v6460_v44 = vmul.f32 %v18074_v30, %v18074_v30 }
0x2117   : > { %v18080_v58 = vsub.f32 %v18006_v40, %v6445_v42  ;;  %v6480_v23 = vsel %vm2494_vm0, %v6460_v44, 0.0  ;;  %v8476_v40 = vld [vmem:[%s18923_s0 + $0x28] sm:$0xff] }
0x2118   : > { %6481 = vadd.xlane.f32.xlu1 %v6480_v23  ;;  %12588 = vmatprep.subr.mxu1 %v8476_v40 }
0x2119   : > { %v6461_v6 = vmul.f32 %v18080_v58, %v18080_v58  ;;  %12589 = vmatpush3.msra.mxu1 %v8476_v40 }
0x211a   : > { %12590 = vmatprep.subr.mxu1 %v8475_v36 }
0x211b   : > { %v6483_v8 = vsel %vm2494_vm0, %v6461_v6, 0.0  ;;  %12591 = vmatpush3.msra.mxu1 %v8475_v36 }
0x211c   : > { %6484 = vadd.xlane.f32.xlu1 %v6483_v8  ;;  %12592 = vmatprep.subr.mxu1 %v8474_v41 }
0x211d   : > { %12593 = vmatpush3.msra.mxu1 %v8474_v41 }
0x211e   : > { %12594 = vmatprep.subr.mxu1 %v8473_v35 }
0x211f   : > { %12595 = vmatpush3.msra.mxu1 %v8473_v35 }
0x2120   : > { %12596 = vmatprep.subr.mxu1 %v8472_v14 }
0x2121   : > { %12597 = vmatpush3.msra.mxu1 %v8472_v14 }
0x2122   : > { %12598 = vmatprep.subr.mxu1 %v8471_v25 }
0x2123   : > { %12599 = vmatpush3.msra.mxu1 %v8471_v25 }
0x2124   : > { %12628 = vmatprep.subr.mxu1 %v18095_v21 }
0x2189   : > { %v6464_v49 = vpop.xlane.xlu1 %6463 }
0x218a   : > { %v6486_v59 = vmul.f32 0.0625, %v6464_v49 }
0x218c   : > { %v6494_v0 = vadd.f32 1e-05, %v6486_v59  ;;  %v10488_v59 = vld [vmem:[%s18924_s5] sm:$0xff] }
0x218d   : > { %v6467_v46 = vpop.xlane.xlu1 %6466 }
0x218e   : > { %v6487_v63 = vmul.f32 0.0625, %v6467_v46 }
0x2190   : > { %v6495_v55 = vadd.f32 1e-05, %v6487_v63 }
0x2191   : > { %v6470_v4 = vpop.xlane.xlu1 %6469 }
0x2192   : > { %v6488_v50 = vmul.f32 0.0625, %v6470_v4 }
0x2194   : > { %v6496_v60 = vadd.f32 1e-05, %v6488_v50 }
0x2195   : > { %v6473_v57 = vpop.xlane.xlu1 %6472 }
0x2196   : > { %v6489_v19 = vmul.f32 0.0625, %v6473_v57 }
0x2198   : > { %v6497_v7 = vadd.f32 1e-05, %v6489_v19  ;;  %v11546_v19 = vld [vmem:[#allocation5] ss:$0 sm:$0xff] }
0x2199   : > { %v6476_v31 = vpop.xlane.xlu1 %6475 }
0x219a   : > { %v6490_v29 = vmul.f32 0.0625, %v6476_v31 }
0x219c   : > { %v6498_v40 = vadd.f32 1e-05, %v6490_v29 }
0x219d   : > { %v6479_v53 = vpop.xlane.xlu1 %6478 }
0x219e   : > { %v6491_v36 = vmul.f32 0.0625, %v6479_v53 }
0x21a1   : > { %v6482_v10 = vpop.xlane.xlu1 %6481 }
0x21a2   : > { %v6492_v35 = vmul.f32 0.0625, %v6482_v10 }
0x21a5   : > { %v6485_v14 = vpop.xlane.xlu1 %6484 }
0x21a6   : > { %v6493_v31 = vmul.f32 0.0625, %v6485_v14 }
0x21a8   : > { %v6501_v53 = vadd.f32 1e-05, %v6493_v31 }
0x21c1   : > { %v12574_v20 = vpop.f32.mrf.mxu0 }
0x21c2   : > { %v10138_v15 = vadd.f32 %v12574_v20, %v11652_v18  ;;  %v6499_v20 = vadd.f32 1e-05, %v6491_v36 }
0x21c3   : > { %v10132_v11 = vpop.f32.mrf.mxu0 }
0x21c4   : > { %v10180_v16 = vmul.f32 0.70710677, %v10138_v15  ;;  %v10133_v38 = vadd.f32 %v11652_v18, %v10132_v11  ;;  %v10172_v57 = vmul.f32 0.5, %v10138_v15 }
0x21c6   : > { %13224 = verf.f32 %v10180_v16  ;;  %v10179_v28 = vmul.f32 0.70710677, %v10133_v38  ;;  %v10171_v46 = vmul.f32 0.5, %v10133_v38 }
0x21c8   : > { %13226 = verf.f32 %v10179_v28  ;;  %v12577_v32 = vpop.f32.mrf.mxu0 }
0x21c9   : > { %v18098_v1 = vadd.f32 %v12577_v32, %v11652_v18 }
0x21ca   : > { %v10142_v47 = vpop.f32.mrf.mxu0 }
0x21cb   : > { %v10182_v3 = vmul.f32 0.70710677, %v18098_v1  ;;  %v10143_v45 = vadd.f32 %v11652_v18, %v10142_v47 }
0x21cc   : > { %v12580_v5 = vpop.f32.mrf.mxu0 }
0x21cd   : > { %13228 = verf.f32 %v10182_v3  ;;  %v10181_v26 = vmul.f32 0.70710677, %v10143_v45  ;;  %v18101_v54 = vadd.f32 %v12580_v5, %v11652_v18  ;;  %v10173_v63 = vmul.f32 0.5, %v10143_v45 }
0x21ce   : > { %v10152_v52 = vpop.f32.mrf.mxu0 }
0x21cf   : > { %13230 = verf.f32 %v10181_v26  ;;  %v10184_v27 = vmul.f32 0.70710677, %v18101_v54  ;;  %v10153_v43 = vadd.f32 %v11652_v18, %v10152_v52  ;;  %v10176_v29 = vmul.f32 0.5, %v18101_v54  ;;  %v11547_v54 = vld [vmem:[#allocation7] ss:$0 sm:$0xff] }
0x21d0   : > { %13232 = vrsqrt.f32 %v6494_v0  ;;  %v12583_v22 = vpop.f32.mrf.mxu0  ;;  %v10174_v0 = vmul.f32 0.5, %v18098_v1 }
0x21d1   : > { %13234 = verf.f32 %v10184_v27  ;;  %v10183_v42 = vmul.f32 0.70710677, %v10153_v43  ;;  %v18104_v44 = vadd.f32 %v12583_v22, %v11652_v18  ;;  %v10175_v27 = vmul.f32 0.5, %v10153_v43 }
0x21d2   : > { %13236 = vrsqrt.f32 %v6495_v55  ;;  %v10162_v23 = vpop.f32.mrf.mxu0 }
0x21d3   : > { %v13225_v6 = vpop.eup %13224  ;;  %13238 = verf.f32 %v10183_v42  ;;  %v10186_v8 = vmul.f32 0.70710677, %v18104_v44  ;;  %v10163_v62 = vadd.f32 %v11652_v18, %v10162_v23  ;;  %v6500_v18 = vadd.f32 1e-05, %v6492_v35 }
0x21d4   : > { %13240 = vrsqrt.f32 %v6496_v60  ;;  %v10196_v25 = vadd.f32 1.0, %v13225_v6 }
0x21d5   : > { %v13227_v41 = vpop.eup %13226  ;;  %13242 = verf.f32 %v10186_v8  ;;  %v10185_v49 = vmul.f32 0.70710677, %v10163_v62 }
0x21d6   : > { %v10195_v4 = vadd.f32 1.0, %v13227_v41  ;;  %v10204_v16 = vmul.f32 %v10196_v25, %v10172_v57  ;;  %v10178_v41 = vmul.f32 0.5, %v18104_v44 }
0x21d7   : > { %13244 = verf.f32 %v10185_v49 }
0x21d8   : > { %13246 = vrsqrt.f32 %v6497_v7  ;;  %v10203_v11 = vmul.f32 %v10195_v4, %v10171_v46  ;;  %v10177_v7 = vmul.f32 0.5, %v10163_v62 }
0x21d9   : > { %13248 = vrsqrt.f32 %v6498_v40 }
0x21da   : > { %v13229_v28 = vpop.eup %13228  ;;  %12600 = vmatprep.mubr.msk.f32.mxu1 %vm2982_vm8, %v10203_v11  ;;  %13250 = vrsqrt.f32 %v6499_v20 }
0x21db   : > { %12601 = vmatmul.mubr.msk.f32.vlgmr.msra.gmra.mxu1 %vm2982_vm8, %v10204_v16  ;;  %v10198_v38 = vadd.f32 1.0, %v13229_v28  ;;  %13252 = vrsqrt.f32 %v6500_v18 }
0x21dc   : > { %v13231_v32 = vpop.eup %13230  ;;  %12629 = vmatpush3.msra.mxu1 %v18095_v21  ;;  %13254 = vrsqrt.f32 %v6501_v53 }
0x21dd   : > { %v13233_v15 = vpop.eup %13232  ;;  %v10197_v47 = vadd.f32 1.0, %v13231_v32  ;;  %12630 = vmatprep.subr.mxu1 %v10488_v59  ;;  %v10206_v55 = vmul.f32 %v10198_v38, %v10174_v0 }
0x21de   : > { %v13235_v3 = vpop.eup %13234  ;;  %12631 = vmatpush3.msra.mxu1 %v10488_v59  ;;  %v6510_v21 = vmul.f32 %v13233_v15, %v18016_v17  ;;  %v11661_v15 = vld [vmem:[#allocation37] ss:$0 sm:$0xff] }
0x21df   : > { %v13237_v50 = vpop.eup %13236  ;;  %v10205_v5 = vmul.f32 %v10197_v47, %v10173_v63  ;;  %v10200_v52 = vadd.f32 1.0, %v13235_v3 }
0x21e0   : > { %v13239_v26 = vpop.eup %13238  ;;  %v6511_v42 = vmul.f32 %v13237_v50, %v18024_v9  ;;  %v6524_v40 = vmul.f32 %v11546_v19, %v6510_v21 }
0x21e1   : > { %v13241_v10 = vpop.eup %13240  ;;  %v10199_v60 = vadd.f32 1.0, %v13239_v26  ;;  %12603 = vmatprep.mubr.msk.f32.mxu1 %vm2982_vm8, %v10205_v5  ;;  %v10208_v23 = vmul.f32 %v10200_v52, %v10176_v29 }
0x21e2   : > { %v13243_v45 = vpop.eup %13242  ;;  %12604 = vmatmul.mubr.msk.f32.gmra.mxu1 %vm2982_vm8, %v10206_v55  ;;  %v6512_v17 = vmul.f32 %v13241_v10, %v18034_v56  ;;  %v6525_v14 = vmul.f32 %v11546_v19, %v6511_v42  ;;  %v6538_v62 = vadd.f32 %v11547_v54, %v6524_v40 }
0x21e3   : > { %v10207_v1 = vmul.f32 %v10199_v60, %v10175_v27  ;;  %v10202_v6 = vadd.f32 1.0, %v13243_v45 }
0x21e4   : > { %v13245_v22 = vpop.eup %13244  ;;  %v6526_v46 = vmul.f32 %v11546_v19, %v6512_v17  ;;  %v6539_v56 = vadd.f32 %v11547_v54, %v6525_v14 }
0x21e5   : > { %v13247_v8 = vpop.eup %13246  ;;  %v10201_v43 = vadd.f32 1.0, %v13245_v22  ;;  %12606 = vmatprep.mubr.msk.f32.mxu1 %vm2982_vm8, %v10207_v1  ;;  %v10210_v25 = vmul.f32 %v10202_v6, %v10178_v41 }
0x21e6   : > { %v13249_v36 = vpop.eup %13248  ;;  %12607 = vmatmul.mubr.msk.f32.gmra.mxu1 %vm2982_vm8, %v10208_v23  ;;  %v6513_v9 = vmul.f32 %v13247_v8, %v18045_v48  ;;  %v6540_v11 = vadd.f32 %v11547_v54, %v6526_v46 }
0x21e7   : > { %v10209_v35 = vmul.f32 %v10201_v43, %v10177_v7  ;;  %v13251_v49 = vpop.eup %13250  ;;  %v6514_v4 = vmul.f32 %v13249_v36, %v18057_v34 }
0x21e8   : > { %v13253_v57 = vpop.eup %13252  ;;  %v6527_v44 = vmul.f32 %v11546_v19, %v6513_v9  ;;  %v6515_v20 = vmul.f32 %v13251_v49, %v18067_v13 }
0x21e9   : > { %12609 = vmatprep.mubr.msk.f32.mxu1 %vm2982_vm8, %v10209_v35  ;;  %v13255_v31 = vpop.eup %13254  ;;  %v6528_v18 = vmul.f32 %v11546_v19, %v6514_v4  ;;  %v6516_v48 = vmul.f32 %v13253_v57, %v18074_v30 }
0x21ea   : > { %12610 = vmatmul.mubr.msk.f32.gmra.mxu1 %vm2982_vm8, %v10210_v25  ;;  %v6541_v16 = vadd.f32 %v11547_v54, %v6527_v44  ;;  %v6529_v34 = vmul.f32 %v11546_v19, %v6515_v20  ;;  %v6517_v28 = vmul.f32 %v13255_v31, %v18080_v58 }
0x21eb   : > { %12632 = vmatprep.mubr.msk.f32.mxu1 %vm2494_vm0, %v6538_v62  ;;  %v6542_v59 = vadd.f32 %v11547_v54, %v6528_v18  ;;  %v6530_v32 = vmul.f32 %v11546_v19, %v6516_v48 }
0x21ec   : > { %v6543_v13 = vadd.f32 %v11547_v54, %v6529_v34  ;;  %v6531_v53 = vmul.f32 %v11546_v19, %v6517_v28 }
0x21ed   : > { %v6544_v38 = vadd.f32 %v11547_v54, %v6530_v32 }
0x21ee   : > { %12633 = vmatmul.mubr.msk.f32.vlgmr.msra.gmra.mxu1 %vm2494_vm0, %v6539_v56  ;;  %v6545_v30 = vadd.f32 %v11547_v54, %v6531_v53 }
0x21ef   : > { %12635 = vmatprep.mubr.msk.f32.mxu1 %vm2494_vm0, %v6540_v11 }
0x21f2   : > { %12636 = vmatmul.mubr.msk.f32.gmra.mxu1 %vm2494_vm0, %v6541_v16 }
0x21f3   : > { %12638 = vmatprep.mubr.msk.f32.mxu1 %vm2494_vm0, %v6542_v59 }
0x21f6   : > { %12639 = vmatmul.mubr.msk.f32.gmra.mxu1 %vm2494_vm0, %v6543_v13 }
0x21f7   : > { %12641 = vmatprep.mubr.msk.f32.mxu1 %vm2494_vm0, %v6544_v38 }
0x21fa   : > { %12642 = vmatmul.mubr.msk.f32.gmra.mxu1 %vm2494_vm0, %v6545_v30 }
0x229b   : > { %v12602_v63 = vpop.f32.mrf.mxu1 }
0x229c   : > { %v10313_v47 = vadd.f32 %v12602_v63, %v11661_v15 }
0x229d   : > { %v10307_v58 = vpop.f32.mrf.mxu1 }
0x229e   : > { %v10347_v3 = vadd.f32 %v10313_v47, %v17875_v12  ;;  %v10308_v0 = vadd.f32 %v11661_v15, %v10307_v58 }
0x22a0   : > { %v10346_v50 = vadd.f32 %v10308_v0, %v17878_v37  ;;  %v10359_v5 = vsel %vm2494_vm0, %v10347_v3, 0.0 }
0x22a1   : > { %10360 = vadd.xlane.f32.xlu0 %v10359_v5 }
0x22a2   : > { %v12605_v26 = vpop.f32.mrf.mxu1  ;;  %v10356_v10 = vsel %vm2494_vm0, %v10346_v50, 0.0 }
0x22a3   : > { %v10323_v55 = vadd.f32 %v12605_v26, %v11661_v15 }
0x22a4   : > { %v10317_v52 = vpop.f32.mrf.mxu1 }
0x22a5   : > { %v10349_v27 = vadd.f32 %v10323_v55, %v17888_v24  ;;  %v10318_v60 = vadd.f32 %v11661_v15, %v10317_v52  ;;  %10357 = vadd.xlane.f32.xlu0 %v10356_v10  ;;  %v10491_v55 = vld [vmem:[%s18924_s5 + $0x18] sm:$0xff]  ;;  %v10490_v52 = vld [vmem:[%s18924_s5 + $0x10] sm:$0xff] }
0x22a6   : > { %v12608_v21 = vpop.f32.mrf.mxu1  ;;  %12612 = vmatprep.subr.mxu0 %v10491_v55 }
0x22a7   : > { %v10365_v45 = vsel %vm2494_vm0, %v10349_v27, 0.0  ;;  %v10348_v12 = vadd.f32 %v10318_v60, %v17885_v33  ;;  %v10333_v19 = vadd.f32 %v12608_v21, %v11661_v15  ;;  %12613 = vmatpush3.msra.mxu0 %v10491_v55 }
0x22a8   : > { %v10327_v29 = vpop.f32.mrf.mxu1  ;;  %12614 = vmatprep.subr.mxu0 %v10490_v52 }
0x22a9   : > { %10366 = vadd.xlane.f32.xlu0 %v10365_v45  ;;  %v10351_v1 = vadd.f32 %v10333_v19, %v17898_v61  ;;  %v10328_v22 = vadd.f32 %v11661_v15, %v10327_v29  ;;  %v10362_v42 = vsel %vm2494_vm0, %v10348_v12, 0.0  ;;  %12615 = vmatpush3.msra.mxu0 %v10490_v52 }
0x22aa   : > { %v12611_v37 = vpop.f32.mrf.mxu1 }
0x22ab   : > { %v10350_v24 = vadd.f32 %v10328_v22, %v17893_v39  ;;  %v10371_v8 = vsel %vm2494_vm0, %v10351_v1, 0.0  ;;  %v10343_v7 = vadd.f32 %v12611_v37, %v11661_v15 }
0x22ac   : > { %v10337_v23 = vpop.f32.mrf.mxu1 }
0x22ad   : > { %10363 = vadd.xlane.f32.xlu0 %v10362_v42  ;;  %v10338_v6 = vadd.f32 %v11661_v15, %v10337_v23  ;;  %v10368_v43 = vsel %vm2494_vm0, %v10350_v24, 0.0  ;;  %v10353_v40 = vadd.f32 %v10343_v7, %v17906_v51 }
0x22af   : > { %v10352_v33 = vadd.f32 %v10338_v6, %v17903_v2  ;;  %v10377_v17 = vsel %vm2494_vm0, %v10353_v40, 0.0 }
0x22b1   : > { %10372 = vadd.xlane.f32.xlu0 %v10371_v8  ;;  %v10374_v61 = vsel %vm2494_vm0, %v10352_v33, 0.0 }
0x22b5   : > { %10369 = vadd.xlane.f32.xlu0 %v10368_v43  ;;  %v11670_v43 = vld [vmem:[#allocation38] ss:$0 sm:$0xff] }
0x22b9   : > { %10375 = vadd.xlane.f32.xlu0 %v10374_v61 }
0x22bd   : > { %10378 = vadd.xlane.f32.xlu0 %v10377_v17 }
0x232a   : > { %v10361_v36 = vpop.xlane.xlu0 %10360 }
0x232b   : > { %v10381_v39 = vmul.f32 0.0625, %v10361_v36 }
0x232d   : > { %v18152_v41 = vsub.f32 %v10347_v3, %v10381_v39 }
0x232e   : > { %v10358_v54 = vpop.xlane.xlu0 %10357 }
0x232f   : > { %v10380_v35 = vmul.f32 0.0625, %v10358_v54  ;;  %v10397_v2 = vmul.f32 %v18152_v41, %v18152_v41 }
0x2331   : > { %v18156_v14 = vsub.f32 %v10346_v50, %v10380_v35  ;;  %v10407_v25 = vsel %vm2494_vm0, %v10397_v2, 0.0  ;;  %v11671_v2 = vld [vmem:[#allocation40] ss:$0 sm:$0xff] }
0x2332   : > { %v10367_v51 = vpop.xlane.xlu0 %10366  ;;  %10408 = vadd.xlane.f32.xlu0 %v10407_v25 }
0x2333   : > { %v10383_v9 = vmul.f32 0.0625, %v10367_v51  ;;  %v10396_v49 = vmul.f32 %v18156_v14, %v18156_v14 }
0x2335   : > { %v18161_v62 = vsub.f32 %v10349_v27, %v10383_v9  ;;  %v10404_v46 = vsel %vm2494_vm0, %v10396_v49, 0.0 }
0x2336   : > { %v10364_v4 = vpop.xlane.xlu0 %10363  ;;  %10405 = vadd.xlane.f32.xlu0 %v10404_v46 }
0x2337   : > { %v10382_v57 = vmul.f32 0.0625, %v10364_v4  ;;  %v10399_v56 = vmul.f32 %v18161_v62, %v18161_v62 }
0x2339   : > { %v18166_v44 = vsub.f32 %v10348_v12, %v10382_v57  ;;  %v10413_v20 = vsel %vm2494_vm0, %v10399_v56, 0.0 }
0x233a   : > { %v10373_v31 = vpop.xlane.xlu0 %10372  ;;  %10414 = vadd.xlane.f32.xlu0 %v10413_v20 }
0x233b   : > { %v10385_v11 = vmul.f32 0.0625, %v10373_v31  ;;  %v10398_v18 = vmul.f32 %v18166_v44, %v18166_v44 }
0x233d   : > { %v18171_v48 = vsub.f32 %v10351_v1, %v10385_v11  ;;  %v10410_v16 = vsel %vm2494_vm0, %v10398_v18, 0.0 }
0x233e   : > { %v10370_v34 = vpop.xlane.xlu0 %10369  ;;  %10411 = vadd.xlane.f32.xlu0 %v10410_v16 }
0x233f   : > { %v10384_v28 = vmul.f32 0.0625, %v10370_v34  ;;  %v10401_v59 = vmul.f32 %v18171_v48, %v18171_v48 }
0x2341   : > { %v18176_v32 = vsub.f32 %v10350_v24, %v10384_v28  ;;  %v10419_v13 = vsel %vm2494_vm0, %v10401_v59, 0.0 }
0x2342   : > { %10420 = vadd.xlane.f32.xlu0 %v10419_v13  ;;  %v10376_v53 = vpop.xlane.xlu0 %10375 }
0x2343   : > { %v10386_v38 = vmul.f32 0.0625, %v10376_v53  ;;  %v10400_v30 = vmul.f32 %v18176_v32, %v18176_v32 }
0x2345   : > { %v18181_v15 = vsub.f32 %v10352_v33, %v10386_v38  ;;  %v10416_v63 = vsel %vm2494_vm0, %v10400_v30, 0.0 }
0x2346   : > { %10417 = vadd.xlane.f32.xlu0 %v10416_v63  ;;  %v10379_v47 = vpop.xlane.xlu0 %10378 }
0x2347   : > { %v10387_v58 = vmul.f32 0.0625, %v10379_v47  ;;  %v10402_v3 = vmul.f32 %v18181_v15, %v18181_v15 }
0x2349   : > { %v18186_v0 = vsub.f32 %v10353_v40, %v10387_v58  ;;  %v10422_v50 = vsel %vm2494_vm0, %v10402_v3, 0.0 }
0x234a   : > { %10423 = vadd.xlane.f32.xlu0 %v10422_v50 }
0x234b   : > { %v10403_v5 = vmul.f32 %v18186_v0, %v18186_v0 }
0x234d   : > { %v10425_v26 = vsel %vm2494_vm0, %v10403_v5, 0.0  ;;  %v12634_v5 = vpop.f32.mrf.mxu1 }
0x234e   : > { %10426 = vadd.xlane.f32.xlu0 %v10425_v26  ;;  %v11688_v26 = vld [vmem:[#allocation41] ss:$0 sm:$0xff] }
0x23bb   : > { %v10409_v10 = vpop.xlane.xlu0 %10408 }
0x23bc   : > { %v10429_v27 = vmul.f32 0.0625, %v10409_v10 }
0x23be   : > { %v10437_v60 = vadd.f32 1e-05, %v10429_v27 }
0x23bf   : > { %v10406_v21 = vpop.xlane.xlu0 %10405 }
0x23c0   : > { %13256 = vrsqrt.f32 %v10437_v60  ;;  %v10428_v45 = vmul.f32 0.0625, %v10406_v21 }
0x23c2   : > { %v10436_v12 = vadd.f32 1e-05, %v10428_v45 }
0x23c3   : > { %v10415_v19 = vpop.xlane.xlu0 %10414 }
0x23c4   : > { %13258 = vrsqrt.f32 %v10436_v12  ;;  %v10431_v29 = vmul.f32 0.0625, %v10415_v19 }
0x23c6   : > { %v10439_v37 = vadd.f32 1e-05, %v10431_v29 }
0x23c7   : > { %v10412_v1 = vpop.xlane.xlu0 %10411 }
0x23c8   : > { %13260 = vrsqrt.f32 %v10439_v37  ;;  %v10430_v22 = vmul.f32 0.0625, %v10412_v1 }
0x23ca   : > { %v10438_v42 = vadd.f32 1e-05, %v10430_v22 }
0x23cb   : > { %v10421_v23 = vpop.xlane.xlu0 %10420 }
0x23cc   : > { %13262 = vrsqrt.f32 %v10438_v42  ;;  %v10433_v24 = vmul.f32 0.0625, %v10421_v23 }
0x23cd   : > { %v13257_v6 = vpop.eup %13256 }
0x23ce   : > { %v10441_v8 = vadd.f32 1e-05, %v10433_v24  ;;  %v10453_v7 = vmul.f32 %v13257_v6, %v18152_v41 }
0x23cf   : > { %v10418_v33 = vpop.xlane.xlu0 %10417 }
0x23d0   : > { %13264 = vrsqrt.f32 %v10441_v8  ;;  %v10432_v40 = vmul.f32 0.0625, %v10418_v33  ;;  %v10467_v39 = vmul.f32 %v11670_v43, %v10453_v7 }
0x23d1   : > { %v13259_v61 = vpop.eup %13258 }
0x23d2   : > { %v10440_v17 = vadd.f32 1e-05, %v10432_v40  ;;  %v10452_v36 = vmul.f32 %v13259_v61, %v18156_v14  ;;  %v10481_v4 = vadd.f32 %v11671_v2, %v10467_v39 }
0x23d3   : > { %v10424_v54 = vpop.xlane.xlu0 %10423 }
0x23d4   : > { %13266 = vrsqrt.f32 %v10440_v17  ;;  %v10434_v35 = vmul.f32 0.0625, %v10424_v54  ;;  %v10466_v25 = vmul.f32 %v11670_v43, %v10452_v36 }
0x23d5   : > { %v13261_v51 = vpop.eup %13260 }
0x23d6   : > { %v10442_v9 = vadd.f32 1e-05, %v10434_v35  ;;  %v10480_v49 = vadd.f32 %v11671_v2, %v10466_v25  ;;  %v10455_v46 = vmul.f32 %v13261_v51, %v18161_v62 }
0x23d7   : > { %v10427_v41 = vpop.xlane.xlu0 %10426 }
0x23d8   : > { %13268 = vrsqrt.f32 %v10442_v9  ;;  %v10435_v57 = vmul.f32 0.0625, %v10427_v41  ;;  %12616 = vmatprep.mubr.msk.f32.mxu0 %vm2494_vm0, %v10480_v49  ;;  %v10469_v31 = vmul.f32 %v11670_v43, %v10455_v46 }
0x23d9   : > { %v13263_v56 = vpop.eup %13262  ;;  %12617 = vmatmul.mubr.msk.f32.vlgmr.msra.gmra.mxu0 %vm2494_vm0, %v10481_v4 }
0x23da   : > { %v10443_v14 = vadd.f32 1e-05, %v10435_v57  ;;  %v10454_v20 = vmul.f32 %v13263_v56, %v18166_v44  ;;  %v10483_v62 = vadd.f32 %v11671_v2, %v10469_v31 }
0x23dc   : > { %13270 = vrsqrt.f32 %v10443_v14  ;;  %v10468_v11 = vmul.f32 %v11670_v43, %v10454_v20 }
0x23dd   : > { %v13265_v18 = vpop.eup %13264 }
0x23de   : > { %v10482_v16 = vadd.f32 %v11671_v2, %v10468_v11  ;;  %v10457_v34 = vmul.f32 %v13265_v18, %v18171_v48 }
0x23e0   : > { %12619 = vmatprep.mubr.msk.f32.mxu0 %vm2494_vm0, %v10482_v16  ;;  %v10471_v13 = vmul.f32 %v11670_v43, %v10457_v34 }
0x23e1   : > { %v13267_v28 = vpop.eup %13266  ;;  %12620 = vmatmul.mubr.msk.f32.gmra.mxu0 %vm2494_vm0, %v10483_v62 }
0x23e2   : > { %v10456_v59 = vmul.f32 %v13267_v28, %v18176_v32  ;;  %v10485_v63 = vadd.f32 %v11671_v2, %v10471_v13 }
0x23e4   : > { %v10470_v53 = vmul.f32 %v11670_v43, %v10456_v59 }
0x23e5   : > { %v13269_v38 = vpop.eup %13268 }
0x23e6   : > { %v10484_v30 = vadd.f32 %v11671_v2, %v10470_v53  ;;  %v10458_v44 = vmul.f32 %v13269_v38, %v18181_v15  ;;  %v10714_v15 = vpop.f32.mrf.mxu1 }
0x23e8   : > { %12622 = vmatprep.mubr.msk.f32.mxu0 %vm2494_vm0, %v10484_v30  ;;  %v10472_v47 = vmul.f32 %v11670_v43, %v10458_v44  ;;  %v12637_v21 = vpop.f32.mrf.mxu1 }
0x23e9   : > { %v13271_v58 = vpop.eup %13270  ;;  %12623 = vmatmul.mubr.msk.f32.gmra.mxu0 %vm2494_vm0, %v10485_v63 }
0x23ea   : > { %v10459_v48 = vmul.f32 %v13271_v58, %v18186_v0  ;;  %v10486_v3 = vadd.f32 %v11671_v2, %v10472_v47  ;;  %v10724_v29 = vpop.f32.mrf.mxu1 }
0x23ec   : > { %12625 = vmatprep.mubr.msk.f32.mxu0 %vm2494_vm0, %v10486_v3  ;;  %v10473_v50 = vmul.f32 %v11670_v43, %v10459_v48  ;;  %v12640_v23 = vpop.f32.mrf.mxu1 }
0x23ee   : > { %v10487_v32 = vadd.f32 %v11671_v2, %v10473_v50  ;;  %v10734_v33 = vpop.f32.mrf.mxu1 }
0x23f0   : > { %12626 = vmatmul.mubr.msk.f32.gmra.mxu0 %vm2494_vm0, %v10487_v32  ;;  %v12643_v36 = vpop.f32.mrf.mxu1 }
0x23f2   : > { %v10744_v51 = vpop.f32.mrf.mxu1 }
0x2499   : > { %v12618_v55 = vpop.f32.mrf.mxu0 }
0x249a   : > { %v10720_v52 = vadd.f32 %v12634_v5, %v12618_v55 }
0x249b   : > { %v10585_v10 = vpop.f32.mrf.mxu0 }
0x249c   : > { %v10760_v27 = vadd.f32 %v11688_v26, %v10720_v52  ;;  %v10715_v60 = vadd.f32 %v10714_v15, %v10585_v10 }
0x249e   : > { %v10759_v45 = vadd.f32 %v11688_v26, %v10715_v60  ;;  %v10771_v0 = vsel %vm10767_vm6, %v10760_v27, 0.0 }
0x249f   : > { %10772 = vadd.xlane.f32.xlu0 %v10771_v0 }
0x24a0   : > { %v10768_v12 = vsel %vm10767_vm6, %v10759_v45, 0.0 }
0x24a1   : > { %v12621_v19 = vpop.f32.mrf.mxu0  ;;  %10769 = vadd.xlane.f32.xlu1 %v10768_v12 }
0x24a2   : > { %v10730_v37 = vadd.f32 %v12637_v21, %v12621_v19 }
0x24a3   : > { %v10595_v1 = vpop.f32.mrf.mxu0 }
0x24a4   : > { %v10762_v22 = vadd.f32 %v11688_v26, %v10730_v37  ;;  %v10725_v42 = vadd.f32 %v10724_v29, %v10595_v1 }
0x24a6   : > { %v10761_v24 = vadd.f32 %v11688_v26, %v10725_v42  ;;  %v10777_v6 = vsel %vm10767_vm6, %v10762_v22, 0.0 }
0x24a7   : > { %10778 = vadd.xlane.f32.xlu0 %v10777_v6 }
0x24a8   : > { %v10774_v8 = vsel %vm10767_vm6, %v10761_v24, 0.0 }
0x24a9   : > { %v12624_v7 = vpop.f32.mrf.mxu0  ;;  %10775 = vadd.xlane.f32.xlu1 %v10774_v8 }
0x24aa   : > { %v10740_v43 = vadd.f32 %v12640_v23, %v12624_v7 }
0x24ab   : > { %v10605_v40 = vpop.f32.mrf.mxu0 }
0x24ac   : > { %v10764_v61 = vadd.f32 %v11688_v26, %v10740_v43  ;;  %v10735_v17 = vadd.f32 %v10734_v33, %v10605_v40 }
0x24ae   : > { %v10763_v39 = vadd.f32 %v11688_v26, %v10735_v17  ;;  %v10783_v54 = vsel %vm10767_vm6, %v10764_v61, 0.0 }
0x24af   : > { %10784 = vadd.xlane.f32.xlu0 %v10783_v54 }
0x24b0   : > { %v12627_v35 = vpop.f32.mrf.mxu0  ;;  %v10780_v2 = vsel %vm10767_vm6, %v10763_v39, 0.0 }
0x24b1   : > { %v10750_v25 = vadd.f32 %v12643_v36, %v12627_v35  ;;  %10781 = vadd.xlane.f32.xlu1 %v10780_v2  ;;  %v18258_v2 = vld [vmem:[#allocation43] ss:$0 sm:$0xff] }
0x24b2   : > { %v10615_v9 = vpop.f32.mrf.mxu0 }
0x24b3   : > { %v10766_v49 = vadd.f32 %v11688_v26, %v10750_v25  ;;  %v10745_v46 = vadd.f32 %v10744_v51, %v10615_v9 }
0x24b5   : > { %v10765_v41 = vadd.f32 %v11688_v26, %v10745_v46  ;;  %v10789_v4 = vsel %vm10767_vm6, %v10766_v49, 0.0 }
0x24b6   : > { %10790 = vadd.xlane.f32.xlu0 %v10789_v4 }
0x24b7   : > { %v10786_v57 = vsel %vm10767_vm6, %v10765_v41, 0.0 }
0x24b8   : > { %10787 = vadd.xlane.f32.xlu1 %v10786_v57 }
0x2528   : > { %v10773_v56 = vpop.xlane.xlu0 %10772 }
0x2529   : > { %v10794_v14 = vmul.f32 0.03125, %v10773_v56 }
0x252a   : > { %v10770_v20 = vpop.xlane.xlu1 %10769 }
0x252b   : > { %v18218_v31 = vsub.f32 %v10760_v27, %v10794_v14  ;;  %v10793_v11 = vmul.f32 0.03125, %v10770_v20 }
0x252d   : > { %v18220_v18 = vsub.f32 %v10759_v45, %v10793_v11  ;;  %v10810_v16 = vmul.f32 %v18218_v31, %v18218_v31 }
0x252f   : > { %v10820_v34 = vsel %vm10767_vm6, %v10810_v16, 0.0  ;;  %v10809_v62 = vmul.f32 %v18220_v18, %v18220_v18 }
0x2530   : > { %v10779_v28 = vpop.xlane.xlu0 %10778  ;;  %10821 = vadd.xlane.f32.xlu0 %v10820_v34 }
0x2531   : > { %v10796_v59 = vmul.f32 0.03125, %v10779_v28  ;;  %v10817_v13 = vsel %vm10767_vm6, %v10809_v62, 0.0 }
0x2532   : > { %10818 = vadd.xlane.f32.xlu1 %v10817_v13  ;;  %v10776_v53 = vpop.xlane.xlu1 %10775 }
0x2533   : > { %v18228_v38 = vsub.f32 %v10762_v22, %v10796_v59  ;;  %v10795_v30 = vmul.f32 0.03125, %v10776_v53 }
0x2535   : > { %v18230_v44 = vsub.f32 %v10761_v24, %v10795_v30  ;;  %v10812_v63 = vmul.f32 %v18228_v38, %v18228_v38 }
0x2537   : > { %v10826_v47 = vsel %vm10767_vm6, %v10812_v63, 0.0  ;;  %v10811_v58 = vmul.f32 %v18230_v44, %v18230_v44 }
0x2538   : > { %v10785_v48 = vpop.xlane.xlu0 %10784  ;;  %10827 = vadd.xlane.f32.xlu0 %v10826_v47 }
0x2539   : > { %v10798_v3 = vmul.f32 0.03125, %v10785_v48  ;;  %v10823_v50 = vsel %vm10767_vm6, %v10811_v58, 0.0 }
0x253a   : > { %10824 = vadd.xlane.f32.xlu1 %v10823_v50  ;;  %v10782_v32 = vpop.xlane.xlu1 %10781 }
0x253b   : > { %v18238_v5 = vsub.f32 %v10764_v61, %v10798_v3  ;;  %v10797_v26 = vmul.f32 0.03125, %v10782_v32 }
0x253d   : > { %v18240_v55 = vsub.f32 %v10763_v39, %v10797_v26  ;;  %v10814_v15 = vmul.f32 %v18238_v5, %v18238_v5 }
0x253f   : > { %v10791_v52 = vpop.xlane.xlu0 %10790  ;;  %v10832_v10 = vsel %vm10767_vm6, %v10814_v15, 0.0  ;;  %v10813_v27 = vmul.f32 %v18240_v55, %v18240_v55 }
0x2540   : > { %v10800_v60 = vmul.f32 0.03125, %v10791_v52  ;;  %10833 = vadd.xlane.f32.xlu0 %v10832_v10 }
0x2541   : > { %v10788_v21 = vpop.xlane.xlu1 %10787  ;;  %v10829_v45 = vsel %vm10767_vm6, %v10813_v27, 0.0 }
0x2542   : > { %v18248_v0 = vsub.f32 %v10766_v49, %v10800_v60  ;;  %v10799_v12 = vmul.f32 0.03125, %v10788_v21  ;;  %10830 = vadd.xlane.f32.xlu1 %v10829_v45 }
0x2544   : > { %v18250_v19 = vsub.f32 %v10765_v41, %v10799_v12  ;;  %v10816_v29 = vmul.f32 %v18248_v0, %v18248_v0  ;;  %v18261_v41 = vld [vmem:[#allocation44] ss:$0 sm:$0xff] }
0x2546   : > { %v10838_v37 = vsel %vm10767_vm6, %v10816_v29, 0.0  ;;  %v10815_v1 = vmul.f32 %v18250_v19, %v18250_v19 }
0x2547   : > { %10839 = vadd.xlane.f32.xlu0 %v10838_v37 }
0x2548   : > { %v10835_v22 = vsel %vm10767_vm6, %v10815_v1, 0.0 }
0x2549   : > { %10836 = vadd.xlane.f32.xlu1 %v10835_v22 }
0x25b9   : > { %v10822_v42 = vpop.xlane.xlu0 %10821 }
0x25ba   : > { %v10842_v23 = vmul.f32 0.03125, %v10822_v42 }
0x25bb   : > { %v10819_v24 = vpop.xlane.xlu1 %10818 }
0x25bc   : > { %v10850_v6 = vadd.f32 1e-05, %v10842_v23  ;;  %v10841_v8 = vmul.f32 0.03125, %v10819_v24 }
0x25be   : > { %13272 = vrsqrt.f32 %v10850_v6  ;;  %v10849_v7 = vadd.f32 1e-05, %v10841_v8 }
0x25c0   : > { %13274 = vrsqrt.f32 %v10849_v7 }
0x25c1   : > { %v10828_v33 = vpop.xlane.xlu0 %10827 }
0x25c2   : > { %v10844_v43 = vmul.f32 0.03125, %v10828_v33 }
0x25c3   : > { %v10825_v40 = vpop.xlane.xlu1 %10824 }
0x25c4   : > { %v10852_v61 = vadd.f32 1e-05, %v10844_v43  ;;  %v10843_v17 = vmul.f32 0.03125, %v10825_v40 }
0x25c6   : > { %13276 = vrsqrt.f32 %v10852_v61  ;;  %v10851_v36 = vadd.f32 1e-05, %v10843_v17 }
0x25c8   : > { %13278 = vrsqrt.f32 %v10851_v36 }
0x25c9   : > { %v10834_v39 = vpop.xlane.xlu0 %10833 }
0x25ca   : > { %v10846_v54 = vmul.f32 0.03125, %v10834_v39 }
0x25cb   : > { %v13273_v35 = vpop.eup %13272  ;;  %v10831_v25 = vpop.xlane.xlu1 %10830 }
0x25cc   : > { %v10866_v51 = vmul.f32 %v13273_v35, %v18218_v31  ;;  %v10854_v9 = vadd.f32 1e-05, %v10846_v54  ;;  %v10845_v49 = vmul.f32 0.03125, %v10831_v25 }
0x25cd   : > { %v13275_v46 = vpop.eup %13274 }
0x25ce   : > { %v10880_v4 = vmul.f32 %v18258_v2, %v10866_v51  ;;  %v10865_v57 = vmul.f32 %v13275_v46, %v18220_v18  ;;  %13280 = vrsqrt.f32 %v10854_v9  ;;  %v10853_v56 = vadd.f32 1e-05, %v10845_v49 }
0x25d0   : > { %v10894_v14 = vadd.f32 %v18261_v41, %v10880_v4  ;;  %v10879_v20 = vmul.f32 %v18258_v2, %v10865_v57  ;;  %13282 = vrsqrt.f32 %v10853_v56  ;;  %v10840_v11 = vpop.xlane.xlu0 %10839 }
0x25d1   : > { %v10848_v16 = vmul.f32 0.03125, %v10840_v11 }
0x25d2   : > { %v10902_v34 = vadd.f32 3.0, %v10894_v14  ;;  %v10893_v31 = vadd.f32 %v18261_v41, %v10879_v20  ;;  %v10837_v62 = vpop.xlane.xlu1 %10836 }
0x25d3   : > { %v13277_v28 = vpop.eup %13276  ;;  %v10856_v59 = vadd.f32 1e-05, %v10848_v16  ;;  %v10847_v13 = vmul.f32 0.03125, %v10837_v62 }
0x25d4   : > { %v10910_v53 = vmax.f32 %v10902_v34, 0.0  ;;  %v10901_v18 = vadd.f32 3.0, %v10893_v31  ;;  %v10868_v30 = vmul.f32 %v13277_v28, %v18228_v38 }
0x25d5   : > { %v13279_v63 = vpop.eup %13278  ;;  %13284 = vrsqrt.f32 %v10856_v59  ;;  %v10855_v47 = vadd.f32 1e-05, %v10847_v13 }
0x25d6   : > { %v10918_v58 = vmin.f32 %v10910_v53, 6.0  ;;  %v10909_v48 = vmax.f32 %v10901_v18, 0.0  ;;  %v10882_v3 = vmul.f32 %v18258_v2, %v10868_v30  ;;  %v10867_v50 = vmul.f32 %v13279_v63, %v18230_v44 }
0x25d7   : > { %13286 = vrsqrt.f32 %v10855_v47 }
0x25d8   : > { %v10926_v32 = vmul.f32 %v10918_v58, %v10894_v14  ;;  %v10917_v26 = vmin.f32 %v10909_v48, 6.0  ;;  %v10896_v15 = vadd.f32 %v18261_v41, %v10882_v3  ;;  %v10881_v52 = vmul.f32 %v18258_v2, %v10867_v50 }
0x25da   : > { %v10934_v38 = vmul.f32 0.16666667, %v10926_v32  ;;  %v10925_v10 = vmul.f32 %v10917_v26, %v10893_v31  ;;  %v10904_v27 = vadd.f32 3.0, %v10896_v15  ;;  %v10895_v60 = vadd.f32 %v18261_v41, %v10881_v52 }
0x25db   : > { %v13281_v21 = vpop.eup %13280 }
0x25dc   : > { %10942 = vst.msk [vmem:[%s18275_s3 + $0x8] sm:$0xff] %vm10767_vm6, %v10934_v38  ;;  %v10933_v44 = vmul.f32 0.16666667, %v10925_v10  ;;  %v10912_v45 = vmax.f32 %v10904_v27, 0.0  ;;  %v10903_v12 = vadd.f32 3.0, %v10895_v60  ;;  %v10870_v29 = vmul.f32 %v13281_v21, %v18238_v5 }
0x25dd   : > { %v13283_v37 = vpop.eup %13282 }
0x25de   : > { %10941 = vst.msk [vmem:[%s18275_s3] sm:$0xff] %vm10767_vm6, %v10933_v44  ;;  %v10920_v1 = vmin.f32 %v10912_v45, 6.0  ;;  %v10911_v22 = vmax.f32 %v10903_v12, 0.0  ;;  %v10884_v42 = vmul.f32 %v18258_v2, %v10870_v29  ;;  %v10869_v23 = vmul.f32 %v13283_v37, %v18240_v55 }
0x25e0   : > { %v10928_v24 = vmul.f32 %v10920_v1, %v10896_v15  ;;  %v10919_v6 = vmin.f32 %v10911_v22, 6.0  ;;  %v10898_v8 = vadd.f32 %v18261_v41, %v10884_v42  ;;  %v10883_v7 = vmul.f32 %v18258_v2, %v10869_v23 }
0x25e2   : > { %v13285_v33 = vpop.eup %13284  ;;  %v10936_v43 = vmul.f32 0.16666667, %v10928_v24  ;;  %v10927_v5 = vmul.f32 %v10919_v6, %v10895_v60  ;;  %v10906_v40 = vadd.f32 3.0, %v10898_v8  ;;  %v10897_v61 = vadd.f32 %v18261_v41, %v10883_v7 }
0x25e3   : > { %v10872_v17 = vmul.f32 %v13285_v33, %v18248_v0 }
0x25e4   : > { %v13287_v36 = vpop.eup %13286  ;;  %10944 = vst.msk [vmem:[%s18275_s3 + $0x18] sm:$0xff] %vm10767_vm6, %v10936_v43  ;;  %v10935_v39 = vmul.f32 0.16666667, %v10927_v5  ;;  %v10914_v55 = vmax.f32 %v10906_v40, 0.0  ;;  %v10905_v54 = vadd.f32 3.0, %v10897_v61 }
0x25e5   : > { %v10886_v35 = vmul.f32 %v18258_v2, %v10872_v17  ;;  %v10871_v25 = vmul.f32 %v13287_v36, %v18250_v19 }
0x25e6   : > { %10943 = vst.msk [vmem:[%s18275_s3 + $0x10] sm:$0xff] %vm10767_vm6, %v10935_v39  ;;  %v10922_v51 = vmin.f32 %v10914_v55, 6.0  ;;  %v10913_v9 = vmax.f32 %v10905_v54, 0.0 }
0x25e7   : > { %v10900_v49 = vadd.f32 %v18261_v41, %v10886_v35  ;;  %v10885_v0 = vmul.f32 %v18258_v2, %v10871_v25 }
0x25e8   : > { %v10930_v46 = vmul.f32 %v10922_v51, %v10898_v8  ;;  %v10921_v4 = vmin.f32 %v10913_v9, 6.0 }
0x25e9   : > { %v10908_v57 = vadd.f32 3.0, %v10900_v49  ;;  %v10899_v56 = vadd.f32 %v18261_v41, %v10885_v0 }
0x25ea   : > { %v10938_v14 = vmul.f32 0.16666667, %v10930_v46  ;;  %v10929_v20 = vmul.f32 %v10921_v4, %v10897_v61 }
0x25eb   : > { %v10916_v11 = vmax.f32 %v10908_v57, 0.0  ;;  %v10907_v19 = vadd.f32 3.0, %v10899_v56 }
0x25ec   : > { %10946 = vst.msk [vmem:[%s18275_s3 + $0x28] sm:$0xff] %vm10767_vm6, %v10938_v14  ;;  %v10937_v16 = vmul.f32 0.16666667, %v10929_v20 }
0x25ed   : > { %v10924_v34 = vmin.f32 %v10916_v11, 6.0  ;;  %v10915_v31 = vmax.f32 %v10907_v19, 0.0 }
0x25ee   : > { %10945 = vst.msk [vmem:[%s18275_s3 + $0x20] sm:$0xff] %vm10767_vm6, %v10937_v16 }
0x25ef   : > { %v10932_v62 = vmul.f32 %v10924_v34, %v10900_v49  ;;  %v10923_v2 = vmin.f32 %v10915_v31, 6.0 }
0x25f1   : > { %v10940_v28 = vmul.f32 0.16666667, %v10932_v62  ;;  %v10931_v59 = vmul.f32 %v10923_v2, %v10899_v56 }
0x25f3   : > { %10948 = vst.msk [vmem:[%s18275_s3 + $0x38] sm:$0xff] %vm10767_vm6, %v10940_v28  ;;  %v10939_v13 = vmul.f32 0.16666667, %v10931_v59 }
0x25f5   : > { %10947 = vst.msk [vmem:[%s18275_s3 + $0x30] sm:$0xff] %vm10767_vm6, %v10939_v13 }
0x25f6 PF: > { %s170_s28 = sadd.s32 1, %s14098_s28  }
0x25f7   : > { %p167_p8 = scmp.ge.s32.totalorder %s170_s28, 4  }
0x25f9   :  { %169 = sbr.rel (!%p167_p8) target bundleno = 157 (0x9d), region = 526 }
0x25fe   :  { %10970 = vsyncpa [#allocation4], 1 }
0x25ff   :  { %10972 = vsyncpa [#allocation4 + $0x1], 1 }
0x2600   :  { %10973 = vsyncpa [#allocation6], 1 }
0x2601   :  { %10974 = vsyncpa [#allocation9], 1 }
0x2602   :  { %10975 = vsyncpa [#allocation12], 1 }
0x2603   :  { %10976 = vsyncpa [#allocation15], 1 }
0x2604   :  { %10977 = vsyncpa [#allocation18], 1 }
0x2605   :  { %10978 = vsyncpa [#allocation21], 1 }
0x2606   :  { %10979 = vsyncpa [#allocation24], 1 }
0x2607   :  { %10980 = vsyncpa [#allocation27], 1 }
0x2608   :  { %10981 = vsyncpa [#allocation30], 1 }
0x2609   :  { %10982 = vsyncpa [#allocation33], 1 }
0x260a   :  { %10983 = vsyncpa [#allocation36], 1 }
0x260b   :  { %10984 = vsyncpa [#allocation39], 1 }
0x260c   :  { %10985 = vsyncpa [#allocation42], 1 }
0x260d   :  { %10986 = vsyncpa [#allocation45], 1 }

</bundles_post_ra>
